<compile_context>
chip_gen: v6e
topology: v6e:2x2x1
jax: 0.10.0
libtpu: 0.0.40
codegen_flags: <defaults>
</compile_context>

<pallas_src>
import functools

import jax
import jax.numpy as jnp
from jax import lax
from jax.experimental import pallas as pl
from jax.experimental.pallas import tpu as pltpu


# ----------------------------------------------------------------------------
# Fused ImageEncoder: relu(x@W1+b1) -> ... -> relu(x@W5+b5) in ONE pallas_call
# ----------------------------------------------------------------------------

def _round_up(x, m):
    return (x + m - 1) // m * m


def _fused_mlp_kernel(x_ref,
                      w1_ref, b1_ref, w2_ref, b2_ref, w3_ref, b3_ref,
                      w4_ref, b4_ref, w5_ref, b5_ref,
                      o_ref):
    """All five layers in one kernel; every weight stays resident in VMEM."""
    h = x_ref[...]                                        # (B, K) bf16
    y = None
    for w_ref, b_ref in ((w1_ref, b1_ref), (w2_ref, b2_ref), (w3_ref, b3_ref),
                         (w4_ref, b4_ref), (w5_ref, b5_ref)):
        y = jnp.dot(h, w_ref[...], preferred_element_type=jnp.float32)  # MXU, f32 acc
        y = jnp.maximum(y + b_ref[...], 0.0)              # bias + ReLU in f32
        h = y.astype(jnp.bfloat16)                        # bf16 into next MXU pass
    o_ref[...] = y                                        # f32 out (ReLU after last layer, as in torch)


def init_image_encoder_params(image_dimension, embedding_dimension, seed=0):
    """PyTorch-style uniform(+-1/sqrt(fan_in)) init, pre-padded & pre-cast once.

    Weights are stored transposed vs. PyTorch ([in, out]) so each layer is
    x @ W + b, padded to lane multiples of 128 at init (not in the hot path)
    and cast to bf16 (biases stay f32).
    # TODO(synk): the real SkipGram2 loads these weights from `encoder_path`.
    """
    dims = [image_dimension, 2048, 1024, 512, 256, embedding_dimension]
    pdims = [_round_up(d, 128) for d in dims]
    key = jax.random.PRNGKey(seed)
    weights = []
    for i in range(5):
        fan_in, fan_out = dims[i], dims[i + 1]
        key, kw, kb = jax.random.split(key, 3)
        bound = 1.0 / float(fan_in) ** 0.5
        w = jax.random.uniform(kw, (fan_in, fan_out), jnp.float32, -bound, bound)
        b = jax.random.uniform(kb, (fan_out,), jnp.float32, -bound, bound)
        wp = jnp.zeros((pdims[i], pdims[i + 1]), jnp.float32)
        wp = wp.at[:fan_in, :fan_out].set(w)
        bp = jnp.zeros((1, pdims[i + 1]), jnp.float32).at[:, :fan_out].set(b)
        weights.append((wp.astype(jnp.bfloat16), bp))
    return {"weights": weights, "out_dim": embedding_dimension}


@functools.partial(jax.jit, static_argnames=("out_dim",))
def _image_encoder_forward_impl(weights, emb, out_dim):
    kp = weights[0][0].shape[0]        # padded input width of layer 1
    np_last = weights[-1][0].shape[1]  # padded output width of layer 5
    B = emb.shape[0]

    xp = jnp.zeros((B, kp), jnp.bfloat16).at[:, :emb.shape[1]].set(
        emb.astype(jnp.bfloat16))

    flat = [xp]
    for w, b in weights:
        flat.extend((w, b))

    vmem_spec = pl.BlockSpec(memory_space=pltpu.MemorySpace.VMEM)
    out = pl.pallas_call(
        _fused_mlp_kernel,
        out_shape=jax.ShapeDtypeStruct((B, np_last), jnp.float32),
        in_specs=[vmem_spec] * len(flat),
        out_specs=vmem_spec,
        compiler_params=pltpu.CompilerParams(
            # ~6 MB of resident bf16 weights; 32 MiB covers every generation
            # (raises v5e's 16 MiB scoped default, stays well under v7x's 64 MiB).
            vmem_limit_bytes=32 * 1024 * 1024,
        ),
    )(*flat)
    return out[:, :out_dim]


def image_encoder_forward(params, emb):
    """Fused Pallas forward of the 5-layer MLP (dropout = identity / eval)."""
    return _image_encoder_forward_impl(params["weights"], emb, params["out_dim"])


def image_encoder_reference(params, emb):
    """Pure-JAX reference mirroring the kernel's bf16/f32 numerics."""
    weights = params["weights"]
    kp = weights[0][0].shape[0]
    B = emb.shape[0]
    h = jnp.zeros((B, kp), jnp.bfloat16).at[:, :emb.shape[1]].set(
        emb.astype(jnp.bfloat16))
    y = None
    for w, b in weights:
        y = jnp.maximum(jnp.dot(h, w, preferred_element_type=jnp.float32) + b, 0.0)
        h = y.astype(jnp.bfloat16)
    return y[:, :params["out_dim"]]


# ----------------------------------------------------------------------------
# SkipGram2.forward: gather rows, score = sum(u*v), loss = -mean(logsigmoid)
# Single kernel invocation: all 2*B row gathers issued as concurrent DMAs,
# then one vectorized (B, E) compute pass.
# ----------------------------------------------------------------------------

def _skipgram_kernel(word_ref, ctx_ref, emb_hbm, cemb_hbm,
                     u_out_ref, loss_ref,
                     u_buf, v_buf, sems, *, inv_batch):
    batch = u_out_ref.shape[0]

    # Issue every row-gather DMA up front (one semaphore per copy) so the DMA
    # engine overlaps all of them instead of serializing per-pair grid steps.
    def issue(i, carry):
        w = word_ref[i]
        c = ctx_ref[i]
        pltpu.make_async_copy(emb_hbm.at[pl.ds(w, 1)],
                              u_buf.at[pl.ds(i, 1)], sems.at[0, i]).start()
        pltpu.make_async_copy(cemb_hbm.at[pl.ds(c, 1)],
                              v_buf.at[pl.ds(i, 1)], sems.at[1, i]).start()
        return carry

    lax.fori_loop(0, batch, issue, 0)

    # Wait for all gathers (descriptor shapes match the issued copies).
    def wait(i, carry):
        pltpu.make_async_copy(emb_hbm.at[pl.ds(0, 1)],
                              u_buf.at[pl.ds(i, 1)], sems.at[0, i]).wait()
        pltpu.make_async_copy(cemb_hbm.at[pl.ds(0, 1)],
                              v_buf.at[pl.ds(i, 1)], sems.at[1, i]).wait()
        return carry

    lax.fori_loop(0, batch, wait, 0)

    u = u_buf[...]                                        # (B, E) f32
    v = v_buf[...]
    u_out_ref[...] = u                                    # embed_u passthrough
    score = jnp.sum(u * v, axis=-1, keepdims=True)        # (B, 1)
    # numerically-stable logsigmoid: min(x, 0) - log(1 + exp(-|x|))
    log_sig = jnp.minimum(score, 0.0) - jnp.log(1.0 + jnp.exp(-jnp.abs(score)))
    loss_ref[...] = -jnp.sum(log_sig, axis=0, keepdims=True) * inv_batch


@jax.jit
def skipgram_forward(embeddings, context_embeddings, word, context):
    """Pallas SkipGram2.forward: returns (-mean(logsigmoid(sum(u*v, -1))), embed_u)."""
    V, E = embeddings.shape
    B = word.shape[0]

    kernel = functools.partial(_skipgram_kernel, inv_batch=1.0 / B)
    embed_u, loss = pl.pallas_call(
        kernel,
        out_shape=(jax.ShapeDtypeStruct((B, E), jnp.float32),
                   jax.ShapeDtypeStruct((1, 1), jnp.float32)),
        in_specs=[
            pl.BlockSpec(memory_space=pltpu.MemorySpace.SMEM),   # word ids
            pl.BlockSpec(memory_space=pltpu.MemorySpace.SMEM),   # context ids
            pl.BlockSpec(memory_space=pl.ANY),                   # embeddings stay in HBM
            pl.BlockSpec(memory_space=pl.ANY),                   # context_embeddings stay in HBM
        ],
        out_specs=(
            pl.BlockSpec(memory_space=pltpu.MemorySpace.VMEM),
            pl.BlockSpec(memory_space=pltpu.MemorySpace.VMEM),
        ),
        scratch_shapes=[
            pltpu.VMEM((B, E), jnp.float32),                     # gathered u rows
            pltpu.VMEM((B, E), jnp.float32),                     # gathered v rows
            pltpu.SemaphoreType.DMA((2, B)),                     # one sem per copy
        ],
    )(word.astype(jnp.int32), context.astype(jnp.int32),
      embeddings.astype(jnp.float32), context_embeddings.astype(jnp.float32))
    return loss[0, 0], embed_u


def skipgram_reference(embeddings, context_embeddings, word, context):
    u = embeddings[word]
    v = context_embeddings[context]
    score = jnp.sum(u * v, axis=1)
    log_target = jax.nn.log_sigmoid(score)
    return -jnp.mean(log_target), u


# ----------------------------------------------------------------------------
# Demo / correctness check
# ----------------------------------------------------------------------------

if __name__ == "__main__":
    vocab_size = 64
    embedding_dimension = 32
    image_dimension = 128
    n_images = 16
    batch = 8

    root = jax.random.PRNGKey(0)
    k_feat, k_emb, k_word, k_ctx = jax.random.split(root, 4)

    # --- SkipGram2.__init__ equivalent ---------------------------------------
    enc_params = init_image_encoder_params(image_dimension, embedding_dimension, seed=0)
    images_feat = jax.random.normal(k_feat, (n_images, image_dimension), jnp.float32)

    d = image_encoder_forward(enc_params, images_feat)           # fused Pallas MLP
    d = jax.block_until_ready(d)
    d_ref = image_encoder_reference(enc_params, images_feat)
    assert d.shape == (n_images, embedding_dimension), d.shape
    assert jnp.allclose(d, d_ref, atol=1e-3, rtol=1e-3), "encoder mismatch vs reference"

    initrange = (2.0 / (vocab_size + embedding_dimension)) ** 0.5
    embeddings = jax.random.uniform(
        k_emb, (vocab_size, embedding_dimension), jnp.float32, -initrange, initrange)
    context_embeddings = jnp.zeros((vocab_size, embedding_dimension), jnp.float32)
    arr_ind = jnp.arange(n_images, dtype=jnp.int32) * 2          # deterministic "image" vocab ids
    embeddings = embeddings.at[arr_ind].set(d)
    context_embeddings = context_embeddings.at[arr_ind].set(d)

    # --- SkipGram2.forward ----------------------------------------------------
    word = jax.random.randint(k_word, (batch,), 0, vocab_size, jnp.int32)
    context = jax.random.randint(k_ctx, (batch,), 0, vocab_size, jnp.int32)

    loss, embed_u = skipgram_forward(embeddings, context_embeddings, word, context)
    loss = jax.block_until_ready(loss)

    loss_ref, embed_u_ref = skipgram_reference(embeddings, context_embeddings, word, context)
    assert embed_u.shape == (batch, embedding_dimension), embed_u.shape
    assert jnp.allclose(embed_u, embed_u_ref, atol=1e-6, rtol=1e-6), "embed_u mismatch"
    assert jnp.allclose(loss, loss_ref, atol=1e-5, rtol=1e-5), "loss mismatch"

    print("KERNEL_OK")
</pallas_src>

<mosaic_0001>
module attributes {stable_mosaic.version = 11 : i64} {
  func.func @_fused_mlp_kernel(%arg0: memref<16x128xbf16, #tpu.memory_space<vmem>>, %arg1: memref<128x2048xbf16, #tpu.memory_space<vmem>>, %arg2: memref<1x2048xf32, #tpu.memory_space<vmem>>, %arg3: memref<2048x1024xbf16, #tpu.memory_space<vmem>>, %arg4: memref<1x1024xf32, #tpu.memory_space<vmem>>, %arg5: memref<1024x512xbf16, #tpu.memory_space<vmem>>, %arg6: memref<1x512xf32, #tpu.memory_space<vmem>>, %arg7: memref<512x256xbf16, #tpu.memory_space<vmem>>, %arg8: memref<1x256xf32, #tpu.memory_space<vmem>>, %arg9: memref<256x128xbf16, #tpu.memory_space<vmem>>, %arg10: memref<1x128xf32, #tpu.memory_space<vmem>>, %arg11: memref<16x128xf32, #tpu.memory_space<vmem>>) attributes {dimension_semantics = [], scalar_prefetch = 0 : i64, scratch_operands = 0 : i64, tpu.core_type = #tpu.core_type<tc>} {
    %c0 = arith.constant 0 : index
    %c0_0 = arith.constant 0 : index
    %0 = vector.load %arg0[%c0, %c0_0] : memref<16x128xbf16, #tpu.memory_space<vmem>>, vector<16x128xbf16>
    %c0_1 = arith.constant 0 : index
    %c0_2 = arith.constant 0 : index
    %1 = vector.load %arg1[%c0_1, %c0_2] : memref<128x2048xbf16, #tpu.memory_space<vmem>>, vector<128x2048xbf16>
    %cst = arith.constant dense<0.000000e+00> : vector<16x2048xf32>
    %2 = tpu.matmul %0, %1, %cst {dimension_numbers = #tpu.dot_dimension_numbers<[1], [0], [0], [1], [0, 0, 1, 1], [], []>} : vector<16x128xbf16>, vector<128x2048xbf16>, vector<16x2048xf32> -> vector<16x2048xf32>
    %c0_3 = arith.constant 0 : index
    %c0_4 = arith.constant 0 : index
    %3 = vector.load %arg2[%c0_3, %c0_4] : memref<1x2048xf32, #tpu.memory_space<vmem>>, vector<1x2048xf32>
    %4 = vector.broadcast %3 : vector<1x2048xf32> to vector<16x2048xf32>
    %5 = arith.addf %2, %4 : vector<16x2048xf32>
    %cst_5 = arith.constant 0.000000e+00 : f32
    %6 = vector.broadcast %cst_5 : f32 to vector<16x2048xf32>
    %7 = arith.maximumf %5, %6 : vector<16x2048xf32>
    %8 = arith.truncf %7 : vector<16x2048xf32> to vector<16x2048xbf16>
    %c0_6 = arith.constant 0 : index
    %c0_7 = arith.constant 0 : index
    %9 = vector.load %arg3[%c0_6, %c0_7] : memref<2048x1024xbf16, #tpu.memory_space<vmem>>, vector<2048x1024xbf16>
    %cst_8 = arith.constant dense<0.000000e+00> : vector<16x1024xf32>
    %10 = tpu.matmul %8, %9, %cst_8 {dimension_numbers = #tpu.dot_dimension_numbers<[1], [0], [0], [1], [0, 0, 1, 1], [], []>} : vector<16x2048xbf16>, vector<2048x1024xbf16>, vector<16x1024xf32> -> vector<16x1024xf32>
    %c0_9 = arith.constant 0 : index
    %c0_10 = arith.constant 0 : index
    %11 = vector.load %arg4[%c0_9, %c0_10] : memref<1x1024xf32, #tpu.memory_space<vmem>>, vector<1x1024xf32>
    %12 = vector.broadcast %11 : vector<1x1024xf32> to vector<16x1024xf32>
    %13 = arith.addf %10, %12 : vector<16x1024xf32>
    %cst_11 = arith.constant 0.000000e+00 : f32
    %14 = vector.broadcast %cst_11 : f32 to vector<16x1024xf32>
    %15 = arith.maximumf %13, %14 : vector<16x1024xf32>
    %16 = arith.truncf %15 : vector<16x1024xf32> to vector<16x1024xbf16>
    %c0_12 = arith.constant 0 : index
    %c0_13 = arith.constant 0 : index
    %17 = vector.load %arg5[%c0_12, %c0_13] : memref<1024x512xbf16, #tpu.memory_space<vmem>>, vector<1024x512xbf16>
    %cst_14 = arith.constant dense<0.000000e+00> : vector<16x512xf32>
    %18 = tpu.matmul %16, %17, %cst_14 {dimension_numbers = #tpu.dot_dimension_numbers<[1], [0], [0], [1], [0, 0, 1, 1], [], []>} : vector<16x1024xbf16>, vector<1024x512xbf16>, vector<16x512xf32> -> vector<16x512xf32>
    %c0_15 = arith.constant 0 : index
    %c0_16 = arith.constant 0 : index
    %19 = vector.load %arg6[%c0_15, %c0_16] : memref<1x512xf32, #tpu.memory_space<vmem>>, vector<1x512xf32>
    %20 = vector.broadcast %19 : vector<1x512xf32> to vector<16x512xf32>
    %21 = arith.addf %18, %20 : vector<16x512xf32>
    %cst_17 = arith.constant 0.000000e+00 : f32
    %22 = vector.broadcast %cst_17 : f32 to vector<16x512xf32>
    %23 = arith.maximumf %21, %22 : vector<16x512xf32>
    %24 = arith.truncf %23 : vector<16x512xf32> to vector<16x512xbf16>
    %c0_18 = arith.constant 0 : index
    %c0_19 = arith.constant 0 : index
    %25 = vector.load %arg7[%c0_18, %c0_19] : memref<512x256xbf16, #tpu.memory_space<vmem>>, vector<512x256xbf16>
    %cst_20 = arith.constant dense<0.000000e+00> : vector<16x256xf32>
    %26 = tpu.matmul %24, %25, %cst_20 {dimension_numbers = #tpu.dot_dimension_numbers<[1], [0], [0], [1], [0, 0, 1, 1], [], []>} : vector<16x512xbf16>, vector<512x256xbf16>, vector<16x256xf32> -> vector<16x256xf32>
    %c0_21 = arith.constant 0 : index
    %c0_22 = arith.constant 0 : index
    %27 = vector.load %arg8[%c0_21, %c0_22] : memref<1x256xf32, #tpu.memory_space<vmem>>, vector<1x256xf32>
    %28 = vector.broadcast %27 : vector<1x256xf32> to vector<16x256xf32>
    %29 = arith.addf %26, %28 : vector<16x256xf32>
    %cst_23 = arith.constant 0.000000e+00 : f32
    %30 = vector.broadcast %cst_23 : f32 to vector<16x256xf32>
    %31 = arith.maximumf %29, %30 : vector<16x256xf32>
    %32 = arith.truncf %31 : vector<16x256xf32> to vector<16x256xbf16>
    %c0_24 = arith.constant 0 : index
    %c0_25 = arith.constant 0 : index
    %33 = vector.load %arg9[%c0_24, %c0_25] : memref<256x128xbf16, #tpu.memory_space<vmem>>, vector<256x128xbf16>
    %cst_26 = arith.constant dense<0.000000e+00> : vector<16x128xf32>
    %34 = tpu.matmul %32, %33, %cst_26 {dimension_numbers = #tpu.dot_dimension_numbers<[1], [0], [0], [1], [0, 0, 1, 1], [], []>} : vector<16x256xbf16>, vector<256x128xbf16>, vector<16x128xf32> -> vector<16x128xf32>
    %c0_27 = arith.constant 0 : index
    %c0_28 = arith.constant 0 : index
    %35 = vector.load %arg10[%c0_27, %c0_28] : memref<1x128xf32, #tpu.memory_space<vmem>>, vector<1x128xf32>
    %36 = vector.broadcast %35 : vector<1x128xf32> to vector<16x128xf32>
    %37 = arith.addf %34, %36 : vector<16x128xf32>
    %cst_29 = arith.constant 0.000000e+00 : f32
    %38 = vector.broadcast %cst_29 : f32 to vector<16x128xf32>
    %39 = arith.maximumf %37, %38 : vector<16x128xf32>
    %c0_30 = arith.constant 0 : index
    %c0_31 = arith.constant 0 : index
    %40 = vector.load %arg11[%c0_30, %c0_31] : memref<16x128xf32, #tpu.memory_space<vmem>>, vector<16x128xf32>
    tpu.vector_store %arg11[%c0_30, %c0_31], %39 {strides = array<i32>} : memref<16x128xf32, #tpu.memory_space<vmem>>, vector<16x128xf32>,
    return
  }
}

</mosaic_0001>

<bundles_post_ra>
// kernel: _image_encoder_forward_impl.1
= control target key start
LH: loop header
LB: loop body
LE: loop exit
PB: predicated region body
PF: predicated region fallthrough
CT: control target
= control target key end

     0   :  { %16 = vsyncpa [#allocation3], 0  ;;  %s14474_s0 = inlined_call_operand.vmem [shape: bf16[16,128], index: 0, kind: input, shape index: {}]   ;;  %s14475_s1 = inlined_call_operand.hbm [shape: bf16[128,2048], index: 1, kind: input, shape index: {}]   ;;  %s14476_s2 = inlined_call_operand.hbm [shape: f32[1,2048], index: 2, kind: input, shape index: {}]   ;;  %s14477_s3 = inlined_call_operand.hbm [shape: bf16[2048,1024], index: 3, kind: input, shape index: {}]   ;;  %s14478_s4 = inlined_call_operand.hbm [shape: f32[1,1024], index: 4, kind: input, shape index: {}]   ;;  %s14479_s5 = inlined_call_operand.hbm [shape: bf16[1024,512], index: 5, kind: input, shape index: {}]   ;;  %s14480_s6 = inlined_call_operand.hbm [shape: f32[1,512], index: 6, kind: input, shape index: {}]   ;;  %s14481_s7 = inlined_call_operand.hbm [shape: bf16[512,256], index: 7, kind: input, shape index: {}]   ;;  %s14482_s8 = inlined_call_operand.hbm [shape: f32[1,256], index: 8, kind: input, shape index: {}]   ;;  %s14483_s9 = inlined_call_operand.hbm [shape: bf16[256,128], index: 9, kind: input, shape index: {}]   ;;  %s14484_s10 = inlined_call_operand.hbm [shape: f32[1,128], index: 10, kind: input, shape index: {}]   ;;  %s14485_s11 = inlined_call_operand.hbm [shape: f32[16,128], index: 11, kind: output, shape index: {}]  }
   0x1   :  { %17 = vsyncpa [#allocation6], 0 }
   0x2   :  { %18 = vsyncpa [#allocation9], 0 }
   0x3   :  { %19 = vsyncpa [#allocation12], 0 }
   0x4   :  { %20 = vsyncpa [#allocation15], 0 }
   0x5   :  { %21 = vsyncpa [#allocation18], 0 }
   0x6   :  { %22 = vsyncpa [#allocation4], 0  ;;  %s13875_s17 = smov [#allocation5]   ;;  %s13876_s19 = smov [#allocation8]  }
   0x7   :  { %s43_s18 = sshll.u32 %s13875_s17, 4  ;;  %s65_s20 = sshll.u32 %s13876_s19, 4  ;;  %s44_s18 = int_to_ptr.vmem [resolvable:$true] %s43_s18  ;;  %s66_s20 = int_to_ptr.vmem [resolvable:$true] %s65_s20 }
   0x8   :  { %s13649_s21 = scalar_lea.vmem %s44_s18, 256  ;;  %p13654_p1 = scmp.lt.s32.totalorder %s44_s18, %s44_s18 }
   0x9   :  { %p13650_p0 = scmp.ne.s32.totalorder %s44_s18, %s13649_s21  ;;  %p13655_p2 = scmp.lt.s32.totalorder %s13649_s21, %s13649_s21 }
   0xb   :  { %p13656_p3 = por %p13655_p2, %p13654_p1 }
   0xd   :  { %p13657_p4 = pnand %p13656_p3, %p13650_p0 }
   0xf   :  { %13660 = shalt.err (!%p13657_p4)
}
  0x10   :  { %46 = dma.hbm_to_vmem [thread:$0]  %s14476_s2, 256, %s44_s18, [#allocation6]  }
  0x11   :  { %s13669_s24 = scalar_lea.vmem %s66_s20, 128  ;;  %p13674_p6 = scmp.lt.s32.totalorder %s66_s20, %s66_s20 }
  0x12   :  { %p13670_p5 = scmp.ne.s32.totalorder %s66_s20, %s13669_s24  ;;  %p13675_p7 = scmp.lt.s32.totalorder %s13669_s24, %s13669_s24 }
  0x14   :  { %p13676_p8 = por %p13675_p7, %p13674_p6 }
  0x16   :  { %p13677_p9 = pnand %p13676_p8, %p13670_p5 }
  0x18   :  { %13680 = shalt.err (!%p13677_p9)
}
  0x19   :  { %68 = dma.hbm_to_vmem [thread:$0]  %s14478_s4, 128, %s66_s20, [#allocation9]  }
  0x1a   :  { %s13877_s27 = smov [#allocation11]   ;;  %s13878_s29 = smov [#allocation14]  }
  0x1b   :  { %s87_s28 = sshll.u32 %s13877_s27, 4  ;;  %s109_s30 = sshll.u32 %s13878_s29, 4  ;;  %s88_s28 = int_to_ptr.vmem [resolvable:$true] %s87_s28  ;;  %s110_s30 = int_to_ptr.vmem [resolvable:$true] %s109_s30 }
  0x1c   :  { %s13689_s12 = scalar_lea.vmem %s88_s28, 64  ;;  %p13694_p11 = scmp.lt.s32.totalorder %s88_s28, %s88_s28 }
  0x1d   :  { %p13690_p10 = scmp.ne.s32.totalorder %s88_s28, %s13689_s12  ;;  %p13695_p12 = scmp.lt.s32.totalorder %s13689_s12, %s13689_s12 }
  0x1f   :  { %p13696_p13 = por %p13695_p12, %p13694_p11 }
  0x21   :  { %p13697_p0 = pnand %p13696_p13, %p13690_p10 }
  0x23   :  { %13700 = shalt.err (!%p13697_p0)
}
  0x24   :  { %90 = dma.hbm_to_vmem [thread:$0]  %s14480_s6, 64, %s88_s28, [#allocation12]  }
  0x25   :  { %s13709_s14 = scalar_lea.vmem %s110_s30, 32  ;;  %p13714_p2 = scmp.lt.s32.totalorder %s110_s30, %s110_s30 }
  0x26   :  { %p13710_p1 = scmp.ne.s32.totalorder %s110_s30, %s13709_s14  ;;  %p13715_p3 = scmp.lt.s32.totalorder %s13709_s14, %s13709_s14 }
  0x28   :  { %p13716_p4 = por %p13715_p3, %p13714_p2 }
  0x2a   :  { %p13717_p5 = pnand %p13716_p4, %p13710_p1 }
  0x2c   :  { %13720 = shalt.err (!%p13717_p5)
}
  0x2d   :  { %112 = dma.hbm_to_vmem [thread:$0]  %s14482_s8, 32, %s110_s30, [#allocation15]  }
  0x2e   :  { %s13879_s16 = smov [#allocation2]  }
  0x2f   :  { %s30_s17 = sshll.u32 %s13879_s16, 4  ;;  %s31_s17 = int_to_ptr.vmem [resolvable:$true] %s30_s17 }
  0x30   :  { %s13729_s18 = scalar_lea.vmem %s31_s17, 16384  ;;  %p13734_p7 = scmp.lt.s32.totalorder %s31_s17, %s31_s17 }
  0x31   :  { %p13730_p6 = scmp.ne.s32.totalorder %s31_s17, %s13729_s18  ;;  %p13735_p8 = scmp.lt.s32.totalorder %s13729_s18, %s13729_s18 }
  0x33   :  { %p13736_p9 = por %p13735_p8, %p13734_p7 }
  0x35   :  { %p13737_p10 = pnand %p13736_p9, %p13730_p6 }
  0x37   :  { %13740 = shalt.err (!%p13737_p10)
}
  0x38   :  { %s13880_s6 = smov 1024   ;;  %s13881_s19 = smov 64  }
  0x39   :  { %36 = dma.hbm_to_vmem [thread:$0]  %s14475_s1, 16384, %s31_s17, [#allocation3], %s13880_s6, %s13880_s6, %s13881_s19  }
  0x3a   :  { %s13882_s22 = smov [#allocation7]  }
  0x3b   :  { %s52_s23 = sshll.u32 %s13882_s22, 4  ;;  %s53_s23 = int_to_ptr.vmem [resolvable:$true] %s52_s23 }
  0x3c   :  { %s13749_s8 = scalar_lea.vmem %s53_s23, 131072  ;;  %p13754_p12 = scmp.lt.s32.totalorder %s53_s23, %s53_s23 }
  0x3d   :  { %p13750_p11 = scmp.ne.s32.totalorder %s53_s23, %s13749_s8  ;;  %p13755_p13 = scmp.lt.s32.totalorder %s13749_s8, %s13749_s8 }
  0x3f   :  { %p13756_p0 = por %p13755_p13, %p13754_p12 }
  0x41   :  { %p13757_p1 = pnand %p13756_p0, %p13750_p11 }
  0x43   :  { %13760 = shalt.err (!%p13757_p1)
}
  0x44   :  { %s13883_s24 = smov 512   ;;  %s13884_s25 = smov 32  }
  0x45   :  { %58 = dma.hbm_to_vmem [thread:$0]  %s14477_s3, 131072, %s53_s23, [#allocation6], %s13883_s24, %s13883_s24, %s13884_s25  }
  0x46   :  { %s13885_s28 = smov [#allocation10]  }
  0x47   :  { %s74_s29 = sshll.u32 %s13885_s28, 4  ;;  %s75_s29 = int_to_ptr.vmem [resolvable:$true] %s74_s29 }
  0x48   :  { %s13769_s1 = scalar_lea.vmem %s75_s29, 32768  ;;  %p13774_p3 = scmp.lt.s32.totalorder %s75_s29, %s75_s29 }
  0x49   :  { %p13770_p2 = scmp.ne.s32.totalorder %s75_s29, %s13769_s1  ;;  %p13775_p4 = scmp.lt.s32.totalorder %s13769_s1, %s13769_s1 }
  0x4b   :  { %p13776_p5 = por %p13775_p4, %p13774_p3 }
  0x4d   :  { %p13777_p6 = pnand %p13776_p5, %p13770_p2 }
  0x4f   :  { %13780 = shalt.err (!%p13777_p6)
}
  0x50   :  { %s13886_s30 = smov 256   ;;  %s13887_s12 = smov 16  }
  0x51   :  { %80 = dma.hbm_to_vmem [thread:$0]  %s14479_s5, 32768, %s75_s29, [#allocation9], %s13886_s30, %s13886_s30, %s13887_s12  }
  0x52   :  { %s13888_s14 = smov [#allocation13]  }
  0x53   :  { %s96_s4 = sshll.u32 %s13888_s14, 4  ;;  %s97_s4 = int_to_ptr.vmem [resolvable:$true] %s96_s4 }
  0x54   :  { %s13789_s3 = scalar_lea.vmem %s97_s4, 8192  ;;  %p13794_p8 = scmp.lt.s32.totalorder %s97_s4, %s97_s4 }
  0x55   :  { %p13790_p7 = scmp.ne.s32.totalorder %s97_s4, %s13789_s3  ;;  %p13795_p9 = scmp.lt.s32.totalorder %s13789_s3, %s13789_s3 }
  0x57   :  { %p13796_p10 = por %p13795_p9, %p13794_p8 }
  0x59   :  { %p13797_p11 = pnand %p13796_p10, %p13790_p7 }
  0x5b   :  { %13800 = shalt.err (!%p13797_p11)
}
  0x5c   :  { %s13889_s15 = smov 128   ;;  %s13890_s16 = smov 8  }
  0x5d   :  { %102 = dma.hbm_to_vmem [thread:$0]  %s14481_s7, 8192, %s97_s4, [#allocation12], %s13889_s15, %s13889_s15, %s13890_s16  }
  0x5e   :  { %s13891_s5 = smov [#allocation16]   ;;  %s13892_s20 = smov [#allocation17]  }
  0x5f   :  { %s118_s6 = sshll.u32 %s13891_s5, 4  ;;  %s131_s21 = sshll.u32 %s13892_s20, 4  ;;  %s119_s6 = int_to_ptr.vmem [resolvable:$true] %s118_s6  ;;  %s132_s21 = int_to_ptr.vmem [resolvable:$true] %s131_s21 }
  0x60   :  { %s13809_s22 = scalar_lea.vmem %s119_s6, 2048  ;;  %p13814_p13 = scmp.lt.s32.totalorder %s119_s6, %s119_s6 }
  0x61   :  { %p13810_p12 = scmp.ne.s32.totalorder %s119_s6, %s13809_s22  ;;  %p13815_p0 = scmp.lt.s32.totalorder %s13809_s22, %s13809_s22 }
  0x63   :  { %p13816_p1 = por %p13815_p0, %p13814_p13 }
  0x65   :  { %p13817_p2 = pnand %p13816_p1, %p13810_p12 }
  0x67   :  { %13820 = shalt.err (!%p13817_p2)
}
  0x68   :  { %s13893_s23 = smov 4   ;;  %s13829_s7 = scalar_lea.vmem %s132_s21, 16 }
  0x69   :  { %124 = dma.hbm_to_vmem [thread:$0]  %s14483_s9, 2048, %s119_s6, [#allocation15], %s13881_s19, %s13881_s19, %s13893_s23  }
  0x6a   :  { %p13830_p3 = scmp.ne.s32.totalorder %s132_s21, %s13829_s7  ;;  %s13833_s25 = scalar_lea.vmem %s132_s21, 32 }
  0x6b   :  { %p13834_p4 = scmp.lt.s32.totalorder %s132_s21, %s132_s21  ;;  %p13835_p5 = scmp.lt.s32.totalorder %s13833_s25, %s13829_s7 }
  0x6d   :  { %p13836_p6 = por %p13835_p5, %p13834_p4 }
  0x6f   :  { %p13837_p7 = pnand %p13836_p6, %p13830_p3 }
  0x71   :  { %13840 = shalt.err (!%p13837_p7)
}
  0x72   :  { %134 = dma.hbm_to_vmem [thread:$0]  %s14484_s10, 16, %s132_s21, [#allocation18]  }
  0x73   :  { %13861 = dma.done.wait [#allocation3], 16384  }
  0x74   :  { %13862 = vsyncadd [#allocation3], 4294950912 }
  0x75   :  { %13863 = dma.done.wait [#allocation6], 131328  }
  0x76   :  { %13864 = vsyncadd [#allocation6], 4294835968 }
  0x77   :  { %13865 = dma.done.wait [#allocation9], 32896  }
  0x78   :  { %13866 = vsyncadd [#allocation9], 4294934400 }
  0x79   :  { %13867 = dma.done.wait [#allocation12], 8256  }
  0x7a   :  { %13868 = vsyncadd [#allocation12], 4294959040 }
  0x7b   :  { %13869 = dma.done.wait [#allocation15], 2080  }
  0x7c   :  { %13870 = vsyncadd [#allocation15], 4294965216 }
  0x7d   :  { %13871 = dma.done.wait [#allocation18], 16  }
  0x7e   :  { %13872 = vsyncadd [#allocation18], 4294967280  ;;  %v13894_v0 = vmov 0   ;;  %v280_v1 = vld [vmem:[#allocation2 + $0x380] sm:$0xff]  ;;  %v281_v3 = vld [vmem:[#allocation2 + $0x388] sm:$0xff] }
  0x7f   :  { %1058 = vmatprep.mubr.bf16.mxu0 %v13894_v0  ;;  %1101 = vmatprep.mubr.bf16.mxu1 %v13894_v0  ;;  %v288_v2 = vld [vmem:[#allocation2 + $0x3c0] sm:$0xff]  ;;  %v289_v5 = vld [vmem:[#allocation2 + $0x3c8] sm:$0xff]  ;;  %v282_v63 = vld [vmem:[#allocation2 + $0x390] sm:$0xff] }
  0x80   :  { %v11722_v4 = vcombine.high %v280_v1, %v288_v2  ;;  %v11721_v6 = vcombine.low %v280_v1, %v288_v2  ;;  %v264_v7 = vld [vmem:[#allocation2 + $0x300] sm:$0xff]  ;;  %v11724_v9 = vcombine.high %v281_v3, %v289_v5  ;;  %v11723_v10 = vcombine.low %v281_v3, %v289_v5  ;;  %v265_v12 = vld [vmem:[#allocation2 + $0x308] sm:$0xff]  ;;  %v290_v1 = vld [vmem:[#allocation2 + $0x3d0] sm:$0xff] }
  0x81   :  { %v272_v8 = vld [vmem:[#allocation2 + $0x340] sm:$0xff]  ;;  %v273_v13 = vld [vmem:[#allocation2 + $0x348] sm:$0xff]  ;;  %v283_v2 = vld [vmem:[#allocation2 + $0x398] sm:$0xff] }
  0x82   :  { %v11706_v11 = vcombine.high %v264_v7, %v272_v8  ;;  %v248_v14 = vld [vmem:[#allocation2 + $0x280] sm:$0xff]  ;;  %1026 = vmatprep.subr.bf16.mxu0 %v11722_v4  ;;  %v11708_v15 = vcombine.high %v265_v12, %v273_v13  ;;  %v249_v17 = vld [vmem:[#allocation2 + $0x288] sm:$0xff]  ;;  %1069 = vmatprep.subr.bf16.mxu1 %v11724_v9  ;;  %v11705_v19 = vcombine.low %v264_v7, %v272_v8  ;;  %v291_v3 = vld [vmem:[#allocation2 + $0x3d8] sm:$0xff] }
  0x83   :  { %v256_v16 = vld [vmem:[#allocation2 + $0x2c0] sm:$0xff]  ;;  %v257_v18 = vld [vmem:[#allocation2 + $0x2c8] sm:$0xff]  ;;  %1027 = vmatpush1.bf16.msra.mxu0 %v11721_v6  ;;  %1070 = vmatpush1.bf16.msra.mxu1 %v11723_v10  ;;  %v11707_v20 = vcombine.low %v265_v12, %v273_v13  ;;  %v11726_v6 = vcombine.high %v282_v63, %v290_v1  ;;  %v11728_v7 = vcombine.high %v283_v2, %v291_v3  ;;  %v266_v8 = vld [vmem:[#allocation2 + $0x310] sm:$0xff] }
  0x84   :  { %1028 = vmatprep.subr.bf16.mxu0 %v11706_v11  ;;  %v11690_v21 = vcombine.high %v248_v14, %v256_v16  ;;  %1071 = vmatprep.subr.bf16.mxu1 %v11708_v15  ;;  %v11692_v22 = vcombine.high %v249_v17, %v257_v18  ;;  %v232_v23 = vld [vmem:[#allocation2 + $0x200] sm:$0xff]  ;;  %v233_v25 = vld [vmem:[#allocation2 + $0x208] sm:$0xff]  ;;  %v11689_v27 = vcombine.low %v248_v14, %v256_v16  ;;  %v274_v9 = vld [vmem:[#allocation2 + $0x350] sm:$0xff] }
  0x85   :  { %v240_v24 = vld [vmem:[#allocation2 + $0x240] sm:$0xff]  ;;  %v241_v26 = vld [vmem:[#allocation2 + $0x248] sm:$0xff]  ;;  %v11691_v28 = vcombine.low %v249_v17, %v257_v18  ;;  %v267_v11 = vld [vmem:[#allocation2 + $0x318] sm:$0xff]  ;;  %v11725_v13 = vcombine.low %v282_v63, %v290_v1  ;;  %v11727_v14 = vcombine.low %v283_v2, %v291_v3  ;;  %v11710_v15 = vcombine.high %v266_v8, %v274_v9 }
  0x86   :  { %v11674_v29 = vcombine.high %v232_v23, %v240_v24  ;;  %v11676_v30 = vcombine.high %v233_v25, %v241_v26  ;;  %v216_v31 = vld [vmem:[#allocation2 + $0x180] sm:$0xff]  ;;  %v217_v33 = vld [vmem:[#allocation2 + $0x188] sm:$0xff]  ;;  %v11673_v35 = vcombine.low %v232_v23, %v240_v24  ;;  %v11675_v36 = vcombine.low %v233_v25, %v241_v26  ;;  %v275_v12 = vld [vmem:[#allocation2 + $0x358] sm:$0xff] }
  0x87   :  { %1029 = vmatpush1.bf16.msra.mxu0 %v11705_v19  ;;  %1072 = vmatpush1.bf16.msra.mxu1 %v11707_v20  ;;  %v224_v32 = vld [vmem:[#allocation2 + $0x1c0] sm:$0xff]  ;;  %v225_v34 = vld [vmem:[#allocation2 + $0x1c8] sm:$0xff]  ;;  %v11712_v16 = vcombine.high %v267_v11, %v275_v12  ;;  %v250_v17 = vld [vmem:[#allocation2 + $0x290] sm:$0xff] }
  0x88   :  { %1030 = vmatprep.subr.bf16.mxu0 %v11690_v21  ;;  %1073 = vmatprep.subr.bf16.mxu1 %v11692_v22  ;;  %v11658_v37 = vcombine.high %v216_v31, %v224_v32  ;;  %v11660_v38 = vcombine.high %v217_v33, %v225_v34  ;;  %v200_v39 = vld [vmem:[#allocation2 + $0x100] sm:$0xff]  ;;  %v201_v41 = vld [vmem:[#allocation2 + $0x108] sm:$0xff]  ;;  %v11657_v43 = vcombine.low %v216_v31, %v224_v32  ;;  %v258_v18 = vld [vmem:[#allocation2 + $0x2d0] sm:$0xff] }
  0x89   :  { %v208_v40 = vld [vmem:[#allocation2 + $0x140] sm:$0xff]  ;;  %v209_v42 = vld [vmem:[#allocation2 + $0x148] sm:$0xff]  ;;  %v11659_v44 = vcombine.low %v217_v33, %v225_v34  ;;  %v251_v19 = vld [vmem:[#allocation2 + $0x298] sm:$0xff]  ;;  %v11709_v21 = vcombine.low %v266_v8, %v274_v9  ;;  %v11711_v22 = vcombine.low %v267_v11, %v275_v12  ;;  %v11694_v23 = vcombine.high %v250_v17, %v258_v18 }
  0x8a   :  { %v11642_v45 = vcombine.high %v200_v39, %v208_v40  ;;  %v11644_v46 = vcombine.high %v201_v41, %v209_v42  ;;  %v184_v47 = vld [vmem:[#allocation2 + $0x80] sm:$0xff]  ;;  %v185_v49 = vld [vmem:[#allocation2 + $0x88] sm:$0xff]  ;;  %v11641_v51 = vcombine.low %v200_v39, %v208_v40  ;;  %v11643_v52 = vcombine.low %v201_v41, %v209_v42  ;;  %v259_v20 = vld [vmem:[#allocation2 + $0x2d8] sm:$0xff] }
  0x8b   :  { %1031 = vmatpush1.bf16.msra.mxu0 %v11689_v27  ;;  %1074 = vmatpush1.bf16.msra.mxu1 %v11691_v28  ;;  %v192_v48 = vld [vmem:[#allocation2 + $0xc0] sm:$0xff]  ;;  %v193_v50 = vld [vmem:[#allocation2 + $0xc8] sm:$0xff]  ;;  %v11696_v24 = vcombine.high %v251_v19, %v259_v20  ;;  %v234_v25 = vld [vmem:[#allocation2 + $0x210] sm:$0xff] }
  0x8c   :  { %1032 = vmatprep.subr.bf16.mxu0 %v11674_v29  ;;  %1075 = vmatprep.subr.bf16.mxu1 %v11676_v30  ;;  %v11626_v53 = vcombine.high %v184_v47, %v192_v48  ;;  %v11628_v54 = vcombine.high %v185_v49, %v193_v50  ;;  %v168_v55 = vld [vmem:[#allocation2] sm:$0xff]  ;;  %v169_v57 = vld [vmem:[#allocation2 + $0x8] sm:$0xff]  ;;  %v11625_v59 = vcombine.low %v184_v47, %v192_v48  ;;  %v242_v26 = vld [vmem:[#allocation2 + $0x250] sm:$0xff] }
  0x8d   :  { %v176_v56 = vld [vmem:[#allocation2 + $0x40] sm:$0xff]  ;;  %v177_v58 = vld [vmem:[#allocation2 + $0x48] sm:$0xff]  ;;  %v11627_v60 = vcombine.low %v185_v49, %v193_v50  ;;  %v235_v27 = vld [vmem:[#allocation2 + $0x218] sm:$0xff]  ;;  %v11693_v29 = vcombine.low %v250_v17, %v258_v18  ;;  %v11695_v30 = vcombine.low %v251_v19, %v259_v20  ;;  %v11678_v31 = vcombine.high %v234_v25, %v242_v26 }
  0x8e   :  { %v11610_v61 = vcombine.high %v168_v55, %v176_v56  ;;  %v11612_v62 = vcombine.high %v169_v57, %v177_v58  ;;  %v11609_v4 = vcombine.low %v168_v55, %v176_v56  ;;  %v11611_v5 = vcombine.low %v169_v57, %v177_v58  ;;  %v13997_v10 = vld [vmem:[%s14474_s0] sm:$0xff]   ;;  %v243_v28 = vld [vmem:[#allocation2 + $0x258] sm:$0xff]  ;;  %v218_v33 = vld [vmem:[#allocation2 + $0x190] sm:$0xff]  ;;  %s13895_s0 = smov [#allocation19]  }
  0x8f   :  { %1033 = vmatpush1.bf16.msra.mxu0 %v11673_v35  ;;  %1076 = vmatpush1.bf16.msra.mxu1 %v11675_v36  ;;  %v11680_v32 = vcombine.high %v235_v27, %v243_v28  ;;  %v226_v34 = vld [vmem:[#allocation2 + $0x1d0] sm:$0xff]  ;;  %v219_v35 = vld [vmem:[#allocation2 + $0x198] sm:$0xff]  ;;  %v284_v2 = vld [vmem:[#allocation2 + $0x3a0] sm:$0xff]  ;;  %s11591_s19 = sshll.u32 %s13895_s0, 4  ;;  %s11592_s19 = int_to_ptr.vmem [resolvable:$true] %s11591_s19 }
  0x90   :  { %1034 = vmatprep.subr.bf16.mxu0 %v11658_v37  ;;  %1077 = vmatprep.subr.bf16.mxu1 %v11660_v38  ;;  %v227_v36 = vld [vmem:[#allocation2 + $0x1d8] sm:$0xff]  ;;  %v11677_v37 = vcombine.low %v234_v25, %v242_v26  ;;  %v11679_v38 = vcombine.low %v235_v27, %v243_v28  ;;  %v11662_v39 = vcombine.high %v218_v33, %v226_v34  ;;  %v202_v41 = vld [vmem:[#allocation2 + $0x110] sm:$0xff]  ;;  %v292_v3 = vld [vmem:[#allocation2 + $0x3e0] sm:$0xff]  ;;  %s13841_s28 = scalar_lea.vmem %s11592_s19, 256  ;;  %p13846_p9 = scmp.lt.s32.totalorder %s11592_s19, %s11592_s19 }
  0x91   :  { %v11664_v40 = vcombine.high %v219_v35, %v227_v36  ;;  %v210_v42 = vld [vmem:[#allocation2 + $0x150] sm:$0xff]  ;;  %v276_v8 = vld [vmem:[#allocation2 + $0x360] sm:$0xff]  ;;  %v11730_v11 = vcombine.high %v284_v2, %v292_v3  ;;  %v269_v12 = vld [vmem:[#allocation2 + $0x328] sm:$0xff]  ;;  %p13842_p8 = scmp.ne.s32.totalorder %s11592_s19, %s13841_s28  ;;  %p13847_p10 = scmp.lt.s32.totalorder %s13841_s28, %s13841_s28 }
  0x92   :  { %v11646_v47 = vcombine.high %v202_v41, %v210_v42  ;;  %v186_v49 = vld [vmem:[#allocation2 + $0x90] sm:$0xff]  ;;  %v260_v17 = vld [vmem:[#allocation2 + $0x2e0] sm:$0xff]  ;;  %v253_v20 = vld [vmem:[#allocation2 + $0x2a8] sm:$0xff] }
  0x93   :  { %1035 = vmatpush1.bf16.msra.mxu0 %v11657_v43  ;;  %1078 = vmatpush1.bf16.msra.mxu1 %v11659_v44  ;;  %v203_v43 = vld [vmem:[#allocation2 + $0x118] sm:$0xff]  ;;  %v194_v50 = vld [vmem:[#allocation2 + $0xd0] sm:$0xff]  ;;  %v244_v25 = vld [vmem:[#allocation2 + $0x260] sm:$0xff]  ;;  %p13848_p11 = por %p13847_p10, %p13846_p9 }
  0x94   :  { %1036 = vmatprep.subr.bf16.mxu0 %v11642_v45  ;;  %1079 = vmatprep.subr.bf16.mxu1 %v11644_v46  ;;  %v211_v44 = vld [vmem:[#allocation2 + $0x158] sm:$0xff]  ;;  %v11661_v45 = vcombine.low %v218_v33, %v226_v34  ;;  %v11663_v46 = vcombine.low %v219_v35, %v227_v36  ;;  %v11630_v55 = vcombine.high %v186_v49, %v194_v50  ;;  %v170_v57 = vld [vmem:[#allocation2 + $0x10] sm:$0xff]  ;;  %v237_v28 = vld [vmem:[#allocation2 + $0x228] sm:$0xff] }
  0x95   :  { %v11648_v48 = vcombine.high %v203_v43, %v211_v44  ;;  %v178_v58 = vld [vmem:[#allocation2 + $0x50] sm:$0xff]  ;;  %v228_v33 = vld [vmem:[#allocation2 + $0x1e0] sm:$0xff]  ;;  %v221_v36 = vld [vmem:[#allocation2 + $0x1a8] sm:$0xff]  ;;  %p13849_p12 = pnand %p13848_p11, %p13842_p8 }
  0x96   :  { %v11614_v63 = vcombine.high %v170_v57, %v178_v58 }
  0x97   :  { %1037 = vmatpush1.bf16.msra.mxu0 %v11641_v51  ;;  %1080 = vmatpush1.bf16.msra.mxu1 %v11643_v52  ;;  %v187_v51 = vld [vmem:[#allocation2 + $0x98] sm:$0xff] }
  0x98   :  { %1038 = vmatprep.subr.bf16.mxu0 %v11626_v53  ;;  %1081 = vmatprep.subr.bf16.mxu1 %v11628_v54  ;;  %v195_v52 = vld [vmem:[#allocation2 + $0xd8] sm:$0xff]  ;;  %v11645_v53 = vcombine.low %v202_v41, %v210_v42  ;;  %v11647_v54 = vcombine.low %v203_v43, %v211_v44  ;;  %v212_v41 = vld [vmem:[#allocation2 + $0x160] sm:$0xff]  ;;  %v205_v44 = vld [vmem:[#allocation2 + $0x128] sm:$0xff] }
  0x99   :  { %v11632_v56 = vcombine.high %v187_v51, %v195_v52 }
  0x9b   :  { %1039 = vmatpush1.bf16.msra.mxu0 %v11625_v59  ;;  %1082 = vmatpush1.bf16.msra.mxu1 %v11627_v60  ;;  %v171_v59 = vld [vmem:[#allocation2 + $0x18] sm:$0xff] }
  0x9c   :  { %1040 = vmatprep.subr.bf16.mxu0 %v11610_v61  ;;  %1083 = vmatprep.subr.bf16.mxu1 %v11612_v62  ;;  %v179_v60 = vld [vmem:[#allocation2 + $0x58] sm:$0xff]  ;;  %v11629_v61 = vcombine.low %v186_v49, %v194_v50  ;;  %v11631_v62 = vcombine.low %v187_v51, %v195_v52  ;;  %v196_v49 = vld [vmem:[#allocation2 + $0xe0] sm:$0xff]  ;;  %v189_v52 = vld [vmem:[#allocation2 + $0xa8] sm:$0xff] }
  0x9d   :  { %v11616_v1 = vcombine.high %v171_v59, %v179_v60  ;;  %v11615_v9 = vcombine.low %v171_v59, %v179_v60  ;;  %v173_v60 = vld [vmem:[#allocation2 + $0x28] sm:$0xff] }
  0x9f   :  { %1041 = vmatpush1.bf16.msra.mxu0 %v11609_v4  ;;  %1084 = vmatpush1.bf16.msra.mxu1 %v11611_v5  ;;  %v285_v4 = vld [vmem:[#allocation2 + $0x3a8] sm:$0xff] }
  0xa0   :  { %1112 = vmatprep.subr.bf16.mxu0 %v11726_v6  ;;  %1155 = vmatprep.subr.bf16.mxu1 %v11728_v7  ;;  %v293_v5 = vld [vmem:[#allocation2 + $0x3e8] sm:$0xff]  ;;  %v11613_v6 = vcombine.low %v170_v57, %v178_v58  ;;  %v268_v7 = vld [vmem:[#allocation2 + $0x320] sm:$0xff] }
  0xa1   :  { %v11731_v18 = vcombine.low %v285_v4, %v293_v5  ;;  %v11714_v19 = vcombine.high %v268_v7, %v276_v8  ;;  %v180_v57 = vld [vmem:[#allocation2 + $0x60] sm:$0xff] }
  0xa2   :  { %1059 = vmatmul.mubr.bf16.vlgmr.msra.gmra.mxu0 %v13997_v10  ;;  %1102 = vmatmul.mubr.bf16.vlgmr.msra.gmra.mxu1 %v13997_v10 }
  0xa3   :  { %1113 = vmatpush1.bf16.msra.mxu0 %v11725_v13  ;;  %1156 = vmatpush1.bf16.msra.mxu1 %v11727_v14  ;;  %v277_v13 = vld [vmem:[#allocation2 + $0x368] sm:$0xff]  ;;  %v11732_v14 = vcombine.high %v285_v4, %v293_v5  ;;  %v287_v5 = vld [vmem:[#allocation2 + $0x3b8] sm:$0xff] }
  0xa4   :  { %1114 = vmatprep.subr.bf16.mxu0 %v11710_v15  ;;  %1157 = vmatprep.subr.bf16.mxu1 %v11712_v16  ;;  %v11729_v15 = vcombine.low %v284_v2, %v292_v3  ;;  %v252_v16 = vld [vmem:[#allocation2 + $0x2a0] sm:$0xff]  ;;  %v11715_v26 = vcombine.low %v269_v12, %v277_v13  ;;  %v294_v2 = vld [vmem:[#allocation2 + $0x3f0] sm:$0xff] }
  0xa5   :  { %1144 = vmatprep.mubr.bf16.mxu0 %v13894_v0  ;;  %1187 = vmatprep.mubr.bf16.mxu1 %v13894_v0  ;;  %v11698_v27 = vcombine.high %v252_v16, %v260_v17 }
  0xa7   :  { %1115 = vmatpush1.bf16.msra.mxu0 %v11709_v21  ;;  %1158 = vmatpush1.bf16.msra.mxu1 %v11711_v22  ;;  %v261_v21 = vld [vmem:[#allocation2 + $0x2e8] sm:$0xff]  ;;  %v11716_v22 = vcombine.high %v269_v12, %v277_v13 }
  0xa8   :  { %1116 = vmatprep.subr.bf16.mxu0 %v11694_v23  ;;  %1159 = vmatprep.subr.bf16.mxu1 %v11696_v24  ;;  %v11713_v23 = vcombine.low %v268_v7, %v276_v8  ;;  %v236_v24 = vld [vmem:[#allocation2 + $0x220] sm:$0xff]  ;;  %v11699_v34 = vcombine.low %v253_v20, %v261_v21 }
  0xa9   :  { %v11682_v35 = vcombine.high %v236_v24, %v244_v25 }
  0xab   :  { %1117 = vmatpush1.bf16.msra.mxu0 %v11693_v29  ;;  %1160 = vmatpush1.bf16.msra.mxu1 %v11695_v30  ;;  %v245_v29 = vld [vmem:[#allocation2 + $0x268] sm:$0xff]  ;;  %v11700_v30 = vcombine.high %v253_v20, %v261_v21  ;;  %v254_v21 = vld [vmem:[#allocation2 + $0x2b0] sm:$0xff] }
  0xac   :  { %1118 = vmatprep.subr.bf16.mxu0 %v11678_v31  ;;  %1161 = vmatprep.subr.bf16.mxu1 %v11680_v32  ;;  %v11697_v31 = vcombine.low %v252_v16, %v260_v17  ;;  %v220_v32 = vld [vmem:[#allocation2 + $0x1a0] sm:$0xff]  ;;  %v11683_v42 = vcombine.low %v237_v28, %v245_v29 }
  0xad   :  { %v11666_v43 = vcombine.high %v220_v32, %v228_v33 }
  0xaf   :  { %1119 = vmatpush1.bf16.msra.mxu0 %v11677_v37  ;;  %1162 = vmatpush1.bf16.msra.mxu1 %v11679_v38  ;;  %v229_v37 = vld [vmem:[#allocation2 + $0x1e8] sm:$0xff]  ;;  %v11684_v38 = vcombine.high %v237_v28, %v245_v29  ;;  %v238_v29 = vld [vmem:[#allocation2 + $0x230] sm:$0xff] }
  0xb0   :  { %1120 = vmatprep.subr.bf16.mxu0 %v11662_v39  ;;  %1163 = vmatprep.subr.bf16.mxu1 %v11664_v40  ;;  %v11681_v39 = vcombine.low %v236_v24, %v244_v25  ;;  %v204_v40 = vld [vmem:[#allocation2 + $0x120] sm:$0xff]  ;;  %v11667_v50 = vcombine.low %v221_v36, %v229_v37  ;;  %v263_v24 = vld [vmem:[#allocation2 + $0x2f8] sm:$0xff] }
  0xb1   :  { %v11650_v51 = vcombine.high %v204_v40, %v212_v41 }
  0xb3   :  { %1121 = vmatpush1.bf16.msra.mxu0 %v11661_v45  ;;  %1164 = vmatpush1.bf16.msra.mxu1 %v11663_v46  ;;  %v213_v45 = vld [vmem:[#allocation2 + $0x168] sm:$0xff]  ;;  %v11668_v46 = vcombine.high %v221_v36, %v229_v37  ;;  %v222_v37 = vld [vmem:[#allocation2 + $0x1b0] sm:$0xff] }
  0xb4   :  { %1122 = vmatprep.subr.bf16.mxu0 %v11646_v47  ;;  %1165 = vmatprep.subr.bf16.mxu1 %v11648_v48  ;;  %v11665_v47 = vcombine.low %v220_v32, %v228_v33  ;;  %v188_v48 = vld [vmem:[#allocation2 + $0xa0] sm:$0xff]  ;;  %v11651_v58 = vcombine.low %v205_v44, %v213_v45  ;;  %v247_v32 = vld [vmem:[#allocation2 + $0x278] sm:$0xff] }
  0xb5   :  { %v11634_v59 = vcombine.high %v188_v48, %v196_v49 }
  0xb7   :  { %1123 = vmatpush1.bf16.msra.mxu0 %v11645_v53  ;;  %1166 = vmatpush1.bf16.msra.mxu1 %v11647_v54  ;;  %v197_v53 = vld [vmem:[#allocation2 + $0xe8] sm:$0xff]  ;;  %v11652_v54 = vcombine.high %v205_v44, %v213_v45  ;;  %v206_v44 = vld [vmem:[#allocation2 + $0x130] sm:$0xff] }
  0xb8   :  { %1124 = vmatprep.subr.bf16.mxu0 %v11630_v55  ;;  %1167 = vmatprep.subr.bf16.mxu1 %v11632_v56  ;;  %v11649_v55 = vcombine.low %v204_v40, %v212_v41  ;;  %v172_v56 = vld [vmem:[#allocation2 + $0x20] sm:$0xff]  ;;  %v11635_v3 = vcombine.low %v189_v52, %v197_v53  ;;  %v231_v40 = vld [vmem:[#allocation2 + $0x1f8] sm:$0xff]  ;;  %v214_v45 = vld [vmem:[#allocation2 + $0x170] sm:$0xff] }
  0xb9   :  { %v11618_v4 = vcombine.high %v172_v56, %v180_v57  ;;  %v11617_v8 = vcombine.low %v172_v56, %v180_v57  ;;  %v11653_v56 = vcombine.low %v206_v44, %v214_v45  ;;  %v174_v57 = vld [vmem:[#allocation2 + $0x30] sm:$0xff] }
  0xbb   :  { %1125 = vmatpush1.bf16.msra.mxu0 %v11629_v61  ;;  %1168 = vmatpush1.bf16.msra.mxu1 %v11631_v62  ;;  %v181_v61 = vld [vmem:[#allocation2 + $0x68] sm:$0xff]  ;;  %v11636_v62 = vcombine.high %v189_v52, %v197_v53  ;;  %v11654_v52 = vcombine.high %v206_v44, %v214_v45 }
  0xbc   :  { %1126 = vmatprep.subr.bf16.mxu0 %v11614_v63  ;;  %1169 = vmatprep.subr.bf16.mxu1 %v11616_v1  ;;  %v11633_v63 = vcombine.low %v188_v48, %v196_v49  ;;  %v286_v1 = vld [vmem:[#allocation2 + $0x3b0] sm:$0xff]  ;;  %v11620_v7 = vcombine.high %v173_v60, %v181_v61  ;;  %v11619_v12 = vcombine.low %v173_v60, %v181_v61 }
  0xbd   :  { %v11734_v13 = vcombine.high %v286_v1, %v294_v2  ;;  %v11733_v17 = vcombine.low %v286_v1, %v294_v2  ;;  %v190_v49 = vld [vmem:[#allocation2 + $0xb0] sm:$0xff] }
  0xbe   :  { %v1474_v2 = vld [vmem:[#allocation7 + $0x1c0] sm:$0xff] }
  0xbf   :  { %1127 = vmatpush1.bf16.msra.mxu0 %v11613_v6  ;;  %1170 = vmatpush1.bf16.msra.mxu1 %v11615_v9  ;;  %v295_v6 = vld [vmem:[#allocation2 + $0x3f8] sm:$0xff]  ;;  %v270_v9 = vld [vmem:[#allocation2 + $0x330] sm:$0xff] }
  0xc0   :  { %1198 = vmatprep.subr.bf16.mxu0 %v11730_v11  ;;  %1241 = vmatprep.subr.bf16.mxu1 %v11732_v14  ;;  %v278_v11 = vld [vmem:[#allocation2 + $0x370] sm:$0xff]  ;;  %v271_v14 = vld [vmem:[#allocation2 + $0x338] sm:$0xff]  ;;  %v11736_v16 = vcombine.high %v287_v5, %v295_v6 }
  0xc1   :  { %v11717_v25 = vcombine.low %v270_v9, %v278_v11 }
  0xc2   :  { %1145 = vmatmul.mubr.bf16.vlgmr.msra.gmra.mxu0 %v13997_v10  ;;  %1188 = vmatmul.mubr.bf16.vlgmr.msra.gmra.mxu1 %v13997_v10 }
  0xc3   :  { %1199 = vmatpush1.bf16.msra.mxu0 %v11729_v15  ;;  %1242 = vmatpush1.bf16.msra.mxu1 %v11731_v18  ;;  %v279_v15 = vld [vmem:[#allocation2 + $0x378] sm:$0xff]  ;;  %v11735_v18 = vcombine.low %v287_v5, %v295_v6 }
  0xc4   :  { %1200 = vmatprep.subr.bf16.mxu0 %v11714_v19  ;;  %1243 = vmatprep.subr.bf16.mxu1 %v11716_v22  ;;  %v11718_v19 = vcombine.high %v270_v9, %v278_v11  ;;  %v11720_v20 = vcombine.high %v271_v14, %v279_v15  ;;  %v262_v22 = vld [vmem:[#allocation2 + $0x2f0] sm:$0xff] }
  0xc5   :  { %1230 = vmatprep.mubr.bf16.mxu0 %v13894_v0  ;;  %1273 = vmatprep.mubr.bf16.mxu1 %v13894_v0  ;;  %v11701_v33 = vcombine.low %v254_v21, %v262_v22  ;;  %v1466_v11 = vld [vmem:[#allocation7 + $0x180] sm:$0xff] }
  0xc7   :  { %1201 = vmatpush1.bf16.msra.mxu0 %v11713_v23  ;;  %1244 = vmatpush1.bf16.msra.mxu1 %v11715_v26  ;;  %v255_v23 = vld [vmem:[#allocation2 + $0x2b8] sm:$0xff]  ;;  %v11719_v26 = vcombine.low %v271_v14, %v279_v15 }
  0xc8   :  { %1202 = vmatprep.subr.bf16.mxu0 %v11698_v27  ;;  %1245 = vmatprep.subr.bf16.mxu1 %v11700_v30  ;;  %v11702_v27 = vcombine.high %v254_v21, %v262_v22  ;;  %v11704_v28 = vcombine.high %v255_v23, %v263_v24  ;;  %v246_v30 = vld [vmem:[#allocation2 + $0x270] sm:$0xff] }
  0xc9   :  { %v11685_v41 = vcombine.low %v238_v29, %v246_v30 }
  0xcb   :  { %1203 = vmatpush1.bf16.msra.mxu0 %v11697_v31  ;;  %1246 = vmatpush1.bf16.msra.mxu1 %v11699_v34  ;;  %v239_v31 = vld [vmem:[#allocation2 + $0x238] sm:$0xff]  ;;  %v11703_v34 = vcombine.low %v255_v23, %v263_v24  ;;  %v1586_v24 = vld [vmem:[#allocation7 + $0x540] sm:$0xff] }
  0xcc   :  { %1204 = vmatprep.subr.bf16.mxu0 %v11682_v35  ;;  %1247 = vmatprep.subr.bf16.mxu1 %v11684_v38  ;;  %v11686_v35 = vcombine.high %v238_v29, %v246_v30  ;;  %v11688_v36 = vcombine.high %v239_v31, %v247_v32  ;;  %v230_v38 = vld [vmem:[#allocation2 + $0x1f0] sm:$0xff] }
  0xcd   :  { %v11669_v48 = vcombine.low %v222_v37, %v230_v38 }
  0xcf   :  { %1205 = vmatpush1.bf16.msra.mxu0 %v11681_v39  ;;  %1248 = vmatpush1.bf16.msra.mxu1 %v11683_v42  ;;  %v223_v39 = vld [vmem:[#allocation2 + $0x1b8] sm:$0xff]  ;;  %v11687_v42 = vcombine.low %v239_v31, %v247_v32  ;;  %v1578_v32 = vld [vmem:[#allocation7 + $0x500] sm:$0xff] }
  0xd0   :  { %1206 = vmatprep.subr.bf16.mxu0 %v11666_v43  ;;  %1249 = vmatprep.subr.bf16.mxu1 %v11668_v46  ;;  %v11670_v43 = vcombine.high %v222_v37, %v230_v38  ;;  %v207_v46 = vld [vmem:[#allocation2 + $0x138] sm:$0xff] }
  0xd3   :  { %1207 = vmatpush1.bf16.msra.mxu0 %v11665_v47  ;;  %1250 = vmatpush1.bf16.msra.mxu1 %v11667_v50  ;;  %v215_v47 = vld [vmem:[#allocation2 + $0x178] sm:$0xff]  ;;  %v198_v50 = vld [vmem:[#allocation2 + $0xf0] sm:$0xff] }
  0xd4   :  { %1208 = vmatprep.subr.bf16.mxu0 %v11650_v51  ;;  %1251 = vmatprep.subr.bf16.mxu1 %v11652_v54  ;;  %v11671_v51 = vcombine.low %v223_v39, %v231_v40  ;;  %v11656_v53 = vcombine.high %v207_v46, %v215_v47  ;;  %v191_v54 = vld [vmem:[#allocation2 + $0xb8] sm:$0xff]  ;;  %v11638_v60 = vcombine.high %v190_v49, %v198_v50 }
  0xd5   :  { %v11637_v1 = vcombine.low %v190_v49, %v198_v50  ;;  %v1426_v49 = vld [vmem:[#allocation7 + $0x40] sm:$0xff] }
  0xd6   :  { %v1430_v50 = vld [vmem:[#allocation7 + $0x60] sm:$0xff] }
  0xd7   :  { %1209 = vmatpush1.bf16.msra.mxu0 %v11649_v55  ;;  %1252 = vmatpush1.bf16.msra.mxu1 %v11651_v58  ;;  %v199_v55 = vld [vmem:[#allocation2 + $0xf8] sm:$0xff]  ;;  %v182_v58 = vld [vmem:[#allocation2 + $0x70] sm:$0xff] }
  0xd8   :  { %1210 = vmatprep.subr.bf16.mxu0 %v11634_v59  ;;  %1253 = vmatprep.subr.bf16.mxu1 %v11636_v62  ;;  %v11655_v59 = vcombine.low %v207_v46, %v215_v47  ;;  %v11640_v61 = vcombine.high %v191_v54, %v199_v55  ;;  %v175_v62 = vld [vmem:[#allocation2 + $0x38] sm:$0xff]  ;;  %v11622_v5 = vcombine.high %v174_v57, %v182_v58  ;;  %v1562_v46 = vld [vmem:[#allocation7 + $0x480] sm:$0xff] }
  0xd9   :  { %v11621_v9 = vcombine.low %v174_v57, %v182_v58  ;;  %v1566_v47 = vld [vmem:[#allocation7 + $0x4a0] sm:$0xff] }
  0xda   :  { %v1418_v57 = vld [vmem:[#allocation7] sm:$0xff] }
  0xdb   :  { %1211 = vmatpush1.bf16.msra.mxu0 %v11633_v63  ;;  %1254 = vmatpush1.bf16.msra.mxu1 %v11635_v3  ;;  %v183_v63 = vld [vmem:[#allocation2 + $0x78] sm:$0xff]  ;;  %v1478_v3 = vld [vmem:[#allocation7 + $0x1e0] sm:$0xff] }
  0xdc   :  { %1212 = vmatprep.subr.bf16.mxu0 %v11618_v4  ;;  %1255 = vmatprep.subr.bf16.mxu1 %v11620_v7  ;;  %v11639_v4 = vcombine.low %v191_v54, %v199_v55  ;;  %v11624_v6 = vcombine.high %v175_v62, %v183_v63  ;;  %v1602_v7 = vld [vmem:[#allocation7 + $0x5c0] sm:$0xff]  ;;  %v11794_v14 = vcombine.high %v1474_v2, %v1478_v3 }
  0xdd   :  { %v1554_v54 = vld [vmem:[#allocation7 + $0x440] sm:$0xff] }
  0xde   :  { %v1558_v55 = vld [vmem:[#allocation7 + $0x460] sm:$0xff] }
  0xdf   :  { %1213 = vmatpush1.bf16.msra.mxu0 %v11617_v8  ;;  %1256 = vmatpush1.bf16.msra.mxu1 %v11619_v12  ;;  %v1606_v8 = vld [vmem:[#allocation7 + $0x5e0] sm:$0xff] }
  0xe0   :  { %1284 = vmatprep.subr.bf16.mxu0 %v11734_v13  ;;  %1327 = vmatprep.subr.bf16.mxu1 %v11736_v16  ;;  %v1470_v12 = vld [vmem:[#allocation7 + $0x1a0] sm:$0xff]  ;;  %v11623_v13 = vcombine.low %v175_v62, %v183_v63  ;;  %v11922_v15 = vcombine.high %v1602_v7, %v1606_v8  ;;  %v11921_v21 = vcombine.low %v1602_v7, %v1606_v8 }
  0xe1   :  { %v1594_v16 = vld [vmem:[#allocation7 + $0x580] sm:$0xff]  ;;  %v11786_v22 = vcombine.high %v1466_v11, %v1470_v12 }
  0xe2   :  { %1231 = vmatmul.mubr.bf16.vlgmr.msra.gmra.mxu0 %v13997_v10  ;;  %1274 = vmatmul.mubr.bf16.vlgmr.msra.gmra.mxu1 %v13997_v10  ;;  %v1422_v58 = vld [vmem:[#allocation7 + $0x20] sm:$0xff] }
  0xe3   :  { %1285 = vmatpush1.bf16.msra.mxu0 %v11733_v17  ;;  %1328 = vmatpush1.bf16.msra.mxu1 %v11735_v18  ;;  %v1598_v17 = vld [vmem:[#allocation7 + $0x5a0] sm:$0xff]  ;;  %v11793_v18 = vcombine.low %v1474_v2, %v1478_v3 }
  0xe4   :  { %1286 = vmatprep.subr.bf16.mxu0 %v11718_v19  ;;  %1329 = vmatprep.subr.bf16.mxu1 %v11720_v20  ;;  %v1458_v19 = vld [vmem:[#allocation7 + $0x140] sm:$0xff]  ;;  %v11914_v23 = vcombine.high %v1594_v16, %v1598_v17  ;;  %v11913_v29 = vcombine.low %v1594_v16, %v1598_v17 }
  0xe5   :  { %1316 = vmatprep.mubr.bf16.mxu0 %v13894_v0  ;;  %1359 = vmatprep.mubr.bf16.mxu1 %v13894_v0  ;;  %v11672_v0 = vcombine.high %v223_v39, %v231_v40  ;;  %v1462_v20 = vld [vmem:[#allocation7 + $0x160] sm:$0xff] }
  0xe6   :  { %v11778_v30 = vcombine.high %v1458_v19, %v1462_v20  ;;  %v1570_v39 = vld [vmem:[#allocation7 + $0x4c0] sm:$0xff] }
  0xe7   :  { %1287 = vmatpush1.bf16.msra.mxu0 %v11717_v25  ;;  %1330 = vmatpush1.bf16.msra.mxu1 %v11719_v26  ;;  %v1590_v25 = vld [vmem:[#allocation7 + $0x560] sm:$0xff]  ;;  %v11785_v26 = vcombine.low %v1466_v11, %v1470_v12 }
  0xe8   :  { %1288 = vmatprep.subr.bf16.mxu0 %v11702_v27  ;;  %1331 = vmatprep.subr.bf16.mxu1 %v11704_v28  ;;  %v1450_v27 = vld [vmem:[#allocation7 + $0x100] sm:$0xff]  ;;  %v11906_v31 = vcombine.high %v1586_v24, %v1590_v25  ;;  %v11905_v37 = vcombine.low %v1586_v24, %v1590_v25 }
  0xe9   :  { %v1454_v28 = vld [vmem:[#allocation7 + $0x120] sm:$0xff] }
  0xea   :  { %v1574_v40 = vld [vmem:[#allocation7 + $0x4e0] sm:$0xff] }
  0xeb   :  { %1289 = vmatpush1.bf16.msra.mxu0 %v11701_v33  ;;  %1332 = vmatpush1.bf16.msra.mxu1 %v11703_v34  ;;  %v1582_v33 = vld [vmem:[#allocation7 + $0x520] sm:$0xff]  ;;  %v11777_v34 = vcombine.low %v1458_v19, %v1462_v20  ;;  %v11890_v45 = vcombine.high %v1570_v39, %v1574_v40 }
  0xec   :  { %1290 = vmatprep.subr.bf16.mxu0 %v11686_v35  ;;  %1333 = vmatprep.subr.bf16.mxu1 %v11688_v36  ;;  %v1442_v35 = vld [vmem:[#allocation7 + $0xc0] sm:$0xff]  ;;  %v11898_v38 = vcombine.high %v1578_v32, %v1582_v33 }
  0xed   :  { %v1446_v36 = vld [vmem:[#allocation7 + $0xe0] sm:$0xff] }
  0xee   :  { %v11762_v44 = vcombine.high %v1442_v35, %v1446_v36  ;;  %v1546_v62 = vld [vmem:[#allocation7 + $0x400] sm:$0xff] }
  0xef   :  { %1291 = vmatpush1.bf16.msra.mxu0 %v11685_v41  ;;  %1334 = vmatpush1.bf16.msra.mxu1 %v11687_v42  ;;  %v11769_v41 = vcombine.low %v1450_v27, %v1454_v28  ;;  %v1434_v42 = vld [vmem:[#allocation7 + $0x80] sm:$0xff] }
  0xf0   :  { %1292 = vmatprep.subr.bf16.mxu0 %v11670_v43  ;;  %1335 = vmatprep.subr.bf16.mxu1 %v11672_v0  ;;  %v1438_v43 = vld [vmem:[#allocation7 + $0xa0] sm:$0xff]  ;;  %v11897_v0 = vcombine.low %v1578_v32, %v1582_v33 }
  0xf1   :  { %v1550_v63 = vld [vmem:[#allocation7 + $0x420] sm:$0xff] }
  0xf2   :  { %v1538_v2 = vld [vmem:[#allocation7 + $0x3c0] sm:$0xff] }
  0xf3   :  { %1293 = vmatpush1.bf16.msra.mxu0 %v11669_v48  ;;  %1336 = vmatpush1.bf16.msra.mxu1 %v11671_v51  ;;  %v11761_v48 = vcombine.low %v1442_v35, %v1446_v36  ;;  %v11889_v51 = vcombine.low %v1570_v39, %v1574_v40  ;;  %v1542_v3 = vld [vmem:[#allocation7 + $0x3e0] sm:$0xff] }
  0xf4   :  { %1294 = vmatprep.subr.bf16.mxu0 %v11654_v52  ;;  %1337 = vmatprep.subr.bf16.mxu1 %v11656_v53  ;;  %v11754_v52 = vcombine.high %v1434_v42, %v1438_v43  ;;  %v11882_v53 = vcombine.high %v1562_v46, %v1566_v47  ;;  %v1666_v7 = vld [vmem:[#allocation7 + $0x7c0] sm:$0xff] }
  0xf5   :  { %v1670_v8 = vld [vmem:[#allocation7 + $0x7e0] sm:$0xff] }
  0xf6   :  { %v1530_v11 = vld [vmem:[#allocation7 + $0x380] sm:$0xff] }
  0xf7   :  { %1295 = vmatpush1.bf16.msra.mxu0 %v11653_v56  ;;  %1338 = vmatpush1.bf16.msra.mxu1 %v11655_v59  ;;  %v11753_v56 = vcombine.low %v1434_v42, %v1438_v43  ;;  %v11881_v59 = vcombine.low %v1562_v46, %v1566_v47  ;;  %v1534_v12 = vld [vmem:[#allocation7 + $0x3a0] sm:$0xff] }
  0xf8   :  { %1296 = vmatprep.subr.bf16.mxu0 %v11638_v60  ;;  %1339 = vmatprep.subr.bf16.mxu1 %v11640_v61  ;;  %v11746_v60 = vcombine.high %v1426_v49, %v1430_v50  ;;  %v11874_v61 = vcombine.high %v1554_v54, %v1558_v55  ;;  %v1658_v16 = vld [vmem:[#allocation7 + $0x780] sm:$0xff] }
  0xf9   :  { %v1662_v17 = vld [vmem:[#allocation7 + $0x7a0] sm:$0xff] }
  0xfa   :  { %v1522_v19 = vld [vmem:[#allocation7 + $0x340] sm:$0xff] }
  0xfb   :  { %1297 = vmatpush1.bf16.msra.mxu0 %v11637_v1  ;;  %1340 = vmatpush1.bf16.msra.mxu1 %v11639_v4  ;;  %v11745_v1 = vcombine.low %v1426_v49, %v1430_v50  ;;  %v11873_v4 = vcombine.low %v1554_v54, %v1558_v55  ;;  %v1526_v20 = vld [vmem:[#allocation7 + $0x360] sm:$0xff] }
  0xfc   :  { %1298 = vmatprep.subr.bf16.mxu0 %v11622_v5  ;;  %1341 = vmatprep.subr.bf16.mxu1 %v11624_v6  ;;  %v11738_v5 = vcombine.high %v1418_v57, %v1422_v58  ;;  %v11866_v6 = vcombine.high %v1546_v62, %v1550_v63  ;;  %v1650_v24 = vld [vmem:[#allocation7 + $0x740] sm:$0xff] }
  0xfd   :  { %v1654_v25 = vld [vmem:[#allocation7 + $0x760] sm:$0xff] }
  0xfe   :  { %v1642_v32 = vld [vmem:[#allocation7 + $0x700] sm:$0xff] }
  0xff   :  { %1299 = vmatpush1.bf16.msra.mxu0 %v11621_v9  ;;  %1342 = vmatpush1.bf16.msra.mxu1 %v11623_v13  ;;  %v11737_v9 = vcombine.low %v1418_v57, %v1422_v58  ;;  %v11865_v13 = vcombine.low %v1546_v62, %v1550_v63  ;;  %v1646_v33 = vld [vmem:[#allocation7 + $0x720] sm:$0xff] }
 0x100   :  { %7604 = vmatprep.subr.bf16.mxu0 %v11794_v14  ;;  %7647 = vmatprep.subr.bf16.mxu1 %v11922_v15  ;;  %v11858_v14 = vcombine.high %v1538_v2, %v1542_v3  ;;  %v11986_v15 = vcombine.high %v1666_v7, %v1670_v8  ;;  %v1506_v35 = vld [vmem:[#allocation7 + $0x2c0] sm:$0xff] }
 0x101   :  { %v1510_v36 = vld [vmem:[#allocation7 + $0x2e0] sm:$0xff] }
 0x102   :  { %1317 = vmatmul.mubr.bf16.vlgmr.msra.gmra.mxu0 %v13997_v10  ;;  %1360 = vmatmul.mubr.bf16.vlgmr.msra.gmra.mxu1 %v13997_v10  ;;  %v11770_v10 = vcombine.high %v1450_v27, %v1454_v28  ;;  %v1514_v27 = vld [vmem:[#allocation7 + $0x300] sm:$0xff] }
 0x103   :  { %7605 = vmatpush1.bf16.msra.mxu0 %v11793_v18  ;;  %7648 = vmatpush1.bf16.msra.mxu1 %v11921_v21  ;;  %v11857_v18 = vcombine.low %v1538_v2, %v1542_v3  ;;  %v11985_v21 = vcombine.low %v1666_v7, %v1670_v8  ;;  %v1518_v28 = vld [vmem:[#allocation7 + $0x320] sm:$0xff] }
 0x104   :  { %7606 = vmatprep.subr.bf16.mxu0 %v11786_v22  ;;  %7649 = vmatprep.subr.bf16.mxu1 %v11914_v23  ;;  %v11850_v22 = vcombine.high %v1530_v11, %v1534_v12  ;;  %v11978_v23 = vcombine.high %v1658_v16, %v1662_v17  ;;  %v1634_v39 = vld [vmem:[#allocation7 + $0x6c0] sm:$0xff] }
 0x105   :  { %v1638_v40 = vld [vmem:[#allocation7 + $0x6e0] sm:$0xff] }
 0x106   :  { %v1498_v42 = vld [vmem:[#allocation7 + $0x280] sm:$0xff] }
 0x107   :  { %7607 = vmatpush1.bf16.msra.mxu0 %v11785_v26  ;;  %7650 = vmatpush1.bf16.msra.mxu1 %v11913_v29  ;;  %v11849_v26 = vcombine.low %v1530_v11, %v1534_v12  ;;  %v11977_v29 = vcombine.low %v1658_v16, %v1662_v17  ;;  %v1502_v43 = vld [vmem:[#allocation7 + $0x2a0] sm:$0xff] }
 0x108   :  { %7608 = vmatprep.subr.bf16.mxu0 %v11778_v30  ;;  %7651 = vmatprep.subr.bf16.mxu1 %v11906_v31  ;;  %v11842_v30 = vcombine.high %v1522_v19, %v1526_v20  ;;  %v11970_v31 = vcombine.high %v1650_v24, %v1654_v25  ;;  %v1626_v46 = vld [vmem:[#allocation7 + $0x680] sm:$0xff] }
 0x109   :  { %v1630_v47 = vld [vmem:[#allocation7 + $0x6a0] sm:$0xff] }
 0x10a   :  { %v1490_v49 = vld [vmem:[#allocation7 + $0x240] sm:$0xff] }
 0x10b   :  { %7609 = vmatpush1.bf16.msra.mxu0 %v11777_v34  ;;  %7652 = vmatpush1.bf16.msra.mxu1 %v11905_v37  ;;  %v11841_v34 = vcombine.low %v1522_v19, %v1526_v20  ;;  %v11969_v37 = vcombine.low %v1650_v24, %v1654_v25  ;;  %v1494_v50 = vld [vmem:[#allocation7 + $0x260] sm:$0xff]  ;;  %v14036_v19 = vld [vmem:[#allocation5] sm:$0xff] }
 0x10c   :  { %7610 = vmatprep.subr.bf16.mxu0 %v11770_v10  ;;  %7653 = vmatprep.subr.bf16.mxu1 %v11898_v38  ;;  %v11834_v10 = vcombine.high %v1514_v27, %v1518_v28  ;;  %v11962_v38 = vcombine.high %v1642_v32, %v1646_v33  ;;  %v1618_v54 = vld [vmem:[#allocation7 + $0x640] sm:$0xff] }
 0x10d   :  { %v1622_v55 = vld [vmem:[#allocation7 + $0x660] sm:$0xff] }
 0x10e   :  { %v1482_v57 = vld [vmem:[#allocation7 + $0x200] sm:$0xff] }
 0x10f   :  { %7611 = vmatpush1.bf16.msra.mxu0 %v11769_v41  ;;  %7654 = vmatpush1.bf16.msra.mxu1 %v11897_v0  ;;  %v11833_v41 = vcombine.low %v1514_v27, %v1518_v28  ;;  %v11961_v0 = vcombine.low %v1642_v32, %v1646_v33  ;;  %v1486_v58 = vld [vmem:[#allocation7 + $0x220] sm:$0xff] }
 0x110   :  { %7612 = vmatprep.subr.bf16.mxu0 %v11762_v44  ;;  %7655 = vmatprep.subr.bf16.mxu1 %v11890_v45  ;;  %v11826_v44 = vcombine.high %v1506_v35, %v1510_v36  ;;  %v11954_v45 = vcombine.high %v1634_v39, %v1638_v40  ;;  %v1610_v62 = vld [vmem:[#allocation7 + $0x600] sm:$0xff] }
 0x111   :  { %v1614_v63 = vld [vmem:[#allocation7 + $0x620] sm:$0xff] }
 0x112   :  { %v14013_v2 = vld [vmem:[#allocation7 + $0x9c0] sm:$0xff]  ;;  %v11929_v11 = vcombine.low %v1610_v62, %v1614_v63 }
 0x113   :  { %7613 = vmatpush1.bf16.msra.mxu0 %v11761_v48  ;;  %7656 = vmatpush1.bf16.msra.mxu1 %v11889_v51  ;;  %v11825_v48 = vcombine.low %v1506_v35, %v1510_v36  ;;  %v11953_v51 = vcombine.low %v1634_v39, %v1638_v40  ;;  %v14015_v3 = vld [vmem:[#allocation7 + $0x9e0] sm:$0xff] }
 0x114   :  { %7614 = vmatprep.subr.bf16.mxu0 %v11754_v52  ;;  %7657 = vmatprep.subr.bf16.mxu1 %v11882_v53  ;;  %v11818_v52 = vcombine.high %v1498_v42, %v1502_v43  ;;  %v11946_v53 = vcombine.high %v1626_v46, %v1630_v47  ;;  %v14017_v7 = vld [vmem:[#allocation7 + $0xdc0] sm:$0xff]  ;;  %v12050_v12 = vcombine.high %v14013_v2, %v14015_v3 }
 0x115   :  { %v14019_v8 = vld [vmem:[#allocation7 + $0xde0] sm:$0xff] }
 0x117   :  { %7615 = vmatpush1.bf16.msra.mxu0 %v11753_v56  ;;  %7658 = vmatpush1.bf16.msra.mxu1 %v11881_v59  ;;  %v11817_v56 = vcombine.low %v1498_v42, %v1502_v43  ;;  %v11945_v59 = vcombine.low %v1626_v46, %v1630_v47 }
 0x118   :  { %7616 = vmatprep.subr.bf16.mxu0 %v11746_v60  ;;  %7659 = vmatprep.subr.bf16.mxu1 %v11874_v61  ;;  %v11810_v60 = vcombine.high %v1490_v49, %v1494_v50  ;;  %v11938_v61 = vcombine.high %v1618_v54, %v1622_v55 }
 0x11b   :  { %7617 = vmatpush1.bf16.msra.mxu0 %v11745_v1  ;;  %7660 = vmatpush1.bf16.msra.mxu1 %v11873_v4  ;;  %v11809_v1 = vcombine.low %v1490_v49, %v1494_v50  ;;  %v11937_v4 = vcombine.low %v1618_v54, %v1622_v55  ;;  %v1854_v49 = vld [vmem:[#allocation7 + $0xda0] sm:$0xff]  ;;  %v12177_v55 = vcombine.low %v14017_v7, %v14019_v8 }
 0x11c   :  { %7618 = vmatprep.subr.bf16.mxu0 %v11738_v5  ;;  %7661 = vmatprep.subr.bf16.mxu1 %v11866_v6  ;;  %v11802_v5 = vcombine.high %v1482_v57, %v1486_v58  ;;  %v11930_v6 = vcombine.high %v1610_v62, %v1614_v63  ;;  %v1846_v62 = vld [vmem:[#allocation7 + $0xd60] sm:$0xff] }
 0x11f   :  { %7619 = vmatpush1.bf16.msra.mxu0 %v11737_v9  ;;  %7662 = vmatpush1.bf16.msra.mxu1 %v11865_v13  ;;  %v11801_v9 = vcombine.low %v1482_v57, %v1486_v58  ;;  %v12178_v13 = vcombine.high %v14017_v7, %v14019_v8  ;;  %v1838_v7 = vld [vmem:[#allocation7 + $0xd20] sm:$0xff] }
 0x120   :  { %7620 = vmatprep.subr.bf16.mxu0 %v11858_v14  ;;  %7663 = vmatprep.subr.bf16.mxu1 %v11986_v15  ;;  %v300_v14 = vlaneseq }
 0x122   :  { %v14025_v15 = vshrl.u32 %v300_v14, 7  ;;  %v1702_v14 = vld [vmem:[#allocation7 + $0x8e0] sm:$0xff] }
 0x123   :  { %7621 = vmatpush2.bf16.msra.mxu0 %v11857_v18  ;;  %7664 = vmatpush2.bf16.msra.mxu1 %v11985_v21 }
 0x124   :  { %7622 = vmatprep.subr.bf16.mxu0 %v11850_v22  ;;  %7665 = vmatprep.subr.bf16.mxu1 %v11978_v23  ;;  %v14028_v16 = vsub.s32 1, %v14025_v15  ;;  %v14031_v17 = vsub.s32 0, %v14025_v15  ;;  %v14034_v18 = vsub.s32 3, %v14025_v15  ;;  %v14039_v20 = vsub.s32 2, %v14025_v15 }
 0x126   :  { %14494 = vst [vmem:[#allocation27_spill] sm:$0xff] %v14031_v17  ;;  %14495 = vst [vmem:[#allocation28_spill] sm:$0xff] %v14039_v20  ;;  %v307_v23 = vrot.slane %v14036_v19, %v14028_v16  ;;  %v303_v24 = vrot.slane %v14036_v19, %v14031_v17  ;;  %v311_v27 = vrot.slane %v14036_v19, %v14039_v20 }
 0x127   :  { %7623 = vmatpush2.bf16.msra.mxu0 %v11849_v26  ;;  %7666 = vmatpush2.bf16.msra.mxu1 %v11977_v29  ;;  %v315_v26 = vrot.slane %v14036_v19, %v14034_v18 }
 0x128   :  { %7624 = vmatprep.subr.bf16.mxu0 %v11842_v30  ;;  %7667 = vmatprep.subr.bf16.mxu1 %v11970_v31 }
 0x12b   :  { %7625 = vmatpush2.bf16.msra.mxu0 %v11841_v34  ;;  %7668 = vmatpush2.bf16.msra.mxu1 %v11969_v37 }
 0x12c   :  { %7626 = vmatprep.subr.bf16.mxu0 %v11834_v10  ;;  %7669 = vmatprep.subr.bf16.mxu1 %v11962_v38 }
 0x12f   :  { %7627 = vmatpush2.bf16.msra.mxu0 %v11833_v41  ;;  %7670 = vmatpush2.bf16.msra.mxu1 %v11961_v0  ;;  %v1722_v0 = vld [vmem:[#allocation7 + $0x980] sm:$0xff] }
 0x130   :  { %7628 = vmatprep.subr.bf16.mxu0 %v11826_v44  ;;  %7671 = vmatprep.subr.bf16.mxu1 %v11954_v45  ;;  %v1726_v44 = vld [vmem:[#allocation7 + $0x9a0] sm:$0xff] }
 0x131   :  { %v12041_v63 = vcombine.low %v1722_v0, %v1726_v44 }
 0x133   :  { %7629 = vmatpush2.bf16.msra.mxu0 %v11825_v48  ;;  %7672 = vmatpush2.bf16.msra.mxu1 %v11953_v51  ;;  %v1850_v48 = vld [vmem:[#allocation7 + $0xd80] sm:$0xff] }
 0x134   :  { %7630 = vmatprep.subr.bf16.mxu0 %v11818_v52  ;;  %7673 = vmatprep.subr.bf16.mxu1 %v11946_v53  ;;  %v12049_v52 = vcombine.low %v14013_v2, %v14015_v3  ;;  %v12170_v58 = vcombine.high %v1850_v48, %v1854_v49 }
 0x137   :  { %7631 = vmatpush2.bf16.msra.mxu0 %v11817_v56  ;;  %7674 = vmatpush2.bf16.msra.mxu1 %v11945_v59  ;;  %v12042_v56 = vcombine.high %v1722_v0, %v1726_v44  ;;  %v1714_v59 = vld [vmem:[#allocation7 + $0x940] sm:$0xff] }
 0x138   :  { %7632 = vmatprep.subr.bf16.mxu0 %v11810_v60  ;;  %7675 = vmatprep.subr.bf16.mxu1 %v11938_v61  ;;  %v1718_v60 = vld [vmem:[#allocation7 + $0x960] sm:$0xff] }
 0x139   :  { %v1842_v61 = vld [vmem:[#allocation7 + $0xd40] sm:$0xff]  ;;  %v12034_v2 = vcombine.high %v1714_v59, %v1718_v60  ;;  %v12033_v8 = vcombine.low %v1714_v59, %v1718_v60 }
 0x13a   :  { %v12162_v3 = vcombine.high %v1842_v61, %v1846_v62 }
 0x13b   :  { %7633 = vmatpush2.bf16.msra.mxu0 %v11809_v1  ;;  %7676 = vmatpush2.bf16.msra.mxu1 %v11937_v4  ;;  %v12169_v1 = vcombine.low %v1850_v48, %v1854_v49  ;;  %v1706_v4 = vld [vmem:[#allocation7 + $0x900] sm:$0xff] }
 0x13c   :  { %7634 = vmatprep.subr.bf16.mxu0 %v11802_v5  ;;  %7677 = vmatprep.subr.bf16.mxu1 %v11930_v6  ;;  %v1710_v5 = vld [vmem:[#allocation7 + $0x920] sm:$0xff] }
 0x13d   :  { %v1834_v6 = vld [vmem:[#allocation7 + $0xd00] sm:$0xff] }
 0x13e   :  { %v1802_v49 = vld [vmem:[#allocation7 + $0xc00] sm:$0xff] }
 0x13f   :  { %7635 = vmatpush2.bf16.msra.mxu0 %v11801_v9  ;;  %7678 = vmatpush2.bf16.msra.mxu1 %v11929_v11  ;;  %v12161_v9 = vcombine.low %v1842_v61, %v1846_v62  ;;  %v12026_v11 = vcombine.high %v1706_v4, %v1710_v5 }
 0x140   :  { %7690 = vmatprep.subr.bf16.mxu0 %v12050_v12  ;;  %7733 = vmatprep.subr.bf16.mxu1 %v12178_v13  ;;  %v12154_v12 = vcombine.high %v1834_v6, %v1838_v7  ;;  %v1698_v13 = vld [vmem:[#allocation7 + $0x8c0] sm:$0xff] }
 0x162   :  { %v1060_v21 = vpop.f32.mrf.mxu0  ;;  %v1103_v22 = vpop.f32.mrf.mxu1 }
 0x163   :  { %v1061_v33 = vadd.f32 %v1060_v21, %v303_v24  ;;  %v1104_v37 = vadd.f32 %v1103_v22, %v311_v27  ;;  %v1826_v21 = vld [vmem:[#allocation7 + $0xcc0] sm:$0xff] }
 0x164   :  { %v1062_v25 = vpop.f32.mrf.mxu0  ;;  %v1105_v28 = vpop.f32.mrf.mxu1  ;;  %v1830_v22 = vld [vmem:[#allocation7 + $0xce0] sm:$0xff] }
 0x165   :  { %v1063_v30 = vadd.f32 %v1062_v25, %v307_v23  ;;  %v1106_v34 = vadd.f32 %v1105_v28, %v315_v26  ;;  %v1370_v45 = vmax.f32 %v1061_v33, 0.0  ;;  %v1372_v50 = vmax.f32 %v1104_v37, 0.0  ;;  %v1694_v28 = vld [vmem:[#allocation7 + $0x8a0] sm:$0xff] }
 0x166   :  { %v1064_v29 = vpop.f32.mrf.mxu0  ;;  %v1107_v32 = vpop.f32.mrf.mxu1  ;;  %v12018_v25 = vcombine.high %v1698_v13, %v1702_v14  ;;  %v12145_v33 = vcombine.low %v1826_v21, %v1830_v22  ;;  %v1682_v37 = vld [vmem:[#allocation7 + $0x840] sm:$0xff] }
 0x167   :  { %v1065_v31 = vadd.f32 %v1064_v29, %v303_v24  ;;  %v1108_v35 = vadd.f32 %v1107_v32, %v311_v27  ;;  %v1371_v41 = vmax.f32 %v1063_v30, 0.0  ;;  %v1373_v46 = vmax.f32 %v1106_v34, 0.0  ;;  %v1690_v27 = vld [vmem:[#allocation7 + $0x880] sm:$0xff] }
 0x168   :  { %v1066_v36 = vpop.f32.mrf.mxu0  ;;  %v1109_v38 = vpop.f32.mrf.mxu1  ;;  %v12153_v24 = vcombine.low %v1834_v6, %v1838_v7  ;;  %v1818_v29 = vld [vmem:[#allocation7 + $0xc80] sm:$0xff]  ;;  %v14066_v32 = vsub.s32 5, %v14025_v15  ;;  %v12010_v34 = vcombine.high %v1690_v27, %v1694_v28 }
 0x169   :  { %v1067_v10 = vadd.f32 %v1066_v36, %v307_v23  ;;  %v1386_v39 = vmax.f32 %v1065_v31, 0.0  ;;  %v1110_v40 = vadd.f32 %v1109_v38, %v315_v26  ;;  %v1388_v42 = vmax.f32 %v1108_v35, 0.0  ;;  %v1822_v30 = vld [vmem:[#allocation7 + $0xca0] sm:$0xff] }
 0x16a   :  { %v12025_v23 = vcombine.low %v1706_v4, %v1710_v5  ;;  %v12146_v26 = vcombine.high %v1826_v21, %v1830_v22  ;;  %v12017_v31 = vcombine.low %v1698_v13, %v1702_v14  ;;  %14496 = vst [vmem:[#allocation29_spill] sm:$0xff] %v14066_v32  ;;  %v14069_v35 = vsub.s32 7, %v14025_v15  ;;  %v1810_v38 = vld [vmem:[#allocation7 + $0xc40] sm:$0xff] }
 0x16b   :  { %v1387_v43 = vmax.f32 %v1067_v10, 0.0  ;;  %v1389_v47 = vmax.f32 %v1110_v40, 0.0  ;;  %v14053_v53 = vpack.c.bf16 %v1386_v39, %v1370_v45  ;;  %v14059_v57 = vpack.c.bf16 %v1388_v42, %v1372_v50  ;;  %v1686_v10 = vld [vmem:[#allocation7 + $0x860] sm:$0xff] }
 0x16c   :  { %14497 = vst [vmem:[#allocation30_spill] sm:$0xff] %v14069_v35  ;;  %v12138_v36 = vcombine.high %v1818_v29, %v1822_v30  ;;  %v1814_v39 = vld [vmem:[#allocation7 + $0xc60] sm:$0xff]  ;;  %v12009_v40 = vcombine.low %v1690_v27, %v1694_v28  ;;  %v12137_v42 = vcombine.low %v1818_v29, %v1822_v30  ;;  %v331_v44 = vrot.slane %v14036_v19, %v14069_v35 }
 0x16d   :  { %v14049_v51 = vpack.c.bf16 %v1387_v43, %v1371_v41  ;;  %v14055_v54 = vpack.c.bf16 %v1389_v47, %v1373_v46  ;;  %v323_v41 = vrot.slane %v14036_v19, %v14066_v32  ;;  %v12002_v43 = vcombine.high %v1682_v37, %v1686_v10  ;;  %v1674_v46 = vld [vmem:[#allocation7 + $0x800] sm:$0xff] }
 0x16e   :  { %v12130_v45 = vcombine.high %v1810_v38, %v1814_v39  ;;  %v1678_v47 = vld [vmem:[#allocation7 + $0x820] sm:$0xff]  ;;  %v12129_v59 = vcombine.low %v1810_v38, %v1814_v39 }
 0x16f   :  { %7636 = vmatprep.mubr.bf16.mxu0 %v14049_v51  ;;  %7679 = vmatprep.mubr.bf16.mxu1 %v14055_v54  ;;  %v1806_v50 = vld [vmem:[#allocation7 + $0xc20] sm:$0xff]  ;;  %v11994_v60 = vcombine.high %v1674_v46, %v1678_v47  ;;  %v11993_v7 = vcombine.low %v1674_v46, %v1678_v47 }
 0x170   :  { %7637 = vmatmul.mubr.bf16.vlgmr.msra.gmra.mxu0 %v14053_v53  ;;  %7680 = vmatmul.mubr.bf16.vlgmr.msra.gmra.mxu1 %v14059_v57  ;;  %v1922_v4 = vld [vmem:[#allocation7 + $0xfc0] sm:$0xff] }
 0x171   :  { %7691 = vmatpush1.bf16.msra.mxu0 %v12049_v52  ;;  %7734 = vmatpush1.bf16.msra.mxu1 %v12177_v55  ;;  %v12001_v55 = vcombine.low %v1682_v37, %v1686_v10  ;;  %v1926_v5 = vld [vmem:[#allocation7 + $0xfe0] sm:$0xff] }
 0x172   :  { %7692 = vmatprep.subr.bf16.mxu0 %v12042_v56  ;;  %7735 = vmatprep.subr.bf16.mxu1 %v12170_v58  ;;  %v12242_v22 = vcombine.high %v1922_v4, %v1926_v5  ;;  %v1918_v27 = vld [vmem:[#allocation7 + $0xfa0] sm:$0xff] }
 0x173   :  { %v1778_v37 = vld [vmem:[#allocation7 + $0xb40] sm:$0xff] }
 0x174   :  { %v1782_v10 = vld [vmem:[#allocation7 + $0xb60] sm:$0xff] }
 0x175   :  { %7693 = vmatpush1.bf16.msra.mxu0 %v12041_v63  ;;  %7736 = vmatpush1.bf16.msra.mxu1 %v12169_v1  ;;  %v12122_v63 = vcombine.high %v1802_v49, %v1806_v50  ;;  %v1794_v1 = vld [vmem:[#allocation7 + $0xbc0] sm:$0xff] }
 0x176   :  { %7694 = vmatprep.subr.bf16.mxu0 %v12034_v2  ;;  %7737 = vmatprep.subr.bf16.mxu1 %v12162_v3  ;;  %v1798_v2 = vld [vmem:[#allocation7 + $0xbe0] sm:$0xff] }
 0x177   :  { %v12114_v13 = vcombine.high %v1794_v1, %v1798_v2  ;;  %v12113_v29 = vcombine.low %v1794_v1, %v1798_v2  ;;  %v1906_v38 = vld [vmem:[#allocation7 + $0xf40] sm:$0xff] }
 0x178   :  { %v1910_v39 = vld [vmem:[#allocation7 + $0xf60] sm:$0xff] }
 0x179   :  { %7695 = vmatpush1.bf16.msra.mxu0 %v12033_v8  ;;  %7738 = vmatpush1.bf16.msra.mxu1 %v12161_v9  ;;  %v1898_v46 = vld [vmem:[#allocation7 + $0xf00] sm:$0xff] }
 0x17a   :  { %7696 = vmatprep.subr.bf16.mxu0 %v12026_v11  ;;  %7739 = vmatprep.subr.bf16.mxu1 %v12154_v12  ;;  %v12121_v12 = vcombine.low %v1802_v49, %v1806_v50  ;;  %v1902_v47 = vld [vmem:[#allocation7 + $0xf20] sm:$0xff]  ;;  %v12097_v49 = vcombine.low %v1778_v37, %v1782_v10  ;;  %v12225_v50 = vcombine.low %v1906_v38, %v1910_v39 }
 0x17d   :  { %7697 = vmatpush1.bf16.msra.mxu0 %v12025_v23  ;;  %7740 = vmatpush1.bf16.msra.mxu1 %v12153_v24  ;;  %v1786_v23 = vld [vmem:[#allocation7 + $0xb80] sm:$0xff] }
 0x17e   :  { %7698 = vmatprep.subr.bf16.mxu0 %v12018_v25  ;;  %7741 = vmatprep.subr.bf16.mxu1 %v12146_v26  ;;  %v1790_v24 = vld [vmem:[#allocation7 + $0xba0] sm:$0xff] }
 0x17f   :  { %v1914_v26 = vld [vmem:[#allocation7 + $0xf80] sm:$0xff] }
 0x181   :  { %7699 = vmatpush1.bf16.msra.mxu0 %v12017_v31  ;;  %7742 = vmatpush1.bf16.msra.mxu1 %v12145_v33  ;;  %v12241_v31 = vcombine.low %v1922_v4, %v1926_v5  ;;  %v12106_v33 = vcombine.high %v1786_v23, %v1790_v24  ;;  %v1754_v4 = vld [vmem:[#allocation7 + $0xa80] sm:$0xff] }
 0x182   :  { %7700 = vmatprep.subr.bf16.mxu0 %v12010_v34  ;;  %v14073_v0 = vpop.f32.mrf.mxu0  ;;  %7743 = vmatprep.subr.bf16.mxu1 %v12138_v36  ;;  %v14077_v48 = vpop.f32.mrf.mxu1  ;;  %v12234_v36 = vcombine.high %v1914_v26, %v1918_v27  ;;  %v1758_v5 = vld [vmem:[#allocation7 + $0xaa0] sm:$0xff] }
 0x184   :  { %v1148_v52 = vpop.f32.mrf.mxu0  ;;  %v1191_v58 = vpop.f32.mrf.mxu1 }
 0x185   :  { %7701 = vmatpush1.bf16.msra.mxu0 %v12009_v40  ;;  %v1149_v56 = vadd.f32 %v1148_v52, %v323_v41  ;;  %7744 = vmatpush1.bf16.msra.mxu1 %v12137_v42  ;;  %v1192_v62 = vadd.f32 %v1191_v58, %v331_v44  ;;  %v12105_v40 = vcombine.low %v1786_v23, %v1790_v24  ;;  %v1766_v58 = vld [vmem:[#allocation7 + $0xae0] sm:$0xff] }
 0x186   :  { %7702 = vmatprep.subr.bf16.mxu0 %v12002_v43  ;;  %v14079_v61 = vpop.f32.mrf.mxu0  ;;  %7745 = vmatprep.subr.bf16.mxu1 %v12130_v45  ;;  %v14081_v3 = vpop.f32.mrf.mxu1  ;;  %v12098_v42 = vcombine.high %v1778_v37, %v1782_v10  ;;  %v12226_v43 = vcombine.high %v1906_v38, %v1910_v39  ;;  %v1774_v45 = vld [vmem:[#allocation7 + $0xb20] sm:$0xff] }
 0x187   :  { %v1375_v8 = vmax.f32 %v1149_v56, 0.0  ;;  %v1377_v14 = vmax.f32 %v1192_v62, 0.0  ;;  %v1762_v56 = vld [vmem:[#allocation7 + $0xac0] sm:$0xff] }
 0x188   :  { %v1152_v6 = vpop.f32.mrf.mxu0  ;;  %v1195_v11 = vpop.f32.mrf.mxu1  ;;  %v12082_v1 = vcombine.high %v1762_v56, %v1766_v58  ;;  %v1874_v23 = vld [vmem:[#allocation7 + $0xe40] sm:$0xff] }
 0x189   :  { %7703 = vmatpush1.bf16.msra.mxu0 %v12001_v55  ;;  %v1153_v9 = vadd.f32 %v1152_v6, %v323_v41  ;;  %7746 = vmatpush1.bf16.msra.mxu1 %v12129_v59  ;;  %v1196_v21 = vadd.f32 %v1195_v11, %v331_v44  ;;  %v12233_v41 = vcombine.low %v1914_v26, %v1918_v27  ;;  %v1770_v44 = vld [vmem:[#allocation7 + $0xb00] sm:$0xff] }
 0x18a   :  { %7704 = vmatprep.subr.bf16.mxu0 %v11994_v60  ;;  %7747 = vmatprep.subr.bf16.mxu1 %v12122_v63  ;;  %v12090_v52 = vcombine.high %v1770_v44, %v1774_v45  ;;  %v12218_v55 = vcombine.high %v1898_v46, %v1902_v47  ;;  %v1890_v59 = vld [vmem:[#allocation7 + $0xec0] sm:$0xff]  ;;  %v12089_v62 = vcombine.low %v1770_v44, %v1774_v45 }
 0x18b   :  { %v1391_v25 = vmax.f32 %v1153_v9, 0.0  ;;  %v1393_v28 = vmax.f32 %v1196_v21, 0.0  ;;  %v1894_v60 = vld [vmem:[#allocation7 + $0xee0] sm:$0xff]  ;;  %v12217_v63 = vcombine.low %v1898_v46, %v1902_v47  ;;  %v14090_v9 = vsub.s32 4, %v14025_v15 }
 0x18c   :  { %v12210_v2 = vcombine.high %v1890_v59, %v1894_v60  ;;  %v1882_v6 = vld [vmem:[#allocation7 + $0xe80] sm:$0xff]  ;;  %v12209_v11 = vcombine.low %v1890_v59, %v1894_v60  ;;  %v12073_v26 = vcombine.low %v1754_v4, %v1758_v5 }
 0x18d   :  { %7705 = vmatpush1.bf16.msra.mxu0 %v11993_v7  ;;  %v14083_v30 = vpack.c.bf16 %v1391_v25, %v1375_v8  ;;  %7748 = vmatpush1.bf16.msra.mxu1 %v12121_v12  ;;  %v14085_v34 = vpack.c.bf16 %v1393_v28, %v1377_v14  ;;  %v1886_v7 = vld [vmem:[#allocation7 + $0xea0] sm:$0xff]  ;;  %v12081_v8 = vcombine.low %v1762_v56, %v1766_v58  ;;  %v14095_v25 = vld [vmem:[#allocation5 + $0x8] sm:$0xff] }
 0x18e   :  { %7706 = vmatprep.subr.bf16.mxu0 %v12114_v13  ;;  %7749 = vmatprep.subr.bf16.mxu1 %v12242_v22  ;;  %v12074_v12 = vcombine.high %v1754_v4, %v1758_v5  ;;  %v14093_v13 = vsub.s32 6, %v14025_v15  ;;  %v12202_v14 = vcombine.high %v1882_v6, %v1886_v7  ;;  %v1746_v21 = vld [vmem:[#allocation7 + $0xa40] sm:$0xff]  ;;  %v319_v27 = vrot.slane %v14036_v19, %v14090_v9 }
 0x18f   :  { %7722 = vmatprep.mubr.bf16.mxu0 %v14083_v30  ;;  %7765 = vmatprep.mubr.bf16.mxu1 %v14085_v34  ;;  %v1750_v22 = vld [vmem:[#allocation7 + $0xa60] sm:$0xff]  ;;  %v12201_v28 = vcombine.low %v1882_v6, %v1886_v7  ;;  %v339_v10 = vrot.slane %v14095_v25, %v14028_v16 }
 0x190   :  { %14498 = vst [vmem:[#allocation31_spill] sm:$0xff] %v14093_v13  ;;  %v1878_v24 = vld [vmem:[#allocation7 + $0xe60] sm:$0xff]  ;;  %v327_v15 = vrot.slane %v14036_v19, %v14093_v13  ;;  %v1147_v19 = vadd.f32 %v14073_v0, %v319_v27  ;;  %v1151_v46 = vadd.f32 %v14079_v61, %v319_v27 }
 0x191   :  { %7707 = vmatpush2.bf16.msra.mxu0 %v12113_v29  ;;  %7750 = vmatpush2.bf16.msra.mxu1 %v12241_v31  ;;  %v12066_v29 = vcombine.high %v1746_v21, %v1750_v22  ;;  %v1742_v37 = vld [vmem:[#allocation7 + $0xa20] sm:$0xff]  ;;  %v12193_v44 = vcombine.low %v1874_v23, %v1878_v24 }
 0x192   :  { %7708 = vmatprep.subr.bf16.mxu0 %v12106_v33  ;;  %7751 = vmatprep.subr.bf16.mxu1 %v12234_v36  ;;  %v12194_v33 = vcombine.high %v1874_v23, %v1878_v24  ;;  %v1738_v36 = vld [vmem:[#allocation7 + $0xa00] sm:$0xff]  ;;  %v1194_v56 = vadd.f32 %v14081_v3, %v327_v15  ;;  %v1374_v7 = vmax.f32 %v1147_v19, 0.0 }
 0x193   :  { %v1866_v39 = vld [vmem:[#allocation7 + $0xe00] sm:$0xff]  ;;  %v12058_v47 = vcombine.high %v1738_v36, %v1742_v37 }
 0x194   :  { %v2114_v59 = vld [vmem:[#allocation7 + $0x15c0] sm:$0xff] }
 0x195   :  { %7709 = vmatpush2.bf16.msra.mxu0 %v12105_v40  ;;  %7752 = vmatpush2.bf16.msra.mxu1 %v12233_v41  ;;  %v1870_v40 = vld [vmem:[#allocation7 + $0xe20] sm:$0xff] }
 0x196   :  { %7710 = vmatprep.subr.bf16.mxu0 %v12098_v42  ;;  %7753 = vmatprep.subr.bf16.mxu1 %v12226_v43  ;;  %v347_v42 = vrot.slane %v14095_v25, %v14034_v18  ;;  %v12065_v43 = vcombine.low %v1746_v21, %v1750_v22  ;;  %v12186_v58 = vcombine.high %v1866_v39, %v1870_v40  ;;  %v2118_v60 = vld [vmem:[#allocation7 + $0x15e0] sm:$0xff] }
 0x197   :  { %v1982_v21 = vld [vmem:[#allocation7 + $0x11a0] sm:$0xff] }
 0x198   :  { %v2106_v24 = vld [vmem:[#allocation7 + $0x1580] sm:$0xff] }
 0x199   :  { %7711 = vmatpush2.bf16.msra.mxu0 %v12097_v49  ;;  %7754 = vmatpush2.bf16.msra.mxu1 %v12225_v50  ;;  %v1986_v49 = vld [vmem:[#allocation7 + $0x11c0] sm:$0xff] }
 0x19a   :  { %7712 = vmatprep.subr.bf16.mxu0 %v12090_v52  ;;  %7755 = vmatprep.subr.bf16.mxu1 %v12218_v55  ;;  %v1990_v50 = vld [vmem:[#allocation7 + $0x11e0] sm:$0xff]  ;;  %v1190_v55 = vadd.f32 %v14077_v48, %v327_v15  ;;  %v12434_v48 = vcombine.high %v2114_v59, %v2118_v60 }
 0x19b   :  { %v12306_v4 = vcombine.high %v1986_v49, %v1990_v50 }
 0x19d   :  { %7713 = vmatpush2.bf16.msra.mxu0 %v12089_v62  ;;  %7756 = vmatpush2.bf16.msra.mxu1 %v12217_v63 }
 0x19e   :  { %7714 = vmatprep.subr.bf16.mxu0 %v12082_v1  ;;  %7757 = vmatprep.subr.bf16.mxu1 %v12210_v2  ;;  %v12057_v1 = vcombine.low %v1738_v36, %v1742_v37  ;;  %v12185_v2 = vcombine.low %v1866_v39, %v1870_v40  ;;  %v1970_v39 = vld [vmem:[#allocation7 + $0x1140] sm:$0xff] }
 0x19f   :  { %v1974_v40 = vld [vmem:[#allocation7 + $0x1160] sm:$0xff] }
 0x1a1   :  { %7715 = vmatpush2.bf16.msra.mxu0 %v12081_v8  ;;  %7758 = vmatpush2.bf16.msra.mxu1 %v12209_v11  ;;  %v1390_v8 = vmax.f32 %v1151_v46, 0.0  ;;  %v1376_v11 = vmax.f32 %v1190_v55, 0.0  ;;  %v12290_v46 = vcombine.high %v1970_v39, %v1974_v40  ;;  %v2090_v55 = vld [vmem:[#allocation7 + $0x1500] sm:$0xff] }
 0x1a2   :  { %7716 = vmatprep.subr.bf16.mxu0 %v12074_v12  ;;  %v14099_v31 = vpop.f32.mrf.mxu0  ;;  %7759 = vmatprep.subr.bf16.mxu1 %v12202_v14  ;;  %v14105_v38 = vpop.f32.mrf.mxu1  ;;  %v1392_v12 = vmax.f32 %v1194_v56, 0.0  ;;  %v1978_v14 = vld [vmem:[#allocation7 + $0x1180] sm:$0xff] }
 0x1a3   :  { %v14117_v15 = vpack.c.bf16 %v1390_v8, %v1374_v7  ;;  %v12298_v36 = vcombine.high %v1978_v14, %v1982_v21  ;;  %v2094_v56 = vld [vmem:[#allocation7 + $0x1520] sm:$0xff] }
 0x1a4   :  { %v1234_v41 = vpop.f32.mrf.mxu0  ;;  %v1277_v45 = vpop.f32.mrf.mxu1  ;;  %v14119_v37 = vpack.c.bf16 %v1392_v12, %v1376_v11  ;;  %v1946_v8 = vld [vmem:[#allocation7 + $0x1080] sm:$0xff] }
 0x1a5   :  { %7717 = vmatpush2.bf16.msra.mxu0 %v12073_v26  ;;  %7760 = vmatpush2.bf16.msra.mxu1 %v12201_v28  ;;  %v1235_v62 = vadd.f32 %v1234_v41, %v339_v10  ;;  %v1278_v0 = vadd.f32 %v1277_v45, %v347_v42  ;;  %v2110_v26 = vld [vmem:[#allocation7 + $0x15a0] sm:$0xff]  ;;  %v12297_v45 = vcombine.low %v1978_v14, %v1982_v21 }
 0x1a6   :  { %7718 = vmatprep.subr.bf16.mxu0 %v12066_v29  ;;  %v14111_v52 = vpop.f32.mrf.mxu0  ;;  %7761 = vmatprep.subr.bf16.mxu1 %v12194_v33  ;;  %v14115_v63 = vpop.f32.mrf.mxu1  ;;  %v12305_v29 = vcombine.low %v1986_v49, %v1990_v50  ;;  %v12433_v33 = vcombine.low %v2114_v59, %v2118_v60  ;;  %v12425_v19 = vcombine.low %v2106_v24, %v2110_v26  ;;  %v1962_v49 = vld [vmem:[#allocation7 + $0x1100] sm:$0xff] }
 0x1a7   :  { %v1379_v22 = vmax.f32 %v1235_v62, 0.0  ;;  %v1381_v27 = vmax.f32 %v1278_v0, 0.0  ;;  %v1966_v50 = vld [vmem:[#allocation7 + $0x1120] sm:$0xff]  ;;  %v12410_v62 = vcombine.high %v2090_v55, %v2094_v56 }
 0x1a8   :  { %v1238_v61 = vpop.f32.mrf.mxu0  ;;  %v1281_v6 = vpop.f32.mrf.mxu1  ;;  %v12282_v60 = vcombine.high %v1962_v49, %v1966_v50  ;;  %v1954_v0 = vld [vmem:[#allocation7 + $0x10c0] sm:$0xff] }
 0x1a9   :  { %7719 = vmatpush2.bf16.msra.mxu0 %v12065_v43  ;;  %v1239_v5 = vadd.f32 %v1238_v61, %v339_v10  ;;  %7762 = vmatpush2.bf16.msra.mxu1 %v12193_v44  ;;  %v1282_v3 = vadd.f32 %v1281_v6, %v347_v42  ;;  %v12426_v10 = vcombine.high %v2106_v24, %v2110_v26  ;;  %v2098_v42 = vld [vmem:[#allocation7 + $0x1540] sm:$0xff] }
 0x1aa   :  { %7720 = vmatprep.subr.bf16.mxu0 %v12058_v47  ;;  %7763 = vmatprep.subr.bf16.mxu1 %v12186_v58  ;;  %v2102_v43 = vld [vmem:[#allocation7 + $0x1560] sm:$0xff]  ;;  %v12289_v58 = vcombine.low %v1970_v39, %v1974_v40  ;;  %v351_v26 = vrot.slane %v14095_v25, %v14090_v9 }
 0x1ab   :  { %v1395_v23 = vmax.f32 %v1239_v5, 0.0  ;;  %v1397_v28 = vmax.f32 %v1282_v3, 0.0  ;;  %v12418_v47 = vcombine.high %v2098_v42, %v2102_v43  ;;  %v12417_v59 = vcombine.low %v2098_v42, %v2102_v43  ;;  %v1958_v61 = vld [vmem:[#allocation7 + $0x10e0] sm:$0xff] }
 0x1ac   :  { %v12409_v5 = vcombine.low %v2090_v55, %v2094_v56  ;;  %v12274_v6 = vcombine.high %v1954_v0, %v1958_v61  ;;  %v2074_v3 = vld [vmem:[#allocation7 + $0x1480] sm:$0xff]  ;;  %v12273_v12 = vcombine.low %v1954_v0, %v1958_v61 }
 0x1ad   :  { %7721 = vmatpush2.bf16.msra.mxu0 %v12057_v1  ;;  %7764 = vmatpush2.bf16.msra.mxu1 %v12185_v2  ;;  %v14121_v41 = vpack.c.bf16 %v1395_v23, %v1379_v22  ;;  %v14124_v44 = vpack.c.bf16 %v1397_v28, %v1381_v27  ;;  %v2082_v1 = vld [vmem:[#allocation7 + $0x14c0] sm:$0xff] }
 0x1ae   :  { %7776 = vmatprep.subr.bf16.mxu0 %v12306_v4  ;;  %7819 = vmatprep.subr.bf16.mxu1 %v12434_v48  ;;  %v2086_v2 = vld [vmem:[#allocation7 + $0x14e0] sm:$0xff]  ;;  %v12281_v4 = vcombine.low %v1962_v49, %v1966_v50 }
 0x1af   :  { %v12402_v7 = vcombine.high %v2082_v1, %v2086_v2  ;;  %v1950_v48 = vld [vmem:[#allocation7 + $0x10a0] sm:$0xff]  ;;  %v12401_v14 = vcombine.low %v2082_v1, %v2086_v2 }
 0x1b0   :  { %7723 = vmatmul.mubr.bf16.vlgmr.msra.gmra.mxu0 %v14117_v15  ;;  %7766 = vmatmul.mubr.bf16.vlgmr.msra.gmra.mxu1 %v14119_v37  ;;  %v2078_v11 = vld [vmem:[#allocation7 + $0x14a0] sm:$0xff]  ;;  %v12266_v21 = vcombine.high %v1946_v8, %v1950_v48 }
 0x1b1   :  { %7777 = vmatpush1.bf16.msra.mxu0 %v12305_v29  ;;  %7820 = vmatpush1.bf16.msra.mxu1 %v12433_v33  ;;  %v12394_v22 = vcombine.high %v2074_v3, %v2078_v11  ;;  %v1938_v23 = vld [vmem:[#allocation7 + $0x1040] sm:$0xff]  ;;  %v359_v29 = vrot.slane %v14095_v25, %v14093_v13  ;;  %v12265_v33 = vcombine.low %v1946_v8, %v1950_v48 }
 0x1b2   :  { %7778 = vmatprep.subr.bf16.mxu0 %v12298_v36  ;;  %7821 = vmatprep.subr.bf16.mxu1 %v12426_v10  ;;  %v1942_v24 = vld [vmem:[#allocation7 + $0x1060] sm:$0xff]  ;;  %v12393_v36 = vcombine.low %v2074_v3, %v2078_v11 }
 0x1b3   :  { %7808 = vmatprep.mubr.bf16.mxu0 %v14121_v41  ;;  %7851 = vmatprep.mubr.bf16.mxu1 %v14124_v44  ;;  %v2066_v27 = vld [vmem:[#allocation7 + $0x1440] sm:$0xff]  ;;  %v12258_v10 = vcombine.high %v1938_v23, %v1942_v24  ;;  %v12257_v55 = vcombine.low %v1938_v23, %v1942_v24 }
 0x1b4   :  { %v2070_v28 = vld [vmem:[#allocation7 + $0x1460] sm:$0xff] }
 0x1b5   :  { %7779 = vmatpush1.bf16.msra.mxu0 %v12297_v45  ;;  %7822 = vmatpush1.bf16.msra.mxu1 %v12425_v19  ;;  %v12386_v40 = vcombine.high %v2066_v27, %v2070_v28  ;;  %v1930_v42 = vld [vmem:[#allocation7 + $0x1000] sm:$0xff] }
 0x1b6   :  { %7780 = vmatprep.subr.bf16.mxu0 %v12290_v46  ;;  %7823 = vmatprep.subr.bf16.mxu1 %v12418_v47  ;;  %v1934_v43 = vld [vmem:[#allocation7 + $0x1020] sm:$0xff] }
 0x1b7   :  { %v2058_v46 = vld [vmem:[#allocation7 + $0x1400] sm:$0xff]  ;;  %v12249_v48 = vcombine.low %v1930_v42, %v1934_v43 }
 0x1b8   :  { %v2062_v47 = vld [vmem:[#allocation7 + $0x1420] sm:$0xff] }
 0x1b9   :  { %7781 = vmatpush1.bf16.msra.mxu0 %v12289_v58  ;;  %7824 = vmatpush1.bf16.msra.mxu1 %v12417_v59  ;;  %v12385_v58 = vcombine.low %v2066_v27, %v2070_v28  ;;  %v12250_v59 = vcombine.high %v1930_v42, %v1934_v43  ;;  %v2050_v0 = vld [vmem:[#allocation7 + $0x13c0] sm:$0xff]  ;;  %v12377_v11 = vcombine.low %v2058_v46, %v2062_v47 }
 0x1ba   :  { %7782 = vmatprep.subr.bf16.mxu0 %v12282_v60  ;;  %7825 = vmatprep.subr.bf16.mxu1 %v12410_v62  ;;  %v12378_v62 = vcombine.high %v2058_v46, %v2062_v47  ;;  %v2054_v61 = vld [vmem:[#allocation7 + $0x13e0] sm:$0xff] }
 0x1bb   :  { %v2046_v23 = vld [vmem:[#allocation7 + $0x13a0] sm:$0xff] }
 0x1bc   :  { %v2174_v27 = vld [vmem:[#allocation7 + $0x17a0] sm:$0xff] }
 0x1bd   :  { %7783 = vmatpush1.bf16.msra.mxu0 %v12281_v4  ;;  %7826 = vmatpush1.bf16.msra.mxu1 %v12409_v5  ;;  %v2178_v5 = vld [vmem:[#allocation7 + $0x17c0] sm:$0xff] }
 0x1be   :  { %7784 = vmatprep.subr.bf16.mxu0 %v12274_v6  ;;  %7827 = vmatprep.subr.bf16.mxu1 %v12402_v7  ;;  %v2182_v6 = vld [vmem:[#allocation7 + $0x17e0] sm:$0xff] }
 0x1bf   :  { %v2162_v42 = vld [vmem:[#allocation7 + $0x1740] sm:$0xff] }
 0x1c0   :  { %v2166_v43 = vld [vmem:[#allocation7 + $0x1760] sm:$0xff] }
 0x1c1   :  { %7785 = vmatpush1.bf16.msra.mxu0 %v12273_v12  ;;  %7828 = vmatpush1.bf16.msra.mxu1 %v12401_v14  ;;  %v12370_v12 = vcombine.high %v2050_v0, %v2054_v61  ;;  %v12482_v47 = vcombine.high %v2162_v42, %v2166_v43 }
 0x1c2   :  { %7786 = vmatprep.subr.bf16.mxu0 %v12266_v21  ;;  %v1318_v39 = vpop.f32.mrf.mxu0  ;;  %7829 = vmatprep.subr.bf16.mxu1 %v12394_v22  ;;  %v1361_v19 = vpop.f32.mrf.mxu1  ;;  %v12498_v21 = vcombine.high %v2178_v5, %v2182_v6  ;;  %v2042_v22 = vld [vmem:[#allocation7 + $0x1380] sm:$0xff] }
 0x1c3   :  { %v1319_v45 = vadd.f32 %v1318_v39, %v351_v26  ;;  %v1362_v50 = vadd.f32 %v1361_v19, %v359_v29  ;;  %v2034_v39 = vld [vmem:[#allocation7 + $0x1340] sm:$0xff] }
 0x1c4   :  { %v14133_v49 = vpop.f32.mrf.mxu0  ;;  %v14135_v56 = vpop.f32.mrf.mxu1 }
 0x1c5   :  { %7787 = vmatpush1.bf16.msra.mxu0 %v12265_v33  ;;  %7830 = vmatpush1.bf16.msra.mxu1 %v12393_v36  ;;  %v1382_v1 = vmax.f32 %v1319_v45, 0.0  ;;  %v1384_v7 = vmax.f32 %v1362_v50, 0.0  ;;  %v12497_v33 = vcombine.low %v2178_v5, %v2182_v6  ;;  %v12362_v36 = vcombine.high %v2042_v22, %v2046_v23  ;;  %v2026_v50 = vld [vmem:[#allocation7 + $0x1300] sm:$0xff] }
 0x1c6   :  { %7788 = vmatprep.subr.bf16.mxu0 %v12258_v10  ;;  %v1322_v60 = vpop.f32.mrf.mxu0  ;;  %7831 = vmatprep.subr.bf16.mxu1 %v12386_v40  ;;  %v1365_v4 = vpop.f32.mrf.mxu1  ;;  %v2038_v40 = vld [vmem:[#allocation7 + $0x1360] sm:$0xff]  ;;  %v12361_v45 = vcombine.low %v2042_v22, %v2046_v23 }
 0x1c7   :  { %v1323_v2 = vadd.f32 %v1322_v60, %v351_v26  ;;  %v1366_v8 = vadd.f32 %v1365_v4, %v359_v29  ;;  %v2170_v26 = vld [vmem:[#allocation7 + $0x1780] sm:$0xff]  ;;  %v12369_v29 = vcombine.low %v2050_v0, %v2054_v61  ;;  %v12354_v46 = vcombine.high %v2034_v39, %v2038_v40 }
 0x1c8   :  { %v12490_v10 = vcombine.high %v2170_v26, %v2174_v27  ;;  %v12489_v19 = vcombine.low %v2170_v26, %v2174_v27  ;;  %v12353_v60 = vcombine.low %v2034_v39, %v2038_v40  ;;  %v2146_v4 = vld [vmem:[#allocation7 + $0x16c0] sm:$0xff]  ;;  %v335_v39 = vrot.slane %v14095_v25, %v14031_v17 }
 0x1c9   :  { %7789 = vmatpush1.bf16.msra.mxu0 %v12257_v55  ;;  %v1398_v3 = vmax.f32 %v1323_v2, 0.0  ;;  %7832 = vmatpush1.bf16.msra.mxu1 %v12385_v58  ;;  %v1400_v14 = vmax.f32 %v1366_v8, 0.0  ;;  %v2030_v55 = vld [vmem:[#allocation7 + $0x1320] sm:$0xff] }
 0x1ca   :  { %7790 = vmatprep.subr.bf16.mxu0 %v12250_v59  ;;  %7833 = vmatprep.subr.bf16.mxu1 %v12378_v62  ;;  %v2154_v58 = vld [vmem:[#allocation7 + $0x1700] sm:$0xff]  ;;  %v12481_v62 = vcombine.low %v2162_v42, %v2166_v43  ;;  %v12346_v0 = vcombine.high %v2026_v50, %v2030_v55  ;;  %v12345_v6 = vcombine.low %v2026_v50, %v2030_v55 }
 0x1cb   :  { %v14137_v24 = vpack.c.bf16 %v1398_v3, %v1382_v1  ;;  %v14139_v28 = vpack.c.bf16 %v1400_v14, %v1384_v7  ;;  %v2158_v59 = vld [vmem:[#allocation7 + $0x1720] sm:$0xff]  ;;  %v355_v55 = vrot.slane %v14095_v25, %v14066_v32  ;;  %v1576_v32 = vld [vmem:[#allocation7 + $0x4f0] sm:$0xff] }
 0x1cc   :  { %v12474_v61 = vcombine.high %v2154_v58, %v2158_v59  ;;  %v2018_v1 = vld [vmem:[#allocation7 + $0x12c0] sm:$0xff]  ;;  %v12473_v7 = vcombine.low %v2154_v58, %v2158_v59  ;;  %v363_v58 = vrot.slane %v14095_v25, %v14069_v35  ;;  %v1324_v59 = vpop.f32.mrf.mxu0 }
 0x1cd   :  { %7791 = vmatpush1.bf16.msra.mxu0 %v12249_v48  ;;  %7834 = vmatpush1.bf16.msra.mxu1 %v12377_v11  ;;  %v2022_v2 = vld [vmem:[#allocation7 + $0x12e0] sm:$0xff] }
 0x1ce   :  { %7792 = vmatprep.subr.bf16.mxu0 %v12370_v12  ;;  %7835 = vmatprep.subr.bf16.mxu1 %v12498_v21  ;;  %v2150_v5 = vld [vmem:[#allocation7 + $0x16e0] sm:$0xff]  ;;  %v12338_v8 = vcombine.high %v2018_v1, %v2022_v2  ;;  %v12337_v21 = vcombine.low %v2018_v1, %v2022_v2  ;;  %v1233_v1 = vadd.f32 %v14099_v31, %v335_v39 }
 0x1cf   :  { %v12466_v48 = vcombine.high %v2146_v4, %v2150_v5  ;;  %v2010_v3 = vld [vmem:[#allocation7 + $0x1280] sm:$0xff]  ;;  %v12465_v22 = vcombine.low %v2146_v4, %v2150_v5  ;;  %v1237_v2 = vadd.f32 %v14111_v52, %v335_v39 }
 0x1d0   :  { %v2014_v11 = vld [vmem:[#allocation7 + $0x12a0] sm:$0xff] }
 0x1d1   :  { %7793 = vmatpush2.bf16.msra.mxu0 %v12369_v29  ;;  %7836 = vmatpush2.bf16.msra.mxu1 %v12497_v33  ;;  %v2138_v12 = vld [vmem:[#allocation7 + $0x1680] sm:$0xff]  ;;  %v12330_v23 = vcombine.high %v2010_v3, %v2014_v11 }
 0x1d2   :  { %7794 = vmatprep.subr.bf16.mxu0 %v12362_v36  ;;  %7837 = vmatprep.subr.bf16.mxu1 %v12490_v10  ;;  %v2142_v14 = vld [vmem:[#allocation7 + $0x16a0] sm:$0xff]  ;;  %v12329_v10 = vcombine.low %v2010_v3, %v2014_v11  ;;  %v1325_v11 = vadd.f32 %v1324_v59, %v355_v55 }
 0x1d3   :  { %v12458_v26 = vcombine.high %v2138_v12, %v2142_v14  ;;  %v2002_v27 = vld [vmem:[#allocation7 + $0x1240] sm:$0xff]  ;;  %v12457_v40 = vcombine.low %v2138_v12, %v2142_v14  ;;  %v1364_v12 = vadd.f32 %v14135_v56, %v363_v58 }
 0x1d4   :  { %v2006_v29 = vld [vmem:[#allocation7 + $0x1260] sm:$0xff] }
 0x1d5   :  { %7795 = vmatpush2.bf16.msra.mxu0 %v12361_v45  ;;  %7838 = vmatpush2.bf16.msra.mxu1 %v12489_v19  ;;  %v2130_v33 = vld [vmem:[#allocation7 + $0x1640] sm:$0xff]  ;;  %v12322_v42 = vcombine.high %v2002_v27, %v2006_v29  ;;  %v343_v19 = vrot.slane %v14095_v25, %v14039_v20  ;;  %v1321_v25 = vadd.f32 %v14133_v49, %v355_v55 }
 0x1d6   :  { %7796 = vmatprep.subr.bf16.mxu0 %v12354_v46  ;;  %7839 = vmatprep.subr.bf16.mxu1 %v12482_v47  ;;  %v2134_v36 = vld [vmem:[#allocation7 + $0x1660] sm:$0xff] }
 0x1d7   :  { %v1994_v43 = vld [vmem:[#allocation7 + $0x1200] sm:$0xff]  ;;  %v12450_v46 = vcombine.high %v2130_v33, %v2134_v36  ;;  %v1383_v49 = vmax.f32 %v1321_v25, 0.0 }
 0x1d8   :  { %v1998_v45 = vld [vmem:[#allocation7 + $0x1220] sm:$0xff] }
 0x1d9   :  { %7797 = vmatpush2.bf16.msra.mxu0 %v12353_v60  ;;  %7840 = vmatpush2.bf16.msra.mxu1 %v12481_v62  ;;  %v2122_v47 = vld [vmem:[#allocation7 + $0x1600] sm:$0xff]  ;;  %v12321_v60 = vcombine.low %v2002_v27, %v2006_v29  ;;  %v12449_v62 = vcombine.low %v2130_v33, %v2134_v36  ;;  %v12313_v52 = vcombine.low %v1994_v43, %v1998_v45  ;;  %v1399_v27 = vmax.f32 %v1325_v11, 0.0 }
 0x1da   :  { %7798 = vmatprep.subr.bf16.mxu0 %v12346_v0  ;;  %7841 = vmatprep.subr.bf16.mxu1 %v12474_v61  ;;  %v2126_v50 = vld [vmem:[#allocation7 + $0x1620] sm:$0xff]  ;;  %v12314_v0 = vcombine.high %v1994_v43, %v1998_v45  ;;  %v1367_v61 = vpop.f32.mrf.mxu1  ;;  %v1385_v36 = vmax.f32 %v1364_v12, 0.0 }
 0x1db   :  { %v12442_v4 = vcombine.high %v2122_v47, %v2126_v50  ;;  %v2242_v5 = vld [vmem:[#allocation7 + $0x19c0] sm:$0xff]  ;;  %v1368_v31 = vadd.f32 %v1367_v61, %v363_v58  ;;  %v12441_v14 = vcombine.low %v2122_v47, %v2126_v50 }
 0x1dc   :  { %v2374_v3 = vld [vmem:[#allocation7 + $0x1de0] sm:$0xff] }
 0x1dd   :  { %7799 = vmatpush2.bf16.msra.mxu0 %v12345_v6  ;;  %7842 = vmatpush2.bf16.msra.mxu1 %v12473_v7  ;;  %v1276_v6 = vadd.f32 %v14105_v38, %v343_v19  ;;  %v1280_v7 = vadd.f32 %v14115_v63, %v343_v19  ;;  %v2234_v29 = vld [vmem:[#allocation7 + $0x1980] sm:$0xff] }
 0x1de   :  { %7800 = vmatprep.subr.bf16.mxu0 %v12338_v8  ;;  %7843 = vmatprep.subr.bf16.mxu1 %v12466_v48  ;;  %v2246_v8 = vld [vmem:[#allocation7 + $0x19e0] sm:$0xff] }
 0x1df   :  { %v2370_v48 = vld [vmem:[#allocation7 + $0x1dc0] sm:$0xff]  ;;  %v12562_v38 = vcombine.high %v2242_v5, %v2246_v8  ;;  %v1380_v63 = vmax.f32 %v1276_v6, 0.0 }
 0x1e0   :  { %v2238_v33 = vld [vmem:[#allocation7 + $0x19a0] sm:$0xff]  ;;  %v12689_v43 = vcombine.low %v2370_v48, %v2374_v3 }
 0x1e1   :  { %7801 = vmatpush2.bf16.msra.mxu0 %v12337_v21  ;;  %7844 = vmatpush2.bf16.msra.mxu1 %v12465_v22  ;;  %v1378_v21 = vmax.f32 %v1233_v1, 0.0  ;;  %v1394_v22 = vmax.f32 %v1237_v2, 0.0  ;;  %v2362_v56 = vld [vmem:[#allocation7 + $0x1d80] sm:$0xff]  ;;  %v12554_v45 = vcombine.high %v2234_v29, %v2238_v33 }
 0x1e2   :  { %7802 = vmatprep.subr.bf16.mxu0 %v12330_v23  ;;  %7845 = vmatprep.subr.bf16.mxu1 %v12458_v26  ;;  %v12690_v23 = vcombine.high %v2370_v48, %v2374_v3  ;;  %v1396_v26 = vmax.f32 %v1280_v7, 0.0  ;;  %v2366_v39 = vld [vmem:[#allocation7 + $0x1da0] sm:$0xff] }
 0x1e3   :  { %v12682_v47 = vcombine.high %v2362_v56, %v2366_v39  ;;  %v2226_v50 = vld [vmem:[#allocation7 + $0x1940] sm:$0xff] }
 0x1e4   :  { %v14157_v19 = vpack.c.bf16 %v1396_v26, %v1380_v63  ;;  %v2230_v55 = vld [vmem:[#allocation7 + $0x1960] sm:$0xff] }
 0x1e5   :  { %7803 = vmatpush2.bf16.msra.mxu0 %v12329_v10  ;;  %7846 = vmatpush2.bf16.msra.mxu1 %v12457_v40  ;;  %v1401_v10 = vmax.f32 %v1368_v31, 0.0  ;;  %v12561_v40 = vcombine.low %v2242_v5, %v2246_v8  ;;  %v2354_v59 = vld [vmem:[#allocation7 + $0x1d40] sm:$0xff]  ;;  %v12546_v61 = vcombine.high %v2226_v50, %v2230_v55  ;;  %v12545_v7 = vcombine.low %v2226_v50, %v2230_v55 }
 0x1e6   :  { %7804 = vmatprep.subr.bf16.mxu0 %v12322_v42  ;;  %7847 = vmatprep.subr.bf16.mxu1 %v12450_v46  ;;  %v14155_v42 = vpack.c.bf16 %v1394_v22, %v1378_v21  ;;  %v14159_v46 = vpack.c.bf16 %v1399_v27, %v1383_v49  ;;  %v2218_v2 = vld [vmem:[#allocation7 + $0x1900] sm:$0xff] }
 0x1e7   :  { %v14162_v58 = vpack.c.bf16 %v1401_v10, %v1385_v36  ;;  %v2346_v5 = vld [vmem:[#allocation7 + $0x1d00] sm:$0xff] }
 0x1e8   :  { %v2350_v6 = vld [vmem:[#allocation7 + $0x1d20] sm:$0xff] }
 0x1e9   :  { %7805 = vmatpush2.bf16.msra.mxu0 %v12321_v60  ;;  %7848 = vmatpush2.bf16.msra.mxu1 %v12449_v62  ;;  %v2358_v60 = vld [vmem:[#allocation7 + $0x1d60] sm:$0xff]  ;;  %v12553_v62 = vcombine.low %v2234_v29, %v2238_v33  ;;  %v12666_v48 = vcombine.high %v2346_v5, %v2350_v6 }
 0x1ea   :  { %7806 = vmatprep.subr.bf16.mxu0 %v12314_v0  ;;  %7849 = vmatprep.subr.bf16.mxu1 %v12442_v4  ;;  %v12681_v0 = vcombine.low %v2362_v56, %v2366_v39  ;;  %v12674_v1 = vcombine.high %v2354_v59, %v2358_v60  ;;  %v2222_v4 = vld [vmem:[#allocation7 + $0x1920] sm:$0xff]  ;;  %v12673_v25 = vcombine.low %v2354_v59, %v2358_v60 }
 0x1eb   :  { %v12538_v8 = vcombine.high %v2218_v2, %v2222_v4  ;;  %v2210_v3 = vld [vmem:[#allocation7 + $0x18c0] sm:$0xff] }
 0x1ec   :  { %v2214_v11 = vld [vmem:[#allocation7 + $0x18e0] sm:$0xff] }
 0x1ed   :  { %7807 = vmatpush2.bf16.msra.mxu0 %v12313_v52  ;;  %7850 = vmatpush2.bf16.msra.mxu1 %v12441_v14  ;;  %v2338_v12 = vld [vmem:[#allocation7 + $0x1cc0] sm:$0xff]  ;;  %v12537_v52 = vcombine.low %v2218_v2, %v2222_v4  ;;  %v12665_v14 = vcombine.low %v2346_v5, %v2350_v6  ;;  %v12530_v21 = vcombine.high %v2210_v3, %v2214_v11 }
 0x1ee   :  { %7862 = vmatprep.subr.bf16.mxu0 %v12562_v38  ;;  %7905 = vmatprep.subr.bf16.mxu1 %v12690_v23  ;;  %v2342_v31 = vld [vmem:[#allocation7 + $0x1ce0] sm:$0xff]  ;;  %v12529_v49 = vcombine.low %v2210_v3, %v2214_v11 }
 0x1ef   :  { %v12658_v22 = vcombine.high %v2338_v12, %v2342_v31  ;;  %v2202_v38 = vld [vmem:[#allocation7 + $0x1880] sm:$0xff]  ;;  %v12657_v27 = vcombine.low %v2338_v12, %v2342_v31 }
 0x1f0   :  { %7809 = vmatmul.mubr.bf16.vlgmr.msra.gmra.mxu0 %v14155_v42  ;;  %7852 = vmatmul.mubr.bf16.vlgmr.msra.gmra.mxu1 %v14157_v19  ;;  %v2206_v23 = vld [vmem:[#allocation7 + $0x18a0] sm:$0xff] }
 0x1f1   :  { %7863 = vmatpush1.bf16.msra.mxu0 %v12561_v40  ;;  %7906 = vmatpush1.bf16.msra.mxu1 %v12689_v43  ;;  %v2330_v63 = vld [vmem:[#allocation7 + $0x1c80] sm:$0xff]  ;;  %v12522_v29 = vcombine.high %v2202_v38, %v2206_v23  ;;  %v12521_v40 = vcombine.low %v2202_v38, %v2206_v23 }
 0x1f2   :  { %7864 = vmatprep.subr.bf16.mxu0 %v12554_v45  ;;  %7907 = vmatprep.subr.bf16.mxu1 %v12682_v47  ;;  %v2334_v26 = vld [vmem:[#allocation7 + $0x1ca0] sm:$0xff] }
 0x1f3   :  { %7894 = vmatprep.mubr.bf16.mxu0 %v14159_v46  ;;  %7937 = vmatprep.mubr.bf16.mxu1 %v14162_v58  ;;  %v12650_v33 = vcombine.high %v2330_v63, %v2334_v26  ;;  %v2194_v36 = vld [vmem:[#allocation7 + $0x1840] sm:$0xff]  ;;  %v12649_v43 = vcombine.low %v2330_v63, %v2334_v26 }
 0x1f4   :  { %v2198_v10 = vld [vmem:[#allocation7 + $0x1860] sm:$0xff] }
 0x1f5   :  { %7865 = vmatpush1.bf16.msra.mxu0 %v12553_v62  ;;  %7908 = vmatpush1.bf16.msra.mxu1 %v12681_v0  ;;  %v2322_v56 = vld [vmem:[#allocation7 + $0x1c40] sm:$0xff]  ;;  %v12514_v45 = vcombine.high %v2194_v36, %v2198_v10  ;;  %v12513_v62 = vcombine.low %v2194_v36, %v2198_v10 }
 0x1f6   :  { %7866 = vmatprep.subr.bf16.mxu0 %v12546_v61  ;;  %7909 = vmatprep.subr.bf16.mxu1 %v12674_v1  ;;  %v2326_v39 = vld [vmem:[#allocation7 + $0x1c60] sm:$0xff] }
 0x1f7   :  { %v12642_v47 = vcombine.high %v2322_v56, %v2326_v39  ;;  %v2186_v50 = vld [vmem:[#allocation7 + $0x1800] sm:$0xff]  ;;  %v12641_v0 = vcombine.low %v2322_v56, %v2326_v39 }
 0x1f8   :  { %v2190_v55 = vld [vmem:[#allocation7 + $0x1820] sm:$0xff] }
 0x1f9   :  { %7867 = vmatpush1.bf16.msra.mxu0 %v12545_v7  ;;  %7910 = vmatpush1.bf16.msra.mxu1 %v12673_v25  ;;  %v2314_v59 = vld [vmem:[#allocation7 + $0x1c00] sm:$0xff]  ;;  %v12506_v61 = vcombine.high %v2186_v50, %v2190_v55  ;;  %v12505_v7 = vcombine.low %v2186_v50, %v2190_v55 }
 0x1fa   :  { %7868 = vmatprep.subr.bf16.mxu0 %v12538_v8  ;;  %7911 = vmatprep.subr.bf16.mxu1 %v12666_v48  ;;  %v2318_v60 = vld [vmem:[#allocation7 + $0x1c20] sm:$0xff] }
 0x1fb   :  { %v12634_v1 = vcombine.high %v2314_v59, %v2318_v60  ;;  %v2306_v2 = vld [vmem:[#allocation7 + $0x1bc0] sm:$0xff]  ;;  %v12633_v25 = vcombine.low %v2314_v59, %v2318_v60 }
 0x1fc   :  { %v2310_v4 = vld [vmem:[#allocation7 + $0x1be0] sm:$0xff] }
 0x1fd   :  { %7869 = vmatpush1.bf16.msra.mxu0 %v12537_v52  ;;  %7912 = vmatpush1.bf16.msra.mxu1 %v12665_v14  ;;  %v2434_v5 = vld [vmem:[#allocation7 + $0x1fc0] sm:$0xff]  ;;  %v12626_v8 = vcombine.high %v2306_v2, %v2310_v4  ;;  %v12625_v52 = vcombine.low %v2306_v2, %v2310_v4 }
 0x1fe   :  { %7870 = vmatprep.subr.bf16.mxu0 %v12530_v21  ;;  %7913 = vmatprep.subr.bf16.mxu1 %v12658_v22  ;;  %v2438_v6 = vld [vmem:[#allocation7 + $0x1fe0] sm:$0xff] }
 0x1ff   :  { %v12754_v48 = vcombine.high %v2434_v5, %v2438_v6  ;;  %v2298_v3 = vld [vmem:[#allocation7 + $0x1b80] sm:$0xff]  ;;  %v12753_v14 = vcombine.low %v2434_v5, %v2438_v6 }
 0x200   :  { %v2302_v11 = vld [vmem:[#allocation7 + $0x1ba0] sm:$0xff] }
 0x201   :  { %7871 = vmatpush1.bf16.msra.mxu0 %v12529_v49  ;;  %7914 = vmatpush1.bf16.msra.mxu1 %v12657_v27  ;;  %v2426_v12 = vld [vmem:[#allocation7 + $0x1f80] sm:$0xff]  ;;  %v12618_v21 = vcombine.high %v2298_v3, %v2302_v11  ;;  %v12617_v49 = vcombine.low %v2298_v3, %v2302_v11 }
 0x202   :  { %7872 = vmatprep.subr.bf16.mxu0 %v12522_v29  ;;  %7915 = vmatprep.subr.bf16.mxu1 %v12650_v33  ;;  %v2430_v31 = vld [vmem:[#allocation7 + $0x1fa0] sm:$0xff] }
 0x203   :  { %v12746_v22 = vcombine.high %v2426_v12, %v2430_v31  ;;  %v2290_v38 = vld [vmem:[#allocation7 + $0x1b40] sm:$0xff]  ;;  %v12745_v27 = vcombine.low %v2426_v12, %v2430_v31 }
 0x204   :  { %v2294_v23 = vld [vmem:[#allocation7 + $0x1b60] sm:$0xff] }
 0x205   :  { %7873 = vmatpush1.bf16.msra.mxu0 %v12521_v40  ;;  %7916 = vmatpush1.bf16.msra.mxu1 %v12649_v43  ;;  %v2418_v63 = vld [vmem:[#allocation7 + $0x1f40] sm:$0xff]  ;;  %v12610_v29 = vcombine.high %v2290_v38, %v2294_v23  ;;  %v12609_v40 = vcombine.low %v2290_v38, %v2294_v23 }
 0x206   :  { %7874 = vmatprep.subr.bf16.mxu0 %v12514_v45  ;;  %7917 = vmatprep.subr.bf16.mxu1 %v12642_v47  ;;  %v2422_v26 = vld [vmem:[#allocation7 + $0x1f60] sm:$0xff] }
 0x207   :  { %v12738_v33 = vcombine.high %v2418_v63, %v2422_v26  ;;  %v2282_v36 = vld [vmem:[#allocation7 + $0x1b00] sm:$0xff]  ;;  %v12737_v43 = vcombine.low %v2418_v63, %v2422_v26 }
 0x208   :  { %v2286_v10 = vld [vmem:[#allocation7 + $0x1b20] sm:$0xff] }
 0x209   :  { %7875 = vmatpush1.bf16.msra.mxu0 %v12513_v62  ;;  %7918 = vmatpush1.bf16.msra.mxu1 %v12641_v0  ;;  %v2410_v56 = vld [vmem:[#allocation7 + $0x1f00] sm:$0xff]  ;;  %v12602_v45 = vcombine.high %v2282_v36, %v2286_v10  ;;  %v12601_v62 = vcombine.low %v2282_v36, %v2286_v10  ;;  %v1475_v36 = vld [vmem:[#allocation7 + $0x1c8] sm:$0xff] }
 0x20a   :  { %7876 = vmatprep.subr.bf16.mxu0 %v12506_v61  ;;  %7919 = vmatprep.subr.bf16.mxu1 %v12634_v1  ;;  %v2414_v39 = vld [vmem:[#allocation7 + $0x1f20] sm:$0xff]  ;;  %v1479_v10 = vld [vmem:[#allocation7 + $0x1e8] sm:$0xff] }
 0x20b   :  { %v12730_v47 = vcombine.high %v2410_v56, %v2414_v39  ;;  %v2274_v50 = vld [vmem:[#allocation7 + $0x1ac0] sm:$0xff]  ;;  %v12729_v0 = vcombine.low %v2410_v56, %v2414_v39  ;;  %v1603_v56 = vld [vmem:[#allocation7 + $0x5c8] sm:$0xff] }
 0x20c   :  { %v2278_v55 = vld [vmem:[#allocation7 + $0x1ae0] sm:$0xff]  ;;  %v1607_v39 = vld [vmem:[#allocation7 + $0x5e8] sm:$0xff] }
 0x20d   :  { %7877 = vmatpush1.bf16.msra.mxu0 %v12505_v7  ;;  %7920 = vmatpush1.bf16.msra.mxu1 %v12633_v25  ;;  %v2402_v59 = vld [vmem:[#allocation7 + $0x1ec0] sm:$0xff]  ;;  %v12594_v61 = vcombine.high %v2274_v50, %v2278_v55  ;;  %v12593_v7 = vcombine.low %v2274_v50, %v2278_v55  ;;  %v11924_v50 = vcombine.high %v1603_v56, %v1607_v39  ;;  %v1467_v55 = vld [vmem:[#allocation7 + $0x188] sm:$0xff] }
 0x20e   :  { %7878 = vmatprep.subr.bf16.mxu0 %v12626_v8  ;;  %7921 = vmatprep.subr.bf16.mxu1 %v12754_v48  ;;  %v2406_v60 = vld [vmem:[#allocation7 + $0x1ee0] sm:$0xff] }
 0x20f   :  { %v12722_v1 = vcombine.high %v2402_v59, %v2406_v60  ;;  %v2266_v2 = vld [vmem:[#allocation7 + $0x1a80] sm:$0xff]  ;;  %v12721_v25 = vcombine.low %v2402_v59, %v2406_v60  ;;  %v1471_v59 = vld [vmem:[#allocation7 + $0x1a8] sm:$0xff]  ;;  %v11795_v60 = vcombine.low %v1475_v36, %v1479_v10 }
 0x210   :  { %v2270_v4 = vld [vmem:[#allocation7 + $0x1aa0] sm:$0xff] }
 0x211   :  { %7879 = vmatpush2.bf16.msra.mxu0 %v12625_v52  ;;  %7922 = vmatpush2.bf16.msra.mxu1 %v12753_v14  ;;  %v2394_v5 = vld [vmem:[#allocation7 + $0x1e80] sm:$0xff]  ;;  %v12586_v8 = vcombine.high %v2266_v2, %v2270_v4  ;;  %v12585_v52 = vcombine.low %v2266_v2, %v2270_v4  ;;  %v11788_v2 = vcombine.high %v1467_v55, %v1471_v59  ;;  %v1459_v4 = vld [vmem:[#allocation7 + $0x148] sm:$0xff] }
 0x212   :  { %7880 = vmatprep.subr.bf16.mxu0 %v12618_v21  ;;  %7923 = vmatprep.subr.bf16.mxu1 %v12746_v22  ;;  %v2398_v6 = vld [vmem:[#allocation7 + $0x1ea0] sm:$0xff] }
 0x213   :  { %v12714_v48 = vcombine.high %v2394_v5, %v2398_v6  ;;  %v2258_v3 = vld [vmem:[#allocation7 + $0x1a40] sm:$0xff]  ;;  %v12713_v14 = vcombine.low %v2394_v5, %v2398_v6  ;;  %v1463_v5 = vld [vmem:[#allocation7 + $0x168] sm:$0xff] }
 0x214   :  { %v2262_v11 = vld [vmem:[#allocation7 + $0x1a60] sm:$0xff] }
 0x215   :  { %7881 = vmatpush2.bf16.msra.mxu0 %v12617_v49  ;;  %7924 = vmatpush2.bf16.msra.mxu1 %v12745_v27  ;;  %v2386_v12 = vld [vmem:[#allocation7 + $0x1e40] sm:$0xff]  ;;  %v12578_v21 = vcombine.high %v2258_v3, %v2262_v11  ;;  %v12577_v49 = vcombine.low %v2258_v3, %v2262_v11  ;;  %v11787_v11 = vcombine.low %v1467_v55, %v1471_v59 }
 0x216   :  { %7882 = vmatprep.subr.bf16.mxu0 %v12610_v29  ;;  %7925 = vmatprep.subr.bf16.mxu1 %v12738_v33  ;;  %v2390_v31 = vld [vmem:[#allocation7 + $0x1e60] sm:$0xff] }
 0x217   :  { %v12706_v22 = vcombine.high %v2386_v12, %v2390_v31  ;;  %v2250_v38 = vld [vmem:[#allocation7 + $0x1a00] sm:$0xff]  ;;  %v12705_v27 = vcombine.low %v2386_v12, %v2390_v31 }
 0x218   :  { %v2254_v23 = vld [vmem:[#allocation7 + $0x1a20] sm:$0xff] }
 0x219   :  { %7883 = vmatpush2.bf16.msra.mxu0 %v12609_v40  ;;  %7926 = vmatpush2.bf16.msra.mxu1 %v12737_v43  ;;  %v2378_v63 = vld [vmem:[#allocation7 + $0x1e00] sm:$0xff]  ;;  %v12570_v29 = vcombine.high %v2250_v38, %v2254_v23  ;;  %v12569_v40 = vcombine.low %v2250_v38, %v2254_v23  ;;  %v1451_v38 = vld [vmem:[#allocation7 + $0x108] sm:$0xff] }
 0x21a   :  { %7884 = vmatprep.subr.bf16.mxu0 %v12602_v45  ;;  %7927 = vmatprep.subr.bf16.mxu1 %v12730_v47  ;;  %v2382_v26 = vld [vmem:[#allocation7 + $0x1e20] sm:$0xff]  ;;  %v11796_v45 = vcombine.high %v1475_v36, %v1479_v10  ;;  %v1455_v23 = vld [vmem:[#allocation7 + $0x128] sm:$0xff] }
 0x21b   :  { %v12698_v33 = vcombine.high %v2378_v63, %v2382_v26  ;;  %v12697_v43 = vcombine.low %v2378_v63, %v2382_v26  ;;  %v2442_v47 = vld [vmem:[#allocation8] sm:$0xff]  ;;  %v1579_v26 = vld [vmem:[#allocation7 + $0x508] sm:$0xff]  ;;  %v11772_v10 = vcombine.high %v1451_v38, %v1455_v23 }
 0x21d   :  { %7885 = vmatpush2.bf16.msra.mxu0 %v12601_v62  ;;  %7928 = vmatpush2.bf16.msra.mxu1 %v12729_v0  ;;  %v2447_v62 = vrot.slane %v2442_v47, %v14031_v17  ;;  %v1595_v0 = vld [vmem:[#allocation7 + $0x588] sm:$0xff] }
 0x21e   :  { %7886 = vmatprep.subr.bf16.mxu0 %v12594_v61  ;;  %7929 = vmatprep.subr.bf16.mxu1 %v12722_v1  ;;  %v1599_v61 = vld [vmem:[#allocation7 + $0x5a8] sm:$0xff]  ;;  %v11923_v1 = vcombine.low %v1603_v56, %v1607_v39 }
 0x21f   :  { %v11915_v31 = vcombine.low %v1595_v0, %v1599_v61  ;;  %v1575_v47 = vld [vmem:[#allocation7 + $0x4e8] sm:$0xff] }
 0x220   :  { %v2343_v17 = vld [vmem:[#allocation7 + $0x1ce8] sm:$0xff] }
 0x221   :  { %7887 = vmatpush2.bf16.msra.mxu0 %v12593_v7  ;;  %7930 = vmatpush2.bf16.msra.mxu1 %v12721_v25  ;;  %v11916_v7 = vcombine.high %v1595_v0, %v1599_v61  ;;  %v1587_v25 = vld [vmem:[#allocation7 + $0x548] sm:$0xff] }
 0x222   :  { %7888 = vmatprep.subr.bf16.mxu0 %v12586_v8  ;;  %7931 = vmatprep.subr.bf16.mxu1 %v12714_v48  ;;  %v1591_v8 = vld [vmem:[#allocation7 + $0x568] sm:$0xff] }
 0x223   :  { %v11907_v36 = vcombine.low %v1587_v25, %v1591_v8  ;;  %v1439_v0 = vld [vmem:[#allocation7 + $0xa8] sm:$0xff] }
 0x224   :  { %v1563_v61 = vld [vmem:[#allocation7 + $0x488] sm:$0xff] }
 0x225   :  { %7889 = vmatpush2.bf16.msra.mxu0 %v12585_v52  ;;  %7932 = vmatpush2.bf16.msra.mxu1 %v12713_v14  ;;  %v11780_v52 = vcombine.high %v1459_v4, %v1463_v5 }
 0x226   :  { %7890 = vmatprep.subr.bf16.mxu0 %v12578_v21  ;;  %7933 = vmatprep.subr.bf16.mxu1 %v12706_v22  ;;  %v11908_v22 = vcombine.high %v1587_v25, %v1591_v8  ;;  %v1431_v25 = vld [vmem:[#allocation7 + $0x68] sm:$0xff] }
 0x227   :  { %v1555_v8 = vld [vmem:[#allocation7 + $0x448] sm:$0xff] }
 0x229   :  { %7891 = vmatpush2.bf16.msra.mxu0 %v12577_v49  ;;  %7934 = vmatpush2.bf16.msra.mxu1 %v12705_v27  ;;  %v1583_v49 = vld [vmem:[#allocation7 + $0x528] sm:$0xff] }
 0x22a   :  { %7892 = vmatprep.subr.bf16.mxu0 %v12570_v29  ;;  %7935 = vmatprep.subr.bf16.mxu1 %v12698_v33  ;;  %v11779_v29 = vcombine.low %v1459_v4, %v1463_v5  ;;  %v11900_v39 = vcombine.high %v1579_v26, %v1583_v49  ;;  %v11899_v55 = vcombine.low %v1579_v26, %v1583_v49 }
 0x22d   :  { %7893 = vmatpush2.bf16.msra.mxu0 %v12569_v40  ;;  %7936 = vmatpush2.bf16.msra.mxu1 %v12697_v43  ;;  %v1443_v40 = vld [vmem:[#allocation7 + $0xc8] sm:$0xff] }
 0x22e   :  { %7948 = vmatprep.subr.bf16.mxu0 %v11796_v45  ;;  %7991 = vmatprep.subr.bf16.mxu1 %v11924_v50  ;;  %v1447_v43 = vld [vmem:[#allocation7 + $0xe8] sm:$0xff]  ;;  %v11771_v50 = vcombine.low %v1451_v38, %v1455_v23 }
 0x22f   :  { %v1571_v45 = vld [vmem:[#allocation7 + $0x4c8] sm:$0xff]  ;;  %v11764_v59 = vcombine.high %v1443_v40, %v1447_v43 }
 0x230   :  { %7895 = vmatmul.mubr.bf16.vlgmr.msra.gmra.mxu0 %v14137_v24  ;;  %v7638_v6 = vpop.f32.mrf.mxu0  ;;  %7938 = vmatmul.mubr.bf16.vlgmr.msra.gmra.mxu1 %v14139_v28  ;;  %v7681_v3 = vpop.f32.mrf.mxu1  ;;  %v11891_v4 = vcombine.low %v1571_v45, %v1575_v47  ;;  %v1423_v38 = vld [vmem:[#allocation7 + $0x28] sm:$0xff] }
 0x231   :  { %v7639_v48 = vadd.f32 %v7638_v6, %v2447_v62  ;;  %7949 = vmatpush1.bf16.msra.mxu0 %v11795_v60  ;;  %7980 = vmatprep.mubr.bf16.mxu0 %v14049_v51  ;;  %v11892_v60 = vcombine.high %v1571_v45, %v1575_v47  ;;  %v1547_v23 = vld [vmem:[#allocation7 + $0x408] sm:$0xff] }
 0x232   :  { %7992 = vmatpush1.bf16.msra.mxu1 %v11923_v1  ;;  %v14171_v12 = vpop.f32.mrf.mxu0  ;;  %8023 = vmatprep.mubr.bf16.mxu1 %v14055_v54  ;;  %v14176_v21 = vpop.f32.mrf.mxu1  ;;  %v1567_v1 = vld [vmem:[#allocation7 + $0x4a8] sm:$0xff] }
 0x233   :  { %v14173_v14 = vadd.f32 %v7681_v3, %v7639_v48  ;;  %7950 = vmatprep.subr.bf16.mxu0 %v11788_v2  ;;  %7993 = vmatprep.subr.bf16.mxu1 %v11916_v7  ;;  %v11763_v2 = vcombine.low %v1443_v40, %v1447_v43  ;;  %v11884_v6 = vcombine.high %v1563_v61, %v1567_v1  ;;  %v1427_v7 = vld [vmem:[#allocation7 + $0x48] sm:$0xff] }
 0x234   :  { %v7642_v63 = vpop.f32.mrf.mxu0  ;;  %v7685_v33 = vpop.f32.mrf.mxu1  ;;  %v1559_v48 = vld [vmem:[#allocation7 + $0x468] sm:$0xff]  ;;  %v11747_v26 = vcombine.low %v1427_v7, %v1431_v25 }
 0x235   :  { %v7643_v27 = vadd.f32 %v7642_v63, %v2447_v62  ;;  %7951 = vmatpush1.bf16.msra.mxu0 %v11787_v11  ;;  %v1435_v62 = vld [vmem:[#allocation7 + $0x88] sm:$0xff]  ;;  %v11883_v11 = vcombine.low %v1563_v61, %v1567_v1  ;;  %v11875_v49 = vcombine.low %v1555_v8, %v1559_v48 }
 0x236   :  { %7994 = vmatpush1.bf16.msra.mxu1 %v11915_v31  ;;  %7952 = vmatprep.subr.bf16.mxu0 %v11780_v52  ;;  %v11756_v5 = vcombine.high %v1435_v62, %v1439_v0  ;;  %v11755_v3 = vcombine.low %v1435_v62, %v1439_v0  ;;  %v11748_v31 = vcombine.high %v1427_v7, %v1431_v25  ;;  %v1551_v63 = vld [vmem:[#allocation7 + $0x428] sm:$0xff] }
 0x237   :  { %v14178_v56 = vadd.f32 %v7685_v33, %v7643_v27  ;;  %7995 = vmatprep.subr.bf16.mxu1 %v11908_v22  ;;  %v11876_v52 = vcombine.high %v1555_v8, %v1559_v48  ;;  %v1419_v22 = vld [vmem:[#allocation7 + $0x8] sm:$0xff]  ;;  %v11867_v43 = vcombine.low %v1547_v23, %v1551_v63 }
 0x238   :  { %v11740_v27 = vcombine.high %v1419_v22, %v1423_v38  ;;  %v1539_v33 = vld [vmem:[#allocation7 + $0x3c8] sm:$0xff]  ;;  %v11739_v40 = vcombine.low %v1419_v22, %v1423_v38 }
 0x239   :  { %7953 = vmatpush1.bf16.msra.mxu0 %v11779_v29  ;;  %v11868_v29 = vcombine.high %v1547_v23, %v1551_v63 }
 0x23a   :  { %7996 = vmatpush1.bf16.msra.mxu1 %v11907_v36  ;;  %7954 = vmatprep.subr.bf16.mxu0 %v11772_v10  ;;  %v1543_v36 = vld [vmem:[#allocation7 + $0x3e8] sm:$0xff] }
 0x23b   :  { %7997 = vmatprep.subr.bf16.mxu1 %v11900_v39  ;;  %v1667_v10 = vld [vmem:[#allocation7 + $0x7c8] sm:$0xff]  ;;  %v11860_v45 = vcombine.high %v1539_v33, %v1543_v36  ;;  %v11859_v62 = vcombine.low %v1539_v33, %v1543_v36 }
 0x23c   :  { %v1671_v39 = vld [vmem:[#allocation7 + $0x7e8] sm:$0xff] }
 0x23d   :  { %7955 = vmatpush1.bf16.msra.mxu0 %v11771_v50  ;;  %v11988_v47 = vcombine.high %v1667_v10, %v1671_v39  ;;  %v1531_v50 = vld [vmem:[#allocation7 + $0x388] sm:$0xff]  ;;  %v11987_v0 = vcombine.low %v1667_v10, %v1671_v39 }
 0x23e   :  { %7998 = vmatpush1.bf16.msra.mxu1 %v11899_v55  ;;  %7956 = vmatprep.subr.bf16.mxu0 %v11764_v59  ;;  %v1535_v55 = vld [vmem:[#allocation7 + $0x3a8] sm:$0xff] }
 0x23f   :  { %7999 = vmatprep.subr.bf16.mxu1 %v11892_v60  ;;  %v1659_v59 = vld [vmem:[#allocation7 + $0x788] sm:$0xff]  ;;  %v11852_v61 = vcombine.high %v1531_v50, %v1535_v55  ;;  %v11851_v7 = vcombine.low %v1531_v50, %v1535_v55 }
 0x240   :  { %v1663_v60 = vld [vmem:[#allocation7 + $0x7a8] sm:$0xff] }
 0x241   :  { %7957 = vmatpush1.bf16.msra.mxu0 %v11763_v2  ;;  %v11980_v1 = vcombine.high %v1659_v59, %v1663_v60  ;;  %v1523_v2 = vld [vmem:[#allocation7 + $0x348] sm:$0xff]  ;;  %v11979_v25 = vcombine.low %v1659_v59, %v1663_v60 }
 0x242   :  { %8000 = vmatpush1.bf16.msra.mxu1 %v11891_v4  ;;  %7958 = vmatprep.subr.bf16.mxu0 %v11756_v5  ;;  %v1527_v4 = vld [vmem:[#allocation7 + $0x368] sm:$0xff] }
 0x243   :  { %8001 = vmatprep.subr.bf16.mxu1 %v11884_v6  ;;  %v1651_v5 = vld [vmem:[#allocation7 + $0x748] sm:$0xff]  ;;  %v11844_v8 = vcombine.high %v1523_v2, %v1527_v4  ;;  %v11843_v22 = vcombine.low %v1523_v2, %v1527_v4 }
 0x244   :  { %v1655_v6 = vld [vmem:[#allocation7 + $0x768] sm:$0xff] }
 0x245   :  { %7959 = vmatpush1.bf16.msra.mxu0 %v11755_v3  ;;  %v11972_v48 = vcombine.high %v1651_v5, %v1655_v6  ;;  %v1515_v3 = vld [vmem:[#allocation7 + $0x308] sm:$0xff]  ;;  %v11971_v38 = vcombine.low %v1651_v5, %v1655_v6 }
 0x246   :  { %8002 = vmatpush1.bf16.msra.mxu1 %v11883_v11  ;;  %7960 = vmatprep.subr.bf16.mxu0 %v11748_v31  ;;  %v1519_v11 = vld [vmem:[#allocation7 + $0x328] sm:$0xff] }
 0x247   :  { %8003 = vmatprep.subr.bf16.mxu1 %v11876_v52  ;;  %v1643_v31 = vld [vmem:[#allocation7 + $0x708] sm:$0xff]  ;;  %v11836_v23 = vcombine.high %v1515_v3, %v1519_v11  ;;  %v11835_v33 = vcombine.low %v1515_v3, %v1519_v11 }
 0x248   :  { %v1647_v52 = vld [vmem:[#allocation7 + $0x728] sm:$0xff] }
 0x249   :  { %7961 = vmatpush1.bf16.msra.mxu0 %v11747_v26  ;;  %v11964_v63 = vcombine.high %v1643_v31, %v1647_v52  ;;  %v1507_v26 = vld [vmem:[#allocation7 + $0x2c8] sm:$0xff]  ;;  %v11963_v36 = vcombine.low %v1643_v31, %v1647_v52 }
 0x24a   :  { %8004 = vmatpush1.bf16.msra.mxu1 %v11875_v49  ;;  %7962 = vmatprep.subr.bf16.mxu0 %v11740_v27  ;;  %v1511_v49 = vld [vmem:[#allocation7 + $0x2e8] sm:$0xff] }
 0x24b   :  { %8005 = vmatprep.subr.bf16.mxu1 %v11868_v29  ;;  %v1635_v27 = vld [vmem:[#allocation7 + $0x6c8] sm:$0xff]  ;;  %v11828_v10 = vcombine.high %v1507_v26, %v1511_v49  ;;  %v11827_v50 = vcombine.low %v1507_v26, %v1511_v49 }
 0x24c   :  { %v1639_v29 = vld [vmem:[#allocation7 + $0x6e8] sm:$0xff] }
 0x24d   :  { %7963 = vmatpush1.bf16.msra.mxu0 %v11739_v40  ;;  %v11956_v39 = vcombine.high %v1635_v27, %v1639_v29  ;;  %v1499_v40 = vld [vmem:[#allocation7 + $0x288] sm:$0xff]  ;;  %v11955_v55 = vcombine.low %v1635_v27, %v1639_v29 }
 0x24e   :  { %8006 = vmatpush1.bf16.msra.mxu1 %v11867_v43  ;;  %7964 = vmatprep.subr.bf16.mxu0 %v11860_v45  ;;  %v1503_v43 = vld [vmem:[#allocation7 + $0x2a8] sm:$0xff] }
 0x24f   :  { %8007 = vmatprep.subr.bf16.mxu1 %v11988_v47  ;;  %v1627_v45 = vld [vmem:[#allocation7 + $0x688] sm:$0xff]  ;;  %v11820_v59 = vcombine.high %v1499_v40, %v1503_v43  ;;  %v11819_v2 = vcombine.low %v1499_v40, %v1503_v43  ;;  %v14180_v43 = vpop.f32.mrf.mxu0 }
 0x250   :  { %v1631_v47 = vld [vmem:[#allocation7 + $0x6a8] sm:$0xff] }
 0x251   :  { %7965 = vmatpush2.bf16.msra.mxu0 %v11859_v62  ;;  %v11948_v60 = vcombine.high %v1627_v45, %v1631_v47  ;;  %v1491_v62 = vld [vmem:[#allocation7 + $0x248] sm:$0xff]  ;;  %v11947_v4 = vcombine.low %v1627_v45, %v1631_v47  ;;  %v14182_v47 = vpop.f32.mrf.mxu1 }
 0x252   :  { %8008 = vmatpush2.bf16.msra.mxu1 %v11987_v0  ;;  %7966 = vmatprep.subr.bf16.mxu0 %v11852_v61  ;;  %v1495_v0 = vld [vmem:[#allocation7 + $0x268] sm:$0xff] }
 0x253   :  { %8009 = vmatprep.subr.bf16.mxu1 %v11980_v1  ;;  %v1619_v61 = vld [vmem:[#allocation7 + $0x648] sm:$0xff]  ;;  %v11812_v5 = vcombine.high %v1491_v62, %v1495_v0  ;;  %v11811_v3 = vcombine.low %v1491_v62, %v1495_v0 }
 0x254   :  { %v1623_v1 = vld [vmem:[#allocation7 + $0x668] sm:$0xff] }
 0x255   :  { %7967 = vmatpush2.bf16.msra.mxu0 %v11851_v7  ;;  %v11940_v6 = vcombine.high %v1619_v61, %v1623_v1  ;;  %v1483_v7 = vld [vmem:[#allocation7 + $0x208] sm:$0xff]  ;;  %v11939_v11 = vcombine.low %v1619_v61, %v1623_v1 }
 0x256   :  { %8010 = vmatpush2.bf16.msra.mxu1 %v11979_v25  ;;  %7968 = vmatprep.subr.bf16.mxu0 %v11844_v8  ;;  %v1487_v25 = vld [vmem:[#allocation7 + $0x228] sm:$0xff] }
 0x257   :  { %8011 = vmatprep.subr.bf16.mxu1 %v11972_v48  ;;  %v1611_v8 = vld [vmem:[#allocation7 + $0x608] sm:$0xff]  ;;  %v11804_v31 = vcombine.high %v1483_v7, %v1487_v25  ;;  %v11803_v26 = vcombine.low %v1483_v7, %v1487_v25 }
 0x258   :  { %v1615_v48 = vld [vmem:[#allocation7 + $0x628] sm:$0xff] }
 0x259   :  { %7969 = vmatpush2.bf16.msra.mxu0 %v11843_v22  ;;  %v11932_v52 = vcombine.high %v1611_v8, %v1615_v48  ;;  %v1731_v22 = vld [vmem:[#allocation7 + $0x9c8] sm:$0xff]  ;;  %v11931_v49 = vcombine.low %v1611_v8, %v1615_v48 }
 0x25a   :  { %8012 = vmatpush2.bf16.msra.mxu1 %v11971_v38  ;;  %7970 = vmatprep.subr.bf16.mxu0 %v11836_v23  ;;  %v1735_v38 = vld [vmem:[#allocation7 + $0x9e8] sm:$0xff] }
 0x25b   :  { %8013 = vmatprep.subr.bf16.mxu1 %v11964_v63  ;;  %v1859_v23 = vld [vmem:[#allocation7 + $0xdc8] sm:$0xff]  ;;  %v12052_v27 = vcombine.high %v1731_v22, %v1735_v38 }
 0x25c   :  { %v1863_v63 = vld [vmem:[#allocation7 + $0xde8] sm:$0xff] }
 0x25d   :  { %7971 = vmatpush2.bf16.msra.mxu0 %v11835_v33  ;;  %v12180_v29 = vcombine.high %v1859_v23, %v1863_v63  ;;  %v1723_v33 = vld [vmem:[#allocation7 + $0x988] sm:$0xff]  ;;  %v12179_v45 = vcombine.low %v1859_v23, %v1863_v63 }
 0x25e   :  { %8014 = vmatpush2.bf16.msra.mxu1 %v11963_v36  ;;  %7972 = vmatprep.subr.bf16.mxu0 %v11828_v10  ;;  %v1727_v36 = vld [vmem:[#allocation7 + $0x9a8] sm:$0xff]  ;;  %v12051_v10 = vcombine.low %v1731_v22, %v1735_v38 }
 0x25f   :  { %8015 = vmatprep.subr.bf16.mxu1 %v11956_v39  ;;  %v1851_v39 = vld [vmem:[#allocation7 + $0xd88] sm:$0xff] }
 0x260   :  { %v1855_v40 = vld [vmem:[#allocation7 + $0xda8] sm:$0xff] }
 0x261   :  { %7973 = vmatpush2.bf16.msra.mxu0 %v11827_v50  ;;  %v12044_v50 = vcombine.high %v1723_v33, %v1727_v36  ;;  %v12172_v62 = vcombine.high %v1851_v39, %v1855_v40  ;;  %v1843_v0 = vld [vmem:[#allocation7 + $0xd48] sm:$0xff] }
 0x262   :  { %8016 = vmatpush2.bf16.msra.mxu1 %v11955_v55  ;;  %7974 = vmatprep.subr.bf16.mxu0 %v11820_v59  ;;  %v1715_v55 = vld [vmem:[#allocation7 + $0x948] sm:$0xff] }
 0x263   :  { %8017 = vmatprep.subr.bf16.mxu1 %v11948_v60  ;;  %v1719_v59 = vld [vmem:[#allocation7 + $0x968] sm:$0xff] }
 0x264   :  { %v1847_v61 = vld [vmem:[#allocation7 + $0xd68] sm:$0xff]  ;;  %v12036_v7 = vcombine.high %v1715_v55, %v1719_v59  ;;  %v12035_v38 = vcombine.low %v1715_v55, %v1719_v59 }
 0x265   :  { %7975 = vmatpush2.bf16.msra.mxu0 %v11819_v2  ;;  %v1707_v48 = vld [vmem:[#allocation7 + $0x908] sm:$0xff]  ;;  %v12163_v63 = vcombine.low %v1843_v0, %v1847_v61 }
 0x266   :  { %8018 = vmatpush2.bf16.msra.mxu1 %v11947_v4  ;;  %7976 = vmatprep.subr.bf16.mxu0 %v11812_v5  ;;  %v12043_v4 = vcombine.low %v1723_v33, %v1727_v36  ;;  %v1703_v33 = vld [vmem:[#allocation7 + $0x8e8] sm:$0xff] }
 0x267   :  { %8019 = vmatprep.subr.bf16.mxu1 %v11940_v6  ;;  %v12171_v6 = vcombine.low %v1851_v39, %v1855_v40  ;;  %v1827_v36 = vld [vmem:[#allocation7 + $0xcc8] sm:$0xff] }
 0x268   :  { %v1695_v55 = vld [vmem:[#allocation7 + $0x8a8] sm:$0xff] }
 0x269   :  { %7977 = vmatpush2.bf16.msra.mxu0 %v11811_v3  ;;  %v1711_v3 = vld [vmem:[#allocation7 + $0x928] sm:$0xff] }
 0x26a   :  { %8020 = vmatpush2.bf16.msra.mxu1 %v11939_v11  ;;  %7978 = vmatprep.subr.bf16.mxu0 %v11804_v31  ;;  %v1835_v31 = vld [vmem:[#allocation7 + $0xd08] sm:$0xff]  ;;  %v12027_v39 = vcombine.low %v1707_v48, %v1711_v3 }
 0x26b   :  { %8021 = vmatprep.subr.bf16.mxu1 %v11932_v52  ;;  %v1839_v52 = vld [vmem:[#allocation7 + $0xd28] sm:$0xff] }
 0x26c   :  { %v1819_v59 = vld [vmem:[#allocation7 + $0xc88] sm:$0xff] }
 0x26d   :  { %7979 = vmatpush2.bf16.msra.mxu0 %v11803_v26  ;;  %v12028_v26 = vcombine.high %v1707_v48, %v1711_v3 }
 0x26e   :  { %8022 = vmatpush2.bf16.msra.mxu1 %v11931_v49  ;;  %8034 = vmatprep.subr.bf16.mxu0 %v12052_v27  ;;  %v12156_v27 = vcombine.high %v1835_v31, %v1839_v52 }
 0x26f   :  { %8077 = vmatprep.subr.bf16.mxu1 %v12180_v29  ;;  %v1699_v29 = vld [vmem:[#allocation7 + $0x8c8] sm:$0xff] }
 0x270   :  { %v7724_v60 = vpop.f32.mrf.mxu0  ;;  %7981 = vmatmul.mubr.bf16.vlgmr.msra.gmra.mxu0 %v14053_v53  ;;  %v7767_v2 = vpop.f32.mrf.mxu1  ;;  %v12020_v40 = vcombine.high %v1699_v29, %v1703_v33 }
 0x271   :  { %v7725_v1 = vadd.f32 %v7724_v60, %v14173_v14  ;;  %8024 = vmatmul.mubr.bf16.vlgmr.msra.gmra.mxu1 %v14059_v57  ;;  %8035 = vmatpush1.bf16.msra.mxu0 %v12051_v10  ;;  %v12164_v14 = vcombine.high %v1843_v0, %v1847_v61  ;;  %v1831_v10 = vld [vmem:[#allocation7 + $0xce8] sm:$0xff] }
 0x272   :  { %8066 = vmatprep.mubr.bf16.mxu0 %v14083_v30  ;;  %8078 = vmatpush1.bf16.msra.mxu1 %v12179_v45  ;;  %v14188_v5 = vpop.f32.mrf.mxu0  ;;  %v14193_v8 = vpop.f32.mrf.mxu1  ;;  %v12148_v45 = vcombine.high %v1827_v36, %v1831_v10  ;;  %v1823_v60 = vld [vmem:[#allocation7 + $0xca8] sm:$0xff]  ;;  %v12147_v0 = vcombine.low %v1827_v36, %v1831_v10 }
 0x273   :  { %v14190_v25 = vadd.f32 %v7767_v2, %v7725_v1  ;;  %8109 = vmatprep.mubr.bf16.mxu1 %v14085_v34  ;;  %8036 = vmatprep.subr.bf16.mxu0 %v12044_v50  ;;  %v1691_v50 = vld [vmem:[#allocation7 + $0x888] sm:$0xff]  ;;  %v12140_v1 = vcombine.high %v1819_v59, %v1823_v60  ;;  %v12139_v48 = vcombine.low %v1819_v59, %v1823_v60 }
 0x274   :  { %v7728_v11 = vpop.f32.mrf.mxu0  ;;  %8079 = vmatprep.subr.bf16.mxu1 %v12172_v62  ;;  %v7771_v23 = vpop.f32.mrf.mxu1  ;;  %v12019_v62 = vcombine.low %v1699_v29, %v1703_v33  ;;  %v12012_v61 = vcombine.high %v1691_v50, %v1695_v55  ;;  %v1683_v2 = vld [vmem:[#allocation7 + $0x848] sm:$0xff] }
 0x275   :  { %v7729_v22 = vadd.f32 %v7728_v11, %v14178_v56  ;;  %8037 = vmatpush1.bf16.msra.mxu0 %v12043_v4  ;;  %v12155_v56 = vcombine.low %v1835_v31, %v1839_v52  ;;  %v1687_v4 = vld [vmem:[#allocation7 + $0x868] sm:$0xff] }
 0x276   :  { %8080 = vmatpush1.bf16.msra.mxu1 %v12171_v6  ;;  %8038 = vmatprep.subr.bf16.mxu0 %v12036_v7  ;;  %v1811_v6 = vld [vmem:[#allocation7 + $0xc48] sm:$0xff]  ;;  %v12004_v3 = vcombine.high %v1683_v2, %v1687_v4 }
 0x277   :  { %v14196_v49 = vadd.f32 %v7771_v23, %v7729_v22  ;;  %8081 = vmatprep.subr.bf16.mxu1 %v12164_v14  ;;  %v1815_v7 = vld [vmem:[#allocation7 + $0xc68] sm:$0xff]  ;;  %v12011_v14 = vcombine.low %v1691_v50, %v1695_v55  ;;  %v12003_v23 = vcombine.low %v1683_v2, %v1687_v4 }
 0x278   :  { %v12132_v11 = vcombine.high %v1811_v6, %v1815_v7  ;;  %v1675_v31 = vld [vmem:[#allocation7 + $0x808] sm:$0xff] }
 0x279   :  { %8039 = vmatpush1.bf16.msra.mxu0 %v12035_v38  ;;  %v1679_v52 = vld [vmem:[#allocation7 + $0x828] sm:$0xff] }
 0x27a   :  { %8082 = vmatpush1.bf16.msra.mxu1 %v12163_v63  ;;  %8040 = vmatprep.subr.bf16.mxu0 %v12028_v26  ;;  %v1803_v22 = vld [vmem:[#allocation7 + $0xc08] sm:$0xff]  ;;  %v12131_v63 = vcombine.low %v1811_v6, %v1815_v7  ;;  %v11996_v26 = vcombine.high %v1675_v31, %v1679_v52 }
 0x27b   :  { %8083 = vmatprep.subr.bf16.mxu1 %v12156_v27  ;;  %v1807_v38 = vld [vmem:[#allocation7 + $0xc28] sm:$0xff] }
 0x27c   :  { %v12124_v27 = vcombine.high %v1803_v22, %v1807_v38  ;;  %v1795_v29 = vld [vmem:[#allocation7 + $0xbc8] sm:$0xff] }
 0x27d   :  { %8041 = vmatpush1.bf16.msra.mxu0 %v12027_v39  ;;  %v1799_v33 = vld [vmem:[#allocation7 + $0xbe8] sm:$0xff]  ;;  %v11995_v39 = vcombine.low %v1675_v31, %v1679_v52 }
 0x27e   :  { %8084 = vmatpush1.bf16.msra.mxu1 %v12155_v56  ;;  %8042 = vmatprep.subr.bf16.mxu0 %v12020_v40  ;;  %v1923_v36 = vld [vmem:[#allocation7 + $0xfc8] sm:$0xff]  ;;  %v12123_v56 = vcombine.low %v1803_v22, %v1807_v38  ;;  %v12116_v40 = vcombine.high %v1795_v29, %v1799_v33 }
 0x27f   :  { %8085 = vmatprep.subr.bf16.mxu1 %v12148_v45  ;;  %v1927_v10 = vld [vmem:[#allocation7 + $0xfe8] sm:$0xff] }
 0x280   :  { %v12244_v45 = vcombine.high %v1923_v36, %v1927_v10  ;;  %v1787_v50 = vld [vmem:[#allocation7 + $0xb88] sm:$0xff] }
 0x281   :  { %8043 = vmatpush1.bf16.msra.mxu0 %v12019_v62  ;;  %v1791_v55 = vld [vmem:[#allocation7 + $0xba8] sm:$0xff]  ;;  %v12115_v62 = vcombine.low %v1795_v29, %v1799_v33 }
 0x282   :  { %8086 = vmatpush1.bf16.msra.mxu1 %v12147_v0  ;;  %8044 = vmatprep.subr.bf16.mxu0 %v12012_v61  ;;  %v1915_v59 = vld [vmem:[#allocation7 + $0xf88] sm:$0xff]  ;;  %v12243_v0 = vcombine.low %v1923_v36, %v1927_v10  ;;  %v12108_v61 = vcombine.high %v1787_v50, %v1791_v55 }
 0x283   :  { %8087 = vmatprep.subr.bf16.mxu1 %v12140_v1  ;;  %v1919_v60 = vld [vmem:[#allocation7 + $0xfa8] sm:$0xff] }
 0x284   :  { %v12236_v1 = vcombine.high %v1915_v59, %v1919_v60  ;;  %v1779_v2 = vld [vmem:[#allocation7 + $0xb48] sm:$0xff] }
 0x285   :  { %8045 = vmatpush1.bf16.msra.mxu0 %v12011_v14  ;;  %v1783_v4 = vld [vmem:[#allocation7 + $0xb68] sm:$0xff]  ;;  %v12107_v14 = vcombine.low %v1787_v50, %v1791_v55 }
 0x286   :  { %8088 = vmatpush1.bf16.msra.mxu1 %v12139_v48  ;;  %8046 = vmatprep.subr.bf16.mxu0 %v12004_v3  ;;  %v1907_v6 = vld [vmem:[#allocation7 + $0xf48] sm:$0xff]  ;;  %v12235_v48 = vcombine.low %v1915_v59, %v1919_v60  ;;  %v12100_v3 = vcombine.high %v1779_v2, %v1783_v4 }
 0x287   :  { %8089 = vmatprep.subr.bf16.mxu1 %v12132_v11  ;;  %v1911_v7 = vld [vmem:[#allocation7 + $0xf68] sm:$0xff] }
 0x288   :  { %v12228_v11 = vcombine.high %v1907_v6, %v1911_v7  ;;  %v1771_v31 = vld [vmem:[#allocation7 + $0xb08] sm:$0xff] }
 0x289   :  { %8047 = vmatpush1.bf16.msra.mxu0 %v12003_v23  ;;  %v1775_v52 = vld [vmem:[#allocation7 + $0xb28] sm:$0xff]  ;;  %v12099_v23 = vcombine.low %v1779_v2, %v1783_v4 }
 0x28a   :  { %8090 = vmatpush1.bf16.msra.mxu1 %v12131_v63  ;;  %8048 = vmatprep.subr.bf16.mxu0 %v11996_v26  ;;  %v1899_v22 = vld [vmem:[#allocation7 + $0xf08] sm:$0xff]  ;;  %v12227_v63 = vcombine.low %v1907_v6, %v1911_v7  ;;  %v12092_v26 = vcombine.high %v1771_v31, %v1775_v52 }
 0x28b   :  { %8091 = vmatprep.subr.bf16.mxu1 %v12124_v27  ;;  %v1903_v38 = vld [vmem:[#allocation7 + $0xf28] sm:$0xff] }
 0x28c   :  { %v12220_v27 = vcombine.high %v1899_v22, %v1903_v38  ;;  %v1763_v29 = vld [vmem:[#allocation7 + $0xac8] sm:$0xff] }
 0x28d   :  { %8049 = vmatpush1.bf16.msra.mxu0 %v11995_v39  ;;  %v1767_v33 = vld [vmem:[#allocation7 + $0xae8] sm:$0xff]  ;;  %v12091_v39 = vcombine.low %v1771_v31, %v1775_v52 }
 0x28e   :  { %8092 = vmatpush1.bf16.msra.mxu1 %v12123_v56  ;;  %8050 = vmatprep.subr.bf16.mxu0 %v12116_v40  ;;  %v1891_v36 = vld [vmem:[#allocation7 + $0xec8] sm:$0xff]  ;;  %v12219_v56 = vcombine.low %v1899_v22, %v1903_v38  ;;  %v12084_v40 = vcombine.high %v1763_v29, %v1767_v33 }
 0x28f   :  { %8093 = vmatprep.subr.bf16.mxu1 %v12244_v45  ;;  %v1895_v10 = vld [vmem:[#allocation7 + $0xee8] sm:$0xff] }
 0x290   :  { %v12212_v45 = vcombine.high %v1891_v36, %v1895_v10  ;;  %v1755_v50 = vld [vmem:[#allocation7 + $0xa88] sm:$0xff] }
 0x291   :  { %8051 = vmatpush2.bf16.msra.mxu0 %v12115_v62  ;;  %v1759_v55 = vld [vmem:[#allocation7 + $0xaa8] sm:$0xff]  ;;  %v12083_v62 = vcombine.low %v1763_v29, %v1767_v33 }
 0x292   :  { %8094 = vmatpush2.bf16.msra.mxu1 %v12243_v0  ;;  %8052 = vmatprep.subr.bf16.mxu0 %v12108_v61  ;;  %v1883_v59 = vld [vmem:[#allocation7 + $0xe88] sm:$0xff]  ;;  %v12211_v0 = vcombine.low %v1891_v36, %v1895_v10  ;;  %v12076_v61 = vcombine.high %v1755_v50, %v1759_v55 }
 0x293   :  { %8095 = vmatprep.subr.bf16.mxu1 %v12236_v1  ;;  %v1887_v60 = vld [vmem:[#allocation7 + $0xea8] sm:$0xff] }
 0x294   :  { %v12204_v1 = vcombine.high %v1883_v59, %v1887_v60  ;;  %v1747_v2 = vld [vmem:[#allocation7 + $0xa48] sm:$0xff] }
 0x295   :  { %8053 = vmatpush2.bf16.msra.mxu0 %v12107_v14  ;;  %v1751_v4 = vld [vmem:[#allocation7 + $0xa68] sm:$0xff]  ;;  %v12075_v14 = vcombine.low %v1755_v50, %v1759_v55 }
 0x296   :  { %8096 = vmatpush2.bf16.msra.mxu1 %v12235_v48  ;;  %8054 = vmatprep.subr.bf16.mxu0 %v12100_v3  ;;  %v1875_v6 = vld [vmem:[#allocation7 + $0xe48] sm:$0xff]  ;;  %v12203_v48 = vcombine.low %v1883_v59, %v1887_v60  ;;  %v12068_v3 = vcombine.high %v1747_v2, %v1751_v4 }
 0x297   :  { %8097 = vmatprep.subr.bf16.mxu1 %v12228_v11  ;;  %v1879_v7 = vld [vmem:[#allocation7 + $0xe68] sm:$0xff] }
 0x298   :  { %v12196_v11 = vcombine.high %v1875_v6, %v1879_v7  ;;  %v1739_v31 = vld [vmem:[#allocation7 + $0xa08] sm:$0xff] }
 0x299   :  { %8055 = vmatpush2.bf16.msra.mxu0 %v12099_v23  ;;  %v1743_v52 = vld [vmem:[#allocation7 + $0xa28] sm:$0xff]  ;;  %v12067_v23 = vcombine.low %v1747_v2, %v1751_v4 }
 0x29a   :  { %8098 = vmatpush2.bf16.msra.mxu1 %v12227_v63  ;;  %8056 = vmatprep.subr.bf16.mxu0 %v12092_v26  ;;  %v1867_v22 = vld [vmem:[#allocation7 + $0xe08] sm:$0xff]  ;;  %v12195_v63 = vcombine.low %v1875_v6, %v1879_v7  ;;  %v12060_v26 = vcombine.high %v1739_v31, %v1743_v52 }
 0x29b   :  { %8099 = vmatprep.subr.bf16.mxu1 %v12220_v27  ;;  %v1871_v38 = vld [vmem:[#allocation7 + $0xe28] sm:$0xff] }
 0x29c   :  { %v12188_v27 = vcombine.high %v1867_v22, %v1871_v38  ;;  %v1987_v29 = vld [vmem:[#allocation7 + $0x11c8] sm:$0xff] }
 0x29d   :  { %8057 = vmatpush2.bf16.msra.mxu0 %v12091_v39  ;;  %v1991_v33 = vld [vmem:[#allocation7 + $0x11e8] sm:$0xff]  ;;  %v12059_v39 = vcombine.low %v1739_v31, %v1743_v52 }
 0x29e   :  { %8100 = vmatpush2.bf16.msra.mxu1 %v12219_v56  ;;  %8058 = vmatprep.subr.bf16.mxu0 %v12084_v40  ;;  %v2115_v36 = vld [vmem:[#allocation7 + $0x15c8] sm:$0xff]  ;;  %v12187_v56 = vcombine.low %v1867_v22, %v1871_v38  ;;  %v12308_v40 = vcombine.high %v1987_v29, %v1991_v33  ;;  %v12307_v59 = vcombine.low %v1987_v29, %v1991_v33 }
 0x29f   :  { %8101 = vmatprep.subr.bf16.mxu1 %v12212_v45  ;;  %v2119_v10 = vld [vmem:[#allocation7 + $0x15e8] sm:$0xff] }
 0x2a0   :  { %v12436_v45 = vcombine.high %v2115_v36, %v2119_v10  ;;  %v1979_v50 = vld [vmem:[#allocation7 + $0x1188] sm:$0xff] }
 0x2a1   :  { %8059 = vmatpush2.bf16.msra.mxu0 %v12083_v62  ;;  %v1983_v55 = vld [vmem:[#allocation7 + $0x11a8] sm:$0xff] }
 0x2a2   :  { %8102 = vmatpush2.bf16.msra.mxu1 %v12211_v0  ;;  %8060 = vmatprep.subr.bf16.mxu0 %v12076_v61  ;;  %v2107_v60 = vld [vmem:[#allocation7 + $0x1588] sm:$0xff]  ;;  %v14198_v0 = vpop.f32.mrf.mxu0  ;;  %v12435_v61 = vcombine.low %v2115_v36, %v2119_v10  ;;  %v12300_v2 = vcombine.high %v1979_v50, %v1983_v55  ;;  %v12299_v52 = vcombine.low %v1979_v50, %v1983_v55 }
 0x2a3   :  { %8103 = vmatprep.subr.bf16.mxu1 %v12204_v1  ;;  %v2111_v62 = vld [vmem:[#allocation7 + $0x15a8] sm:$0xff]  ;;  %v14200_v1 = vpop.f32.mrf.mxu1 }
 0x2a4   :  { %v1971_v4 = vld [vmem:[#allocation7 + $0x1148] sm:$0xff]  ;;  %v12427_v38 = vcombine.low %v2107_v60, %v2111_v62 }
 0x2a5   :  { %8061 = vmatpush2.bf16.msra.mxu0 %v12075_v14  ;;  %v1975_v6 = vld [vmem:[#allocation7 + $0x1168] sm:$0xff]  ;;  %v12428_v14 = vcombine.high %v2107_v60, %v2111_v62 }
 0x2a6   :  { %8104 = vmatpush2.bf16.msra.mxu1 %v12203_v48  ;;  %8062 = vmatprep.subr.bf16.mxu0 %v12068_v3  ;;  %v2099_v48 = vld [vmem:[#allocation7 + $0x1548] sm:$0xff] }
 0x2a7   :  { %8105 = vmatprep.subr.bf16.mxu1 %v12196_v11  ;;  %v2103_v3 = vld [vmem:[#allocation7 + $0x1568] sm:$0xff] }
 0x2a8   :  { %v1967_v29 = vld [vmem:[#allocation7 + $0x1128] sm:$0xff] }
 0x2a9   :  { %8063 = vmatpush2.bf16.msra.mxu0 %v12067_v23  ;;  %v12292_v23 = vcombine.high %v1971_v4, %v1975_v6  ;;  %v2091_v36 = vld [vmem:[#allocation7 + $0x1508] sm:$0xff] }
 0x2aa   :  { %8106 = vmatpush2.bf16.msra.mxu1 %v12195_v63  ;;  %8064 = vmatprep.subr.bf16.mxu0 %v12060_v26  ;;  %v2095_v10 = vld [vmem:[#allocation7 + $0x1528] sm:$0xff] }
 0x2ab   :  { %8107 = vmatprep.subr.bf16.mxu1 %v12188_v27  ;;  %v1963_v27 = vld [vmem:[#allocation7 + $0x1108] sm:$0xff] }
 0x2ac   :  { %v12284_v50 = vcombine.high %v1963_v27, %v1967_v29  ;;  %v1955_v60 = vld [vmem:[#allocation7 + $0x10c8] sm:$0xff] }
 0x2ad   :  { %8065 = vmatpush2.bf16.msra.mxu0 %v12059_v39  ;;  %v1959_v62 = vld [vmem:[#allocation7 + $0x10e8] sm:$0xff] }
 0x2ae   :  { %8108 = vmatpush2.bf16.msra.mxu1 %v12187_v56  ;;  %8120 = vmatprep.subr.bf16.mxu0 %v12308_v40  ;;  %v12291_v56 = vcombine.low %v1971_v4, %v1975_v6  ;;  %v1947_v6 = vld [vmem:[#allocation7 + $0x1088] sm:$0xff] }
 0x2af   :  { %8163 = vmatprep.subr.bf16.mxu1 %v12436_v45  ;;  %v12419_v45 = vcombine.low %v2099_v48, %v2103_v3 }
 0x2b0   :  { %v7810_v7 = vpop.f32.mrf.mxu0  ;;  %8067 = vmatmul.mubr.bf16.vlgmr.msra.gmra.mxu0 %v14117_v15  ;;  %v7853_v31 = vpop.f32.mrf.mxu1 }
 0x2b1   :  { %v7811_v11 = vadd.f32 %v7810_v7, %v14190_v25  ;;  %8110 = vmatmul.mubr.bf16.vlgmr.msra.gmra.mxu1 %v14119_v37  ;;  %8121 = vmatpush1.bf16.msra.mxu0 %v12307_v59  ;;  %v12420_v25 = vcombine.high %v2099_v48, %v2103_v3  ;;  %v12412_v59 = vcombine.high %v2091_v36, %v2095_v10  ;;  %v2075_v48 = vld [vmem:[#allocation7 + $0x1488] sm:$0xff] }
 0x2b2   :  { %8152 = vmatprep.mubr.bf16.mxu0 %v14121_v41  ;;  %8164 = vmatpush1.bf16.msra.mxu1 %v12435_v61  ;;  %v14206_v22 = vpop.f32.mrf.mxu0  ;;  %v14211_v26 = vpop.f32.mrf.mxu1  ;;  %v2083_v61 = vld [vmem:[#allocation7 + $0x14c8] sm:$0xff]  ;;  %v12283_v7 = vcombine.low %v1963_v27, %v1967_v29 }
 0x2b3   :  { %14499 = vst [vmem:[#allocation32_spill] sm:$0xff] %v14206_v22  ;;  %v14208_v63 = vadd.f32 %v7853_v31, %v7811_v11  ;;  %8195 = vmatprep.mubr.bf16.mxu1 %v14124_v44  ;;  %14500 = vst [vmem:[#allocation33_spill] sm:$0xff] %v14211_v26  ;;  %8122 = vmatprep.subr.bf16.mxu0 %v12300_v2  ;;  %v2087_v2 = vld [vmem:[#allocation7 + $0x14e8] sm:$0xff]  ;;  %v12275_v31 = vcombine.low %v1955_v60, %v1959_v62  ;;  %v1960_v26 = vld [vmem:[#allocation7 + $0x10f0] sm:$0xff] }
 0x2b4   :  { %v7814_v33 = vpop.f32.mrf.mxu0  ;;  %8165 = vmatprep.subr.bf16.mxu1 %v12428_v14  ;;  %v7857_v40 = vpop.f32.mrf.mxu1  ;;  %v12276_v14 = vcombine.high %v1955_v60, %v1959_v62  ;;  %v12404_v4 = vcombine.high %v2083_v61, %v2087_v2  ;;  %v1951_v11 = vld [vmem:[#allocation7 + $0x10a8] sm:$0xff]  ;;  %v2344_v22 = vld [vmem:[#allocation7 + $0x1cf0] sm:$0xff] }
 0x2b5   :  { %v7815_v39 = vadd.f32 %v7814_v33, %v14196_v49  ;;  %8123 = vmatpush1.bf16.msra.mxu0 %v12299_v52  ;;  %v12411_v49 = vcombine.low %v2091_v36, %v2095_v10  ;;  %v2079_v3 = vld [vmem:[#allocation7 + $0x14a8] sm:$0xff]  ;;  %v12403_v52 = vcombine.low %v2083_v61, %v2087_v2  ;;  %v12267_v36 = vcombine.low %v1947_v6, %v1951_v11 }
 0x2b6   :  { %8166 = vmatpush1.bf16.msra.mxu1 %v12427_v38  ;;  %8124 = vmatprep.subr.bf16.mxu0 %v12292_v23  ;;  %v12268_v38 = vcombine.high %v1947_v6, %v1951_v11  ;;  %v12396_v23 = vcombine.high %v2075_v48, %v2079_v3  ;;  %v1943_v27 = vld [vmem:[#allocation7 + $0x1068] sm:$0xff]  ;;  %v12395_v10 = vcombine.low %v2075_v48, %v2079_v3 }
 0x2b7   :  { %v14214_v55 = vadd.f32 %v7857_v40, %v7815_v39  ;;  %8167 = vmatprep.subr.bf16.mxu1 %v12420_v25  ;;  %v1939_v25 = vld [vmem:[#allocation7 + $0x1048] sm:$0xff] }
 0x2b8   :  { %v2067_v29 = vld [vmem:[#allocation7 + $0x1448] sm:$0xff]  ;;  %v12260_v39 = vcombine.high %v1939_v25, %v1943_v27  ;;  %v12259_v60 = vcombine.low %v1939_v25, %v1943_v27 }
 0x2b9   :  { %8125 = vmatpush1.bf16.msra.mxu0 %v12291_v56  ;;  %v2071_v33 = vld [vmem:[#allocation7 + $0x1468] sm:$0xff] }
 0x2ba   :  { %8168 = vmatpush1.bf16.msra.mxu1 %v12419_v45  ;;  %8126 = vmatprep.subr.bf16.mxu0 %v12284_v50  ;;  %v12388_v56 = vcombine.high %v2067_v29, %v2071_v33  ;;  %v1931_v40 = vld [vmem:[#allocation7 + $0x1008] sm:$0xff]  ;;  %v12387_v62 = vcombine.low %v2067_v29, %v2071_v33 }
 0x2bb   :  { %8169 = vmatprep.subr.bf16.mxu1 %v12412_v59  ;;  %v1935_v45 = vld [vmem:[#allocation7 + $0x1028] sm:$0xff] }
 0x2bc   :  { %v2059_v50 = vld [vmem:[#allocation7 + $0x1408] sm:$0xff]  ;;  %v12252_v61 = vcombine.high %v1931_v40, %v1935_v45  ;;  %v12251_v6 = vcombine.low %v1931_v40, %v1935_v45 }
 0x2bd   :  { %8127 = vmatpush1.bf16.msra.mxu0 %v12283_v7  ;;  %v2063_v59 = vld [vmem:[#allocation7 + $0x1428] sm:$0xff] }
 0x2be   :  { %8170 = vmatpush1.bf16.msra.mxu1 %v12411_v49  ;;  %8128 = vmatprep.subr.bf16.mxu0 %v12276_v14  ;;  %v12380_v2 = vcombine.high %v2059_v50, %v2063_v59  ;;  %v2051_v7 = vld [vmem:[#allocation7 + $0x13c8] sm:$0xff]  ;;  %v12379_v11 = vcombine.low %v2059_v50, %v2063_v59 }
 0x2bf   :  { %8171 = vmatprep.subr.bf16.mxu1 %v12404_v4  ;;  %v2055_v49 = vld [vmem:[#allocation7 + $0x13e8] sm:$0xff] }
 0x2c0   :  { %v2179_v14 = vld [vmem:[#allocation7 + $0x17c8] sm:$0xff]  ;;  %v12372_v48 = vcombine.high %v2051_v7, %v2055_v49  ;;  %v12371_v25 = vcombine.low %v2051_v7, %v2055_v49 }
 0x2c1   :  { %8129 = vmatpush1.bf16.msra.mxu0 %v12275_v31  ;;  %v2183_v4 = vld [vmem:[#allocation7 + $0x17e8] sm:$0xff] }
 0x2c2   :  { %8172 = vmatpush1.bf16.msra.mxu1 %v12403_v52  ;;  %8130 = vmatprep.subr.bf16.mxu0 %v12268_v38  ;;  %v12500_v3 = vcombine.high %v2179_v14, %v2183_v4  ;;  %v2043_v31 = vld [vmem:[#allocation7 + $0x1388] sm:$0xff]  ;;  %v12499_v27 = vcombine.low %v2179_v14, %v2183_v4 }
 0x2c3   :  { %8173 = vmatprep.subr.bf16.mxu1 %v12396_v23  ;;  %v2047_v52 = vld [vmem:[#allocation7 + $0x13a8] sm:$0xff] }
 0x2c4   :  { %v2171_v38 = vld [vmem:[#allocation7 + $0x1788] sm:$0xff]  ;;  %v12364_v29 = vcombine.high %v2043_v31, %v2047_v52  ;;  %v12363_v40 = vcombine.low %v2043_v31, %v2047_v52 }
 0x2c5   :  { %8131 = vmatpush1.bf16.msra.mxu0 %v12267_v36  ;;  %v2175_v23 = vld [vmem:[#allocation7 + $0x17a8] sm:$0xff] }
 0x2c6   :  { %8174 = vmatpush1.bf16.msra.mxu1 %v12395_v10  ;;  %8132 = vmatprep.subr.bf16.mxu0 %v12260_v39  ;;  %v12492_v33 = vcombine.high %v2171_v38, %v2175_v23  ;;  %v2035_v36 = vld [vmem:[#allocation7 + $0x1348] sm:$0xff]  ;;  %v12491_v45 = vcombine.low %v2171_v38, %v2175_v23 }
 0x2c7   :  { %8175 = vmatprep.subr.bf16.mxu1 %v12388_v56  ;;  %v2039_v10 = vld [vmem:[#allocation7 + $0x1368] sm:$0xff] }
 0x2c8   :  { %v2163_v39 = vld [vmem:[#allocation7 + $0x1748] sm:$0xff]  ;;  %v12356_v50 = vcombine.high %v2035_v36, %v2039_v10  ;;  %v12355_v7 = vcombine.low %v2035_v36, %v2039_v10 }
 0x2c9   :  { %8133 = vmatpush1.bf16.msra.mxu0 %v12259_v60  ;;  %v2167_v56 = vld [vmem:[#allocation7 + $0x1768] sm:$0xff] }
 0x2ca   :  { %8176 = vmatpush1.bf16.msra.mxu1 %v12387_v62  ;;  %8134 = vmatprep.subr.bf16.mxu0 %v12252_v61  ;;  %v12484_v59 = vcombine.high %v2163_v39, %v2167_v56  ;;  %v2027_v60 = vld [vmem:[#allocation7 + $0x1308] sm:$0xff]  ;;  %v12483_v49 = vcombine.low %v2163_v39, %v2167_v56 }
 0x2cb   :  { %8177 = vmatprep.subr.bf16.mxu1 %v12380_v2  ;;  %v2031_v62 = vld [vmem:[#allocation7 + $0x1328] sm:$0xff] }
 0x2cc   :  { %v2155_v61 = vld [vmem:[#allocation7 + $0x1708] sm:$0xff]  ;;  %v12348_v14 = vcombine.high %v2027_v60, %v2031_v62  ;;  %v12347_v31 = vcombine.low %v2027_v60, %v2031_v62 }
 0x2cd   :  { %8135 = vmatpush1.bf16.msra.mxu0 %v12251_v6  ;;  %v2159_v2 = vld [vmem:[#allocation7 + $0x1728] sm:$0xff] }
 0x2ce   :  { %8178 = vmatpush1.bf16.msra.mxu1 %v12379_v11  ;;  %8136 = vmatprep.subr.bf16.mxu0 %v12372_v48  ;;  %v12476_v4 = vcombine.high %v2155_v61, %v2159_v2  ;;  %v2019_v6 = vld [vmem:[#allocation7 + $0x12c8] sm:$0xff]  ;;  %v12475_v52 = vcombine.low %v2155_v61, %v2159_v2 }
 0x2cf   :  { %8179 = vmatprep.subr.bf16.mxu1 %v12500_v3  ;;  %v2023_v11 = vld [vmem:[#allocation7 + $0x12e8] sm:$0xff] }
 0x2d0   :  { %v2147_v48 = vld [vmem:[#allocation7 + $0x16c8] sm:$0xff]  ;;  %v12340_v38 = vcombine.high %v2019_v6, %v2023_v11  ;;  %v12339_v36 = vcombine.low %v2019_v6, %v2023_v11 }
 0x2d1   :  { %8137 = vmatpush2.bf16.msra.mxu0 %v12371_v25  ;;  %v2151_v3 = vld [vmem:[#allocation7 + $0x16e8] sm:$0xff] }
 0x2d2   :  { %8180 = vmatpush2.bf16.msra.mxu1 %v12499_v27  ;;  %8138 = vmatprep.subr.bf16.mxu0 %v12364_v29  ;;  %v12468_v23 = vcombine.high %v2147_v48, %v2151_v3  ;;  %v2011_v25 = vld [vmem:[#allocation7 + $0x1288] sm:$0xff]  ;;  %v12467_v10 = vcombine.low %v2147_v48, %v2151_v3 }
 0x2d3   :  { %8181 = vmatprep.subr.bf16.mxu1 %v12492_v33  ;;  %v2015_v27 = vld [vmem:[#allocation7 + $0x12a8] sm:$0xff] }
 0x2d4   :  { %v2139_v29 = vld [vmem:[#allocation7 + $0x1688] sm:$0xff]  ;;  %v12332_v39 = vcombine.high %v2011_v25, %v2015_v27  ;;  %v12331_v60 = vcombine.low %v2011_v25, %v2015_v27 }
 0x2d5   :  { %8139 = vmatpush2.bf16.msra.mxu0 %v12363_v40  ;;  %v2143_v33 = vld [vmem:[#allocation7 + $0x16a8] sm:$0xff] }
 0x2d6   :  { %8182 = vmatpush2.bf16.msra.mxu1 %v12491_v45  ;;  %8140 = vmatprep.subr.bf16.mxu0 %v12356_v50  ;;  %v12460_v56 = vcombine.high %v2139_v29, %v2143_v33  ;;  %v2003_v40 = vld [vmem:[#allocation7 + $0x1248] sm:$0xff]  ;;  %v12459_v62 = vcombine.low %v2139_v29, %v2143_v33 }
 0x2d7   :  { %8183 = vmatprep.subr.bf16.mxu1 %v12484_v59  ;;  %v2007_v45 = vld [vmem:[#allocation7 + $0x1268] sm:$0xff] }
 0x2d8   :  { %v2131_v50 = vld [vmem:[#allocation7 + $0x1648] sm:$0xff]  ;;  %v12324_v61 = vcombine.high %v2003_v40, %v2007_v45  ;;  %v12323_v6 = vcombine.low %v2003_v40, %v2007_v45  ;;  %v14216_v45 = vpop.f32.mrf.mxu0 }
 0x2d9   :  { %8141 = vmatpush2.bf16.msra.mxu0 %v12355_v7  ;;  %v2135_v59 = vld [vmem:[#allocation7 + $0x1668] sm:$0xff] }
 0x2da   :  { %8184 = vmatpush2.bf16.msra.mxu1 %v12483_v49  ;;  %8142 = vmatprep.subr.bf16.mxu0 %v12348_v14  ;;  %v12452_v2 = vcombine.high %v2131_v50, %v2135_v59  ;;  %v1995_v7 = vld [vmem:[#allocation7 + $0x1208] sm:$0xff]  ;;  %v12451_v11 = vcombine.low %v2131_v50, %v2135_v59  ;;  %v14218_v59 = vpop.f32.mrf.mxu1 }
 0x2db   :  { %8185 = vmatprep.subr.bf16.mxu1 %v12476_v4  ;;  %v1999_v49 = vld [vmem:[#allocation7 + $0x1228] sm:$0xff]  ;;  %14501 = vst [vmem:[#allocation34_spill] sm:$0xff] %v14218_v59  ;;  %v2084_v59 = vld [vmem:[#allocation7 + $0x14d0] sm:$0xff] }
 0x2dc   :  { %v2123_v14 = vld [vmem:[#allocation7 + $0x1608] sm:$0xff]  ;;  %v12316_v48 = vcombine.high %v1995_v7, %v1999_v49  ;;  %v12315_v25 = vcombine.low %v1995_v7, %v1999_v49 }
 0x2dd   :  { %8143 = vmatpush2.bf16.msra.mxu0 %v12347_v31  ;;  %v2127_v4 = vld [vmem:[#allocation7 + $0x1628] sm:$0xff] }
 0x2de   :  { %8186 = vmatpush2.bf16.msra.mxu1 %v12475_v52  ;;  %8144 = vmatprep.subr.bf16.mxu0 %v12340_v38  ;;  %v12444_v3 = vcombine.high %v2123_v14, %v2127_v4  ;;  %v2243_v31 = vld [vmem:[#allocation7 + $0x19c8] sm:$0xff]  ;;  %v12443_v27 = vcombine.low %v2123_v14, %v2127_v4 }
 0x2df   :  { %8187 = vmatprep.subr.bf16.mxu1 %v12468_v23  ;;  %v2247_v52 = vld [vmem:[#allocation7 + $0x19e8] sm:$0xff] }
 0x2e0   :  { %v2371_v38 = vld [vmem:[#allocation7 + $0x1dc8] sm:$0xff]  ;;  %v12564_v29 = vcombine.high %v2243_v31, %v2247_v52 }
 0x2e1   :  { %8145 = vmatpush2.bf16.msra.mxu0 %v12339_v36  ;;  %v2375_v23 = vld [vmem:[#allocation7 + $0x1de8] sm:$0xff] }
 0x2e2   :  { %8188 = vmatpush2.bf16.msra.mxu1 %v12467_v10  ;;  %8146 = vmatprep.subr.bf16.mxu0 %v12332_v39  ;;  %v12692_v33 = vcombine.high %v2371_v38, %v2375_v23  ;;  %v2235_v36 = vld [vmem:[#allocation7 + $0x1988] sm:$0xff]  ;;  %v12563_v39 = vcombine.low %v2243_v31, %v2247_v52  ;;  %v12691_v50 = vcombine.low %v2371_v38, %v2375_v23 }
 0x2e3   :  { %8189 = vmatprep.subr.bf16.mxu1 %v12460_v56  ;;  %v2239_v10 = vld [vmem:[#allocation7 + $0x19a8] sm:$0xff] }
 0x2e4   :  { %v2363_v56 = vld [vmem:[#allocation7 + $0x1d88] sm:$0xff] }
 0x2e5   :  { %8147 = vmatpush2.bf16.msra.mxu0 %v12331_v60  ;;  %v2367_v40 = vld [vmem:[#allocation7 + $0x1da8] sm:$0xff]  ;;  %v12556_v60 = vcombine.high %v2235_v36, %v2239_v10 }
 0x2e6   :  { %8190 = vmatpush2.bf16.msra.mxu1 %v12459_v62  ;;  %8148 = vmatprep.subr.bf16.mxu0 %v12324_v61  ;;  %v2227_v62 = vld [vmem:[#allocation7 + $0x1948] sm:$0xff]  ;;  %v12684_v7 = vcombine.high %v2363_v56, %v2367_v40 }
 0x2e7   :  { %8191 = vmatprep.subr.bf16.mxu1 %v12452_v2  ;;  %v2231_v61 = vld [vmem:[#allocation7 + $0x1968] sm:$0xff] }
 0x2e8   :  { %v2355_v49 = vld [vmem:[#allocation7 + $0x1d48] sm:$0xff]  ;;  %v12548_v31 = vcombine.high %v2227_v62, %v2231_v61 }
 0x2e9   :  { %8149 = vmatpush2.bf16.msra.mxu0 %v12323_v6  ;;  %v2359_v14 = vld [vmem:[#allocation7 + $0x1d68] sm:$0xff] }
 0x2ea   :  { %8192 = vmatpush2.bf16.msra.mxu1 %v12451_v11  ;;  %8150 = vmatprep.subr.bf16.mxu0 %v12316_v48  ;;  %v12555_v11 = vcombine.low %v2235_v36, %v2239_v10  ;;  %v12676_v23 = vcombine.high %v2355_v49, %v2359_v14  ;;  %v12547_v10 = vcombine.low %v2227_v62, %v2231_v61 }
 0x2eb   :  { %8193 = vmatprep.subr.bf16.mxu1 %v12444_v3  ;;  %v12683_v3 = vcombine.low %v2363_v56, %v2367_v40  ;;  %v12675_v56 = vcombine.low %v2355_v49, %v2359_v14  ;;  %v2203_v14 = vld [vmem:[#allocation7 + $0x1888] sm:$0xff] }
 0x2ed   :  { %8151 = vmatpush2.bf16.msra.mxu0 %v12315_v25  ;;  %v2223_v25 = vld [vmem:[#allocation7 + $0x1928] sm:$0xff] }
 0x2ee   :  { %8194 = vmatpush2.bf16.msra.mxu1 %v12443_v27  ;;  %8206 = vmatprep.subr.bf16.mxu0 %v12564_v29  ;;  %v2347_v29 = vld [vmem:[#allocation7 + $0x1d08] sm:$0xff] }
 0x2ef   :  { %8249 = vmatprep.subr.bf16.mxu1 %v12692_v33  ;;  %v2351_v33 = vld [vmem:[#allocation7 + $0x1d28] sm:$0xff] }
 0x2f0   :  { %v7896_v2 = vpop.f32.mrf.mxu0  ;;  %8153 = vmatmul.mubr.bf16.vlgmr.msra.gmra.mxu0 %v14155_v42  ;;  %v7939_v6 = vpop.f32.mrf.mxu1 }
 0x2f1   :  { %v7897_v4 = vadd.f32 %v7896_v2, %v14208_v63  ;;  %8196 = vmatmul.mubr.bf16.vlgmr.msra.gmra.mxu1 %v14157_v19  ;;  %8207 = vmatpush1.bf16.msra.mxu0 %v12563_v39  ;;  %v2219_v63 = vld [vmem:[#allocation7 + $0x1908] sm:$0xff]  ;;  %v12668_v2 = vcombine.high %v2347_v29, %v2351_v33 }
 0x2f2   :  { %8238 = vmatprep.mubr.bf16.mxu0 %v14159_v46  ;;  %8250 = vmatpush1.bf16.msra.mxu1 %v12691_v50  ;;  %v14224_v48 = vpop.f32.mrf.mxu0  ;;  %v14227_v38 = vpop.f32.mrf.mxu1  ;;  %v12540_v40 = vcombine.high %v2219_v63, %v2223_v25  ;;  %v12539_v35 = vcombine.low %v2219_v63, %v2223_v25  ;;  %v2195_v25 = vld [vmem:[#allocation7 + $0x1848] sm:$0xff] }
 0x2f3   :  { %14502 = vst [vmem:[#allocation35_spill] sm:$0xff] %v14224_v48  ;;  %v7940_v52 = vadd.f32 %v7939_v6, %v7897_v4  ;;  %8281 = vmatprep.mubr.bf16.mxu1 %v14162_v58  ;;  %14503 = vst [vmem:[#allocation36_spill] sm:$0xff] %v14227_v38  ;;  %8208 = vmatprep.subr.bf16.mxu0 %v12556_v60  ;;  %v2211_v60 = vld [vmem:[#allocation7 + $0x18c8] sm:$0xff]  ;;  %v1700_v38 = vld [vmem:[#allocation7 + $0x8d0] sm:$0xff] }
 0x2f4   :  { %v7900_v27 = vpop.f32.mrf.mxu0  ;;  %8251 = vmatprep.subr.bf16.mxu1 %v12684_v7  ;;  %v7943_v39 = vpop.f32.mrf.mxu1  ;;  %v2215_v4 = vld [vmem:[#allocation7 + $0x18e8] sm:$0xff]  ;;  %v1828_v48 = vld [vmem:[#allocation7 + $0xcd0] sm:$0xff] }
 0x2f5   :  { %v7901_v36 = vadd.f32 %v7900_v27, %v14214_v55  ;;  %8209 = vmatpush1.bf16.msra.mxu0 %v12555_v11  ;;  %v2339_v6 = vld [vmem:[#allocation7 + $0x1cc8] sm:$0xff]  ;;  %v8980_v13 = vmax.f32 %v7940_v52, 0.0  ;;  %v12667_v55 = vcombine.low %v2347_v29, %v2351_v33  ;;  %v12532_v62 = vcombine.high %v2211_v60, %v2215_v4 }
 0x2f6   :  { %8252 = vmatpush1.bf16.msra.mxu1 %v12683_v3  ;;  %8210 = vmatprep.subr.bf16.mxu0 %v12548_v31  ;;  %v12660_v49 = vcombine.high %v2339_v6, %v2343_v17  ;;  %v2207_v11 = vld [vmem:[#allocation7 + $0x18a8] sm:$0xff]  ;;  %v12659_v52 = vcombine.low %v2339_v6, %v2343_v17 }
 0x2f7   :  { %v7944_v50 = vadd.f32 %v7943_v39, %v7901_v36  ;;  %8253 = vmatprep.subr.bf16.mxu1 %v12676_v23  ;;  %v2331_v3 = vld [vmem:[#allocation7 + $0x1c88] sm:$0xff]  ;;  %v12531_v23 = vcombine.low %v2211_v60, %v2215_v4  ;;  %v12524_v27 = vcombine.high %v2203_v14, %v2207_v11 }
 0x2f8   :  { %v2335_v31 = vld [vmem:[#allocation7 + $0x1ca8] sm:$0xff] }
 0x2f9   :  { %v8988_v7 = vmax.f32 %v7944_v50, 0.0  ;;  %8211 = vmatpush1.bf16.msra.mxu0 %v12547_v10  ;;  %v12652_v63 = vcombine.high %v2331_v3, %v2335_v31  ;;  %v2199_v36 = vld [vmem:[#allocation7 + $0x1868] sm:$0xff]  ;;  %v12651_v10 = vcombine.low %v2331_v3, %v2335_v31 }
 0x2fa   :  { %8254 = vmatpush1.bf16.msra.mxu1 %v12675_v56  ;;  %8212 = vmatprep.subr.bf16.mxu0 %v12540_v40  ;;  %v2323_v29 = vld [vmem:[#allocation7 + $0x1c48] sm:$0xff]  ;;  %v12516_v39 = vcombine.high %v2195_v25, %v2199_v36  ;;  %v12515_v17 = vcombine.low %v2195_v25, %v2199_v36 }
 0x2fb   :  { %v14230_v61 = vpack.c.bf16 %v8988_v7, %v8980_v13  ;;  %8255 = vmatprep.subr.bf16.mxu1 %v12668_v2  ;;  %v2327_v33 = vld [vmem:[#allocation7 + $0x1c68] sm:$0xff]  ;;  %v12523_v13 = vcombine.low %v2203_v14, %v2207_v11 }
 0x2fc   :  { %v12644_v56 = vcombine.high %v2323_v29, %v2327_v33  ;;  %v2191_v40 = vld [vmem:[#allocation7 + $0x1828] sm:$0xff]  ;;  %v12643_v60 = vcombine.low %v2323_v29, %v2327_v33 }
 0x2fd   :  { %14504 = vst [vmem:[#allocation37_spill] sm:$0xff] %v14230_v61  ;;  %8213 = vmatpush1.bf16.msra.mxu0 %v12539_v35  ;;  %v2187_v35 = vld [vmem:[#allocation7 + $0x1808] sm:$0xff]  ;;  %v1572_v61 = vld [vmem:[#allocation7 + $0x4d0] sm:$0xff] }
 0x2fe   :  { %8256 = vmatpush1.bf16.msra.mxu1 %v12667_v55  ;;  %8214 = vmatprep.subr.bf16.mxu0 %v12532_v62  ;;  %v2315_v50 = vld [vmem:[#allocation7 + $0x1c08] sm:$0xff]  ;;  %v12508_v4 = vcombine.high %v2187_v35, %v2191_v40  ;;  %v12507_v14 = vcombine.low %v2187_v35, %v2191_v40 }
 0x2ff   :  { %8257 = vmatprep.subr.bf16.mxu1 %v12660_v49  ;;  %v2319_v2 = vld [vmem:[#allocation7 + $0x1c28] sm:$0xff] }
 0x300   :  { %v12636_v6 = vcombine.high %v2315_v50, %v2319_v2  ;;  %v2307_v7 = vld [vmem:[#allocation7 + $0x1bc8] sm:$0xff]  ;;  %v12635_v11 = vcombine.low %v2315_v50, %v2319_v2 }
 0x301   :  { %8215 = vmatpush1.bf16.msra.mxu0 %v12531_v23  ;;  %v2311_v55 = vld [vmem:[#allocation7 + $0x1be8] sm:$0xff] }
 0x302   :  { %8258 = vmatpush1.bf16.msra.mxu1 %v12659_v52  ;;  %8216 = vmatprep.subr.bf16.mxu0 %v12524_v27  ;;  %v2435_v62 = vld [vmem:[#allocation7 + $0x1fc8] sm:$0xff]  ;;  %v12628_v3 = vcombine.high %v2307_v7, %v2311_v55  ;;  %v12627_v25 = vcombine.low %v2307_v7, %v2311_v55 }
 0x303   :  { %8259 = vmatprep.subr.bf16.mxu1 %v12652_v63  ;;  %v2439_v49 = vld [vmem:[#allocation7 + $0x1fe8] sm:$0xff] }
 0x304   :  { %v12756_v31 = vcombine.high %v2435_v62, %v2439_v49  ;;  %v2299_v23 = vld [vmem:[#allocation7 + $0x1b88] sm:$0xff]  ;;  %v12755_v36 = vcombine.low %v2435_v62, %v2439_v49 }
 0x305   :  { %8217 = vmatpush1.bf16.msra.mxu0 %v12523_v13  ;;  %v2303_v52 = vld [vmem:[#allocation7 + $0x1ba8] sm:$0xff] }
 0x306   :  { %8260 = vmatpush1.bf16.msra.mxu1 %v12651_v10  ;;  %8218 = vmatprep.subr.bf16.mxu0 %v12516_v39  ;;  %v2427_v27 = vld [vmem:[#allocation7 + $0x1f88] sm:$0xff]  ;;  %v12620_v29 = vcombine.high %v2299_v23, %v2303_v52  ;;  %v12619_v35 = vcombine.low %v2299_v23, %v2303_v52 }
 0x307   :  { %8261 = vmatprep.subr.bf16.mxu1 %v12644_v56  ;;  %v2431_v63 = vld [vmem:[#allocation7 + $0x1fa8] sm:$0xff] }
 0x308   :  { %v12748_v33 = vcombine.high %v2427_v27, %v2431_v63  ;;  %v2291_v13 = vld [vmem:[#allocation7 + $0x1b48] sm:$0xff]  ;;  %v12747_v40 = vcombine.low %v2427_v27, %v2431_v63 }
 0x309   :  { %8219 = vmatpush1.bf16.msra.mxu0 %v12515_v17  ;;  %v2295_v10 = vld [vmem:[#allocation7 + $0x1b68] sm:$0xff] }
 0x30a   :  { %8262 = vmatpush1.bf16.msra.mxu1 %v12643_v60  ;;  %8220 = vmatprep.subr.bf16.mxu0 %v12508_v4  ;;  %v2419_v39 = vld [vmem:[#allocation7 + $0x1f48] sm:$0xff]  ;;  %v12612_v50 = vcombine.high %v2291_v13, %v2295_v10  ;;  %v12611_v7 = vcombine.low %v2291_v13, %v2295_v10 }
 0x30b   :  { %8263 = vmatprep.subr.bf16.mxu1 %v12636_v6  ;;  %v2423_v56 = vld [vmem:[#allocation7 + $0x1f68] sm:$0xff] }
 0x30c   :  { %v12740_v2 = vcombine.high %v2419_v39, %v2423_v56  ;;  %v2283_v17 = vld [vmem:[#allocation7 + $0x1b08] sm:$0xff]  ;;  %v12739_v55 = vcombine.low %v2419_v39, %v2423_v56 }
 0x30d   :  { %8221 = vmatpush1.bf16.msra.mxu0 %v12507_v14  ;;  %v2287_v60 = vld [vmem:[#allocation7 + $0x1b28] sm:$0xff] }
 0x30e   :  { %8264 = vmatpush1.bf16.msra.mxu1 %v12635_v11  ;;  %8222 = vmatprep.subr.bf16.mxu0 %v12628_v3  ;;  %v2411_v4 = vld [vmem:[#allocation7 + $0x1f08] sm:$0xff]  ;;  %v12604_v62 = vcombine.high %v2283_v17, %v2287_v60  ;;  %v12603_v23 = vcombine.low %v2283_v17, %v2287_v60 }
 0x30f   :  { %8265 = vmatprep.subr.bf16.mxu1 %v12756_v31  ;;  %v2415_v6 = vld [vmem:[#allocation7 + $0x1f28] sm:$0xff] }
 0x310   :  { %v12732_v49 = vcombine.high %v2411_v4, %v2415_v6  ;;  %v2275_v14 = vld [vmem:[#allocation7 + $0x1ac8] sm:$0xff]  ;;  %v12731_v52 = vcombine.low %v2411_v4, %v2415_v6 }
 0x311   :  { %8223 = vmatpush2.bf16.msra.mxu0 %v12627_v25  ;;  %v2279_v11 = vld [vmem:[#allocation7 + $0x1ae8] sm:$0xff] }
 0x312   :  { %8266 = vmatpush2.bf16.msra.mxu1 %v12755_v36  ;;  %8224 = vmatprep.subr.bf16.mxu0 %v12620_v29  ;;  %v2403_v3 = vld [vmem:[#allocation7 + $0x1ec8] sm:$0xff]  ;;  %v12596_v27 = vcombine.high %v2275_v14, %v2279_v11  ;;  %v12595_v13 = vcombine.low %v2275_v14, %v2279_v11 }
 0x313   :  { %8267 = vmatprep.subr.bf16.mxu1 %v12748_v33  ;;  %v2407_v31 = vld [vmem:[#allocation7 + $0x1ee8] sm:$0xff] }
 0x314   :  { %v12724_v63 = vcombine.high %v2403_v3, %v2407_v31  ;;  %v2267_v25 = vld [vmem:[#allocation7 + $0x1a88] sm:$0xff]  ;;  %v12723_v10 = vcombine.low %v2403_v3, %v2407_v31 }
 0x315   :  { %8225 = vmatpush2.bf16.msra.mxu0 %v12619_v35  ;;  %v2271_v36 = vld [vmem:[#allocation7 + $0x1aa8] sm:$0xff] }
 0x316   :  { %8268 = vmatpush2.bf16.msra.mxu1 %v12747_v40  ;;  %8226 = vmatprep.subr.bf16.mxu0 %v12612_v50  ;;  %v2395_v29 = vld [vmem:[#allocation7 + $0x1e88] sm:$0xff]  ;;  %v12588_v39 = vcombine.high %v2267_v25, %v2271_v36  ;;  %v12587_v17 = vcombine.low %v2267_v25, %v2271_v36 }
 0x317   :  { %8269 = vmatprep.subr.bf16.mxu1 %v12740_v2  ;;  %v2399_v33 = vld [vmem:[#allocation7 + $0x1ea8] sm:$0xff] }
 0x318   :  { %v12716_v56 = vcombine.high %v2395_v29, %v2399_v33  ;;  %v2259_v35 = vld [vmem:[#allocation7 + $0x1a48] sm:$0xff]  ;;  %v12715_v60 = vcombine.low %v2395_v29, %v2399_v33 }
 0x319   :  { %8227 = vmatpush2.bf16.msra.mxu0 %v12611_v7  ;;  %v2263_v40 = vld [vmem:[#allocation7 + $0x1a68] sm:$0xff] }
 0x31a   :  { %8270 = vmatpush2.bf16.msra.mxu1 %v12739_v55  ;;  %8228 = vmatprep.subr.bf16.mxu0 %v12604_v62  ;;  %v2387_v50 = vld [vmem:[#allocation7 + $0x1e48] sm:$0xff]  ;;  %v12580_v4 = vcombine.high %v2259_v35, %v2263_v40  ;;  %v12579_v14 = vcombine.low %v2259_v35, %v2263_v40  ;;  %v1596_v40 = vld [vmem:[#allocation7 + $0x590] sm:$0xff] }
 0x31b   :  { %8271 = vmatprep.subr.bf16.mxu1 %v12732_v49  ;;  %v2391_v2 = vld [vmem:[#allocation7 + $0x1e68] sm:$0xff] }
 0x31c   :  { %v12708_v6 = vcombine.high %v2387_v50, %v2391_v2  ;;  %v2251_v7 = vld [vmem:[#allocation7 + $0x1a08] sm:$0xff]  ;;  %v12707_v11 = vcombine.low %v2387_v50, %v2391_v2  ;;  %v1600_v50 = vld [vmem:[#allocation7 + $0x5b0] sm:$0xff]  ;;  %v14233_v2 = vpop.f32.mrf.mxu0 }
 0x31d   :  { %8229 = vmatpush2.bf16.msra.mxu0 %v12603_v23  ;;  %v2255_v55 = vld [vmem:[#allocation7 + $0x1a28] sm:$0xff]  ;;  %v1476_v23 = vld [vmem:[#allocation7 + $0x1d0] sm:$0xff]  ;;  %14505 = vst [vmem:[#allocation38_spill] sm:$0xff] %v14233_v2 }
 0x31e   :  { %8272 = vmatpush2.bf16.msra.mxu1 %v12731_v52  ;;  %8230 = vmatprep.subr.bf16.mxu0 %v12596_v27  ;;  %v2379_v62 = vld [vmem:[#allocation7 + $0x1e08] sm:$0xff]  ;;  %v12572_v3 = vcombine.high %v2251_v7, %v2255_v55  ;;  %v1480_v52 = vld [vmem:[#allocation7 + $0x1f0] sm:$0xff]  ;;  %v12571_v25 = vcombine.low %v2251_v7, %v2255_v55 }
 0x31f   :  { %8273 = vmatprep.subr.bf16.mxu1 %v12724_v63  ;;  %v2383_v49 = vld [vmem:[#allocation7 + $0x1e28] sm:$0xff]  ;;  %v1604_v27 = vld [vmem:[#allocation7 + $0x5d0] sm:$0xff]  ;;  %v11798_v29 = vcombine.high %v1476_v23, %v1480_v52  ;;  %v11797_v35 = vcombine.low %v1476_v23, %v1480_v52  ;;  %v11917_v52 = vcombine.low %v1596_v40, %v1600_v50 }
 0x320   :  { %v12700_v31 = vcombine.high %v2379_v62, %v2383_v49  ;;  %v1608_v63 = vld [vmem:[#allocation7 + $0x5f0] sm:$0xff]  ;;  %v12699_v36 = vcombine.low %v2379_v62, %v2383_v49  ;;  %v11918_v62 = vcombine.high %v1596_v40, %v1600_v50 }
 0x321   :  { %8231 = vmatpush2.bf16.msra.mxu0 %v12595_v13  ;;  %v11926_v33 = vcombine.high %v1604_v27, %v1608_v63  ;;  %v1468_v13 = vld [vmem:[#allocation7 + $0x190] sm:$0xff] }
 0x322   :  { %8274 = vmatpush2.bf16.msra.mxu1 %v12723_v10  ;;  %8232 = vmatprep.subr.bf16.mxu0 %v12588_v39  ;;  %v1472_v10 = vld [vmem:[#allocation7 + $0x1b0] sm:$0xff]  ;;  %v13638_v39 = vld [vmem:[#allocation8] sm:$0xff] }
 0x323   :  { %8275 = vmatprep.subr.bf16.mxu1 %v12716_v56  ;;  %v2455_v56 = vrot.slane %v13638_v39, %v14039_v20  ;;  %v1464_v7 = vld [vmem:[#allocation7 + $0x170] sm:$0xff] }
 0x324   :  { %v1588_v49 = vld [vmem:[#allocation7 + $0x550] sm:$0xff] }
 0x325   :  { %8233 = vmatpush2.bf16.msra.mxu0 %v12587_v17  ;;  %v11925_v17 = vcombine.low %v1604_v27, %v1608_v63  ;;  %v1448_v20 = vld [vmem:[#allocation7 + $0xf0] sm:$0xff] }
 0x326   :  { %8276 = vmatpush2.bf16.msra.mxu1 %v12715_v60  ;;  %8234 = vmatprep.subr.bf16.mxu0 %v12580_v4  ;;  %v14235_v60 = vpop.f32.mrf.mxu1  ;;  %v11790_v4 = vcombine.high %v1468_v13, %v1472_v10  ;;  %v1832_v2 = vld [vmem:[#allocation7 + $0xcf0] sm:$0xff] }
 0x327   :  { %8277 = vmatprep.subr.bf16.mxu1 %v12708_v6  ;;  %14506 = vst [vmem:[#allocation39_spill] sm:$0xff] %v14235_v60  ;;  %v1460_v6 = vld [vmem:[#allocation7 + $0x150] sm:$0xff] }
 0x328   :  { %v11782_v27 = vcombine.high %v1460_v6, %v1464_v7  ;;  %v1704_v60 = vld [vmem:[#allocation7 + $0x8f0] sm:$0xff] }
 0x329   :  { %8235 = vmatpush2.bf16.msra.mxu0 %v12579_v14  ;;  %v1592_v14 = vld [vmem:[#allocation7 + $0x570] sm:$0xff] }
 0x32a   :  { %8278 = vmatpush2.bf16.msra.mxu1 %v12707_v11  ;;  %8236 = vmatprep.subr.bf16.mxu0 %v12572_v3  ;;  %v11909_v40 = vcombine.low %v1588_v49, %v1592_v14 }
 0x32b   :  { %8279 = vmatprep.subr.bf16.mxu1 %v12700_v31  ;;  %v11789_v31 = vcombine.low %v1468_v13, %v1472_v10  ;;  %v1580_v13 = vld [vmem:[#allocation7 + $0x510] sm:$0xff] }
 0x32c   :  { %v1584_v10 = vld [vmem:[#allocation7 + $0x530] sm:$0xff] }
 0x32d   :  { %8237 = vmatpush2.bf16.msra.mxu0 %v12571_v25 }
 0x32e   :  { %8280 = vmatpush2.bf16.msra.mxu1 %v12699_v36  ;;  %8292 = vmatprep.subr.bf16.mxu0 %v11798_v29  ;;  %v11910_v36 = vcombine.high %v1588_v49, %v1592_v14  ;;  %v1452_v29 = vld [vmem:[#allocation7 + $0x110] sm:$0xff] }
 0x32f   :  { %8335 = vmatprep.subr.bf16.mxu1 %v11926_v33  ;;  %v1456_v33 = vld [vmem:[#allocation7 + $0x130] sm:$0xff] }
 0x330   :  { %v7982_v55 = vpop.f32.mrf.mxu0  ;;  %8239 = vmatmul.mubr.bf16.vlgmr.msra.gmra.mxu0 %v14137_v24  ;;  %v11774_v50 = vcombine.high %v1452_v29, %v1456_v33  ;;  %v1564_v49 = vld [vmem:[#allocation7 + $0x490] sm:$0xff] }
 0x331   :  { %v7983_v11 = vadd.f32 %v7982_v55, %v2455_v56  ;;  %v8025_v3 = vpop.f32.mrf.mxu1  ;;  %8282 = vmatmul.mubr.bf16.vlgmr.msra.gmra.mxu1 %v14139_v28  ;;  %8293 = vmatpush1.bf16.msra.mxu0 %v11797_v35  ;;  %v1568_v14 = vld [vmem:[#allocation7 + $0x4b0] sm:$0xff] }
 0x332   :  { %8324 = vmatprep.mubr.bf16.mxu0 %v14049_v51  ;;  %8336 = vmatpush1.bf16.msra.mxu1 %v11925_v17  ;;  %v14240_v23 = vpop.f32.mrf.mxu0  ;;  %v11781_v17 = vcombine.low %v1460_v6, %v1464_v7  ;;  %v11894_v6 = vcombine.high %v1572_v61, %v1576_v32  ;;  %v1436_v7 = vld [vmem:[#allocation7 + $0x90] sm:$0xff] }
 0x333   :  { %v14242_v63 = vadd.f32 %v8025_v3, %v7983_v11  ;;  %8367 = vmatprep.mubr.bf16.mxu1 %v14055_v54  ;;  %v14245_v25 = vpop.f32.mrf.mxu1  ;;  %8294 = vmatprep.subr.bf16.mxu0 %v11790_v4  ;;  %v11902_v3 = vcombine.high %v1580_v13, %v1584_v10  ;;  %v1444_v4 = vld [vmem:[#allocation7 + $0xd0] sm:$0xff] }
 0x334   :  { %v7986_v39 = vpop.f32.mrf.mxu0  ;;  %8337 = vmatprep.subr.bf16.mxu1 %v11918_v62  ;;  %v11773_v62 = vcombine.low %v1452_v29, %v1456_v33  ;;  %v1432_v29 = vld [vmem:[#allocation7 + $0x70] sm:$0xff] }
 0x335   :  { %v7987_v35 = vadd.f32 %v7986_v39, %v2455_v56  ;;  %8295 = vmatpush1.bf16.msra.mxu0 %v11789_v31  ;;  %v8029_v55 = vpop.f32.mrf.mxu1  ;;  %v11901_v56 = vcombine.low %v1580_v13, %v1584_v10  ;;  %v11766_v31 = vcombine.high %v1444_v4, %v1448_v20  ;;  %v1556_v33 = vld [vmem:[#allocation7 + $0x450] sm:$0xff]  ;;  %v11885_v10 = vcombine.low %v1564_v49, %v1568_v14 }
 0x336   :  { %8338 = vmatpush1.bf16.msra.mxu1 %v11917_v52  ;;  %8296 = vmatprep.subr.bf16.mxu0 %v11782_v27  ;;  %v1440_v52 = vld [vmem:[#allocation7 + $0xb0] sm:$0xff]  ;;  %v11765_v27 = vcombine.low %v1444_v4, %v1448_v20 }
 0x337   :  { %v14247_v11 = vadd.f32 %v8029_v55, %v7987_v35  ;;  %8339 = vmatprep.subr.bf16.mxu1 %v11910_v36  ;;  %v11893_v36 = vcombine.low %v1572_v61, %v1576_v32  ;;  %v11758_v39 = vcombine.high %v1436_v7, %v1440_v52  ;;  %v11886_v35 = vcombine.high %v1564_v49, %v1568_v14  ;;  %v1560_v55 = vld [vmem:[#allocation7 + $0x470] sm:$0xff] }
 0x338   :  { %v11757_v13 = vcombine.low %v1436_v7, %v1440_v52  ;;  %v1424_v20 = vld [vmem:[#allocation7 + $0x30] sm:$0xff]  ;;  %v11877_v61 = vcombine.low %v1556_v33, %v1560_v55 }
 0x339   :  { %8297 = vmatpush1.bf16.msra.mxu0 %v11781_v17  ;;  %v1428_v17 = vld [vmem:[#allocation7 + $0x50] sm:$0xff] }
 0x33a   :  { %8340 = vmatpush1.bf16.msra.mxu1 %v11909_v40  ;;  %8298 = vmatprep.subr.bf16.mxu0 %v11774_v50  ;;  %v11750_v40 = vcombine.high %v1428_v17, %v1432_v29  ;;  %v11878_v50 = vcombine.high %v1556_v33, %v1560_v55  ;;  %v1548_v4 = vld [vmem:[#allocation7 + $0x410] sm:$0xff]  ;;  %v11749_v32 = vcombine.low %v1428_v17, %v1432_v29 }
 0x33b   :  { %8341 = vmatprep.subr.bf16.mxu1 %v11902_v3  ;;  %v1420_v3 = vld [vmem:[#allocation7 + $0x10] sm:$0xff] }
 0x33c   :  { %v1544_v7 = vld [vmem:[#allocation7 + $0x3f0] sm:$0xff]  ;;  %v11741_v49 = vcombine.low %v1420_v3, %v1424_v20 }
 0x33d   :  { %8299 = vmatpush1.bf16.msra.mxu0 %v11773_v62  ;;  %v1552_v62 = vld [vmem:[#allocation7 + $0x430] sm:$0xff] }
 0x33e   :  { %8342 = vmatpush1.bf16.msra.mxu1 %v11901_v56  ;;  %8300 = vmatprep.subr.bf16.mxu0 %v11766_v31  ;;  %v11742_v56 = vcombine.high %v1420_v3, %v1424_v20  ;;  %v11870_v31 = vcombine.high %v1548_v4, %v1552_v62  ;;  %v1668_v52 = vld [vmem:[#allocation7 + $0x7d0] sm:$0xff]  ;;  %v11869_v14 = vcombine.low %v1548_v4, %v1552_v62 }
 0x33f   :  { %8343 = vmatprep.subr.bf16.mxu1 %v11894_v6  ;;  %v1540_v6 = vld [vmem:[#allocation7 + $0x3d0] sm:$0xff] }
 0x340   :  { %v1536_v17 = vld [vmem:[#allocation7 + $0x3b0] sm:$0xff]  ;;  %v11861_v33 = vcombine.low %v1540_v6, %v1544_v7 }
 0x341   :  { %8301 = vmatpush1.bf16.msra.mxu0 %v11765_v27  ;;  %v1672_v27 = vld [vmem:[#allocation7 + $0x7f0] sm:$0xff] }
 0x342   :  { %8344 = vmatpush1.bf16.msra.mxu1 %v11893_v36  ;;  %8302 = vmatprep.subr.bf16.mxu0 %v11758_v39  ;;  %v11862_v36 = vcombine.high %v1540_v6, %v1544_v7  ;;  %v11990_v39 = vcombine.high %v1668_v52, %v1672_v27  ;;  %v1660_v29 = vld [vmem:[#allocation7 + $0x790] sm:$0xff]  ;;  %v11989_v55 = vcombine.low %v1668_v52, %v1672_v27 }
 0x343   :  { %8345 = vmatprep.subr.bf16.mxu1 %v11886_v35  ;;  %v1532_v35 = vld [vmem:[#allocation7 + $0x390] sm:$0xff] }
 0x344   :  { %v1528_v3 = vld [vmem:[#allocation7 + $0x370] sm:$0xff]  ;;  %v11853_v4 = vcombine.low %v1532_v35, %v1536_v17 }
 0x345   :  { %8303 = vmatpush1.bf16.msra.mxu0 %v11757_v13  ;;  %v1664_v13 = vld [vmem:[#allocation7 + $0x7b0] sm:$0xff] }
 0x346   :  { %8346 = vmatpush1.bf16.msra.mxu1 %v11885_v10  ;;  %8304 = vmatprep.subr.bf16.mxu0 %v11750_v40  ;;  %v11854_v10 = vcombine.high %v1532_v35, %v1536_v17  ;;  %v11982_v40 = vcombine.high %v1660_v29, %v1664_v13  ;;  %v1652_v20 = vld [vmem:[#allocation7 + $0x750] sm:$0xff]  ;;  %v11981_v62 = vcombine.low %v1660_v29, %v1664_v13 }
 0x347   :  { %8347 = vmatprep.subr.bf16.mxu1 %v11878_v50  ;;  %v1524_v50 = vld [vmem:[#allocation7 + $0x350] sm:$0xff] }
 0x348   :  { %v1520_v6 = vld [vmem:[#allocation7 + $0x330] sm:$0xff]  ;;  %v11845_v52 = vcombine.low %v1524_v50, %v1528_v3 }
 0x349   :  { %8305 = vmatpush1.bf16.msra.mxu0 %v11749_v32  ;;  %v1656_v32 = vld [vmem:[#allocation7 + $0x770] sm:$0xff] }
 0x34a   :  { %8348 = vmatpush1.bf16.msra.mxu1 %v11877_v61  ;;  %8306 = vmatprep.subr.bf16.mxu0 %v11742_v56  ;;  %v11846_v61 = vcombine.high %v1524_v50, %v1528_v3  ;;  %v11974_v56 = vcombine.high %v1652_v20, %v1656_v32  ;;  %v1644_v7 = vld [vmem:[#allocation7 + $0x710] sm:$0xff]  ;;  %v11973_v27 = vcombine.low %v1652_v20, %v1656_v32 }
 0x34b   :  { %8349 = vmatprep.subr.bf16.mxu1 %v11870_v31  ;;  %v1516_v31 = vld [vmem:[#allocation7 + $0x310] sm:$0xff] }
 0x34c   :  { %v1512_v35 = vld [vmem:[#allocation7 + $0x2f0] sm:$0xff]  ;;  %v11837_v29 = vcombine.low %v1516_v31, %v1520_v6 }
 0x34d   :  { %8307 = vmatpush1.bf16.msra.mxu0 %v11741_v49  ;;  %v1648_v49 = vld [vmem:[#allocation7 + $0x730] sm:$0xff] }
 0x34e   :  { %8350 = vmatpush1.bf16.msra.mxu1 %v11869_v14  ;;  %8308 = vmatprep.subr.bf16.mxu0 %v11862_v36  ;;  %v11838_v14 = vcombine.high %v1516_v31, %v1520_v6  ;;  %v11966_v36 = vcombine.high %v1644_v7, %v1648_v49  ;;  %v1636_v17 = vld [vmem:[#allocation7 + $0x6d0] sm:$0xff]  ;;  %v11965_v13 = vcombine.low %v1644_v7, %v1648_v49 }
 0x34f   :  { %8351 = vmatprep.subr.bf16.mxu1 %v11990_v39  ;;  %v1508_v39 = vld [vmem:[#allocation7 + $0x2d0] sm:$0xff] }
 0x350   :  { %v1504_v50 = vld [vmem:[#allocation7 + $0x2b0] sm:$0xff]  ;;  %v11829_v20 = vcombine.low %v1508_v39, %v1512_v35 }
 0x351   :  { %8309 = vmatpush2.bf16.msra.mxu0 %v11861_v33  ;;  %v1640_v33 = vld [vmem:[#allocation7 + $0x6f0] sm:$0xff] }
 0x352   :  { %8352 = vmatpush2.bf16.msra.mxu1 %v11989_v55  ;;  %8310 = vmatprep.subr.bf16.mxu0 %v11854_v10  ;;  %v11830_v55 = vcombine.high %v1508_v39, %v1512_v35  ;;  %v11958_v10 = vcombine.high %v1636_v17, %v1640_v33  ;;  %v1628_v3 = vld [vmem:[#allocation7 + $0x690] sm:$0xff]  ;;  %v11957_v32 = vcombine.low %v1636_v17, %v1640_v33 }
 0x353   :  { %8353 = vmatprep.subr.bf16.mxu1 %v11982_v40  ;;  %v1500_v40 = vld [vmem:[#allocation7 + $0x290] sm:$0xff] }
 0x354   :  { %v1496_v31 = vld [vmem:[#allocation7 + $0x270] sm:$0xff]  ;;  %v11821_v7 = vcombine.low %v1500_v40, %v1504_v50 }
 0x355   :  { %8311 = vmatpush2.bf16.msra.mxu0 %v11853_v4  ;;  %v1632_v4 = vld [vmem:[#allocation7 + $0x6b0] sm:$0xff] }
 0x356   :  { %8354 = vmatpush2.bf16.msra.mxu1 %v11981_v62  ;;  %8312 = vmatprep.subr.bf16.mxu0 %v11846_v61  ;;  %v11822_v62 = vcombine.high %v1500_v40, %v1504_v50  ;;  %v11950_v61 = vcombine.high %v1628_v3, %v1632_v4  ;;  %v1620_v6 = vld [vmem:[#allocation7 + $0x650] sm:$0xff]  ;;  %v11949_v49 = vcombine.low %v1628_v3, %v1632_v4 }
 0x357   :  { %8355 = vmatprep.subr.bf16.mxu1 %v11974_v56  ;;  %v1492_v56 = vld [vmem:[#allocation7 + $0x250] sm:$0xff] }
 0x358   :  { %v1488_v39 = vld [vmem:[#allocation7 + $0x230] sm:$0xff]  ;;  %v11813_v17 = vcombine.low %v1492_v56, %v1496_v31 }
 0x359   :  { %8313 = vmatpush2.bf16.msra.mxu0 %v11845_v52  ;;  %v1624_v52 = vld [vmem:[#allocation7 + $0x670] sm:$0xff] }
 0x35a   :  { %8356 = vmatpush2.bf16.msra.mxu1 %v11973_v27  ;;  %8314 = vmatprep.subr.bf16.mxu0 %v11838_v14  ;;  %v11814_v27 = vcombine.high %v1492_v56, %v1496_v31  ;;  %v11942_v14 = vcombine.high %v1620_v6, %v1624_v52  ;;  %v1612_v35 = vld [vmem:[#allocation7 + $0x610] sm:$0xff]  ;;  %v11941_v33 = vcombine.low %v1620_v6, %v1624_v52 }
 0x35b   :  { %8357 = vmatprep.subr.bf16.mxu1 %v11966_v36  ;;  %v1484_v36 = vld [vmem:[#allocation7 + $0x210] sm:$0xff] }
 0x35c   :  { %v1736_v40 = vld [vmem:[#allocation7 + $0x9f0] sm:$0xff]  ;;  %v11805_v3 = vcombine.low %v1484_v36, %v1488_v39 }
 0x35d   :  { %8315 = vmatpush2.bf16.msra.mxu0 %v11837_v29  ;;  %v1616_v29 = vld [vmem:[#allocation7 + $0x630] sm:$0xff] }
 0x35e   :  { %8358 = vmatpush2.bf16.msra.mxu1 %v11965_v13  ;;  %8316 = vmatprep.subr.bf16.mxu0 %v11830_v55  ;;  %v11806_v13 = vcombine.high %v1484_v36, %v1488_v39  ;;  %v11934_v55 = vcombine.high %v1612_v35, %v1616_v29  ;;  %v1860_v50 = vld [vmem:[#allocation7 + $0xdd0] sm:$0xff]  ;;  %v11933_v4 = vcombine.low %v1612_v35, %v1616_v29 }
 0x35f   :  { %8359 = vmatprep.subr.bf16.mxu1 %v11958_v10  ;;  %v1732_v10 = vld [vmem:[#allocation7 + $0x9d0] sm:$0xff] }
 0x360   :  { %v1728_v56 = vld [vmem:[#allocation7 + $0x9b0] sm:$0xff]  ;;  %v12053_v31 = vcombine.low %v1732_v10, %v1736_v40 }
 0x361   :  { %8317 = vmatpush2.bf16.msra.mxu0 %v11829_v20  ;;  %v1864_v20 = vld [vmem:[#allocation7 + $0xdf0] sm:$0xff] }
 0x362   :  { %8360 = vmatpush2.bf16.msra.mxu1 %v11957_v32  ;;  %8318 = vmatprep.subr.bf16.mxu0 %v11822_v62  ;;  %v12054_v32 = vcombine.high %v1732_v10, %v1736_v40  ;;  %v12182_v62 = vcombine.high %v1860_v50, %v1864_v20  ;;  %v1852_v6 = vld [vmem:[#allocation7 + $0xd90] sm:$0xff] }
 0x363   :  { %8361 = vmatprep.subr.bf16.mxu1 %v11950_v61  ;;  %v1724_v61 = vld [vmem:[#allocation7 + $0x990] sm:$0xff] }
 0x364   :  { %v1856_v52 = vld [vmem:[#allocation7 + $0xdb0] sm:$0xff]  ;;  %v12045_v10 = vcombine.low %v1724_v61, %v1728_v56 }
 0x365   :  { %8319 = vmatpush2.bf16.msra.mxu0 %v11821_v7  ;;  %v14249_v7 = vpop.f32.mrf.mxu0  ;;  %v1716_v36 = vld [vmem:[#allocation7 + $0x950] sm:$0xff]  ;;  %v12174_v29 = vcombine.high %v1852_v6, %v1856_v52 }
 0x366   :  { %8362 = vmatpush2.bf16.msra.mxu1 %v11949_v49  ;;  %8320 = vmatprep.subr.bf16.mxu0 %v11814_v27  ;;  %v12181_v49 = vcombine.low %v1860_v50, %v1864_v20  ;;  %v14251_v27 = vpop.f32.mrf.mxu1  ;;  %v1720_v39 = vld [vmem:[#allocation7 + $0x970] sm:$0xff]  ;;  %v12173_v50 = vcombine.low %v1852_v6, %v1856_v52 }
 0x367   :  { %8363 = vmatprep.subr.bf16.mxu1 %v11942_v14  ;;  %v12046_v14 = vcombine.high %v1724_v61, %v1728_v56  ;;  %v12038_v20 = vcombine.high %v1716_v36, %v1720_v39  ;;  %v1836_v61 = vld [vmem:[#allocation7 + $0xd10] sm:$0xff] }
 0x368   :  { %v1840_v56 = vld [vmem:[#allocation7 + $0xd30] sm:$0xff] }
 0x369   :  { %8321 = vmatpush2.bf16.msra.mxu0 %v11813_v17  ;;  %v1844_v17 = vld [vmem:[#allocation7 + $0xd50] sm:$0xff] }
 0x36a   :  { %8364 = vmatpush2.bf16.msra.mxu1 %v11941_v33  ;;  %8322 = vmatprep.subr.bf16.mxu0 %v11806_v13  ;;  %v1848_v33 = vld [vmem:[#allocation7 + $0xd70] sm:$0xff] }
 0x36b   :  { %8365 = vmatprep.subr.bf16.mxu1 %v11934_v55  ;;  %v12165_v52 = vcombine.low %v1844_v17, %v1848_v33 }
 0x36d   :  { %8323 = vmatpush2.bf16.msra.mxu0 %v11805_v3 }
 0x36e   :  { %8366 = vmatpush2.bf16.msra.mxu1 %v11933_v4  ;;  %8378 = vmatprep.subr.bf16.mxu0 %v12054_v32  ;;  %v1708_v32 = vld [vmem:[#allocation7 + $0x910] sm:$0xff] }
 0x36f   :  { %8421 = vmatprep.subr.bf16.mxu1 %v12182_v62  ;;  %v1712_v62 = vld [vmem:[#allocation7 + $0x930] sm:$0xff] }
 0x370   :  { %v8068_v35 = vpop.f32.mrf.mxu0  ;;  %8325 = vmatmul.mubr.bf16.vlgmr.msra.gmra.mxu0 %v14053_v53 }
 0x371   :  { %v8069_v13 = vadd.f32 %v8068_v35, %v14242_v63  ;;  %v8111_v55 = vpop.f32.mrf.mxu1  ;;  %8368 = vmatmul.mubr.bf16.vlgmr.msra.gmra.mxu1 %v14059_v57  ;;  %8379 = vmatpush1.bf16.msra.mxu0 %v12053_v31  ;;  %v12166_v63 = vcombine.high %v1844_v17, %v1848_v33  ;;  %v1820_v17 = vld [vmem:[#allocation7 + $0xc90] sm:$0xff] }
 0x372   :  { %8410 = vmatprep.mubr.bf16.mxu0 %v14083_v30  ;;  %8422 = vmatpush1.bf16.msra.mxu1 %v12181_v49  ;;  %v14257_v40 = vpop.f32.mrf.mxu0  ;;  %v12037_v49 = vcombine.low %v1716_v36, %v1720_v39  ;;  %v12150_v36 = vcombine.high %v1828_v48, %v1832_v2  ;;  %v1692_v39 = vld [vmem:[#allocation7 + $0x890] sm:$0xff] }
 0x373   :  { %v14259_v3 = vadd.f32 %v8111_v55, %v8069_v13  ;;  %8453 = vmatprep.mubr.bf16.mxu1 %v14085_v34  ;;  %v14262_v4 = vpop.f32.mrf.mxu1  ;;  %8380 = vmatprep.subr.bf16.mxu0 %v12046_v14  ;;  %v12030_v13 = vcombine.high %v1708_v32, %v1712_v62  ;;  %v12158_v14 = vcombine.high %v1836_v61, %v1840_v56  ;;  %v1824_v33 = vld [vmem:[#allocation7 + $0xcb0] sm:$0xff] }
 0x374   :  { %14507 = vst [vmem:[#allocation40_spill] sm:$0xff] %v14262_v4  ;;  %v8072_v35 = vpop.f32.mrf.mxu0  ;;  %8423 = vmatprep.subr.bf16.mxu1 %v12174_v29  ;;  %v12029_v29 = vcombine.low %v1708_v32, %v1712_v62  ;;  %v1688_v32 = vld [vmem:[#allocation7 + $0x870] sm:$0xff] }
 0x375   :  { %v8073_v31 = vadd.f32 %v8072_v35, %v14247_v11  ;;  %8381 = vmatpush1.bf16.msra.mxu0 %v12045_v10  ;;  %v8115_v6 = vpop.f32.mrf.mxu1  ;;  %v12157_v11 = vcombine.low %v1836_v61, %v1840_v56  ;;  %v12022_v10 = vcombine.high %v1700_v38, %v1704_v60  ;;  %v1812_v62 = vld [vmem:[#allocation7 + $0xc50] sm:$0xff]  ;;  %v12141_v56 = vcombine.low %v1820_v17, %v1824_v33 }
 0x376   :  { %8424 = vmatpush1.bf16.msra.mxu1 %v12173_v50  ;;  %8382 = vmatprep.subr.bf16.mxu0 %v12038_v20  ;;  %v1696_v50 = vld [vmem:[#allocation7 + $0x8b0] sm:$0xff]  ;;  %v12021_v20 = vcombine.low %v1700_v38, %v1704_v60 }
 0x377   :  { %v14265_v55 = vadd.f32 %v8115_v6, %v8073_v31  ;;  %8425 = vmatprep.subr.bf16.mxu1 %v12166_v63  ;;  %v12149_v63 = vcombine.low %v1828_v48, %v1832_v2  ;;  %v12014_v35 = vcombine.high %v1692_v39, %v1696_v50  ;;  %v12142_v31 = vcombine.high %v1820_v17, %v1824_v33  ;;  %v1816_v6 = vld [vmem:[#allocation7 + $0xc70] sm:$0xff] }
 0x378   :  { %v12013_v61 = vcombine.low %v1692_v39, %v1696_v50  ;;  %v1680_v38 = vld [vmem:[#allocation7 + $0x830] sm:$0xff]  ;;  %v12133_v2 = vcombine.low %v1812_v62, %v1816_v6 }
 0x379   :  { %8383 = vmatpush1.bf16.msra.mxu0 %v12037_v49  ;;  %v1684_v49 = vld [vmem:[#allocation7 + $0x850] sm:$0xff] }
 0x37a   :  { %8426 = vmatpush1.bf16.msra.mxu1 %v12165_v52  ;;  %8384 = vmatprep.subr.bf16.mxu0 %v12030_v13  ;;  %v12006_v52 = vcombine.high %v1684_v49, %v1688_v32  ;;  %v12134_v13 = vcombine.high %v1812_v62, %v1816_v6  ;;  %v1804_v60 = vld [vmem:[#allocation7 + $0xc10] sm:$0xff]  ;;  %v12005_v48 = vcombine.low %v1684_v49, %v1688_v32 }
 0x37b   :  { %8427 = vmatprep.subr.bf16.mxu1 %v12158_v14  ;;  %v1676_v14 = vld [vmem:[#allocation7 + $0x810] sm:$0xff] }
 0x37c   :  { %v1800_v39 = vld [vmem:[#allocation7 + $0xbf0] sm:$0xff]  ;;  %v11997_v17 = vcombine.low %v1676_v14, %v1680_v38 }
 0x37d   :  { %8385 = vmatpush1.bf16.msra.mxu0 %v12029_v29  ;;  %v1808_v29 = vld [vmem:[#allocation7 + $0xc30] sm:$0xff] }
 0x37e   :  { %8428 = vmatpush1.bf16.msra.mxu1 %v12157_v11  ;;  %8386 = vmatprep.subr.bf16.mxu0 %v12022_v10  ;;  %v11998_v11 = vcombine.high %v1676_v14, %v1680_v38  ;;  %v12126_v10 = vcombine.high %v1804_v60, %v1808_v29  ;;  %v1924_v50 = vld [vmem:[#allocation7 + $0xfd0] sm:$0xff]  ;;  %v12125_v33 = vcombine.low %v1804_v60, %v1808_v29 }
 0x37f   :  { %8429 = vmatprep.subr.bf16.mxu1 %v12150_v36  ;;  %v1796_v36 = vld [vmem:[#allocation7 + $0xbd0] sm:$0xff] }
 0x380   :  { %v1792_v49 = vld [vmem:[#allocation7 + $0xbb0] sm:$0xff]  ;;  %v12117_v62 = vcombine.low %v1796_v36, %v1800_v39 }
 0x381   :  { %8387 = vmatpush1.bf16.msra.mxu0 %v12021_v20  ;;  %v1928_v20 = vld [vmem:[#allocation7 + $0xff0] sm:$0xff] }
 0x382   :  { %8430 = vmatpush1.bf16.msra.mxu1 %v12149_v63  ;;  %8388 = vmatprep.subr.bf16.mxu0 %v12014_v35  ;;  %v12118_v63 = vcombine.high %v1796_v36, %v1800_v39  ;;  %v12246_v35 = vcombine.high %v1924_v50, %v1928_v20  ;;  %v1916_v32 = vld [vmem:[#allocation7 + $0xf90] sm:$0xff]  ;;  %v12245_v6 = vcombine.low %v1924_v50, %v1928_v20 }
 0x383   :  { %8431 = vmatprep.subr.bf16.mxu1 %v12142_v31  ;;  %v1788_v31 = vld [vmem:[#allocation7 + $0xb90] sm:$0xff] }
 0x384   :  { %v1784_v14 = vld [vmem:[#allocation7 + $0xb70] sm:$0xff]  ;;  %v12109_v60 = vcombine.low %v1788_v31, %v1792_v49 }
 0x385   :  { %8389 = vmatpush1.bf16.msra.mxu0 %v12013_v61  ;;  %v1920_v61 = vld [vmem:[#allocation7 + $0xfb0] sm:$0xff] }
 0x386   :  { %8432 = vmatpush1.bf16.msra.mxu1 %v12141_v56  ;;  %8390 = vmatprep.subr.bf16.mxu0 %v12006_v52  ;;  %v12110_v56 = vcombine.high %v1788_v31, %v1792_v49  ;;  %v12238_v52 = vcombine.high %v1916_v32, %v1920_v61  ;;  %v1908_v38 = vld [vmem:[#allocation7 + $0xf50] sm:$0xff]  ;;  %v12237_v29 = vcombine.low %v1916_v32, %v1920_v61 }
 0x387   :  { %8433 = vmatprep.subr.bf16.mxu1 %v12134_v13  ;;  %v1780_v13 = vld [vmem:[#allocation7 + $0xb50] sm:$0xff] }
 0x388   :  { %v1776_v36 = vld [vmem:[#allocation7 + $0xb30] sm:$0xff]  ;;  %v12101_v50 = vcombine.low %v1780_v13, %v1784_v14 }
 0x389   :  { %8391 = vmatpush1.bf16.msra.mxu0 %v12005_v48  ;;  %v1912_v48 = vld [vmem:[#allocation7 + $0xf70] sm:$0xff] }
 0x38a   :  { %8434 = vmatpush1.bf16.msra.mxu1 %v12133_v2  ;;  %8392 = vmatprep.subr.bf16.mxu0 %v11998_v11  ;;  %v12102_v2 = vcombine.high %v1780_v13, %v1784_v14  ;;  %v12230_v11 = vcombine.high %v1908_v38, %v1912_v48  ;;  %v1900_v39 = vld [vmem:[#allocation7 + $0xf10] sm:$0xff]  ;;  %v12229_v20 = vcombine.low %v1908_v38, %v1912_v48 }
 0x38b   :  { %8435 = vmatprep.subr.bf16.mxu1 %v12126_v10  ;;  %v1772_v10 = vld [vmem:[#allocation7 + $0xb10] sm:$0xff] }
 0x38c   :  { %v1768_v31 = vld [vmem:[#allocation7 + $0xaf0] sm:$0xff]  ;;  %v12093_v32 = vcombine.low %v1772_v10, %v1776_v36 }
 0x38d   :  { %8393 = vmatpush1.bf16.msra.mxu0 %v11997_v17  ;;  %v1904_v17 = vld [vmem:[#allocation7 + $0xf30] sm:$0xff] }
 0x38e   :  { %8436 = vmatpush1.bf16.msra.mxu1 %v12125_v33  ;;  %8394 = vmatprep.subr.bf16.mxu0 %v12118_v63  ;;  %v12094_v33 = vcombine.high %v1772_v10, %v1776_v36  ;;  %v12222_v63 = vcombine.high %v1900_v39, %v1904_v17  ;;  %v1892_v49 = vld [vmem:[#allocation7 + $0xed0] sm:$0xff]  ;;  %v12221_v61 = vcombine.low %v1900_v39, %v1904_v17 }
 0x38f   :  { %8437 = vmatprep.subr.bf16.mxu1 %v12246_v35  ;;  %v1764_v35 = vld [vmem:[#allocation7 + $0xad0] sm:$0xff] }
 0x390   :  { %v1760_v13 = vld [vmem:[#allocation7 + $0xab0] sm:$0xff]  ;;  %v12085_v38 = vcombine.low %v1764_v35, %v1768_v31 }
 0x391   :  { %8395 = vmatpush2.bf16.msra.mxu0 %v12117_v62  ;;  %v1896_v62 = vld [vmem:[#allocation7 + $0xef0] sm:$0xff] }
 0x392   :  { %8438 = vmatpush2.bf16.msra.mxu1 %v12245_v6  ;;  %8396 = vmatprep.subr.bf16.mxu0 %v12110_v56  ;;  %v12086_v6 = vcombine.high %v1764_v35, %v1768_v31  ;;  %v12214_v56 = vcombine.high %v1892_v49, %v1896_v62  ;;  %v1884_v14 = vld [vmem:[#allocation7 + $0xe90] sm:$0xff]  ;;  %v12213_v48 = vcombine.low %v1892_v49, %v1896_v62 }
 0x393   :  { %8439 = vmatprep.subr.bf16.mxu1 %v12238_v52  ;;  %v1756_v52 = vld [vmem:[#allocation7 + $0xa90] sm:$0xff] }
 0x394   :  { %v1752_v10 = vld [vmem:[#allocation7 + $0xa70] sm:$0xff]  ;;  %v12077_v39 = vcombine.low %v1756_v52, %v1760_v13 }
 0x395   :  { %8397 = vmatpush2.bf16.msra.mxu0 %v12109_v60  ;;  %v1888_v60 = vld [vmem:[#allocation7 + $0xeb0] sm:$0xff] }
 0x396   :  { %8440 = vmatpush2.bf16.msra.mxu1 %v12237_v29  ;;  %8398 = vmatprep.subr.bf16.mxu0 %v12102_v2  ;;  %v12078_v29 = vcombine.high %v1756_v52, %v1760_v13  ;;  %v12206_v2 = vcombine.high %v1884_v14, %v1888_v60  ;;  %v1876_v36 = vld [vmem:[#allocation7 + $0xe50] sm:$0xff]  ;;  %v12205_v17 = vcombine.low %v1884_v14, %v1888_v60 }
 0x397   :  { %8441 = vmatprep.subr.bf16.mxu1 %v12230_v11  ;;  %v1748_v11 = vld [vmem:[#allocation7 + $0xa50] sm:$0xff] }
 0x398   :  { %v1744_v35 = vld [vmem:[#allocation7 + $0xa30] sm:$0xff]  ;;  %v12069_v49 = vcombine.low %v1748_v11, %v1752_v10 }
 0x399   :  { %8399 = vmatpush2.bf16.msra.mxu0 %v12101_v50  ;;  %v1880_v50 = vld [vmem:[#allocation7 + $0xe70] sm:$0xff] }
 0x39a   :  { %8442 = vmatpush2.bf16.msra.mxu1 %v12229_v20  ;;  %8400 = vmatprep.subr.bf16.mxu0 %v12094_v33  ;;  %v12070_v20 = vcombine.high %v1748_v11, %v1752_v10  ;;  %v12198_v33 = vcombine.high %v1876_v36, %v1880_v50  ;;  %v1868_v31 = vld [vmem:[#allocation7 + $0xe10] sm:$0xff]  ;;  %v12197_v62 = vcombine.low %v1876_v36, %v1880_v50 }
 0x39b   :  { %8443 = vmatprep.subr.bf16.mxu1 %v12222_v63  ;;  %v1740_v63 = vld [vmem:[#allocation7 + $0xa10] sm:$0xff] }
 0x39c   :  { %v1992_v52 = vld [vmem:[#allocation7 + $0x11f0] sm:$0xff]  ;;  %v12061_v14 = vcombine.low %v1740_v63, %v1744_v35 }
 0x39d   :  { %8401 = vmatpush2.bf16.msra.mxu0 %v12093_v32  ;;  %v1872_v32 = vld [vmem:[#allocation7 + $0xe30] sm:$0xff] }
 0x39e   :  { %8444 = vmatpush2.bf16.msra.mxu1 %v12221_v61  ;;  %8402 = vmatprep.subr.bf16.mxu0 %v12086_v6  ;;  %v12062_v61 = vcombine.high %v1740_v63, %v1744_v35  ;;  %v12190_v6 = vcombine.high %v1868_v31, %v1872_v32  ;;  %v2116_v13 = vld [vmem:[#allocation7 + $0x15d0] sm:$0xff]  ;;  %v12189_v60 = vcombine.low %v1868_v31, %v1872_v32 }
 0x39f   :  { %8445 = vmatprep.subr.bf16.mxu1 %v12214_v56  ;;  %v1988_v56 = vld [vmem:[#allocation7 + $0x11d0] sm:$0xff] }
 0x3a0   :  { %v1984_v11 = vld [vmem:[#allocation7 + $0x11b0] sm:$0xff]  ;;  %v12309_v10 = vcombine.low %v1988_v56, %v1992_v52 }
 0x3a1   :  { %8403 = vmatpush2.bf16.msra.mxu0 %v12085_v38  ;;  %v2120_v38 = vld [vmem:[#allocation7 + $0x15f0] sm:$0xff] }
 0x3a2   :  { %8446 = vmatpush2.bf16.msra.mxu1 %v12213_v48  ;;  %8404 = vmatprep.subr.bf16.mxu0 %v12078_v29  ;;  %v12310_v48 = vcombine.high %v1988_v56, %v1992_v52  ;;  %v12438_v29 = vcombine.high %v2116_v13, %v2120_v38  ;;  %v2108_v36 = vld [vmem:[#allocation7 + $0x1590] sm:$0xff] }
 0x3a3   :  { %8447 = vmatprep.subr.bf16.mxu1 %v12206_v2  ;;  %v1980_v2 = vld [vmem:[#allocation7 + $0x1190] sm:$0xff] }
 0x3a4   :  { %v2112_v50 = vld [vmem:[#allocation7 + $0x15b0] sm:$0xff]  ;;  %v12301_v56 = vcombine.low %v1980_v2, %v1984_v11 }
 0x3a5   :  { %8405 = vmatpush2.bf16.msra.mxu0 %v12077_v39  ;;  %v14267_v39 = vpop.f32.mrf.mxu0  ;;  %v1972_v63 = vld [vmem:[#allocation7 + $0x1150] sm:$0xff]  ;;  %v12430_v32 = vcombine.high %v2108_v36, %v2112_v50 }
 0x3a6   :  { %8448 = vmatpush2.bf16.msra.mxu1 %v12205_v17  ;;  %8406 = vmatprep.subr.bf16.mxu0 %v12070_v20  ;;  %v12437_v17 = vcombine.low %v2116_v13, %v2120_v38  ;;  %v14269_v20 = vpop.f32.mrf.mxu1  ;;  %v1976_v35 = vld [vmem:[#allocation7 + $0x1170] sm:$0xff]  ;;  %v12429_v13 = vcombine.low %v2108_v36, %v2112_v50 }
 0x3a7   :  { %8449 = vmatprep.subr.bf16.mxu1 %v12198_v33  ;;  %v12302_v33 = vcombine.high %v1980_v2, %v1984_v11  ;;  %v12294_v38 = vcombine.high %v1972_v63, %v1976_v35  ;;  %v2092_v2 = vld [vmem:[#allocation7 + $0x1510] sm:$0xff] }
 0x3a8   :  { %v2096_v11 = vld [vmem:[#allocation7 + $0x1530] sm:$0xff] }
 0x3a9   :  { %8407 = vmatpush2.bf16.msra.mxu0 %v12069_v49  ;;  %v2100_v49 = vld [vmem:[#allocation7 + $0x1550] sm:$0xff] }
 0x3aa   :  { %8450 = vmatpush2.bf16.msra.mxu1 %v12197_v62  ;;  %8408 = vmatprep.subr.bf16.mxu0 %v12062_v61  ;;  %v2104_v62 = vld [vmem:[#allocation7 + $0x1570] sm:$0xff] }
 0x3ab   :  { %8451 = vmatprep.subr.bf16.mxu1 %v12190_v6  ;;  %v12421_v50 = vcombine.low %v2100_v49, %v2104_v62 }
 0x3ad   :  { %8409 = vmatpush2.bf16.msra.mxu0 %v12061_v14 }
 0x3ae   :  { %8452 = vmatpush2.bf16.msra.mxu1 %v12189_v60  ;;  %8464 = vmatprep.subr.bf16.mxu0 %v12310_v48  ;;  %v1964_v48 = vld [vmem:[#allocation7 + $0x1110] sm:$0xff] }
 0x3af   :  { %8507 = vmatprep.subr.bf16.mxu1 %v12438_v29  ;;  %v1968_v29 = vld [vmem:[#allocation7 + $0x1130] sm:$0xff] }
 0x3b0   :  { %v8154_v31 = vpop.f32.mrf.mxu0  ;;  %8411 = vmatmul.mubr.bf16.vlgmr.msra.gmra.mxu0 %v14117_v15 }
 0x3b1   :  { %v8155_v61 = vadd.f32 %v8154_v31, %v14259_v3  ;;  %v8197_v6 = vpop.f32.mrf.mxu1  ;;  %8454 = vmatmul.mubr.bf16.vlgmr.msra.gmra.mxu1 %v14119_v37  ;;  %8465 = vmatpush1.bf16.msra.mxu0 %v12309_v10  ;;  %v12422_v3 = vcombine.high %v2100_v49, %v2104_v62  ;;  %v2076_v49 = vld [vmem:[#allocation7 + $0x1490] sm:$0xff] }
 0x3b2   :  { %8496 = vmatprep.mubr.bf16.mxu0 %v14121_v41  ;;  %8508 = vmatpush1.bf16.msra.mxu1 %v12437_v17  ;;  %v14275_v52 = vpop.f32.mrf.mxu0  ;;  %v12293_v17 = vcombine.low %v1972_v63, %v1976_v35  ;;  %v1948_v35 = vld [vmem:[#allocation7 + $0x1090] sm:$0xff] }
 0x3b3   :  { %14508 = vst [vmem:[#allocation41_spill] sm:$0xff] %v14275_v52  ;;  %v14277_v14 = vadd.f32 %v8197_v6, %v8155_v61  ;;  %8539 = vmatprep.mubr.bf16.mxu1 %v14124_v44  ;;  %v14280_v60 = vpop.f32.mrf.mxu1  ;;  %8466 = vmatprep.subr.bf16.mxu0 %v12302_v33  ;;  %v12286_v61 = vcombine.high %v1964_v48, %v1968_v29  ;;  %v2088_v52 = vld [vmem:[#allocation7 + $0x14f0] sm:$0xff] }
 0x3b4   :  { %14509 = vst [vmem:[#allocation42_spill] sm:$0xff] %v14280_v60  ;;  %v8158_v31 = vpop.f32.mrf.mxu0  ;;  %8509 = vmatprep.subr.bf16.mxu1 %v12430_v32  ;;  %v12414_v33 = vcombine.high %v2092_v2, %v2096_v11  ;;  %v1956_v60 = vld [vmem:[#allocation7 + $0x10d0] sm:$0xff]  ;;  %v12285_v32 = vcombine.low %v1964_v48, %v1968_v29  ;;  %v12406_v63 = vcombine.high %v2084_v59, %v2088_v52 }
 0x3b5   :  { %v8159_v10 = vadd.f32 %v8158_v31, %v14265_v55  ;;  %8467 = vmatpush1.bf16.msra.mxu0 %v12301_v56  ;;  %v8201_v36 = vpop.f32.mrf.mxu1  ;;  %v12413_v55 = vcombine.low %v2092_v2, %v2096_v11  ;;  %v12278_v56 = vcombine.high %v1956_v60, %v1960_v26  ;;  %v2080_v62 = vld [vmem:[#allocation7 + $0x14b0] sm:$0xff] }
 0x3b6   :  { %8510 = vmatpush1.bf16.msra.mxu1 %v12429_v13  ;;  %8468 = vmatprep.subr.bf16.mxu0 %v12294_v38  ;;  %v1952_v13 = vld [vmem:[#allocation7 + $0x10b0] sm:$0xff]  ;;  %v12277_v38 = vcombine.low %v1956_v60, %v1960_v26  ;;  %v12397_v11 = vcombine.low %v2076_v49, %v2080_v62 }
 0x3b7   :  { %v14283_v6 = vadd.f32 %v8201_v36, %v8159_v10  ;;  %8511 = vmatprep.subr.bf16.mxu1 %v12422_v3  ;;  %v12405_v3 = vcombine.low %v2084_v59, %v2088_v52  ;;  %v12270_v31 = vcombine.high %v1948_v35, %v1952_v13  ;;  %v12398_v10 = vcombine.high %v2076_v49, %v2080_v62  ;;  %v1944_v48 = vld [vmem:[#allocation7 + $0x1070] sm:$0xff] }
 0x3b8   :  { %v2068_v29 = vld [vmem:[#allocation7 + $0x1450] sm:$0xff]  ;;  %v12269_v2 = vcombine.low %v1948_v35, %v1952_v13 }
 0x3b9   :  { %8469 = vmatpush1.bf16.msra.mxu0 %v12293_v17  ;;  %v1940_v17 = vld [vmem:[#allocation7 + $0x1050] sm:$0xff] }
 0x3ba   :  { %8512 = vmatpush1.bf16.msra.mxu1 %v12421_v50  ;;  %8470 = vmatprep.subr.bf16.mxu0 %v12286_v61  ;;  %v2072_v36 = vld [vmem:[#allocation7 + $0x1470] sm:$0xff]  ;;  %v12262_v50 = vcombine.high %v1940_v17, %v1944_v48  ;;  %v12261_v59 = vcombine.low %v1940_v17, %v1944_v48 }
 0x3bb   :  { %8513 = vmatprep.subr.bf16.mxu1 %v12414_v33  ;;  %v12390_v61 = vcombine.high %v2068_v29, %v2072_v36  ;;  %v1932_v33 = vld [vmem:[#allocation7 + $0x1010] sm:$0xff]  ;;  %v12389_v52 = vcombine.low %v2068_v29, %v2072_v36 }
 0x3bc   :  { %v1936_v26 = vld [vmem:[#allocation7 + $0x1030] sm:$0xff] }
 0x3bd   :  { %8471 = vmatpush1.bf16.msra.mxu0 %v12285_v32  ;;  %v2060_v60 = vld [vmem:[#allocation7 + $0x1410] sm:$0xff]  ;;  %v12253_v49 = vcombine.low %v1932_v33, %v1936_v26 }
 0x3be   :  { %8514 = vmatpush1.bf16.msra.mxu1 %v12413_v55  ;;  %8472 = vmatprep.subr.bf16.mxu0 %v12278_v56  ;;  %v2064_v32 = vld [vmem:[#allocation7 + $0x1430] sm:$0xff]  ;;  %v12254_v55 = vcombine.high %v1932_v33, %v1936_v26 }
 0x3bf   :  { %8515 = vmatprep.subr.bf16.mxu1 %v12406_v63  ;;  %v12382_v56 = vcombine.high %v2060_v60, %v2064_v32  ;;  %v2052_v63 = vld [vmem:[#allocation7 + $0x13d0] sm:$0xff]  ;;  %v12381_v62 = vcombine.low %v2060_v60, %v2064_v32 }
 0x3c0   :  { %v2056_v35 = vld [vmem:[#allocation7 + $0x13f0] sm:$0xff] }
 0x3c1   :  { %8473 = vmatpush1.bf16.msra.mxu0 %v12277_v38  ;;  %v2180_v13 = vld [vmem:[#allocation7 + $0x17d0] sm:$0xff]  ;;  %v12373_v29 = vcombine.low %v2052_v63, %v2056_v35 }
 0x3c2   :  { %8516 = vmatpush1.bf16.msra.mxu1 %v12405_v3  ;;  %8474 = vmatprep.subr.bf16.mxu0 %v12270_v31  ;;  %v2184_v38 = vld [vmem:[#allocation7 + $0x17f0] sm:$0xff]  ;;  %v12374_v3 = vcombine.high %v2052_v63, %v2056_v35 }
 0x3c3   :  { %8517 = vmatprep.subr.bf16.mxu1 %v12398_v10  ;;  %v12502_v31 = vcombine.high %v2180_v13, %v2184_v38  ;;  %v2044_v10 = vld [vmem:[#allocation7 + $0x1390] sm:$0xff]  ;;  %v12501_v36 = vcombine.low %v2180_v13, %v2184_v38 }
 0x3c4   :  { %v2048_v17 = vld [vmem:[#allocation7 + $0x13b0] sm:$0xff] }
 0x3c5   :  { %8475 = vmatpush1.bf16.msra.mxu0 %v12269_v2  ;;  %v2172_v48 = vld [vmem:[#allocation7 + $0x1790] sm:$0xff]  ;;  %v12365_v60 = vcombine.low %v2044_v10, %v2048_v17 }
 0x3c6   :  { %8518 = vmatpush1.bf16.msra.mxu1 %v12397_v11  ;;  %8476 = vmatprep.subr.bf16.mxu0 %v12262_v50  ;;  %v2176_v2 = vld [vmem:[#allocation7 + $0x17b0] sm:$0xff]  ;;  %v12366_v11 = vcombine.high %v2044_v10, %v2048_v17 }
 0x3c7   :  { %8519 = vmatprep.subr.bf16.mxu1 %v12390_v61  ;;  %v12494_v50 = vcombine.high %v2172_v48, %v2176_v2  ;;  %v2036_v61 = vld [vmem:[#allocation7 + $0x1350] sm:$0xff]  ;;  %v12493_v32 = vcombine.low %v2172_v48, %v2176_v2 }
 0x3c8   :  { %v2040_v33 = vld [vmem:[#allocation7 + $0x1370] sm:$0xff] }
 0x3c9   :  { %8477 = vmatpush1.bf16.msra.mxu0 %v12261_v59  ;;  %v2164_v26 = vld [vmem:[#allocation7 + $0x1750] sm:$0xff]  ;;  %v12357_v13 = vcombine.low %v2036_v61, %v2040_v33 }
 0x3ca   :  { %8520 = vmatpush1.bf16.msra.mxu1 %v12389_v52  ;;  %8478 = vmatprep.subr.bf16.mxu0 %v12254_v55  ;;  %v2168_v59 = vld [vmem:[#allocation7 + $0x1770] sm:$0xff]  ;;  %v12358_v52 = vcombine.high %v2036_v61, %v2040_v33 }
 0x3cb   :  { %8521 = vmatprep.subr.bf16.mxu1 %v12382_v56  ;;  %v12486_v55 = vcombine.high %v2164_v26, %v2168_v59  ;;  %v2028_v56 = vld [vmem:[#allocation7 + $0x1310] sm:$0xff]  ;;  %v12485_v38 = vcombine.low %v2164_v26, %v2168_v59 }
 0x3cc   :  { %v2032_v63 = vld [vmem:[#allocation7 + $0x1330] sm:$0xff] }
 0x3cd   :  { %8479 = vmatpush1.bf16.msra.mxu0 %v12253_v49  ;;  %v2156_v35 = vld [vmem:[#allocation7 + $0x1710] sm:$0xff]  ;;  %v12349_v48 = vcombine.low %v2028_v56, %v2032_v63 }
 0x3ce   :  { %8522 = vmatpush1.bf16.msra.mxu1 %v12381_v62  ;;  %8480 = vmatprep.subr.bf16.mxu0 %v12374_v3  ;;  %v2160_v49 = vld [vmem:[#allocation7 + $0x1730] sm:$0xff]  ;;  %v12350_v62 = vcombine.high %v2028_v56, %v2032_v63 }
 0x3cf   :  { %8523 = vmatprep.subr.bf16.mxu1 %v12502_v31  ;;  %v12478_v3 = vcombine.high %v2156_v35, %v2160_v49  ;;  %v2020_v31 = vld [vmem:[#allocation7 + $0x12d0] sm:$0xff]  ;;  %v12477_v2 = vcombine.low %v2156_v35, %v2160_v49 }
 0x3d0   :  { %v2024_v10 = vld [vmem:[#allocation7 + $0x12f0] sm:$0xff] }
 0x3d1   :  { %8481 = vmatpush2.bf16.msra.mxu0 %v12373_v29  ;;  %v2148_v17 = vld [vmem:[#allocation7 + $0x16d0] sm:$0xff]  ;;  %v12341_v26 = vcombine.low %v2020_v31, %v2024_v10 }
 0x3d2   :  { %8524 = vmatpush2.bf16.msra.mxu1 %v12501_v36  ;;  %8482 = vmatprep.subr.bf16.mxu0 %v12366_v11  ;;  %v2152_v29 = vld [vmem:[#allocation7 + $0x16f0] sm:$0xff]  ;;  %v12342_v36 = vcombine.high %v2020_v31, %v2024_v10 }
 0x3d3   :  { %8525 = vmatprep.subr.bf16.mxu1 %v12494_v50  ;;  %v12470_v11 = vcombine.high %v2148_v17, %v2152_v29  ;;  %v2012_v50 = vld [vmem:[#allocation7 + $0x1290] sm:$0xff]  ;;  %v12469_v59 = vcombine.low %v2148_v17, %v2152_v29 }
 0x3d4   :  { %v2016_v61 = vld [vmem:[#allocation7 + $0x12b0] sm:$0xff] }
 0x3d5   :  { %8483 = vmatpush2.bf16.msra.mxu0 %v12365_v60  ;;  %v2140_v33 = vld [vmem:[#allocation7 + $0x1690] sm:$0xff]  ;;  %v12333_v35 = vcombine.low %v2012_v50, %v2016_v61 }
 0x3d6   :  { %8526 = vmatpush2.bf16.msra.mxu1 %v12493_v32  ;;  %8484 = vmatprep.subr.bf16.mxu0 %v12358_v52  ;;  %v2144_v60 = vld [vmem:[#allocation7 + $0x16b0] sm:$0xff]  ;;  %v12334_v32 = vcombine.high %v2012_v50, %v2016_v61 }
 0x3d7   :  { %8527 = vmatprep.subr.bf16.mxu1 %v12486_v55  ;;  %v12462_v52 = vcombine.high %v2140_v33, %v2144_v60  ;;  %v2004_v55 = vld [vmem:[#allocation7 + $0x1250] sm:$0xff]  ;;  %v12461_v49 = vcombine.low %v2140_v33, %v2144_v60 }
 0x3d8   :  { %v2008_v56 = vld [vmem:[#allocation7 + $0x1270] sm:$0xff] }
 0x3d9   :  { %8485 = vmatpush2.bf16.msra.mxu0 %v12357_v13  ;;  %v2132_v63 = vld [vmem:[#allocation7 + $0x1650] sm:$0xff]  ;;  %v12325_v17 = vcombine.low %v2004_v55, %v2008_v56 }
 0x3da   :  { %8528 = vmatpush2.bf16.msra.mxu1 %v12485_v38  ;;  %8486 = vmatprep.subr.bf16.mxu0 %v12350_v62  ;;  %v2136_v13 = vld [vmem:[#allocation7 + $0x1670] sm:$0xff]  ;;  %v12326_v38 = vcombine.high %v2004_v55, %v2008_v56 }
 0x3db   :  { %8529 = vmatprep.subr.bf16.mxu1 %v12478_v3  ;;  %v12454_v62 = vcombine.high %v2132_v63, %v2136_v13  ;;  %v1996_v3 = vld [vmem:[#allocation7 + $0x1210] sm:$0xff]  ;;  %v12453_v29 = vcombine.low %v2132_v63, %v2136_v13 }
 0x3dc   :  { %v2000_v31 = vld [vmem:[#allocation7 + $0x1230] sm:$0xff] }
 0x3dd   :  { %8487 = vmatpush2.bf16.msra.mxu0 %v12349_v48  ;;  %v2124_v10 = vld [vmem:[#allocation7 + $0x1610] sm:$0xff]  ;;  %v12317_v33 = vcombine.low %v1996_v3, %v2000_v31 }
 0x3de   :  { %8530 = vmatpush2.bf16.msra.mxu1 %v12477_v2  ;;  %8488 = vmatprep.subr.bf16.mxu0 %v12342_v36  ;;  %v2128_v48 = vld [vmem:[#allocation7 + $0x1630] sm:$0xff]  ;;  %v12318_v2 = vcombine.high %v1996_v3, %v2000_v31 }
 0x3df   :  { %8531 = vmatprep.subr.bf16.mxu1 %v12470_v11  ;;  %v12446_v36 = vcombine.high %v2124_v10, %v2128_v48  ;;  %v2244_v11 = vld [vmem:[#allocation7 + $0x19d0] sm:$0xff]  ;;  %v12445_v60 = vcombine.low %v2124_v10, %v2128_v48 }
 0x3e0   :  { %v2248_v50 = vld [vmem:[#allocation7 + $0x19f0] sm:$0xff] }
 0x3e1   :  { %8489 = vmatpush2.bf16.msra.mxu0 %v12341_v26  ;;  %v2372_v61 = vld [vmem:[#allocation7 + $0x1dd0] sm:$0xff]  ;;  %v12565_v56 = vcombine.low %v2244_v11, %v2248_v50 }
 0x3e2   :  { %8532 = vmatpush2.bf16.msra.mxu1 %v12469_v59  ;;  %8490 = vmatprep.subr.bf16.mxu0 %v12334_v32  ;;  %v2376_v26 = vld [vmem:[#allocation7 + $0x1df0] sm:$0xff]  ;;  %v12566_v59 = vcombine.high %v2244_v11, %v2248_v50 }
 0x3e3   :  { %8533 = vmatprep.subr.bf16.mxu1 %v12462_v52  ;;  %v12694_v32 = vcombine.high %v2372_v61, %v2376_v26  ;;  %v2236_v52 = vld [vmem:[#allocation7 + $0x1990] sm:$0xff] }
 0x3e4   :  { %v2240_v55 = vld [vmem:[#allocation7 + $0x19b0] sm:$0xff] }
 0x3e5   :  { %8491 = vmatpush2.bf16.msra.mxu0 %v12333_v35  ;;  %v2364_v63 = vld [vmem:[#allocation7 + $0x1d90] sm:$0xff]  ;;  %v14285_v35 = vpop.f32.mrf.mxu0  ;;  %v12557_v11 = vcombine.low %v2236_v52, %v2240_v55 }
 0x3e6   :  { %8534 = vmatpush2.bf16.msra.mxu1 %v12461_v49  ;;  %8492 = vmatprep.subr.bf16.mxu0 %v12326_v38  ;;  %v2368_v13 = vld [vmem:[#allocation7 + $0x1db0] sm:$0xff]  ;;  %14510 = vst [vmem:[#allocation43_spill] sm:$0xff] %v14285_v35  ;;  %v12693_v49 = vcombine.low %v2372_v61, %v2376_v26  ;;  %v14287_v38 = vpop.f32.mrf.mxu1 }
 0x3e7   :  { %8535 = vmatprep.subr.bf16.mxu1 %v12454_v62  ;;  %14511 = vst [vmem:[#allocation44_spill] sm:$0xff] %v14287_v38  ;;  %v12558_v62 = vcombine.high %v2236_v52, %v2240_v55  ;;  %v2228_v3 = vld [vmem:[#allocation7 + $0x1950] sm:$0xff]  ;;  %v12686_v48 = vcombine.high %v2364_v63, %v2368_v13  ;;  %v12685_v61 = vcombine.low %v2364_v63, %v2368_v13 }
 0x3e8   :  { %v2232_v31 = vld [vmem:[#allocation7 + $0x1970] sm:$0xff] }
 0x3e9   :  { %8493 = vmatpush2.bf16.msra.mxu0 %v12325_v17  ;;  %v2356_v17 = vld [vmem:[#allocation7 + $0x1d50] sm:$0xff]  ;;  %v12550_v26 = vcombine.high %v2228_v3, %v2232_v31 }
 0x3ea   :  { %8536 = vmatpush2.bf16.msra.mxu1 %v12453_v29  ;;  %8494 = vmatprep.subr.bf16.mxu0 %v12318_v2  ;;  %v2360_v29 = vld [vmem:[#allocation7 + $0x1d70] sm:$0xff] }
 0x3eb   :  { %8537 = vmatprep.subr.bf16.mxu1 %v12446_v36  ;;  %v2352_v52 = vld [vmem:[#allocation7 + $0x1d30] sm:$0xff]  ;;  %v12677_v63 = vcombine.low %v2356_v17, %v2360_v29 }
 0x3ec   :  { %v2340_v38 = vld [vmem:[#allocation7 + $0x1cd0] sm:$0xff] }
 0x3ed   :  { %8495 = vmatpush2.bf16.msra.mxu0 %v12317_v33 }
 0x3ee   :  { %8538 = vmatpush2.bf16.msra.mxu1 %v12445_v60  ;;  %8550 = vmatprep.subr.bf16.mxu0 %v12566_v59  ;;  %v12678_v59 = vcombine.high %v2356_v17, %v2360_v29  ;;  %v12662_v17 = vcombine.high %v2340_v38, %v2344_v22  ;;  %v2204_v29 = vld [vmem:[#allocation7 + $0x1890] sm:$0xff] }
 0x3ef   :  { %8593 = vmatprep.subr.bf16.mxu1 %v12694_v32  ;;  %v2224_v32 = vld [vmem:[#allocation7 + $0x1930] sm:$0xff] }
 0x3f0   :  { %v8240_v10 = vpop.f32.mrf.mxu0  ;;  %8497 = vmatmul.mubr.bf16.vlgmr.msra.gmra.mxu0 %v14155_v42 }
 0x3f1   :  { %v8241_v2 = vadd.f32 %v8240_v10, %v14277_v14  ;;  %v8283_v36 = vpop.f32.mrf.mxu1  ;;  %8540 = vmatmul.mubr.bf16.vlgmr.msra.gmra.mxu1 %v14157_v19  ;;  %8551 = vmatpush1.bf16.msra.mxu0 %v12565_v56  ;;  %v2220_v14 = vld [vmem:[#allocation7 + $0x1910] sm:$0xff] }
 0x3f2   :  { %8582 = vmatprep.mubr.bf16.mxu0 %v14159_v46  ;;  %8594 = vmatpush1.bf16.msra.mxu1 %v12693_v49  ;;  %v14293_v50 = vpop.f32.mrf.mxu0  ;;  %v2348_v56 = vld [vmem:[#allocation7 + $0x1d10] sm:$0xff]  ;;  %v12549_v49 = vcombine.low %v2228_v3, %v2232_v31  ;;  %v12542_v13 = vcombine.high %v2220_v14, %v2224_v32  ;;  %v12541_v4 = vcombine.low %v2220_v14, %v2224_v32 }
 0x3f3   :  { %14512 = vst [vmem:[#allocation45_spill] sm:$0xff] %v14293_v50  ;;  %v8284_v33 = vadd.f32 %v8283_v36, %v8241_v2  ;;  %8625 = vmatprep.mubr.bf16.mxu1 %v14162_v58  ;;  %v14296_v60 = vpop.f32.mrf.mxu1  ;;  %8552 = vmatprep.subr.bf16.mxu0 %v12558_v62  ;;  %v12670_v36 = vcombine.high %v2348_v56, %v2352_v52  ;;  %v2212_v62 = vld [vmem:[#allocation7 + $0x18d0] sm:$0xff] }
 0x3f4   :  { %14513 = vst [vmem:[#allocation46_spill] sm:$0xff] %v14296_v60  ;;  %v8244_v10 = vpop.f32.mrf.mxu0  ;;  %8595 = vmatprep.subr.bf16.mxu1 %v12686_v48  ;;  %v2216_v60 = vld [vmem:[#allocation7 + $0x18f0] sm:$0xff] }
 0x3f5   :  { %v8245_v55 = vadd.f32 %v8244_v10, %v14283_v6  ;;  %8553 = vmatpush1.bf16.msra.mxu0 %v12557_v11  ;;  %v8287_v50 = vpop.f32.mrf.mxu1  ;;  %v8982_v35 = vmax.f32 %v8284_v33, 0.0  ;;  %v12669_v6 = vcombine.low %v2348_v56, %v2352_v52  ;;  %v12534_v3 = vcombine.high %v2212_v62, %v2216_v60  ;;  %v2208_v11 = vld [vmem:[#allocation7 + $0x18b0] sm:$0xff] }
 0x3f6   :  { %8596 = vmatpush1.bf16.msra.mxu1 %v12685_v61  ;;  %8554 = vmatprep.subr.bf16.mxu0 %v12550_v26  ;;  %v2336_v61 = vld [vmem:[#allocation7 + $0x1cb0] sm:$0xff]  ;;  %v12533_v26 = vcombine.low %v2212_v62, %v2216_v60  ;;  %v12661_v33 = vcombine.low %v2340_v38, %v2344_v22 }
 0x3f7   :  { %v8288_v2 = vadd.f32 %v8287_v50, %v8245_v55  ;;  %8597 = vmatprep.subr.bf16.mxu1 %v12678_v59  ;;  %v2332_v50 = vld [vmem:[#allocation7 + $0x1c90] sm:$0xff]  ;;  %v12526_v59 = vcombine.high %v2204_v29, %v2208_v11 }
 0x3f8   :  { %v12654_v14 = vcombine.high %v2332_v50, %v2336_v61  ;;  %v2196_v32 = vld [vmem:[#allocation7 + $0x1850] sm:$0xff]  ;;  %v12653_v55 = vcombine.low %v2332_v50, %v2336_v61 }
 0x3f9   :  { %v8990_v48 = vmax.f32 %v8288_v2, 0.0  ;;  %8555 = vmatpush1.bf16.msra.mxu0 %v12549_v49  ;;  %v2200_v10 = vld [vmem:[#allocation7 + $0x1870] sm:$0xff] }
 0x3fa   :  { %8598 = vmatpush1.bf16.msra.mxu1 %v12677_v63  ;;  %8556 = vmatprep.subr.bf16.mxu0 %v12542_v13  ;;  %v2324_v56 = vld [vmem:[#allocation7 + $0x1c50] sm:$0xff]  ;;  %v12518_v49 = vcombine.high %v2196_v32, %v2200_v10  ;;  %v12517_v22 = vcombine.low %v2196_v32, %v2200_v10 }
 0x3fb   :  { %v14299_v31 = vpack.c.bf16 %v8990_v48, %v8982_v35  ;;  %8599 = vmatprep.subr.bf16.mxu1 %v12670_v36  ;;  %v2328_v52 = vld [vmem:[#allocation7 + $0x1c70] sm:$0xff]  ;;  %v12525_v35 = vcombine.low %v2204_v29, %v2208_v11 }
 0x3fc   :  { %v12646_v63 = vcombine.high %v2324_v56, %v2328_v52  ;;  %v2192_v60 = vld [vmem:[#allocation7 + $0x1830] sm:$0xff]  ;;  %v12645_v38 = vcombine.low %v2324_v56, %v2328_v52 }
 0x3fd   :  { %14514 = vst [vmem:[#allocation47_spill] sm:$0xff] %v14299_v31  ;;  %8557 = vmatpush1.bf16.msra.mxu0 %v12541_v4  ;;  %v2188_v4 = vld [vmem:[#allocation7 + $0x1810] sm:$0xff] }
 0x3fe   :  { %8600 = vmatpush1.bf16.msra.mxu1 %v12669_v6  ;;  %8558 = vmatprep.subr.bf16.mxu0 %v12534_v3  ;;  %v2316_v13 = vld [vmem:[#allocation7 + $0x1c10] sm:$0xff]  ;;  %v12510_v36 = vcombine.high %v2188_v4, %v2192_v60  ;;  %v12509_v29 = vcombine.low %v2188_v4, %v2192_v60 }
 0x3ff   :  { %8601 = vmatprep.subr.bf16.mxu1 %v12662_v17  ;;  %v2320_v2 = vld [vmem:[#allocation7 + $0x1c30] sm:$0xff] }
 0x400   :  { %v12638_v62 = vcombine.high %v2316_v13, %v2320_v2  ;;  %v2308_v48 = vld [vmem:[#allocation7 + $0x1bd0] sm:$0xff]  ;;  %v12637_v11 = vcombine.low %v2316_v13, %v2320_v2 }
 0x401   :  { %8559 = vmatpush1.bf16.msra.mxu0 %v12533_v26  ;;  %v2312_v6 = vld [vmem:[#allocation7 + $0x1bf0] sm:$0xff] }
 0x402   :  { %8602 = vmatpush1.bf16.msra.mxu1 %v12661_v33  ;;  %8560 = vmatprep.subr.bf16.mxu0 %v12526_v59  ;;  %v2436_v3 = vld [vmem:[#allocation7 + $0x1fd0] sm:$0xff]  ;;  %v12630_v50 = vcombine.high %v2308_v48, %v2312_v6  ;;  %v12629_v32 = vcombine.low %v2308_v48, %v2312_v6 }
 0x403   :  { %8603 = vmatprep.subr.bf16.mxu1 %v12654_v14  ;;  %v2440_v17 = vld [vmem:[#allocation7 + $0x1ff0] sm:$0xff] }
 0x404   :  { %v12758_v61 = vcombine.high %v2436_v3, %v2440_v17  ;;  %v2300_v26 = vld [vmem:[#allocation7 + $0x1b90] sm:$0xff]  ;;  %v12757_v10 = vcombine.low %v2436_v3, %v2440_v17 }
 0x405   :  { %8561 = vmatpush1.bf16.msra.mxu0 %v12525_v35  ;;  %v2304_v33 = vld [vmem:[#allocation7 + $0x1bb0] sm:$0xff] }
 0x406   :  { %8604 = vmatpush1.bf16.msra.mxu1 %v12653_v55  ;;  %8562 = vmatprep.subr.bf16.mxu0 %v12518_v49  ;;  %v2428_v59 = vld [vmem:[#allocation7 + $0x1f90] sm:$0xff]  ;;  %v12622_v56 = vcombine.high %v2300_v26, %v2304_v33  ;;  %v12621_v4 = vcombine.low %v2300_v26, %v2304_v33 }
 0x407   :  { %8605 = vmatprep.subr.bf16.mxu1 %v12646_v63  ;;  %v2432_v14 = vld [vmem:[#allocation7 + $0x1fb0] sm:$0xff] }
 0x408   :  { %v12750_v52 = vcombine.high %v2428_v59, %v2432_v14  ;;  %v2292_v35 = vld [vmem:[#allocation7 + $0x1b50] sm:$0xff]  ;;  %v12749_v60 = vcombine.low %v2428_v59, %v2432_v14 }
 0x409   :  { %8563 = vmatpush1.bf16.msra.mxu0 %v12517_v22  ;;  %v2296_v55 = vld [vmem:[#allocation7 + $0x1b70] sm:$0xff] }
 0x40a   :  { %8606 = vmatpush1.bf16.msra.mxu1 %v12645_v38  ;;  %8564 = vmatprep.subr.bf16.mxu0 %v12510_v36  ;;  %v2420_v49 = vld [vmem:[#allocation7 + $0x1f50] sm:$0xff]  ;;  %v12614_v13 = vcombine.high %v2292_v35, %v2296_v55  ;;  %v12613_v48 = vcombine.low %v2292_v35, %v2296_v55 }
 0x40b   :  { %8607 = vmatprep.subr.bf16.mxu1 %v12638_v62  ;;  %v2424_v63 = vld [vmem:[#allocation7 + $0x1f70] sm:$0xff] }
 0x40c   :  { %v12742_v2 = vcombine.high %v2420_v49, %v2424_v63  ;;  %v2284_v22 = vld [vmem:[#allocation7 + $0x1b10] sm:$0xff]  ;;  %v12741_v6 = vcombine.low %v2420_v49, %v2424_v63 }
 0x40d   :  { %8565 = vmatpush1.bf16.msra.mxu0 %v12509_v29  ;;  %v2288_v38 = vld [vmem:[#allocation7 + $0x1b30] sm:$0xff] }
 0x40e   :  { %8608 = vmatpush1.bf16.msra.mxu1 %v12637_v11  ;;  %8566 = vmatprep.subr.bf16.mxu0 %v12630_v50  ;;  %v2412_v36 = vld [vmem:[#allocation7 + $0x1f10] sm:$0xff]  ;;  %v12606_v3 = vcombine.high %v2284_v22, %v2288_v38  ;;  %v12605_v26 = vcombine.low %v2284_v22, %v2288_v38 }
 0x40f   :  { %8609 = vmatprep.subr.bf16.mxu1 %v12758_v61  ;;  %v2416_v62 = vld [vmem:[#allocation7 + $0x1f30] sm:$0xff] }
 0x410   :  { %v12734_v17 = vcombine.high %v2412_v36, %v2416_v62  ;;  %v2276_v29 = vld [vmem:[#allocation7 + $0x1ad0] sm:$0xff]  ;;  %v12733_v33 = vcombine.low %v2412_v36, %v2416_v62 }
 0x411   :  { %8567 = vmatpush2.bf16.msra.mxu0 %v12629_v32  ;;  %v2280_v11 = vld [vmem:[#allocation7 + $0x1af0] sm:$0xff] }
 0x412   :  { %8610 = vmatpush2.bf16.msra.mxu1 %v12757_v10  ;;  %8568 = vmatprep.subr.bf16.mxu0 %v12622_v56  ;;  %v2404_v50 = vld [vmem:[#allocation7 + $0x1ed0] sm:$0xff]  ;;  %v12598_v59 = vcombine.high %v2276_v29, %v2280_v11  ;;  %v12597_v35 = vcombine.low %v2276_v29, %v2280_v11 }
 0x413   :  { %8611 = vmatprep.subr.bf16.mxu1 %v12750_v52  ;;  %v2408_v61 = vld [vmem:[#allocation7 + $0x1ef0] sm:$0xff] }
 0x414   :  { %v12726_v14 = vcombine.high %v2404_v50, %v2408_v61  ;;  %v2268_v32 = vld [vmem:[#allocation7 + $0x1a90] sm:$0xff]  ;;  %v12725_v55 = vcombine.low %v2404_v50, %v2408_v61 }
 0x415   :  { %8569 = vmatpush2.bf16.msra.mxu0 %v12621_v4  ;;  %v2272_v10 = vld [vmem:[#allocation7 + $0x1ab0] sm:$0xff] }
 0x416   :  { %8612 = vmatpush2.bf16.msra.mxu1 %v12749_v60  ;;  %8570 = vmatprep.subr.bf16.mxu0 %v12614_v13  ;;  %v2396_v56 = vld [vmem:[#allocation7 + $0x1e90] sm:$0xff]  ;;  %v12590_v49 = vcombine.high %v2268_v32, %v2272_v10  ;;  %v12589_v22 = vcombine.low %v2268_v32, %v2272_v10 }
 0x417   :  { %8613 = vmatprep.subr.bf16.mxu1 %v12742_v2  ;;  %v2400_v52 = vld [vmem:[#allocation7 + $0x1eb0] sm:$0xff] }
 0x418   :  { %v12718_v63 = vcombine.high %v2396_v56, %v2400_v52  ;;  %v2260_v4 = vld [vmem:[#allocation7 + $0x1a50] sm:$0xff]  ;;  %v12717_v38 = vcombine.low %v2396_v56, %v2400_v52 }
 0x419   :  { %8571 = vmatpush2.bf16.msra.mxu0 %v12613_v48  ;;  %v2264_v60 = vld [vmem:[#allocation7 + $0x1a70] sm:$0xff] }
 0x41a   :  { %8614 = vmatpush2.bf16.msra.mxu1 %v12741_v6  ;;  %8572 = vmatprep.subr.bf16.mxu0 %v12606_v3  ;;  %v2388_v13 = vld [vmem:[#allocation7 + $0x1e50] sm:$0xff]  ;;  %v12582_v36 = vcombine.high %v2260_v4, %v2264_v60  ;;  %v12581_v29 = vcombine.low %v2260_v4, %v2264_v60  ;;  %v1597_v60 = vld [vmem:[#allocation7 + $0x598] sm:$0xff] }
 0x41b   :  { %8615 = vmatprep.subr.bf16.mxu1 %v12734_v17  ;;  %v2392_v2 = vld [vmem:[#allocation7 + $0x1e70] sm:$0xff] }
 0x41c   :  { %v12710_v62 = vcombine.high %v2388_v13, %v2392_v2  ;;  %v2252_v48 = vld [vmem:[#allocation7 + $0x1a10] sm:$0xff]  ;;  %v12709_v11 = vcombine.low %v2388_v13, %v2392_v2  ;;  %v1601_v13 = vld [vmem:[#allocation7 + $0x5b8] sm:$0xff]  ;;  %v14302_v2 = vpop.f32.mrf.mxu0 }
 0x41d   :  { %8573 = vmatpush2.bf16.msra.mxu0 %v12605_v26  ;;  %v2256_v6 = vld [vmem:[#allocation7 + $0x1a30] sm:$0xff]  ;;  %v1477_v26 = vld [vmem:[#allocation7 + $0x1d8] sm:$0xff] }
 0x41e   :  { %8616 = vmatpush2.bf16.msra.mxu1 %v12733_v33  ;;  %8574 = vmatprep.subr.bf16.mxu0 %v12598_v59  ;;  %v2380_v3 = vld [vmem:[#allocation7 + $0x1e10] sm:$0xff]  ;;  %v12574_v50 = vcombine.high %v2252_v48, %v2256_v6  ;;  %v1481_v33 = vld [vmem:[#allocation7 + $0x1f8] sm:$0xff]  ;;  %v12573_v32 = vcombine.low %v2252_v48, %v2256_v6 }
 0x41f   :  { %8617 = vmatprep.subr.bf16.mxu1 %v12726_v14  ;;  %v2384_v17 = vld [vmem:[#allocation7 + $0x1e30] sm:$0xff]  ;;  %v1605_v59 = vld [vmem:[#allocation7 + $0x5d8] sm:$0xff]  ;;  %v11800_v56 = vcombine.high %v1477_v26, %v1481_v33  ;;  %v11799_v4 = vcombine.low %v1477_v26, %v1481_v33  ;;  %v11919_v26 = vcombine.low %v1597_v60, %v1601_v13 }
 0x420   :  { %v12702_v61 = vcombine.high %v2380_v3, %v2384_v17  ;;  %v1609_v14 = vld [vmem:[#allocation7 + $0x5f8] sm:$0xff]  ;;  %v12701_v10 = vcombine.low %v2380_v3, %v2384_v17  ;;  %v11920_v3 = vcombine.high %v1597_v60, %v1601_v13 }
 0x421   :  { %8575 = vmatpush2.bf16.msra.mxu0 %v12597_v35  ;;  %v11928_v52 = vcombine.high %v1605_v59, %v1609_v14  ;;  %v1469_v35 = vld [vmem:[#allocation7 + $0x198] sm:$0xff] }
 0x422   :  { %8618 = vmatpush2.bf16.msra.mxu1 %v12725_v55  ;;  %8576 = vmatprep.subr.bf16.mxu0 %v12590_v49  ;;  %v1473_v55 = vld [vmem:[#allocation7 + $0x1b8] sm:$0xff]  ;;  %v13639_v49 = vld [vmem:[#allocation8] sm:$0xff] }
 0x423   :  { %8619 = vmatprep.subr.bf16.mxu1 %v12718_v63  ;;  %v2463_v63 = vrot.slane %v13639_v49, %v14090_v9  ;;  %v1465_v48 = vld [vmem:[#allocation7 + $0x178] sm:$0xff] }
 0x424   :  { %v1589_v17 = vld [vmem:[#allocation7 + $0x558] sm:$0xff] }
 0x425   :  { %8577 = vmatpush2.bf16.msra.mxu0 %v12589_v22  ;;  %v11927_v22 = vcombine.low %v1605_v59, %v1609_v14  ;;  %v1593_v9 = vld [vmem:[#allocation7 + $0x578] sm:$0xff] }
 0x426   :  { %8620 = vmatpush2.bf16.msra.mxu1 %v12717_v38  ;;  %8578 = vmatprep.subr.bf16.mxu0 %v12582_v36  ;;  %v14304_v38 = vpop.f32.mrf.mxu1  ;;  %v11792_v36 = vcombine.high %v1469_v35, %v1473_v55  ;;  %v11911_v60 = vcombine.low %v1589_v17, %v1593_v9 }
 0x427   :  { %8621 = vmatprep.subr.bf16.mxu1 %v12710_v62  ;;  %v1461_v62 = vld [vmem:[#allocation7 + $0x158] sm:$0xff] }
 0x428   :  { %v11784_v33 = vcombine.high %v1461_v62, %v1465_v48  ;;  %v11783_v49 = vcombine.low %v1461_v62, %v1465_v48  ;;  %v1437_v48 = vld [vmem:[#allocation7 + $0x98] sm:$0xff] }
 0x429   :  { %8579 = vmatpush2.bf16.msra.mxu0 %v12581_v29 }
 0x42a   :  { %8622 = vmatpush2.bf16.msra.mxu1 %v12709_v11  ;;  %8580 = vmatprep.subr.bf16.mxu0 %v12574_v50  ;;  %v11791_v50 = vcombine.low %v1469_v35, %v1473_v55  ;;  %v1581_v35 = vld [vmem:[#allocation7 + $0x518] sm:$0xff] }
 0x42b   :  { %8623 = vmatprep.subr.bf16.mxu1 %v12702_v61  ;;  %v1585_v55 = vld [vmem:[#allocation7 + $0x538] sm:$0xff] }
 0x42d   :  { %8581 = vmatpush2.bf16.msra.mxu0 %v12573_v32  ;;  %v11912_v32 = vcombine.high %v1589_v17, %v1593_v9  ;;  %v1565_v17 = vld [vmem:[#allocation7 + $0x498] sm:$0xff] }
 0x42e   :  { %8624 = vmatpush2.bf16.msra.mxu1 %v12701_v10  ;;  %8636 = vmatprep.subr.bf16.mxu0 %v11800_v56  ;;  %v1453_v10 = vld [vmem:[#allocation7 + $0x118] sm:$0xff] }
 0x42f   :  { %8679 = vmatprep.subr.bf16.mxu1 %v11928_v52  ;;  %v1457_v56 = vld [vmem:[#allocation7 + $0x138] sm:$0xff] }
 0x430   :  { %v8326_v6 = vpop.f32.mrf.mxu0  ;;  %8583 = vmatmul.mubr.bf16.vlgmr.msra.gmra.mxu0 %v14137_v24  ;;  %v11776_v13 = vcombine.high %v1453_v10, %v1457_v56  ;;  %v1569_v9 = vld [vmem:[#allocation7 + $0x4b8] sm:$0xff] }
 0x431   :  { %v8327_v29 = vadd.f32 %v8326_v6, %v2463_v63  ;;  %v8369_v11 = vpop.f32.mrf.mxu1  ;;  %8626 = vmatmul.mubr.bf16.vlgmr.msra.gmra.mxu1 %v14139_v28  ;;  %8637 = vmatpush1.bf16.msra.mxu0 %v11799_v4  ;;  %v1449_v6 = vld [vmem:[#allocation7 + $0xf8] sm:$0xff] }
 0x432   :  { %8668 = vmatprep.mubr.bf16.mxu0 %v14049_v51  ;;  %8680 = vmatpush1.bf16.msra.mxu1 %v11927_v22  ;;  %v14309_v61 = vpop.f32.mrf.mxu0 }
 0x433   :  { %v14311_v59 = vadd.f32 %v8369_v11, %v8327_v29  ;;  %8711 = vmatprep.mubr.bf16.mxu1 %v14055_v54  ;;  %v14314_v14 = vpop.f32.mrf.mxu1  ;;  %8638 = vmatprep.subr.bf16.mxu0 %v11792_v36  ;;  %v11904_v54 = vcombine.high %v1581_v35, %v1585_v55  ;;  %v1445_v36 = vld [vmem:[#allocation7 + $0xd8] sm:$0xff] }
 0x434   :  { %v8330_v52 = vpop.f32.mrf.mxu0  ;;  %8681 = vmatprep.subr.bf16.mxu1 %v11920_v3  ;;  %v1573_v29 = vld [vmem:[#allocation7 + $0x4d8] sm:$0xff]  ;;  %v11775_v3 = vcombine.low %v1453_v10, %v1457_v56 }
 0x435   :  { %v8331_v51 = vadd.f32 %v8330_v52, %v2463_v63  ;;  %8639 = vmatpush1.bf16.msra.mxu0 %v11791_v50  ;;  %v8373_v4 = vpop.f32.mrf.mxu1  ;;  %v1577_v11 = vld [vmem:[#allocation7 + $0x4f8] sm:$0xff]  ;;  %v11903_v63 = vcombine.low %v1581_v35, %v1585_v55  ;;  %v11768_v50 = vcombine.high %v1445_v36, %v1449_v6  ;;  %v11887_v55 = vcombine.low %v1565_v17, %v1569_v9 }
 0x436   :  { %8682 = vmatpush1.bf16.msra.mxu1 %v11919_v26  ;;  %8640 = vmatprep.subr.bf16.mxu0 %v11784_v33  ;;  %v11896_v62 = vcombine.high %v1573_v29, %v1577_v11  ;;  %v1441_v26 = vld [vmem:[#allocation7 + $0xb8] sm:$0xff]  ;;  %v11767_v33 = vcombine.low %v1445_v36, %v1449_v6 }
 0x437   :  { %v14316_v22 = vadd.f32 %v8373_v4, %v8331_v51  ;;  %8683 = vmatprep.subr.bf16.mxu1 %v11912_v32  ;;  %v11895_v32 = vcombine.low %v1573_v29, %v1577_v11  ;;  %v11760_v52 = vcombine.high %v1437_v48, %v1441_v26  ;;  %v11888_v51 = vcombine.high %v1565_v17, %v1569_v9  ;;  %v1433_v10 = vld [vmem:[#allocation7 + $0x78] sm:$0xff] }
 0x438   :  { %v1557_v56 = vld [vmem:[#allocation7 + $0x458] sm:$0xff]  ;;  %v11759_v35 = vcombine.low %v1437_v48, %v1441_v26 }
 0x439   :  { %8641 = vmatpush1.bf16.msra.mxu0 %v11783_v49  ;;  %v1429_v49 = vld [vmem:[#allocation7 + $0x58] sm:$0xff] }
 0x43a   :  { %8684 = vmatpush1.bf16.msra.mxu1 %v11911_v60  ;;  %8642 = vmatprep.subr.bf16.mxu0 %v11776_v13  ;;  %v1561_v4 = vld [vmem:[#allocation7 + $0x478] sm:$0xff]  ;;  %v11752_v60 = vcombine.high %v1429_v49, %v1433_v10  ;;  %v11751_v29 = vcombine.low %v1429_v49, %v1433_v10 }
 0x43b   :  { %8685 = vmatprep.subr.bf16.mxu1 %v11904_v54  ;;  %v11880_v13 = vcombine.high %v1557_v56, %v1561_v4  ;;  %v1421_v54 = vld [vmem:[#allocation7 + $0x18] sm:$0xff]  ;;  %v11879_v11 = vcombine.low %v1557_v56, %v1561_v4 }
 0x43c   :  { %v1425_v36 = vld [vmem:[#allocation7 + $0x38] sm:$0xff] }
 0x43d   :  { %8643 = vmatpush1.bf16.msra.mxu0 %v11775_v3  ;;  %v1549_v6 = vld [vmem:[#allocation7 + $0x418] sm:$0xff]  ;;  %v11743_v17 = vcombine.low %v1421_v54, %v1425_v36 }
 0x43e   :  { %8686 = vmatpush1.bf16.msra.mxu1 %v11903_v63  ;;  %8644 = vmatprep.subr.bf16.mxu0 %v11768_v50  ;;  %v1553_v3 = vld [vmem:[#allocation7 + $0x438] sm:$0xff]  ;;  %v11744_v63 = vcombine.high %v1421_v54, %v1425_v36 }
 0x43f   :  { %8687 = vmatprep.subr.bf16.mxu1 %v11896_v62  ;;  %v11872_v50 = vcombine.high %v1549_v6, %v1553_v3  ;;  %v1541_v62 = vld [vmem:[#allocation7 + $0x3d8] sm:$0xff]  ;;  %v11871_v9 = vcombine.low %v1549_v6, %v1553_v3 }
 0x440   :  { %v1545_v48 = vld [vmem:[#allocation7 + $0x3f8] sm:$0xff] }
 0x441   :  { %8645 = vmatpush1.bf16.msra.mxu0 %v11767_v33  ;;  %v1669_v26 = vld [vmem:[#allocation7 + $0x7d8] sm:$0xff]  ;;  %v11863_v56 = vcombine.low %v1541_v62, %v1545_v48 }
 0x442   :  { %8688 = vmatpush1.bf16.msra.mxu1 %v11895_v32  ;;  %8646 = vmatprep.subr.bf16.mxu0 %v11760_v52  ;;  %v1673_v33 = vld [vmem:[#allocation7 + $0x7f8] sm:$0xff]  ;;  %v11864_v32 = vcombine.high %v1541_v62, %v1545_v48 }
 0x443   :  { %8689 = vmatprep.subr.bf16.mxu1 %v11888_v51  ;;  %v11992_v52 = vcombine.high %v1669_v26, %v1673_v33  ;;  %v1533_v51 = vld [vmem:[#allocation7 + $0x398] sm:$0xff]  ;;  %v11991_v4 = vcombine.low %v1669_v26, %v1673_v33 }
 0x444   :  { %v1537_v49 = vld [vmem:[#allocation7 + $0x3b8] sm:$0xff] }
 0x445   :  { %8647 = vmatpush1.bf16.msra.mxu0 %v11759_v35  ;;  %v1661_v10 = vld [vmem:[#allocation7 + $0x798] sm:$0xff]  ;;  %v11855_v6 = vcombine.low %v1533_v51, %v1537_v49 }
 0x446   :  { %8690 = vmatpush1.bf16.msra.mxu1 %v11887_v55  ;;  %8648 = vmatprep.subr.bf16.mxu0 %v11752_v60  ;;  %v1665_v35 = vld [vmem:[#allocation7 + $0x7b8] sm:$0xff]  ;;  %v11856_v55 = vcombine.high %v1533_v51, %v1537_v49 }
 0x447   :  { %8691 = vmatprep.subr.bf16.mxu1 %v11880_v13  ;;  %v11984_v60 = vcombine.high %v1661_v10, %v1665_v35  ;;  %v1525_v13 = vld [vmem:[#allocation7 + $0x358] sm:$0xff]  ;;  %v11983_v3 = vcombine.low %v1661_v10, %v1665_v35 }
 0x448   :  { %v1529_v54 = vld [vmem:[#allocation7 + $0x378] sm:$0xff] }
 0x449   :  { %8649 = vmatpush1.bf16.msra.mxu0 %v11751_v29  ;;  %v1653_v36 = vld [vmem:[#allocation7 + $0x758] sm:$0xff]  ;;  %v11847_v26 = vcombine.low %v1525_v13, %v1529_v54 }
 0x44a   :  { %8692 = vmatpush1.bf16.msra.mxu1 %v11879_v11  ;;  %8650 = vmatprep.subr.bf16.mxu0 %v11744_v63  ;;  %v1657_v29 = vld [vmem:[#allocation7 + $0x778] sm:$0xff]  ;;  %v11848_v11 = vcombine.high %v1525_v13, %v1529_v54 }
 0x44b   :  { %8693 = vmatprep.subr.bf16.mxu1 %v11872_v50  ;;  %v11976_v63 = vcombine.high %v1653_v36, %v1657_v29  ;;  %v1517_v50 = vld [vmem:[#allocation7 + $0x318] sm:$0xff]  ;;  %v11975_v33 = vcombine.low %v1653_v36, %v1657_v29 }
 0x44c   :  { %v1521_v62 = vld [vmem:[#allocation7 + $0x338] sm:$0xff] }
 0x44d   :  { %8651 = vmatpush1.bf16.msra.mxu0 %v11743_v17  ;;  %v1645_v48 = vld [vmem:[#allocation7 + $0x718] sm:$0xff]  ;;  %v11839_v10 = vcombine.low %v1517_v50, %v1521_v62 }
 0x44e   :  { %8694 = vmatpush1.bf16.msra.mxu1 %v11871_v9  ;;  %8652 = vmatprep.subr.bf16.mxu0 %v11864_v32  ;;  %v1649_v17 = vld [vmem:[#allocation7 + $0x738] sm:$0xff]  ;;  %v11840_v9 = vcombine.high %v1517_v50, %v1521_v62 }
 0x44f   :  { %8695 = vmatprep.subr.bf16.mxu1 %v11992_v52  ;;  %v11968_v32 = vcombine.high %v1645_v48, %v1649_v17  ;;  %v1509_v52 = vld [vmem:[#allocation7 + $0x2d8] sm:$0xff]  ;;  %v11967_v35 = vcombine.low %v1645_v48, %v1649_v17 }
 0x450   :  { %v1513_v51 = vld [vmem:[#allocation7 + $0x2f8] sm:$0xff] }
 0x451   :  { %8653 = vmatpush2.bf16.msra.mxu0 %v11863_v56  ;;  %v1637_v49 = vld [vmem:[#allocation7 + $0x6d8] sm:$0xff]  ;;  %v11831_v36 = vcombine.low %v1509_v52, %v1513_v51 }
 0x452   :  { %8696 = vmatpush2.bf16.msra.mxu1 %v11991_v4  ;;  %8654 = vmatprep.subr.bf16.mxu0 %v11856_v55  ;;  %v1641_v56 = vld [vmem:[#allocation7 + $0x6f8] sm:$0xff]  ;;  %v11832_v4 = vcombine.high %v1509_v52, %v1513_v51 }
 0x453   :  { %8697 = vmatprep.subr.bf16.mxu1 %v11984_v60  ;;  %v11960_v55 = vcombine.high %v1637_v49, %v1641_v56  ;;  %v1501_v60 = vld [vmem:[#allocation7 + $0x298] sm:$0xff]  ;;  %v11959_v29 = vcombine.low %v1637_v49, %v1641_v56 }
 0x454   :  { %v1505_v13 = vld [vmem:[#allocation7 + $0x2b8] sm:$0xff] }
 0x455   :  { %8655 = vmatpush2.bf16.msra.mxu0 %v11855_v6  ;;  %v1629_v54 = vld [vmem:[#allocation7 + $0x698] sm:$0xff]  ;;  %v11823_v48 = vcombine.low %v1501_v60, %v1505_v13 }
 0x456   :  { %8698 = vmatpush2.bf16.msra.mxu1 %v11983_v3  ;;  %8656 = vmatprep.subr.bf16.mxu0 %v11848_v11  ;;  %v1633_v6 = vld [vmem:[#allocation7 + $0x6b8] sm:$0xff]  ;;  %v11824_v3 = vcombine.high %v1501_v60, %v1505_v13 }
 0x457   :  { %8699 = vmatprep.subr.bf16.mxu1 %v11976_v63  ;;  %v11952_v11 = vcombine.high %v1629_v54, %v1633_v6  ;;  %v1493_v63 = vld [vmem:[#allocation7 + $0x258] sm:$0xff]  ;;  %v11951_v17 = vcombine.low %v1629_v54, %v1633_v6 }
 0x458   :  { %v1497_v50 = vld [vmem:[#allocation7 + $0x278] sm:$0xff] }
 0x459   :  { %8657 = vmatpush2.bf16.msra.mxu0 %v11847_v26  ;;  %v1621_v62 = vld [vmem:[#allocation7 + $0x658] sm:$0xff]  ;;  %v11815_v49 = vcombine.low %v1493_v63, %v1497_v50 }
 0x45a   :  { %8700 = vmatpush2.bf16.msra.mxu1 %v11975_v33  ;;  %8658 = vmatprep.subr.bf16.mxu0 %v11840_v9  ;;  %v1625_v26 = vld [vmem:[#allocation7 + $0x678] sm:$0xff]  ;;  %v11816_v33 = vcombine.high %v1493_v63, %v1497_v50 }
 0x45b   :  { %8701 = vmatprep.subr.bf16.mxu1 %v11968_v32  ;;  %v11944_v9 = vcombine.high %v1621_v62, %v1625_v26  ;;  %v1485_v32 = vld [vmem:[#allocation7 + $0x218] sm:$0xff]  ;;  %v11943_v56 = vcombine.low %v1621_v62, %v1625_v26 }
 0x45c   :  { %v1489_v52 = vld [vmem:[#allocation7 + $0x238] sm:$0xff] }
 0x45d   :  { %8659 = vmatpush2.bf16.msra.mxu0 %v11839_v10  ;;  %v1613_v51 = vld [vmem:[#allocation7 + $0x618] sm:$0xff]  ;;  %v11807_v54 = vcombine.low %v1485_v32, %v1489_v52 }
 0x45e   :  { %8702 = vmatpush2.bf16.msra.mxu1 %v11967_v35  ;;  %8660 = vmatprep.subr.bf16.mxu0 %v11832_v4  ;;  %v1617_v10 = vld [vmem:[#allocation7 + $0x638] sm:$0xff]  ;;  %v11808_v35 = vcombine.high %v1485_v32, %v1489_v52 }
 0x45f   :  { %8703 = vmatprep.subr.bf16.mxu1 %v11960_v55  ;;  %v11936_v4 = vcombine.high %v1613_v51, %v1617_v10  ;;  %v1733_v55 = vld [vmem:[#allocation7 + $0x9d8] sm:$0xff]  ;;  %v11935_v6 = vcombine.low %v1613_v51, %v1617_v10 }
 0x460   :  { %v1737_v60 = vld [vmem:[#allocation7 + $0x9f8] sm:$0xff] }
 0x461   :  { %8661 = vmatpush2.bf16.msra.mxu0 %v11831_v36  ;;  %v1861_v13 = vld [vmem:[#allocation7 + $0xdd8] sm:$0xff]  ;;  %v12055_v50 = vcombine.low %v1733_v55, %v1737_v60 }
 0x462   :  { %8704 = vmatpush2.bf16.msra.mxu1 %v11959_v29  ;;  %8662 = vmatprep.subr.bf16.mxu0 %v11824_v3  ;;  %v1865_v36 = vld [vmem:[#allocation7 + $0xdf8] sm:$0xff]  ;;  %v12056_v29 = vcombine.high %v1733_v55, %v1737_v60 }
 0x463   :  { %8705 = vmatprep.subr.bf16.mxu1 %v11952_v11  ;;  %v12184_v3 = vcombine.high %v1861_v13, %v1865_v36  ;;  %v1725_v11 = vld [vmem:[#allocation7 + $0x998] sm:$0xff] }
 0x464   :  { %v1729_v63 = vld [vmem:[#allocation7 + $0x9b8] sm:$0xff] }
 0x465   :  { %8663 = vmatpush2.bf16.msra.mxu0 %v11823_v48  ;;  %v1853_v62 = vld [vmem:[#allocation7 + $0xd98] sm:$0xff]  ;;  %v14318_v48 = vpop.f32.mrf.mxu0  ;;  %v12047_v55 = vcombine.low %v1725_v11, %v1729_v63 }
 0x466   :  { %8706 = vmatpush2.bf16.msra.mxu1 %v11951_v17  ;;  %8664 = vmatprep.subr.bf16.mxu0 %v11816_v33  ;;  %v1857_v26 = vld [vmem:[#allocation7 + $0xdb8] sm:$0xff]  ;;  %v12183_v17 = vcombine.low %v1861_v13, %v1865_v36  ;;  %v14320_v33 = vpop.f32.mrf.mxu1 }
 0x467   :  { %8707 = vmatprep.subr.bf16.mxu1 %v11944_v9  ;;  %v12048_v9 = vcombine.high %v1725_v11, %v1729_v63  ;;  %v1717_v32 = vld [vmem:[#allocation7 + $0x958] sm:$0xff]  ;;  %v12176_v10 = vcombine.high %v1853_v62, %v1857_v26  ;;  %v12175_v13 = vcombine.low %v1853_v62, %v1857_v26 }
 0x468   :  { %v1721_v52 = vld [vmem:[#allocation7 + $0x978] sm:$0xff] }
 0x469   :  { %8665 = vmatpush2.bf16.msra.mxu0 %v11815_v49  ;;  %v1845_v49 = vld [vmem:[#allocation7 + $0xd58] sm:$0xff]  ;;  %v12040_v36 = vcombine.high %v1717_v32, %v1721_v52  ;;  %v12039_v63 = vcombine.low %v1717_v32, %v1721_v52 }
 0x46a   :  { %8708 = vmatpush2.bf16.msra.mxu1 %v11943_v56  ;;  %8666 = vmatprep.subr.bf16.mxu0 %v11808_v35  ;;  %v1849_v56 = vld [vmem:[#allocation7 + $0xd78] sm:$0xff] }
 0x46b   :  { %8709 = vmatprep.subr.bf16.mxu1 %v11936_v4  ;;  %v1841_v11 = vld [vmem:[#allocation7 + $0xd38] sm:$0xff]  ;;  %v12167_v62 = vcombine.low %v1845_v49, %v1849_v56 }
 0x46c   :  { %v1693_v52 = vld [vmem:[#allocation7 + $0x898] sm:$0xff] }
 0x46d   :  { %8667 = vmatpush2.bf16.msra.mxu0 %v11807_v54 }
 0x46e   :  { %8710 = vmatpush2.bf16.msra.mxu1 %v11935_v6  ;;  %8722 = vmatprep.subr.bf16.mxu0 %v12056_v29  ;;  %v1709_v6 = vld [vmem:[#allocation7 + $0x918] sm:$0xff] }
 0x46f   :  { %8765 = vmatprep.subr.bf16.mxu1 %v12184_v3  ;;  %v1713_v29 = vld [vmem:[#allocation7 + $0x938] sm:$0xff] }
 0x470   :  { %v8412_v51 = vpop.f32.mrf.mxu0  ;;  %8669 = vmatmul.mubr.bf16.vlgmr.msra.gmra.mxu0 %v14053_v53  ;;  %v1837_v3 = vld [vmem:[#allocation7 + $0xd18] sm:$0xff]  ;;  %v12032_v26 = vcombine.high %v1709_v6, %v1713_v29 }
 0x471   :  { %v8413_v35 = vadd.f32 %v8412_v51, %v14311_v59  ;;  %v8455_v4 = vpop.f32.mrf.mxu1  ;;  %8712 = vmatmul.mubr.bf16.vlgmr.msra.gmra.mxu1 %v14059_v57  ;;  %8723 = vmatpush1.bf16.msra.mxu0 %v12055_v50  ;;  %v12168_v59 = vcombine.high %v1845_v49, %v1849_v56  ;;  %v1705_v51 = vld [vmem:[#allocation7 + $0x8f8] sm:$0xff] }
 0x472   :  { %8754 = vmatprep.mubr.bf16.mxu0 %v14083_v30  ;;  %8766 = vmatpush1.bf16.msra.mxu1 %v12183_v17  ;;  %v14326_v60 = vpop.f32.mrf.mxu0  ;;  %v12160_v17 = vcombine.high %v1837_v3, %v1841_v11  ;;  %v1821_v49 = vld [vmem:[#allocation7 + $0xc98] sm:$0xff] }
 0x473   :  { %v14328_v54 = vadd.f32 %v8455_v4, %v8413_v35  ;;  %8797 = vmatprep.mubr.bf16.mxu1 %v14085_v34  ;;  %v14331_v53 = vpop.f32.mrf.mxu1  ;;  %8724 = vmatprep.subr.bf16.mxu0 %v12048_v9  ;;  %v1701_v9 = vld [vmem:[#allocation7 + $0x8d8] sm:$0xff] }
 0x474   :  { %v8416_v57 = vpop.f32.mrf.mxu0  ;;  %8767 = vmatprep.subr.bf16.mxu1 %v12176_v10  ;;  %v1829_v35 = vld [vmem:[#allocation7 + $0xcd8] sm:$0xff]  ;;  %v12031_v10 = vcombine.low %v1709_v6, %v1713_v29 }
 0x475   :  { %v8417_v30 = vadd.f32 %v8416_v57, %v14316_v22  ;;  %8725 = vmatpush1.bf16.msra.mxu0 %v12047_v55  ;;  %v8459_v50 = vpop.f32.mrf.mxu1  ;;  %v1833_v4 = vld [vmem:[#allocation7 + $0xcf8] sm:$0xff]  ;;  %v12159_v22 = vcombine.low %v1837_v3, %v1841_v11  ;;  %v12024_v55 = vcombine.high %v1701_v9, %v1705_v51 }
 0x476   :  { %8768 = vmatpush1.bf16.msra.mxu1 %v12175_v13  ;;  %8726 = vmatprep.subr.bf16.mxu0 %v12040_v36  ;;  %v12152_v32 = vcombine.high %v1829_v35, %v1833_v4  ;;  %v1697_v13 = vld [vmem:[#allocation7 + $0x8b8] sm:$0xff]  ;;  %v12023_v36 = vcombine.low %v1701_v9, %v1705_v51 }
 0x477   :  { %v14334_v34 = vadd.f32 %v8459_v50, %v8417_v30  ;;  %8769 = vmatprep.subr.bf16.mxu1 %v12168_v59  ;;  %v1825_v56 = vld [vmem:[#allocation7 + $0xcb8] sm:$0xff]  ;;  %v12151_v59 = vcombine.low %v1829_v35, %v1833_v4  ;;  %v12016_v57 = vcombine.high %v1693_v52, %v1697_v13  ;;  %v12015_v3 = vcombine.low %v1693_v52, %v1697_v13 }
 0x478   :  { %v12144_v30 = vcombine.high %v1821_v49, %v1825_v56  ;;  %v1689_v6 = vld [vmem:[#allocation7 + $0x878] sm:$0xff]  ;;  %v12143_v11 = vcombine.low %v1821_v49, %v1825_v56 }
 0x479   :  { %8727 = vmatpush1.bf16.msra.mxu0 %v12039_v63  ;;  %v1685_v63 = vld [vmem:[#allocation7 + $0x858] sm:$0xff] }
 0x47a   :  { %8770 = vmatpush1.bf16.msra.mxu1 %v12167_v62  ;;  %8728 = vmatprep.subr.bf16.mxu0 %v12032_v26  ;;  %v1813_v29 = vld [vmem:[#allocation7 + $0xc58] sm:$0xff]  ;;  %v12008_v62 = vcombine.high %v1685_v63, %v1689_v6  ;;  %v12007_v35 = vcombine.low %v1685_v63, %v1689_v6 }
 0x47b   :  { %8771 = vmatprep.subr.bf16.mxu1 %v12160_v17  ;;  %v1817_v50 = vld [vmem:[#allocation7 + $0xc78] sm:$0xff] }
 0x47c   :  { %v12136_v26 = vcombine.high %v1813_v29, %v1817_v50  ;;  %v1677_v17 = vld [vmem:[#allocation7 + $0x818] sm:$0xff]  ;;  %v12135_v4 = vcombine.low %v1813_v29, %v1817_v50 }
 0x47d   :  { %8729 = vmatpush1.bf16.msra.mxu0 %v12031_v10  ;;  %v1681_v9 = vld [vmem:[#allocation7 + $0x838] sm:$0xff] }
 0x47e   :  { %8772 = vmatpush1.bf16.msra.mxu1 %v12159_v22  ;;  %8730 = vmatprep.subr.bf16.mxu0 %v12024_v55  ;;  %v1805_v51 = vld [vmem:[#allocation7 + $0xc18] sm:$0xff]  ;;  %v12000_v22 = vcombine.high %v1677_v17, %v1681_v9  ;;  %v11999_v49 = vcombine.low %v1677_v17, %v1681_v9 }
 0x47f   :  { %8773 = vmatprep.subr.bf16.mxu1 %v12152_v32  ;;  %v1809_v10 = vld [vmem:[#allocation7 + $0xc38] sm:$0xff] }
 0x480   :  { %v12128_v55 = vcombine.high %v1805_v51, %v1809_v10  ;;  %v1797_v32 = vld [vmem:[#allocation7 + $0xbd8] sm:$0xff]  ;;  %v12127_v56 = vcombine.low %v1805_v51, %v1809_v10 }
 0x481   :  { %8731 = vmatpush1.bf16.msra.mxu0 %v12023_v36  ;;  %v1801_v52 = vld [vmem:[#allocation7 + $0xbf8] sm:$0xff] }
 0x482   :  { %8774 = vmatpush1.bf16.msra.mxu1 %v12151_v59  ;;  %8732 = vmatprep.subr.bf16.mxu0 %v12016_v57  ;;  %v1925_v13 = vld [vmem:[#allocation7 + $0xfd8] sm:$0xff]  ;;  %v12120_v59 = vcombine.high %v1797_v32, %v1801_v52  ;;  %v12119_v29 = vcombine.low %v1797_v32, %v1801_v52 }
 0x483   :  { %8775 = vmatprep.subr.bf16.mxu1 %v12144_v30  ;;  %v1929_v36 = vld [vmem:[#allocation7 + $0xff8] sm:$0xff] }
 0x484   :  { %v12248_v57 = vcombine.high %v1925_v13, %v1929_v36  ;;  %v1789_v30 = vld [vmem:[#allocation7 + $0xb98] sm:$0xff]  ;;  %v12247_v50 = vcombine.low %v1925_v13, %v1929_v36 }
 0x485   :  { %8733 = vmatpush1.bf16.msra.mxu0 %v12015_v3  ;;  %v1793_v63 = vld [vmem:[#allocation7 + $0xbb8] sm:$0xff] }
 0x486   :  { %8776 = vmatpush1.bf16.msra.mxu1 %v12143_v11  ;;  %8734 = vmatprep.subr.bf16.mxu0 %v12008_v62  ;;  %v1917_v6 = vld [vmem:[#allocation7 + $0xf98] sm:$0xff]  ;;  %v12112_v11 = vcombine.high %v1789_v30, %v1793_v63  ;;  %v12111_v51 = vcombine.low %v1789_v30, %v1793_v63 }
 0x487   :  { %8777 = vmatprep.subr.bf16.mxu1 %v12136_v26  ;;  %v1921_v3 = vld [vmem:[#allocation7 + $0xfb8] sm:$0xff] }
 0x488   :  { %v12240_v62 = vcombine.high %v1917_v6, %v1921_v3  ;;  %v1781_v26 = vld [vmem:[#allocation7 + $0xb58] sm:$0xff]  ;;  %v12239_v10 = vcombine.low %v1917_v6, %v1921_v3 }
 0x489   :  { %8735 = vmatpush1.bf16.msra.mxu0 %v12007_v35  ;;  %v1785_v17 = vld [vmem:[#allocation7 + $0xb78] sm:$0xff] }
 0x48a   :  { %8778 = vmatpush1.bf16.msra.mxu1 %v12135_v4  ;;  %8736 = vmatprep.subr.bf16.mxu0 %v12000_v22  ;;  %v1909_v9 = vld [vmem:[#allocation7 + $0xf58] sm:$0xff]  ;;  %v12104_v4 = vcombine.high %v1781_v26, %v1785_v17  ;;  %v12103_v13 = vcombine.low %v1781_v26, %v1785_v17 }
 0x48b   :  { %8779 = vmatprep.subr.bf16.mxu1 %v12128_v55  ;;  %v1913_v35 = vld [vmem:[#allocation7 + $0xf78] sm:$0xff] }
 0x48c   :  { %v12232_v22 = vcombine.high %v1909_v9, %v1913_v35  ;;  %v1773_v55 = vld [vmem:[#allocation7 + $0xb18] sm:$0xff]  ;;  %v12231_v36 = vcombine.low %v1909_v9, %v1913_v35 }
 0x48d   :  { %8737 = vmatpush1.bf16.msra.mxu0 %v11999_v49  ;;  %v1777_v32 = vld [vmem:[#allocation7 + $0xb38] sm:$0xff] }
 0x48e   :  { %8780 = vmatpush1.bf16.msra.mxu1 %v12127_v56  ;;  %8738 = vmatprep.subr.bf16.mxu0 %v12120_v59  ;;  %v1901_v52 = vld [vmem:[#allocation7 + $0xf18] sm:$0xff]  ;;  %v12096_v56 = vcombine.high %v1773_v55, %v1777_v32  ;;  %v12095_v6 = vcombine.low %v1773_v55, %v1777_v32 }
 0x48f   :  { %8781 = vmatprep.subr.bf16.mxu1 %v12248_v57  ;;  %v1905_v49 = vld [vmem:[#allocation7 + $0xf38] sm:$0xff] }
 0x490   :  { %v12224_v59 = vcombine.high %v1901_v52, %v1905_v49  ;;  %v1765_v57 = vld [vmem:[#allocation7 + $0xad8] sm:$0xff]  ;;  %v12223_v3 = vcombine.low %v1901_v52, %v1905_v49 }
 0x491   :  { %8739 = vmatpush2.bf16.msra.mxu0 %v12119_v29  ;;  %v1769_v30 = vld [vmem:[#allocation7 + $0xaf8] sm:$0xff] }
 0x492   :  { %8782 = vmatpush2.bf16.msra.mxu1 %v12247_v50  ;;  %8740 = vmatprep.subr.bf16.mxu0 %v12112_v11  ;;  %v1893_v63 = vld [vmem:[#allocation7 + $0xed8] sm:$0xff]  ;;  %v12088_v50 = vcombine.high %v1765_v57, %v1769_v30  ;;  %v12087_v9 = vcombine.low %v1765_v57, %v1769_v30 }
 0x493   :  { %8783 = vmatprep.subr.bf16.mxu1 %v12240_v62  ;;  %v1897_v29 = vld [vmem:[#allocation7 + $0xef8] sm:$0xff] }
 0x494   :  { %v12216_v11 = vcombine.high %v1893_v63, %v1897_v29  ;;  %v1757_v62 = vld [vmem:[#allocation7 + $0xa98] sm:$0xff]  ;;  %v12215_v35 = vcombine.low %v1893_v63, %v1897_v29 }
 0x495   :  { %8741 = vmatpush2.bf16.msra.mxu0 %v12111_v51  ;;  %v1761_v26 = vld [vmem:[#allocation7 + $0xab8] sm:$0xff] }
 0x496   :  { %8784 = vmatpush2.bf16.msra.mxu1 %v12239_v10  ;;  %8742 = vmatprep.subr.bf16.mxu0 %v12104_v4  ;;  %v1885_v17 = vld [vmem:[#allocation7 + $0xe98] sm:$0xff]  ;;  %v12080_v10 = vcombine.high %v1757_v62, %v1761_v26  ;;  %v12079_v52 = vcombine.low %v1757_v62, %v1761_v26 }
 0x497   :  { %8785 = vmatprep.subr.bf16.mxu1 %v12232_v22  ;;  %v1889_v51 = vld [vmem:[#allocation7 + $0xeb8] sm:$0xff] }
 0x498   :  { %v12208_v4 = vcombine.high %v1885_v17, %v1889_v51  ;;  %v1749_v22 = vld [vmem:[#allocation7 + $0xa58] sm:$0xff]  ;;  %v12207_v49 = vcombine.low %v1885_v17, %v1889_v51 }
 0x499   :  { %8743 = vmatpush2.bf16.msra.mxu0 %v12103_v13  ;;  %v1753_v55 = vld [vmem:[#allocation7 + $0xa78] sm:$0xff] }
 0x49a   :  { %8786 = vmatpush2.bf16.msra.mxu1 %v12231_v36  ;;  %8744 = vmatprep.subr.bf16.mxu0 %v12096_v56  ;;  %v1877_v32 = vld [vmem:[#allocation7 + $0xe58] sm:$0xff]  ;;  %v12072_v36 = vcombine.high %v1749_v22, %v1753_v55  ;;  %v12071_v63 = vcombine.low %v1749_v22, %v1753_v55 }
 0x49b   :  { %8787 = vmatprep.subr.bf16.mxu1 %v12224_v59  ;;  %v1881_v13 = vld [vmem:[#allocation7 + $0xe78] sm:$0xff] }
 0x49c   :  { %v12200_v56 = vcombine.high %v1877_v32, %v1881_v13  ;;  %v1741_v59 = vld [vmem:[#allocation7 + $0xa18] sm:$0xff]  ;;  %v12199_v29 = vcombine.low %v1877_v32, %v1881_v13 }
 0x49d   :  { %8745 = vmatpush2.bf16.msra.mxu0 %v12095_v6  ;;  %v1745_v57 = vld [vmem:[#allocation7 + $0xa38] sm:$0xff] }
 0x49e   :  { %8788 = vmatpush2.bf16.msra.mxu1 %v12223_v3  ;;  %8746 = vmatprep.subr.bf16.mxu0 %v12088_v50  ;;  %v1869_v30 = vld [vmem:[#allocation7 + $0xe18] sm:$0xff]  ;;  %v12064_v3 = vcombine.high %v1741_v59, %v1745_v57  ;;  %v12063_v17 = vcombine.low %v1741_v59, %v1745_v57 }
 0x49f   :  { %8789 = vmatprep.subr.bf16.mxu1 %v12216_v11  ;;  %v1873_v6 = vld [vmem:[#allocation7 + $0xe38] sm:$0xff] }
 0x4a0   :  { %v12192_v50 = vcombine.high %v1869_v30, %v1873_v6  ;;  %v1989_v11 = vld [vmem:[#allocation7 + $0x11d8] sm:$0xff]  ;;  %v12191_v51 = vcombine.low %v1869_v30, %v1873_v6 }
 0x4a1   :  { %8747 = vmatpush2.bf16.msra.mxu0 %v12087_v9  ;;  %v1993_v62 = vld [vmem:[#allocation7 + $0x11f8] sm:$0xff] }
 0x4a2   :  { %8790 = vmatpush2.bf16.msra.mxu1 %v12215_v35  ;;  %8748 = vmatprep.subr.bf16.mxu0 %v12080_v10  ;;  %v2117_v26 = vld [vmem:[#allocation7 + $0x15d8] sm:$0xff]  ;;  %v12312_v35 = vcombine.high %v1989_v11, %v1993_v62  ;;  %v12311_v55 = vcombine.low %v1989_v11, %v1993_v62 }
 0x4a3   :  { %8791 = vmatprep.subr.bf16.mxu1 %v12208_v4  ;;  %v2121_v9 = vld [vmem:[#allocation7 + $0x15f8] sm:$0xff] }
 0x4a4   :  { %v12440_v10 = vcombine.high %v2117_v26, %v2121_v9  ;;  %v1981_v4 = vld [vmem:[#allocation7 + $0x1198] sm:$0xff] }
 0x4a5   :  { %8749 = vmatpush2.bf16.msra.mxu0 %v12079_v52  ;;  %v1985_v22 = vld [vmem:[#allocation7 + $0x11b8] sm:$0xff]  ;;  %v14336_v52 = vpop.f32.mrf.mxu0 }
 0x4a6   :  { %8792 = vmatpush2.bf16.msra.mxu1 %v12207_v49  ;;  %8750 = vmatprep.subr.bf16.mxu0 %v12072_v36  ;;  %v2109_v32 = vld [vmem:[#allocation7 + $0x1598] sm:$0xff]  ;;  %v12439_v49 = vcombine.low %v2117_v26, %v2121_v9  ;;  %v14338_v36 = vpop.f32.mrf.mxu1  ;;  %v12303_v11 = vcombine.low %v1981_v4, %v1985_v22 }
 0x4a7   :  { %8793 = vmatprep.subr.bf16.mxu1 %v12200_v56  ;;  %v2113_v13 = vld [vmem:[#allocation7 + $0x15b8] sm:$0xff]  ;;  %v12304_v56 = vcombine.high %v1981_v4, %v1985_v22 }
 0x4a8   :  { %v1973_v59 = vld [vmem:[#allocation7 + $0x1158] sm:$0xff]  ;;  %v12432_v6 = vcombine.high %v2109_v32, %v2113_v13  ;;  %v12431_v26 = vcombine.low %v2109_v32, %v2113_v13 }
 0x4a9   :  { %8751 = vmatpush2.bf16.msra.mxu0 %v12071_v63  ;;  %v1977_v57 = vld [vmem:[#allocation7 + $0x1178] sm:$0xff] }
 0x4aa   :  { %8794 = vmatpush2.bf16.msra.mxu1 %v12199_v29  ;;  %8752 = vmatprep.subr.bf16.mxu0 %v12064_v3  ;;  %v2101_v63 = vld [vmem:[#allocation7 + $0x1558] sm:$0xff]  ;;  %v12296_v9 = vcombine.high %v1973_v59, %v1977_v57  ;;  %v12295_v22 = vcombine.low %v1973_v59, %v1977_v57 }
 0x4ab   :  { %8795 = vmatprep.subr.bf16.mxu1 %v12192_v50  ;;  %v2105_v29 = vld [vmem:[#allocation7 + $0x1578] sm:$0xff] }
 0x4ac   :  { %v2097_v4 = vld [vmem:[#allocation7 + $0x1538] sm:$0xff]  ;;  %v12423_v32 = vcombine.low %v2101_v63, %v2105_v29 }
 0x4ad   :  { %8753 = vmatpush2.bf16.msra.mxu0 %v12063_v17  ;;  %v1949_v57 = vld [vmem:[#allocation7 + $0x1098] sm:$0xff] }
 0x4ae   :  { %8796 = vmatpush2.bf16.msra.mxu1 %v12191_v51  ;;  %8808 = vmatprep.subr.bf16.mxu0 %v12312_v35  ;;  %v1965_v51 = vld [vmem:[#allocation7 + $0x1118] sm:$0xff] }
 0x4af   :  { %8851 = vmatprep.subr.bf16.mxu1 %v12440_v10  ;;  %v1969_v35 = vld [vmem:[#allocation7 + $0x1138] sm:$0xff] }
 0x4b0   :  { %v8498_v30 = vpop.f32.mrf.mxu0  ;;  %8755 = vmatmul.mubr.bf16.vlgmr.msra.gmra.mxu0 %v14117_v15  ;;  %v2093_v10 = vld [vmem:[#allocation7 + $0x1518] sm:$0xff]  ;;  %v12288_v13 = vcombine.high %v1965_v51, %v1969_v35 }
 0x4b1   :  { %v8499_v3 = vadd.f32 %v8498_v30, %v14328_v54  ;;  %v8541_v50 = vpop.f32.mrf.mxu1  ;;  %8798 = vmatmul.mubr.bf16.vlgmr.msra.gmra.mxu1 %v14119_v37  ;;  %8809 = vmatpush1.bf16.msra.mxu0 %v12311_v55  ;;  %v12424_v54 = vcombine.high %v2101_v63, %v2105_v29  ;;  %v1961_v30 = vld [vmem:[#allocation7 + $0x10f8] sm:$0xff] }
 0x4b2   :  { %8840 = vmatprep.mubr.bf16.mxu0 %v14121_v41  ;;  %8852 = vmatpush1.bf16.msra.mxu1 %v12439_v49  ;;  %v14344_v62 = vpop.f32.mrf.mxu0  ;;  %v12416_v49 = vcombine.high %v2093_v10, %v2097_v4  ;;  %v2077_v63 = vld [vmem:[#allocation7 + $0x1498] sm:$0xff] }
 0x4b3   :  { %v14346_v17 = vadd.f32 %v8541_v50, %v8499_v3  ;;  %8883 = vmatprep.mubr.bf16.mxu1 %v14124_v44  ;;  %v14349_v15 = vpop.f32.mrf.mxu1  ;;  %8810 = vmatprep.subr.bf16.mxu0 %v12304_v56  ;;  %v1957_v56 = vld [vmem:[#allocation7 + $0x10d8] sm:$0xff] }
 0x4b4   :  { %v8502_v37 = vpop.f32.mrf.mxu0  ;;  %8853 = vmatprep.subr.bf16.mxu1 %v12432_v6  ;;  %v2085_v3 = vld [vmem:[#allocation7 + $0x14d8] sm:$0xff]  ;;  %v12287_v6 = vcombine.low %v1965_v51, %v1969_v35 }
 0x4b5   :  { %v8503_v41 = vadd.f32 %v8502_v37, %v14334_v34  ;;  %8811 = vmatpush1.bf16.msra.mxu0 %v12303_v11  ;;  %v8545_v55 = vpop.f32.mrf.mxu1  ;;  %v2089_v50 = vld [vmem:[#allocation7 + $0x14f8] sm:$0xff]  ;;  %v12415_v34 = vcombine.low %v2093_v10, %v2097_v4  ;;  %v12280_v11 = vcombine.high %v1957_v56, %v1961_v30 }
 0x4b6   :  { %8854 = vmatpush1.bf16.msra.mxu1 %v12431_v26  ;;  %8812 = vmatprep.subr.bf16.mxu0 %v12296_v9  ;;  %v12408_v59 = vcombine.high %v2085_v3, %v2089_v50  ;;  %v1953_v26 = vld [vmem:[#allocation7 + $0x10b8] sm:$0xff]  ;;  %v12279_v9 = vcombine.low %v1957_v56, %v1961_v30 }
 0x4b7   :  { %v14352_v44 = vadd.f32 %v8545_v55, %v8503_v41  ;;  %8855 = vmatprep.subr.bf16.mxu1 %v12424_v54  ;;  %v2081_v29 = vld [vmem:[#allocation7 + $0x14b8] sm:$0xff]  ;;  %v12407_v54 = vcombine.low %v2085_v3, %v2089_v50  ;;  %v12272_v37 = vcombine.high %v1949_v57, %v1953_v26  ;;  %v12271_v10 = vcombine.low %v1949_v57, %v1953_v26 }
 0x4b8   :  { %v12400_v41 = vcombine.high %v2077_v63, %v2081_v29  ;;  %v1945_v51 = vld [vmem:[#allocation7 + $0x1078] sm:$0xff]  ;;  %v12399_v4 = vcombine.low %v2077_v63, %v2081_v29 }
 0x4b9   :  { %8813 = vmatpush1.bf16.msra.mxu0 %v12295_v22  ;;  %v1941_v22 = vld [vmem:[#allocation7 + $0x1058] sm:$0xff] }
 0x4ba   :  { %8856 = vmatpush1.bf16.msra.mxu1 %v12423_v32  ;;  %8814 = vmatprep.subr.bf16.mxu0 %v12288_v13  ;;  %v2069_v35 = vld [vmem:[#allocation7 + $0x1458] sm:$0xff]  ;;  %v12264_v32 = vcombine.high %v1941_v22, %v1945_v51  ;;  %v12263_v3 = vcombine.low %v1941_v22, %v1945_v51 }
 0x4bb   :  { %8857 = vmatprep.subr.bf16.mxu1 %v12416_v49  ;;  %v2073_v55 = vld [vmem:[#allocation7 + $0x1478] sm:$0xff] }
 0x4bc   :  { %v12392_v13 = vcombine.high %v2069_v35, %v2073_v55  ;;  %v1933_v49 = vld [vmem:[#allocation7 + $0x1018] sm:$0xff]  ;;  %v12391_v50 = vcombine.low %v2069_v35, %v2073_v55 }
 0x4bd   :  { %8815 = vmatpush1.bf16.msra.mxu0 %v12287_v6  ;;  %v1937_v56 = vld [vmem:[#allocation7 + $0x1038] sm:$0xff] }
 0x4be   :  { %8858 = vmatpush1.bf16.msra.mxu1 %v12415_v34  ;;  %8816 = vmatprep.subr.bf16.mxu0 %v12280_v11  ;;  %v2061_v30 = vld [vmem:[#allocation7 + $0x1418] sm:$0xff]  ;;  %v12256_v34 = vcombine.high %v1933_v49, %v1937_v56  ;;  %v12255_v63 = vcombine.low %v1933_v49, %v1937_v56 }
 0x4bf   :  { %8859 = vmatprep.subr.bf16.mxu1 %v12408_v59  ;;  %v2065_v6 = vld [vmem:[#allocation7 + $0x1438] sm:$0xff] }
 0x4c0   :  { %v12384_v11 = vcombine.high %v2061_v30, %v2065_v6  ;;  %v2053_v59 = vld [vmem:[#allocation7 + $0x13d8] sm:$0xff]  ;;  %v12383_v29 = vcombine.low %v2061_v30, %v2065_v6 }
 0x4c1   :  { %8817 = vmatpush1.bf16.msra.mxu0 %v12279_v9  ;;  %v2057_v57 = vld [vmem:[#allocation7 + $0x13f8] sm:$0xff] }
 0x4c2   :  { %8860 = vmatpush1.bf16.msra.mxu1 %v12407_v54  ;;  %8818 = vmatprep.subr.bf16.mxu0 %v12272_v37  ;;  %v2181_v26 = vld [vmem:[#allocation7 + $0x17d8] sm:$0xff]  ;;  %v12376_v54 = vcombine.high %v2053_v59, %v2057_v57  ;;  %v12375_v35 = vcombine.low %v2053_v59, %v2057_v57 }
 0x4c3   :  { %8861 = vmatprep.subr.bf16.mxu1 %v12400_v41  ;;  %v2185_v9 = vld [vmem:[#allocation7 + $0x17f8] sm:$0xff] }
 0x4c4   :  { %v12504_v37 = vcombine.high %v2181_v26, %v2185_v9  ;;  %v2045_v41 = vld [vmem:[#allocation7 + $0x1398] sm:$0xff]  ;;  %v12503_v55 = vcombine.low %v2181_v26, %v2185_v9 }
 0x4c5   :  { %8819 = vmatpush1.bf16.msra.mxu0 %v12271_v10  ;;  %v2049_v22 = vld [vmem:[#allocation7 + $0x13b8] sm:$0xff] }
 0x4c6   :  { %8862 = vmatpush1.bf16.msra.mxu1 %v12399_v4  ;;  %8820 = vmatprep.subr.bf16.mxu0 %v12264_v32  ;;  %v2173_v51 = vld [vmem:[#allocation7 + $0x1798] sm:$0xff]  ;;  %v12368_v4 = vcombine.high %v2045_v41, %v2049_v22  ;;  %v12367_v30 = vcombine.low %v2045_v41, %v2049_v22 }
 0x4c7   :  { %8863 = vmatprep.subr.bf16.mxu1 %v12392_v13  ;;  %v2177_v10 = vld [vmem:[#allocation7 + $0x17b8] sm:$0xff] }
 0x4c8   :  { %v12496_v32 = vcombine.high %v2173_v51, %v2177_v10  ;;  %v2037_v13 = vld [vmem:[#allocation7 + $0x1358] sm:$0xff]  ;;  %v12495_v6 = vcombine.low %v2173_v51, %v2177_v10 }
 0x4c9   :  { %8821 = vmatpush1.bf16.msra.mxu0 %v12263_v3  ;;  %v2041_v49 = vld [vmem:[#allocation7 + $0x1378] sm:$0xff] }
 0x4ca   :  { %8864 = vmatpush1.bf16.msra.mxu1 %v12391_v50  ;;  %8822 = vmatprep.subr.bf16.mxu0 %v12256_v34  ;;  %v2165_v56 = vld [vmem:[#allocation7 + $0x1758] sm:$0xff]  ;;  %v12360_v50 = vcombine.high %v2037_v13, %v2041_v49  ;;  %v12359_v26 = vcombine.low %v2037_v13, %v2041_v49 }
 0x4cb   :  { %8865 = vmatprep.subr.bf16.mxu1 %v12384_v11  ;;  %v2169_v3 = vld [vmem:[#allocation7 + $0x1778] sm:$0xff] }
 0x4cc   :  { %v12488_v34 = vcombine.high %v2165_v56, %v2169_v3  ;;  %v2029_v11 = vld [vmem:[#allocation7 + $0x1318] sm:$0xff]  ;;  %v12487_v9 = vcombine.low %v2165_v56, %v2169_v3 }
 0x4cd   :  { %8823 = vmatpush1.bf16.msra.mxu0 %v12255_v63  ;;  %v2033_v59 = vld [vmem:[#allocation7 + $0x1338] sm:$0xff] }
 0x4ce   :  { %8866 = vmatpush1.bf16.msra.mxu1 %v12383_v29  ;;  %8824 = vmatprep.subr.bf16.mxu0 %v12376_v54  ;;  %v2157_v57 = vld [vmem:[#allocation7 + $0x1718] sm:$0xff]  ;;  %v12352_v29 = vcombine.high %v2029_v11, %v2033_v59  ;;  %v12351_v51 = vcombine.low %v2029_v11, %v2033_v59 }
 0x4cf   :  { %8867 = vmatprep.subr.bf16.mxu1 %v12504_v37  ;;  %v2161_v63 = vld [vmem:[#allocation7 + $0x1738] sm:$0xff] }
 0x4d0   :  { %v12480_v54 = vcombine.high %v2157_v57, %v2161_v63  ;;  %v2021_v37 = vld [vmem:[#allocation7 + $0x12d8] sm:$0xff]  ;;  %v12479_v10 = vcombine.low %v2157_v57, %v2161_v63 }
 0x4d1   :  { %8825 = vmatpush2.bf16.msra.mxu0 %v12375_v35  ;;  %v2025_v41 = vld [vmem:[#allocation7 + $0x12f8] sm:$0xff] }
 0x4d2   :  { %8868 = vmatpush2.bf16.msra.mxu1 %v12503_v55  ;;  %8826 = vmatprep.subr.bf16.mxu0 %v12368_v4  ;;  %v2149_v22 = vld [vmem:[#allocation7 + $0x16d8] sm:$0xff]  ;;  %v12344_v55 = vcombine.high %v2021_v37, %v2025_v41  ;;  %v12343_v56 = vcombine.low %v2021_v37, %v2025_v41 }
 0x4d3   :  { %8869 = vmatprep.subr.bf16.mxu1 %v12496_v32  ;;  %v2153_v35 = vld [vmem:[#allocation7 + $0x16f8] sm:$0xff] }
 0x4d4   :  { %v12472_v4 = vcombine.high %v2149_v22, %v2153_v35  ;;  %v2013_v32 = vld [vmem:[#allocation7 + $0x1298] sm:$0xff]  ;;  %v12471_v3 = vcombine.low %v2149_v22, %v2153_v35 }
 0x4d5   :  { %8827 = vmatpush2.bf16.msra.mxu0 %v12367_v30  ;;  %v2017_v13 = vld [vmem:[#allocation7 + $0x12b8] sm:$0xff] }
 0x4d6   :  { %8870 = vmatpush2.bf16.msra.mxu1 %v12495_v6  ;;  %8828 = vmatprep.subr.bf16.mxu0 %v12360_v50  ;;  %v2141_v49 = vld [vmem:[#allocation7 + $0x1698] sm:$0xff]  ;;  %v12336_v6 = vcombine.high %v2013_v32, %v2017_v13  ;;  %v12335_v57 = vcombine.low %v2013_v32, %v2017_v13 }
 0x4d7   :  { %8871 = vmatprep.subr.bf16.mxu1 %v12488_v34  ;;  %v2145_v30 = vld [vmem:[#allocation7 + $0x16b8] sm:$0xff] }
 0x4d8   :  { %v12464_v50 = vcombine.high %v2141_v49, %v2145_v30  ;;  %v2005_v34 = vld [vmem:[#allocation7 + $0x1258] sm:$0xff]  ;;  %v12463_v63 = vcombine.low %v2141_v49, %v2145_v30 }
 0x4d9   :  { %8829 = vmatpush2.bf16.msra.mxu0 %v12359_v26  ;;  %v2009_v11 = vld [vmem:[#allocation7 + $0x1278] sm:$0xff] }
 0x4da   :  { %8872 = vmatpush2.bf16.msra.mxu1 %v12487_v9  ;;  %8830 = vmatprep.subr.bf16.mxu0 %v12352_v29  ;;  %v2133_v59 = vld [vmem:[#allocation7 + $0x1658] sm:$0xff]  ;;  %v12328_v9 = vcombine.high %v2005_v34, %v2009_v11  ;;  %v12327_v22 = vcombine.low %v2005_v34, %v2009_v11 }
 0x4db   :  { %8873 = vmatprep.subr.bf16.mxu1 %v12480_v54  ;;  %v2137_v26 = vld [vmem:[#allocation7 + $0x1678] sm:$0xff] }
 0x4dc   :  { %v12456_v29 = vcombine.high %v2133_v59, %v2137_v26  ;;  %v1997_v54 = vld [vmem:[#allocation7 + $0x1218] sm:$0xff]  ;;  %v12455_v35 = vcombine.low %v2133_v59, %v2137_v26 }
 0x4dd   :  { %8831 = vmatpush2.bf16.msra.mxu0 %v12351_v51  ;;  %v2001_v37 = vld [vmem:[#allocation7 + $0x1238] sm:$0xff] }
 0x4de   :  { %8874 = vmatpush2.bf16.msra.mxu1 %v12479_v10  ;;  %8832 = vmatprep.subr.bf16.mxu0 %v12344_v55  ;;  %v2125_v41 = vld [vmem:[#allocation7 + $0x1618] sm:$0xff]  ;;  %v12320_v10 = vcombine.high %v1997_v54, %v2001_v37  ;;  %v12319_v49 = vcombine.low %v1997_v54, %v2001_v37 }
 0x4df   :  { %8875 = vmatprep.subr.bf16.mxu1 %v12472_v4  ;;  %v2129_v51 = vld [vmem:[#allocation7 + $0x1638] sm:$0xff] }
 0x4e0   :  { %v12448_v55 = vcombine.high %v2125_v41, %v2129_v51  ;;  %v2245_v4 = vld [vmem:[#allocation7 + $0x19d8] sm:$0xff]  ;;  %v12447_v30 = vcombine.low %v2125_v41, %v2129_v51 }
 0x4e1   :  { %8833 = vmatpush2.bf16.msra.mxu0 %v12343_v56  ;;  %v2249_v32 = vld [vmem:[#allocation7 + $0x19f8] sm:$0xff] }
 0x4e2   :  { %8876 = vmatpush2.bf16.msra.mxu1 %v12471_v3  ;;  %8834 = vmatprep.subr.bf16.mxu0 %v12336_v6  ;;  %v2373_v13 = vld [vmem:[#allocation7 + $0x1dd8] sm:$0xff]  ;;  %v12568_v3 = vcombine.high %v2245_v4, %v2249_v32  ;;  %v12567_v11 = vcombine.low %v2245_v4, %v2249_v32 }
 0x4e3   :  { %8877 = vmatprep.subr.bf16.mxu1 %v12464_v50  ;;  %v2377_v56 = vld [vmem:[#allocation7 + $0x1df8] sm:$0xff] }
 0x4e4   :  { %v12696_v6 = vcombine.high %v2373_v13, %v2377_v56  ;;  %v2237_v50 = vld [vmem:[#allocation7 + $0x1998] sm:$0xff] }
 0x4e5   :  { %8835 = vmatpush2.bf16.msra.mxu0 %v12335_v57  ;;  %v2241_v34 = vld [vmem:[#allocation7 + $0x19b8] sm:$0xff]  ;;  %v14354_v57 = vpop.f32.mrf.mxu0 }
 0x4e6   :  { %8878 = vmatpush2.bf16.msra.mxu1 %v12463_v63  ;;  %8836 = vmatprep.subr.bf16.mxu0 %v12328_v9  ;;  %v2365_v59 = vld [vmem:[#allocation7 + $0x1d98] sm:$0xff]  ;;  %v12695_v63 = vcombine.low %v2373_v13, %v2377_v56  ;;  %v14356_v9 = vpop.f32.mrf.mxu1  ;;  %v12559_v4 = vcombine.low %v2237_v50, %v2241_v34 }
 0x4e7   :  { %8879 = vmatprep.subr.bf16.mxu1 %v12456_v29  ;;  %v2369_v26 = vld [vmem:[#allocation7 + $0x1db8] sm:$0xff]  ;;  %v12560_v29 = vcombine.high %v2237_v50, %v2241_v34 }
 0x4e8   :  { %v2229_v54 = vld [vmem:[#allocation7 + $0x1958] sm:$0xff]  ;;  %v12688_v51 = vcombine.high %v2365_v59, %v2369_v26  ;;  %v12687_v13 = vcombine.low %v2365_v59, %v2369_v26 }
 0x4e9   :  { %8837 = vmatpush2.bf16.msra.mxu0 %v12327_v22  ;;  %v2233_v37 = vld [vmem:[#allocation7 + $0x1978] sm:$0xff] }
 0x4ea   :  { %8880 = vmatpush2.bf16.msra.mxu1 %v12455_v35  ;;  %8838 = vmatprep.subr.bf16.mxu0 %v12320_v10  ;;  %v2357_v22 = vld [vmem:[#allocation7 + $0x1d58] sm:$0xff]  ;;  %v12552_v56 = vcombine.high %v2229_v54, %v2233_v37  ;;  %v12551_v34 = vcombine.low %v2229_v54, %v2233_v37 }
 0x4eb   :  { %8881 = vmatprep.subr.bf16.mxu1 %v12448_v55  ;;  %v2361_v35 = vld [vmem:[#allocation7 + $0x1d78] sm:$0xff] }
 0x4ec   :  { %v2353_v50 = vld [vmem:[#allocation7 + $0x1d38] sm:$0xff]  ;;  %v12679_v59 = vcombine.low %v2357_v22, %v2361_v35 }
 0x4ed   :  { %8839 = vmatpush2.bf16.msra.mxu0 %v12319_v49 }
 0x4ee   :  { %8882 = vmatpush2.bf16.msra.mxu1 %v12447_v30  ;;  %8894 = vmatprep.subr.bf16.mxu0 %v12568_v3  ;;  %v12680_v30 = vcombine.high %v2357_v22, %v2361_v35  ;;  %v2225_v3 = vld [vmem:[#allocation7 + $0x1938] sm:$0xff] }
 0x4ef   :  { %8937 = vmatprep.subr.bf16.mxu1 %v12696_v6  ;;  %v2205_v35 = vld [vmem:[#allocation7 + $0x1898] sm:$0xff] }
 0x4f0   :  { %v8584_v41 = vpop.f32.mrf.mxu0  ;;  %8841 = vmatmul.mubr.bf16.vlgmr.msra.gmra.mxu0 %v14155_v42 }
 0x4f1   :  { %v8585_v10 = vadd.f32 %v8584_v41, %v14346_v17  ;;  %v8627_v55 = vpop.f32.mrf.mxu1  ;;  %8884 = vmatmul.mubr.bf16.vlgmr.msra.gmra.mxu1 %v14157_v19  ;;  %8895 = vmatpush1.bf16.msra.mxu0 %v12567_v11  ;;  %v2221_v17 = vld [vmem:[#allocation7 + $0x1918] sm:$0xff] }
 0x4f2   :  { %8926 = vmatprep.mubr.bf16.mxu0 %v14159_v46  ;;  %8938 = vmatpush1.bf16.msra.mxu1 %v12695_v63  ;;  %v14362_v32 = vpop.f32.mrf.mxu0  ;;  %v2349_v19 = vld [vmem:[#allocation7 + $0x1d18] sm:$0xff]  ;;  %v12544_v26 = vcombine.high %v2221_v17, %v2225_v3 }
 0x4f3   :  { %v8628_v49 = vadd.f32 %v8627_v55, %v8585_v10  ;;  %8969 = vmatprep.mubr.bf16.mxu1 %v14162_v58  ;;  %v14365_v42 = vpop.f32.mrf.mxu1  ;;  %8896 = vmatprep.subr.bf16.mxu0 %v12560_v29  ;;  %v12672_v63 = vcombine.high %v2349_v19, %v2353_v50  ;;  %v2213_v29 = vld [vmem:[#allocation7 + $0x18d8] sm:$0xff] }
 0x4f4   :  { %14515 = vst [vmem:[#allocation48_spill] sm:$0xff] %v14365_v42  ;;  %v8588_v6 = vpop.f32.mrf.mxu0  ;;  %8939 = vmatprep.subr.bf16.mxu1 %v12688_v51  ;;  %v2217_v41 = vld [vmem:[#allocation7 + $0x18f8] sm:$0xff]  ;;  %v12543_v42 = vcombine.low %v2221_v17, %v2225_v3 }
 0x4f5   :  { %v8589_v46 = vadd.f32 %v8588_v6, %v14352_v44  ;;  %8897 = vmatpush1.bf16.msra.mxu0 %v12559_v4  ;;  %v8631_v11 = vpop.f32.mrf.mxu1  ;;  %v2341_v10 = vld [vmem:[#allocation7 + $0x1cd8] sm:$0xff]  ;;  %v8984_v31 = vmax.f32 %v8628_v49, 0.0  ;;  %v12671_v44 = vcombine.low %v2349_v19, %v2353_v50  ;;  %v12536_v54 = vcombine.high %v2213_v29, %v2217_v41 }
 0x4f6   :  { %8940 = vmatpush1.bf16.msra.mxu1 %v12687_v13  ;;  %8898 = vmatprep.subr.bf16.mxu0 %v12552_v56  ;;  %v2345_v55 = vld [vmem:[#allocation7 + $0x1cf8] sm:$0xff] }
 0x4f7   :  { %v8632_v58 = vadd.f32 %v8631_v11, %v8589_v46  ;;  %8941 = vmatprep.subr.bf16.mxu1 %v12680_v30  ;;  %v12664_v22 = vcombine.high %v2341_v10, %v2345_v55  ;;  %v2209_v4 = vld [vmem:[#allocation7 + $0x18b8] sm:$0xff]  ;;  %v12535_v30 = vcombine.low %v2213_v29, %v2217_v41  ;;  %v12663_v49 = vcombine.low %v2341_v10, %v2345_v55 }
 0x4f8   :  { %v2333_v13 = vld [vmem:[#allocation7 + $0x1c98] sm:$0xff]  ;;  %v12528_v6 = vcombine.high %v2205_v35, %v2209_v4 }
 0x4f9   :  { %v8992_v51 = vmax.f32 %v8632_v58, 0.0  ;;  %8899 = vmatpush1.bf16.msra.mxu0 %v12551_v34  ;;  %v2337_v56 = vld [vmem:[#allocation7 + $0x1cb8] sm:$0xff] }
 0x4fa   :  { %8942 = vmatpush1.bf16.msra.mxu1 %v12679_v59  ;;  %8900 = vmatprep.subr.bf16.mxu0 %v12544_v26  ;;  %v12656_v17 = vcombine.high %v2333_v13, %v2337_v56  ;;  %v2197_v3 = vld [vmem:[#allocation7 + $0x1858] sm:$0xff]  ;;  %v12655_v34 = vcombine.low %v2333_v13, %v2337_v56 }
 0x4fb   :  { %v14368_v37 = vpack.c.bf16 %v8992_v51, %v8984_v31  ;;  %8943 = vmatprep.subr.bf16.mxu1 %v12672_v63  ;;  %v2201_v46 = vld [vmem:[#allocation7 + $0x1878] sm:$0xff]  ;;  %v12527_v31 = vcombine.low %v2205_v35, %v2209_v4 }
 0x4fc   :  { %v2325_v19 = vld [vmem:[#allocation7 + $0x1c58] sm:$0xff]  ;;  %v12520_v11 = vcombine.high %v2197_v3, %v2201_v46  ;;  %v12519_v29 = vcombine.low %v2197_v3, %v2201_v46 }
 0x4fd   :  { %8901 = vmatpush1.bf16.msra.mxu0 %v12543_v42  ;;  %v2329_v50 = vld [vmem:[#allocation7 + $0x1c78] sm:$0xff] }
 0x4fe   :  { %8944 = vmatpush1.bf16.msra.mxu1 %v12671_v44  ;;  %8902 = vmatprep.subr.bf16.mxu0 %v12536_v54  ;;  %v12648_v59 = vcombine.high %v2325_v19, %v2329_v50  ;;  %v2189_v42 = vld [vmem:[#allocation7 + $0x1818] sm:$0xff]  ;;  %v12647_v41 = vcombine.low %v2325_v19, %v2329_v50  ;;  %v14370_v50 = vld [vmem:[#allocation8] sm:$0xff] }
 0x4ff   :  { %8945 = vmatprep.subr.bf16.mxu1 %v12664_v22  ;;  %v2193_v26 = vld [vmem:[#allocation7 + $0x1838] sm:$0xff] }
 0x500   :  { %v2317_v58 = vld [vmem:[#allocation7 + $0x1c18] sm:$0xff]  ;;  %v12512_v10 = vcombine.high %v2189_v42, %v2193_v26  ;;  %v12511_v35 = vcombine.low %v2189_v42, %v2193_v26 }
 0x501   :  { %8903 = vmatpush1.bf16.msra.mxu0 %v12535_v30  ;;  %v2321_v63 = vld [vmem:[#allocation7 + $0x1c38] sm:$0xff] }
 0x502   :  { %8946 = vmatpush1.bf16.msra.mxu1 %v12663_v49  ;;  %8904 = vmatprep.subr.bf16.mxu0 %v12528_v6  ;;  %v12640_v55 = vcombine.high %v2317_v58, %v2321_v63  ;;  %v2309_v51 = vld [vmem:[#allocation7 + $0x1bd8] sm:$0xff]  ;;  %v12639_v4 = vcombine.low %v2317_v58, %v2321_v63  ;;  %v2459_v58 = vrot.slane %v14370_v50, %v14034_v18 }
 0x503   :  { %8947 = vmatprep.subr.bf16.mxu1 %v12656_v17  ;;  %v2313_v44 = vld [vmem:[#allocation7 + $0x1bf8] sm:$0xff] }
 0x504   :  { %v2437_v54 = vld [vmem:[#allocation7 + $0x1fd8] sm:$0xff]  ;;  %v12632_v13 = vcombine.high %v2309_v51, %v2313_v44  ;;  %v12631_v3 = vcombine.low %v2309_v51, %v2313_v44  ;;  %v7989_v51 = vadd.f32 %v14249_v7, %v2459_v58 }
 0x505   :  { %8905 = vmatpush1.bf16.msra.mxu0 %v12527_v31  ;;  %v2441_v22 = vld [vmem:[#allocation7 + $0x1ff8] sm:$0xff]  ;;  %v2451_v31 = vrot.slane %v14370_v50, %v14028_v16 }
 0x506   :  { %8948 = vmatpush1.bf16.msra.mxu1 %v12655_v34  ;;  %8906 = vmatprep.subr.bf16.mxu0 %v12520_v11  ;;  %v12760_v56 = vcombine.high %v2437_v54, %v2441_v22  ;;  %v2301_v30 = vld [vmem:[#allocation7 + $0x1b98] sm:$0xff]  ;;  %v12759_v46 = vcombine.low %v2437_v54, %v2441_v22  ;;  %v8032_v7 = vadd.f32 %v14251_v27, %v7989_v51 }
 0x507   :  { %8949 = vmatprep.subr.bf16.mxu1 %v12648_v59  ;;  %v2305_v49 = vld [vmem:[#allocation7 + $0x1bb8] sm:$0xff] }
 0x508   :  { %v2429_v6 = vld [vmem:[#allocation7 + $0x1f98] sm:$0xff]  ;;  %v12624_v19 = vcombine.high %v2301_v30, %v2305_v49  ;;  %v12623_v63 = vcombine.low %v2301_v30, %v2305_v49 }
 0x509   :  { %8907 = vmatpush1.bf16.msra.mxu0 %v12519_v29  ;;  %v2433_v17 = vld [vmem:[#allocation7 + $0x1fb8] sm:$0xff]  ;;  %v7645_v29 = vadd.f32 %v14180_v43, %v2451_v31 }
 0x50a   :  { %8950 = vmatpush1.bf16.msra.mxu1 %v12647_v41  ;;  %8908 = vmatprep.subr.bf16.mxu0 %v12512_v10  ;;  %v12752_v34 = vcombine.high %v2429_v6, %v2433_v17  ;;  %v2293_v11 = vld [vmem:[#allocation7 + $0x1b58] sm:$0xff]  ;;  %v12751_v41 = vcombine.low %v2429_v6, %v2433_v17 }
 0x50b   :  { %8951 = vmatprep.subr.bf16.mxu1 %v12640_v55  ;;  %v2297_v59 = vld [vmem:[#allocation7 + $0x1b78] sm:$0xff]  ;;  %v7641_v55 = vadd.f32 %v14171_v12, %v2451_v31  ;;  %v7688_v43 = vadd.f32 %v14182_v47, %v7645_v29 }
 0x50c   :  { %v2421_v42 = vld [vmem:[#allocation7 + $0x1f58] sm:$0xff]  ;;  %v12616_v10 = vcombine.high %v2293_v11, %v2297_v59 }
 0x50d   :  { %8909 = vmatpush1.bf16.msra.mxu0 %v12511_v35  ;;  %v2425_v26 = vld [vmem:[#allocation7 + $0x1f78] sm:$0xff]  ;;  %v7684_v12 = vadd.f32 %v14176_v21, %v7641_v55  ;;  %v14516_v55 = vld [vmem:[#allocation40_spill] sm:$0xff] }
 0x50e   :  { %8952 = vmatpush1.bf16.msra.mxu1 %v12639_v4  ;;  %8910 = vmatprep.subr.bf16.mxu0 %v12632_v13  ;;  %v12744_v44 = vcombine.high %v2421_v42, %v2425_v26  ;;  %v2285_v54 = vld [vmem:[#allocation7 + $0x1b18] sm:$0xff]  ;;  %v7985_v13 = vadd.f32 %v14240_v23, %v2459_v58  ;;  %v12743_v30 = vcombine.low %v2421_v42, %v2425_v26 }
 0x50f   :  { %8953 = vmatprep.subr.bf16.mxu1 %v12760_v56  ;;  %v2289_v22 = vld [vmem:[#allocation7 + $0x1b38] sm:$0xff]  ;;  %v12615_v56 = vcombine.low %v2293_v11, %v2297_v59  ;;  %v7727_v31 = vadd.f32 %v14188_v5, %v7684_v12 }
 0x510   :  { %v2413_v35 = vld [vmem:[#allocation7 + $0x1f18] sm:$0xff]  ;;  %v12608_v49 = vcombine.high %v2285_v54, %v2289_v22  ;;  %v8028_v47 = vadd.f32 %v14245_v25, %v7985_v13  ;;  %v12607_v11 = vcombine.low %v2285_v54, %v2289_v22 }
 0x511   :  { %8911 = vmatpush2.bf16.msra.mxu0 %v12631_v3  ;;  %v2417_v4 = vld [vmem:[#allocation7 + $0x1f38] sm:$0xff]  ;;  %v7770_v25 = vadd.f32 %v14193_v8, %v7727_v31 }
 0x512   :  { %8954 = vmatpush2.bf16.msra.mxu1 %v12759_v46  ;;  %8912 = vmatprep.subr.bf16.mxu0 %v12624_v19  ;;  %v12736_v6 = vcombine.high %v2413_v35, %v2417_v4  ;;  %v2277_v17 = vld [vmem:[#allocation7 + $0x1ad8] sm:$0xff]  ;;  %v7731_v46 = vadd.f32 %v14198_v0, %v7688_v43  ;;  %v12735_v21 = vcombine.low %v2413_v35, %v2417_v4  ;;  %v14518_v4 = vld [vmem:[#allocation32_spill] sm:$0xff] }
 0x513   :  { %8955 = vmatprep.subr.bf16.mxu1 %v12752_v34  ;;  %v2281_v3 = vld [vmem:[#allocation7 + $0x1af8] sm:$0xff]  ;;  %v8075_v34 = vadd.f32 %v14267_v39, %v8032_v7  ;;  %v8071_v59 = vadd.f32 %v14257_v40, %v8028_v47  ;;  %v7813_v8 = vadd.f32 %v14518_v4, %v7770_v25  ;;  %v14526_v25 = vld [vmem:[#allocation45_spill] sm:$0xff] }
 0x514   :  { %v2405_v19 = vld [vmem:[#allocation7 + $0x1ed8] sm:$0xff]  ;;  %v12600_v27 = vcombine.high %v2277_v17, %v2281_v3  ;;  %v7774_v58 = vadd.f32 %v14200_v1, %v7731_v46  ;;  %v12599_v29 = vcombine.low %v2277_v17, %v2281_v3 }
 0x515   :  { %8913 = vmatpush2.bf16.msra.mxu0 %v12623_v63  ;;  %v2409_v23 = vld [vmem:[#allocation7 + $0x1ef8] sm:$0xff]  ;;  %v8118_v39 = vadd.f32 %v14269_v20, %v8075_v34  ;;  %v8114_v51 = vadd.f32 %v14516_v55, %v8071_v59 }
 0x516   :  { %8956 = vmatpush2.bf16.msra.mxu1 %v12751_v41  ;;  %8914 = vmatprep.subr.bf16.mxu0 %v12616_v10  ;;  %v12728_v42 = vcombine.high %v2405_v19, %v2409_v23  ;;  %v2269_v26 = vld [vmem:[#allocation7 + $0x1a98] sm:$0xff]  ;;  %v7817_v41 = vadd.f32 %v14216_v45, %v7774_v58  ;;  %v12727_v10 = vcombine.low %v2405_v19, %v2409_v23  ;;  %v14522_v23 = vld [vmem:[#allocation33_spill] sm:$0xff] }
 0x517   :  { %8957 = vmatprep.subr.bf16.mxu1 %v12744_v44  ;;  %v2273_v0 = vld [vmem:[#allocation7 + $0x1ab8] sm:$0xff]  ;;  %v14517_v44 = vld [vmem:[#allocation43_spill] sm:$0xff]  ;;  %v7856_v31 = vadd.f32 %v14522_v23, %v7813_v8 }
 0x518   :  { %v2397_v63 = vld [vmem:[#allocation7 + $0x1e98] sm:$0xff]  ;;  %v12592_v40 = vcombine.high %v2269_v26, %v2273_v0  ;;  %v8161_v54 = vadd.f32 %v14517_v44, %v8118_v39  ;;  %v12591_v45 = vcombine.low %v2269_v26, %v2273_v0  ;;  %v14525_v0 = vld [vmem:[#allocation35_spill] sm:$0xff] }
 0x519   :  { %8915 = vmatpush2.bf16.msra.mxu0 %v12615_v56  ;;  %v2401_v5 = vld [vmem:[#allocation7 + $0x1eb8] sm:$0xff]  ;;  %v14519_v56 = vld [vmem:[#allocation41_spill] sm:$0xff]  ;;  %v7899_v58 = vadd.f32 %v14525_v0, %v7856_v31 }
 0x51a   :  { %8958 = vmatpush2.bf16.msra.mxu1 %v12743_v30  ;;  %8916 = vmatprep.subr.bf16.mxu0 %v12608_v49  ;;  %v12720_v1 = vcombine.high %v2397_v63, %v2401_v5  ;;  %v2261_v22 = vld [vmem:[#allocation7 + $0x1a58] sm:$0xff]  ;;  %v8157_v43 = vadd.f32 %v14519_v56, %v8114_v51  ;;  %v12719_v12 = vcombine.low %v2397_v63, %v2401_v5  ;;  %v14528_v51 = vld [vmem:[#allocation36_spill] sm:$0xff] }
 0x51b   :  { %8959 = vmatprep.subr.bf16.mxu1 %v12736_v6  ;;  %v2265_v35 = vld [vmem:[#allocation7 + $0x1a78] sm:$0xff]  ;;  %v14521_v6 = vld [vmem:[#allocation44_spill] sm:$0xff] }
 0x51c   :  { %v2389_v13 = vld [vmem:[#allocation7 + $0x1e58] sm:$0xff]  ;;  %v12584_v7 = vcombine.high %v2261_v22, %v2265_v35  ;;  %v8204_v17 = vadd.f32 %v14521_v6, %v8161_v54  ;;  %v12583_v26 = vcombine.low %v2261_v22, %v2265_v35 }
 0x51d   :  { %8917 = vmatpush2.bf16.msra.mxu0 %v12607_v11  ;;  %v2393_v20 = vld [vmem:[#allocation7 + $0x1e78] sm:$0xff] }
 0x51e   :  { %8960 = vmatpush2.bf16.msra.mxu1 %v12735_v21  ;;  %8918 = vmatprep.subr.bf16.mxu0 %v12600_v27  ;;  %v14520_v30 = vld [vmem:[#allocation34_spill] sm:$0xff]  ;;  %v12712_v3 = vcombine.high %v2389_v13, %v2393_v20  ;;  %v12711_v63 = vcombine.low %v2389_v13, %v2393_v20 }
 0x51f   :  { %8961 = vmatprep.subr.bf16.mxu1 %v12728_v42  ;;  %v7860_v49 = vadd.f32 %v14520_v30, %v7817_v41  ;;  %v2253_v46 = vld [vmem:[#allocation7 + $0x1a18] sm:$0xff]  ;;  %v8247_v42 = vadd.f32 %v14302_v2, %v8204_v17  ;;  %v14527_v41 = vld [vmem:[#allocation39_spill] sm:$0xff]  ;;  %v7942_v2 = vadd.f32 %v14528_v51, %v7899_v58 }
 0x520   :  { %v2257_v19 = vld [vmem:[#allocation7 + $0x1a38] sm:$0xff] }
 0x521   :  { %8919 = vmatpush2.bf16.msra.mxu0 %v12599_v29  ;;  %v14523_v47 = vld [vmem:[#allocation38_spill] sm:$0xff]  ;;  %v12576_v5 = vcombine.high %v2253_v46, %v2257_v19  ;;  %v12575_v55 = vcombine.low %v2253_v46, %v2257_v19  ;;  %v8981_v20 = vmax.f32 %v7942_v2, 0.0 }
 0x522   :  { %8962 = vmatpush2.bf16.msra.mxu1 %v12727_v10  ;;  %8920 = vmatprep.subr.bf16.mxu0 %v12592_v40  ;;  %v7903_v34 = vadd.f32 %v14523_v47, %v7860_v49  ;;  %v2381_v11 = vld [vmem:[#allocation7 + $0x1e18] sm:$0xff]  ;;  %v8290_v40 = vadd.f32 %v14304_v38, %v8247_v42 }
 0x523   :  { %8963 = vmatprep.subr.bf16.mxu1 %v12720_v1  ;;  %v2385_v21 = vld [vmem:[#allocation7 + $0x1e38] sm:$0xff] }
 0x524   :  { %v14524_v27 = vld [vmem:[#allocation42_spill] sm:$0xff]  ;;  %v12704_v29 = vcombine.high %v2381_v11, %v2385_v21  ;;  %v7946_v10 = vadd.f32 %v14527_v41, %v7903_v34  ;;  %v12703_v44 = vcombine.low %v2381_v11, %v2385_v21  ;;  %v8991_v8 = vmax.f32 %v8290_v40, 0.0 }
 0x525   :  { %v8200_v59 = vadd.f32 %v14524_v27, %v8157_v43  ;;  %8921 = vmatpush2.bf16.msra.mxu0 %v12591_v45  ;;  %v13144_v54 = vld [vmem:[#allocation10 + $0xe4] ss:$16 sps:$4 sm:$0xff]   ;;  %v13142_v13 = vld [vmem:[#allocation10 + $0xe0] ss:$16 sps:$4 sm:$0xff]  }
 0x526   :  { %8964 = vmatpush2.bf16.msra.mxu1 %v12719_v12  ;;  %8922 = vmatprep.subr.bf16.mxu0 %v12584_v7  ;;  %v14529_v1 = vld [vmem:[#allocation46_spill] sm:$0xff]  ;;  %v8989_v4 = vmax.f32 %v7946_v10, 0.0 }
 0x527   :  { %v8243_v39 = vadd.f32 %v14526_v25, %v8200_v59  ;;  %8965 = vmatprep.subr.bf16.mxu1 %v12712_v3  ;;  %v13147_v35 = vld [vmem:[#allocation10 + $0x2e4] ss:$16 sps:$4 sm:$0xff]   ;;  %v13145_v38 = vld [vmem:[#allocation10 + $0x2e0] ss:$16 sps:$4 sm:$0xff]  }
 0x528   :  { %v13150_v43 = vld [vmem:[#allocation10 + $0xc4] ss:$16 sps:$4 sm:$0xff]   ;;  %v14408_v45 = vpack.c.bf16 %v8989_v4, %v8981_v20  ;;  %v13148_v12 = vld [vmem:[#allocation10 + $0xc0] ss:$16 sps:$4 sm:$0xff]  }
 0x529   :  { %8923 = vmatpush2.bf16.msra.mxu0 %v12583_v26  ;;  %v8286_v22 = vadd.f32 %v14529_v1, %v8243_v39  ;;  %v13153_v30 = vld [vmem:[#allocation10 + $0x2c4] ss:$16 sps:$4 sm:$0xff]   ;;  %v13151_v7 = vld [vmem:[#allocation10 + $0x2c0] ss:$16 sps:$4 sm:$0xff]  }
 0x52a   :  { %8966 = vmatpush2.bf16.msra.mxu1 %v12711_v63  ;;  %8924 = vmatprep.subr.bf16.mxu0 %v12576_v5  ;;  %v13156_v6 = vld [vmem:[#allocation10 + $0xa4] ss:$16 sps:$4 sm:$0xff]   ;;  %v13154_v3 = vld [vmem:[#allocation10 + $0xa0] ss:$16 sps:$4 sm:$0xff]  }
 0x52b   :  { %8967 = vmatprep.subr.bf16.mxu1 %v12704_v29  ;;  %v8983_v56 = vmax.f32 %v8286_v22, 0.0  ;;  %v13159_v17 = vld [vmem:[#allocation10 + $0x2a4] ss:$16 sps:$4 sm:$0xff]   ;;  %v13160_v19 = vld [vmem:[#allocation10 + $0x80] ss:$16 sps:$4 sm:$0xff]  }
 0x52c   :  { %v13162_v46 = vld [vmem:[#allocation10 + $0x84] ss:$16 sps:$4 sm:$0xff]   ;;  %v13163_v23 = vld [vmem:[#allocation10 + $0x280] ss:$16 sps:$4 sm:$0xff]  }
 0x52d   :  { %8925 = vmatpush2.bf16.msra.mxu0 %v12575_v55  ;;  %v14411_v49 = vpack.c.bf16 %v8991_v8, %v8983_v56  ;;  %v13168_v31 = vld [vmem:[#allocation10 + $0x64] ss:$16 sps:$4 sm:$0xff]   ;;  %v13166_v34 = vld [vmem:[#allocation10 + $0x60] ss:$16 sps:$4 sm:$0xff]  }
 0x52e   :  { %8968 = vmatpush2.bf16.msra.mxu1 %v12703_v44  ;;  %10562 = vmatprep.subr.bf16.mxu0 %v13144_v54  ;;  %v13171_v47 = vld [vmem:[#allocation10 + $0x264] ss:$16 sps:$4 sm:$0xff]   ;;  %v13169_v11 = vld [vmem:[#allocation10 + $0x260] ss:$16 sps:$4 sm:$0xff]   ;;  %v14530_v44 = vld [vmem:[#allocation29_spill] sm:$0xff] }
 0x52f   :  { %10605 = vmatprep.subr.bf16.mxu1 %v13147_v35  ;;  %v13174_v21 = vld [vmem:[#allocation10 + $0x44] ss:$16 sps:$4 sm:$0xff]   ;;  %v13172_v59 = vld [vmem:[#allocation10 + $0x40] ss:$16 sps:$4 sm:$0xff]   ;;  %v2467_v54 = vrot.slane %v14370_v50, %v14530_v44 }
 0x530   :  { %8927 = vmatmul.mubr.bf16.vlgmr.msra.gmra.mxu0 %v14137_v24  ;;  %v13157_v24 = vld [vmem:[#allocation10 + $0x2a0] ss:$16 sps:$4 sm:$0xff]   ;;  %v13177_v27 = vld [vmem:[#allocation10 + $0x244] ss:$16 sps:$4 sm:$0xff]  }
 0x531   :  { %8970 = vmatmul.mubr.bf16.vlgmr.msra.gmra.mxu1 %v14139_v28  ;;  %10563 = vmatpush1.bf16.msra.mxu0 %v13142_v13  ;;  %v13165_v28 = vld [vmem:[#allocation10 + $0x284] ss:$16 sps:$4 sm:$0xff]   ;;  %v13175_v42 = vld [vmem:[#allocation10 + $0x240] ss:$16 sps:$4 sm:$0xff]   ;;  %v8333_v22 = vadd.f32 %v14318_v48, %v2467_v54  ;;  %v8329_v13 = vadd.f32 %v14309_v61, %v2467_v54 }
 0x532   :  { %10594 = vmatprep.mubr.bf16.mxu0 %v14408_v45  ;;  %10606 = vmatpush1.bf16.msra.mxu1 %v13145_v38  ;;  %v13180_v26 = vld [vmem:[#allocation10 + $0x24] ss:$16 sps:$4 sm:$0xff]   ;;  %v13178_v58 = vld [vmem:[#allocation10 + $0x20] ss:$16 sps:$4 sm:$0xff]  }
 0x533   :  { %10637 = vmatprep.mubr.bf16.mxu1 %v14411_v49  ;;  %10564 = vmatprep.subr.bf16.mxu0 %v13150_v43  ;;  %v13183_v0 = vld [vmem:[#allocation10 + $0x224] ss:$16 sps:$4 sm:$0xff]   ;;  %v13181_v63 = vld [vmem:[#allocation10 + $0x220] ss:$16 sps:$4 sm:$0xff]   ;;  %v8376_v38 = vadd.f32 %v14320_v33, %v8333_v22  ;;  %v8372_v48 = vadd.f32 %v14314_v14, %v8329_v13 }
 0x534   :  { %10607 = vmatprep.subr.bf16.mxu1 %v13153_v30  ;;  %v13186_v5 = vld [vmem:[#allocation10 + $0x4] ss:$16 sps:$4 sm:$0xff]   ;;  %v13184_v39 = vld [vmem:[#allocation10] ss:$16 sps:$4 sm:$0xff]  }
 0x535   :  { %10565 = vmatpush1.bf16.msra.mxu0 %v13148_v12  ;;  %v13189_v25 = vld [vmem:[#allocation10 + $0x204] ss:$16 sps:$4 sm:$0xff]   ;;  %v13187_v29 = vld [vmem:[#allocation10 + $0x200] ss:$16 sps:$4 sm:$0xff]   ;;  %v8419_v12 = vadd.f32 %v14336_v52, %v8376_v38 }
 0x536   :  { %10608 = vmatpush1.bf16.msra.mxu1 %v13151_v7  ;;  %10566 = vmatprep.subr.bf16.mxu0 %v13156_v6  ;;  %v13192_v41 = vld [vmem:[#allocation10 + $0x1e4] ss:$16 sps:$4 sm:$0xff]   ;;  %v13190_v40 = vld [vmem:[#allocation10 + $0x1e0] ss:$16 sps:$4 sm:$0xff]   ;;  %v8415_v6 = vadd.f32 %v14326_v60, %v8372_v48 }
 0x537   :  { %10609 = vmatprep.subr.bf16.mxu1 %v13159_v17  ;;  %v13195_v10 = vld [vmem:[#allocation10 + $0x3e4] ss:$16 sps:$4 sm:$0xff]   ;;  %v13193_v55 = vld [vmem:[#allocation10 + $0x3e0] ss:$16 sps:$4 sm:$0xff]  }
 0x538   :  { %v13198_v51 = vld [vmem:[#allocation10 + $0x1c4] ss:$16 sps:$4 sm:$0xff]   ;;  %v13196_v1 = vld [vmem:[#allocation10 + $0x1c0] ss:$16 sps:$4 sm:$0xff]  }
 0x539   :  { %10567 = vmatpush1.bf16.msra.mxu0 %v13154_v3  ;;  %v13201_v2 = vld [vmem:[#allocation10 + $0x3c4] ss:$16 sps:$4 sm:$0xff]   ;;  %v13199_v35 = vld [vmem:[#allocation10 + $0x3c0] ss:$16 sps:$4 sm:$0xff]   ;;  %v8462_v3 = vadd.f32 %v14338_v36, %v8419_v12 }
 0x53a   :  { %10610 = vmatpush1.bf16.msra.mxu1 %v13157_v24  ;;  %10568 = vmatprep.subr.bf16.mxu0 %v13162_v46  ;;  %v13204_v4 = vld [vmem:[#allocation10 + $0x1a4] ss:$16 sps:$4 sm:$0xff]   ;;  %v13202_v20 = vld [vmem:[#allocation10 + $0x1a0] ss:$16 sps:$4 sm:$0xff]   ;;  %v8458_v46 = vadd.f32 %v14331_v53, %v8415_v6 }
 0x53b   :  { %10611 = vmatprep.subr.bf16.mxu1 %v13165_v28  ;;  %v13207_v8 = vld [vmem:[#allocation10 + $0x3a4] ss:$16 sps:$4 sm:$0xff]   ;;  %v13205_v56 = vld [vmem:[#allocation10 + $0x3a0] ss:$16 sps:$4 sm:$0xff]   ;;  %v8505_v14 = vadd.f32 %v14354_v57, %v8462_v3 }
 0x53c   :  { %v13210_v43 = vld [vmem:[#allocation10 + $0x184] ss:$16 sps:$4 sm:$0xff]   ;;  %v13208_v7 = vld [vmem:[#allocation10 + $0x180] ss:$16 sps:$4 sm:$0xff]  }
 0x53d   :  { %10569 = vmatpush1.bf16.msra.mxu0 %v13160_v19  ;;  %v13213_v30 = vld [vmem:[#allocation10 + $0x384] ss:$16 sps:$4 sm:$0xff]   ;;  %v13211_v61 = vld [vmem:[#allocation10 + $0x380] ss:$16 sps:$4 sm:$0xff]   ;;  %v8501_v19 = vadd.f32 %v14344_v62, %v8458_v46 }
 0x53e   :  { %10612 = vmatpush1.bf16.msra.mxu1 %v13163_v23  ;;  %10570 = vmatprep.subr.bf16.mxu0 %v13168_v31  ;;  %v13216_v17 = vld [vmem:[#allocation10 + $0x164] ss:$16 sps:$4 sm:$0xff]   ;;  %v13214_v24 = vld [vmem:[#allocation10 + $0x160] ss:$16 sps:$4 sm:$0xff]   ;;  %v8590_v23 = vpop.f32.mrf.mxu0 }
 0x53f   :  { %10613 = vmatprep.subr.bf16.mxu1 %v13171_v47  ;;  %v13219_v33 = vld [vmem:[#allocation10 + $0x364] ss:$16 sps:$4 sm:$0xff]   ;;  %v13217_v52 = vld [vmem:[#allocation10 + $0x360] ss:$16 sps:$4 sm:$0xff]   ;;  %v8548_v47 = vadd.f32 %v14356_v9, %v8505_v14  ;;  %v8544_v57 = vadd.f32 %v14349_v15, %v8501_v19 }
 0x540   :  { %v13222_v28 = vld [vmem:[#allocation10 + $0x144] ss:$16 sps:$4 sm:$0xff]   ;;  %v13220_v31 = vld [vmem:[#allocation10 + $0x140] ss:$16 sps:$4 sm:$0xff]  }
 0x541   :  { %10571 = vmatpush1.bf16.msra.mxu0 %v13166_v34  ;;  %v13225_v60 = vld [vmem:[#allocation10 + $0x344] ss:$16 sps:$4 sm:$0xff]   ;;  %v13223_v36 = vld [vmem:[#allocation10 + $0x340] ss:$16 sps:$4 sm:$0xff]  }
 0x542   :  { %10614 = vmatpush1.bf16.msra.mxu1 %v13169_v11  ;;  %10572 = vmatprep.subr.bf16.mxu0 %v13174_v21  ;;  %v13228_v34 = vld [vmem:[#allocation10 + $0x124] ss:$16 sps:$4 sm:$0xff]   ;;  %v8591_v11 = vadd.f32 %v8590_v23, %v8548_v47  ;;  %v13226_v21 = vld [vmem:[#allocation10 + $0x120] ss:$16 sps:$4 sm:$0xff]  }
 0x543   :  { %10615 = vmatprep.subr.bf16.mxu1 %v13177_v27  ;;  %v13231_v53 = vld [vmem:[#allocation10 + $0x324] ss:$16 sps:$4 sm:$0xff]   ;;  %v8587_v27 = vadd.f32 %v14362_v32, %v8544_v57  ;;  %v13229_v62 = vld [vmem:[#allocation10 + $0x320] ss:$16 sps:$4 sm:$0xff]  }
 0x544   :  { %v13237_v9 = vld [vmem:[#allocation10 + $0x304] ss:$16 sps:$4 sm:$0xff]   ;;  %v13235_v15 = vld [vmem:[#allocation10 + $0x300] ss:$16 sps:$4 sm:$0xff]  }
 0x545   :  { %10573 = vmatpush1.bf16.msra.mxu0 %v13172_v59  ;;  %v13234_v59 = vld [vmem:[#allocation10 + $0x104] ss:$16 sps:$4 sm:$0xff]   ;;  %v13238_v32 = vld [vmem:[#allocation10 + $0x4e0] ss:$16 sps:$4 sm:$0xff]  }
 0x546   :  { %10616 = vmatpush1.bf16.msra.mxu1 %v13175_v42  ;;  %10574 = vmatprep.subr.bf16.mxu0 %v13180_v26  ;;  %v8633_v42 = vpop.f32.mrf.mxu1  ;;  %v13241_v44 = vld [vmem:[#allocation10 + $0x4c0] ss:$16 sps:$4 sm:$0xff]   ;;  %v13246_v54 = vld [vmem:[#allocation10 + $0x4a4] ss:$16 sps:$4 sm:$0xff]  }
 0x547   :  { %10617 = vmatprep.subr.bf16.mxu1 %v13183_v0  ;;  %v8634_v26 = vadd.f32 %v8633_v42, %v8591_v11  ;;  %v13232_v0 = vld [vmem:[#allocation10 + $0x100] ss:$16 sps:$4 sm:$0xff]   ;;  %v13312_v22 = vld [vmem:[#allocation10 + $0x6a4] ss:$16 sps:$4 sm:$0xff]  }
 0x548   :  { %v13318_v13 = vld [vmem:[#allocation10 + $0x684] ss:$16 sps:$4 sm:$0xff]   ;;  %v13322_v12 = vld [vmem:[#allocation10 + $0x660] ss:$16 sps:$4 sm:$0xff]  }
 0x549   :  { %10575 = vmatpush1.bf16.msra.mxu0 %v13178_v58  ;;  %v14531_v58 = vld [vmem:[#allocation48_spill] sm:$0xff] }
 0x54a   :  { %10618 = vmatpush1.bf16.msra.mxu1 %v13181_v63  ;;  %10576 = vmatprep.subr.bf16.mxu0 %v13186_v5  ;;  %v8630_v63 = vadd.f32 %v14531_v58, %v8587_v27  ;;  %v13240_v5 = vld [vmem:[#allocation10 + $0x4e4] ss:$16 sps:$4 sm:$0xff]   ;;  %v13253_v6 = vld [vmem:[#allocation10 + $0x440] ss:$16 sps:$4 sm:$0xff]  }
 0x54b   :  { %10619 = vmatprep.subr.bf16.mxu1 %v13189_v25  ;;  %v13300_v25 = vld [vmem:[#allocation10 + $0x6e4] ss:$16 sps:$4 sm:$0xff]   ;;  %v13256_v3 = vld [vmem:[#allocation10 + $0x420] ss:$16 sps:$4 sm:$0xff]  }
 0x54c   :  { %v13252_v38 = vld [vmem:[#allocation10 + $0x464] ss:$16 sps:$4 sm:$0xff]   ;;  %v13334_v46 = vld [vmem:[#allocation10 + $0x620] ss:$16 sps:$4 sm:$0xff]  }
 0x54d   :  { %10577 = vmatpush1.bf16.msra.mxu0 %v13184_v39  ;;  %v8993_v39 = vmax.f32 %v8634_v26, 0.0  ;;  %v13255_v48 = vld [vmem:[#allocation10 + $0x444] ss:$16 sps:$4 sm:$0xff]   ;;  %v13262_v23 = vld [vmem:[#allocation10 + $0x5e0] ss:$16 sps:$4 sm:$0xff]  }
 0x54e   :  { %10620 = vmatpush1.bf16.msra.mxu1 %v13187_v29  ;;  %10578 = vmatprep.subr.bf16.mxu0 %v13192_v41  ;;  %v8985_v29 = vmax.f32 %v8630_v63, 0.0  ;;  %v13243_v41 = vld [vmem:[#allocation10 + $0x4c4] ss:$16 sps:$4 sm:$0xff]   ;;  %v13346_v47 = vld [vmem:[#allocation10 + $0x7e0] ss:$16 sps:$4 sm:$0xff]  }
 0x54f   :  { %10621 = vmatprep.subr.bf16.mxu1 %v13195_v10  ;;  %v13298_v10 = vld [vmem:[#allocation10 + $0x6e0] ss:$16 sps:$4 sm:$0xff]   ;;  %v13342_v14 = vld [vmem:[#allocation10 + $0x604] ss:$16 sps:$4 sm:$0xff]  }
 0x550   :  { %v13348_v19 = vld [vmem:[#allocation10 + $0x7e4] ss:$16 sps:$4 sm:$0xff]   ;;  %v13352_v57 = vld [vmem:[#allocation10 + $0x7c0] ss:$16 sps:$4 sm:$0xff]  }
 0x551   :  { %10579 = vmatpush2.bf16.msra.mxu0 %v13190_v40  ;;  %v14432_v40 = vpack.c.bf16 %v8993_v39, %v8985_v29  ;;  %v13360_v11 = vld [vmem:[#allocation10 + $0x7a4] ss:$16 sps:$4 sm:$0xff]   ;;  %v13271_v42 = vld [vmem:[#allocation10 + $0x580] ss:$16 sps:$4 sm:$0xff]  }
 0x552   :  { %10622 = vmatpush2.bf16.msra.mxu1 %v13193_v55  ;;  %10580 = vmatprep.subr.bf16.mxu0 %v13198_v51  ;;  %v14532_v55 = vld [vmem:[#allocation37_spill] sm:$0xff]  ;;  %v13306_v51 = vld [vmem:[#allocation10 + $0x6c4] ss:$16 sps:$4 sm:$0xff]   ;;  %v13364_v26 = vld [vmem:[#allocation10 + $0x780] ss:$16 sps:$4 sm:$0xff]  }
 0x553   :  { %10623 = vmatprep.subr.bf16.mxu1 %v13201_v2  ;;  %v14533_v2 = vld [vmem:[#allocation47_spill] sm:$0xff]  ;;  %v13273_v27 = vld [vmem:[#allocation10 + $0x584] ss:$16 sps:$4 sm:$0xff]   ;;  %v13274_v58 = vld [vmem:[#allocation10 + $0x560] ss:$16 sps:$4 sm:$0xff]  }
 0x554   :  { %v13279_v63 = vld [vmem:[#allocation10 + $0x544] ss:$16 sps:$4 sm:$0xff]  }
 0x555   :  { %10581 = vmatpush2.bf16.msra.mxu0 %v13196_v1  ;;  %v13304_v1 = vld [vmem:[#allocation10 + $0x6c0] ss:$16 sps:$4 sm:$0xff]   ;;  %v13282_v39 = vld [vmem:[#allocation10 + $0x524] ss:$16 sps:$4 sm:$0xff]  }
 0x556   :  { %10624 = vmatpush2.bf16.msra.mxu1 %v13199_v35  ;;  %10582 = vmatprep.subr.bf16.mxu0 %v13204_v4  ;;  %v13244_v35 = vld [vmem:[#allocation10 + $0x4a0] ss:$16 sps:$4 sm:$0xff]   ;;  %v13249_v4 = vld [vmem:[#allocation10 + $0x484] ss:$16 sps:$4 sm:$0xff]  }
 0x557   :  { %10625 = vmatprep.subr.bf16.mxu1 %v13207_v8  ;;  %v13310_v8 = vld [vmem:[#allocation10 + $0x6a0] ss:$16 sps:$4 sm:$0xff]   ;;  %v13384_v29 = vld [vmem:[#allocation10 + $0x724] ss:$16 sps:$4 sm:$0xff]  }
 0x559   :  { %10583 = vmatpush2.bf16.msra.mxu0 %v13202_v20  ;;  %v13247_v20 = vld [vmem:[#allocation10 + $0x480] ss:$16 sps:$4 sm:$0xff]  }
 0x55a   :  { %10626 = vmatpush2.bf16.msra.mxu1 %v13205_v56  ;;  %10584 = vmatprep.subr.bf16.mxu0 %v13210_v43  ;;  %v13316_v56 = vld [vmem:[#allocation10 + $0x680] ss:$16 sps:$4 sm:$0xff]   ;;  %v13324_v43 = vld [vmem:[#allocation10 + $0x664] ss:$16 sps:$4 sm:$0xff]  }
 0x55b   :  { %10627 = vmatprep.subr.bf16.mxu1 %v13213_v30  ;;  %v13250_v30 = vld [vmem:[#allocation10 + $0x460] ss:$16 sps:$4 sm:$0xff]  }
 0x55d   :  { %10585 = vmatpush2.bf16.msra.mxu0 %v13208_v7  ;;  %v13330_v7 = vld [vmem:[#allocation10 + $0x644] ss:$16 sps:$4 sm:$0xff]  }
 0x55e   :  { %10628 = vmatpush2.bf16.msra.mxu1 %v13211_v61  ;;  %10586 = vmatprep.subr.bf16.mxu0 %v13216_v17  ;;  %v13258_v61 = vld [vmem:[#allocation10 + $0x424] ss:$16 sps:$4 sm:$0xff]   ;;  %v13328_v17 = vld [vmem:[#allocation10 + $0x640] ss:$16 sps:$4 sm:$0xff]  }
 0x55f   :  { %10629 = vmatprep.subr.bf16.mxu1 %v13219_v33  ;;  %v13336_v33 = vld [vmem:[#allocation10 + $0x624] ss:$16 sps:$4 sm:$0xff]  }
 0x561   :  { %10587 = vmatpush2.bf16.msra.mxu0 %v13214_v24  ;;  %v13261_v24 = vld [vmem:[#allocation10 + $0x404] ss:$16 sps:$4 sm:$0xff]  }
 0x562   :  { %10630 = vmatpush2.bf16.msra.mxu1 %v13217_v52  ;;  %10588 = vmatprep.subr.bf16.mxu0 %v13222_v28  ;;  %v13259_v52 = vld [vmem:[#allocation10 + $0x400] ss:$16 sps:$4 sm:$0xff]   ;;  %v13264_v28 = vld [vmem:[#allocation10 + $0x5e4] ss:$16 sps:$4 sm:$0xff]  }
 0x563   :  { %10631 = vmatprep.subr.bf16.mxu1 %v13225_v60  ;;  %v13340_v60 = vld [vmem:[#allocation10 + $0x600] ss:$16 sps:$4 sm:$0xff]  }
 0x565   :  { %10589 = vmatpush2.bf16.msra.mxu0 %v13220_v31  ;;  %v13267_v31 = vld [vmem:[#allocation10 + $0x5c4] ss:$16 sps:$4 sm:$0xff]  }
 0x566   :  { %10632 = vmatpush2.bf16.msra.mxu1 %v13223_v36  ;;  %10590 = vmatprep.subr.bf16.mxu0 %v13228_v34  ;;  %v13354_v36 = vld [vmem:[#allocation10 + $0x7c4] ss:$16 sps:$4 sm:$0xff]   ;;  %v13265_v34 = vld [vmem:[#allocation10 + $0x5c0] ss:$16 sps:$4 sm:$0xff]  }
 0x567   :  { %10633 = vmatprep.subr.bf16.mxu1 %v13231_v53  ;;  %v13270_v53 = vld [vmem:[#allocation10 + $0x5a4] ss:$16 sps:$4 sm:$0xff]  }
 0x569   :  { %10591 = vmatpush2.bf16.msra.mxu0 %v13226_v21  ;;  %v13268_v21 = vld [vmem:[#allocation10 + $0x5a0] ss:$16 sps:$4 sm:$0xff]  }
 0x56a   :  { %10634 = vmatpush2.bf16.msra.mxu1 %v13229_v62  ;;  %10592 = vmatprep.subr.bf16.mxu0 %v13234_v59  ;;  %v13358_v62 = vld [vmem:[#allocation10 + $0x7a0] ss:$16 sps:$4 sm:$0xff]   ;;  %v13366_v59 = vld [vmem:[#allocation10 + $0x784] ss:$16 sps:$4 sm:$0xff]  }
 0x56b   :  { %10635 = vmatprep.subr.bf16.mxu1 %v13237_v9  ;;  %v13276_v9 = vld [vmem:[#allocation10 + $0x564] ss:$16 sps:$4 sm:$0xff]  }
 0x56d   :  { %10593 = vmatpush2.bf16.msra.mxu0 %v13232_v0  ;;  %v13372_v0 = vld [vmem:[#allocation10 + $0x764] ss:$16 sps:$4 sm:$0xff]  }
 0x56e   :  { %10636 = vmatpush2.bf16.msra.mxu1 %v13235_v15  ;;  %10648 = vmatprep.subr.bf16.mxu0 %v13240_v5  ;;  %v13370_v15 = vld [vmem:[#allocation10 + $0x760] ss:$16 sps:$4 sm:$0xff]   ;;  %v13378_v5 = vld [vmem:[#allocation10 + $0x744] ss:$16 sps:$4 sm:$0xff]  }
 0x56f   :  { %10691 = vmatprep.subr.bf16.mxu1 %v13300_v25  ;;  %v13277_v25 = vld [vmem:[#allocation10 + $0x540] ss:$16 sps:$4 sm:$0xff]  }
 0x570   :  { %10595 = vmatmul.mubr.bf16.vlgmr.msra.gmra.mxu0 %v14532_v55 }
 0x571   :  { %10638 = vmatmul.mubr.bf16.vlgmr.msra.gmra.mxu1 %v14533_v2  ;;  %10649 = vmatpush1.bf16.msra.mxu0 %v13238_v32  ;;  %v13376_v32 = vld [vmem:[#allocation10 + $0x740] ss:$16 sps:$4 sm:$0xff]  }
 0x572   :  { %10680 = vmatprep.mubr.bf16.mxu0 %v14432_v40  ;;  %10650 = vmatprep.subr.bf16.mxu0 %v13243_v41  ;;  %v13280_v41 = vld [vmem:[#allocation10 + $0x520] ss:$16 sps:$4 sm:$0xff]  }
 0x573   :  { %10692 = vmatpush1.bf16.msra.mxu1 %v13298_v10  ;;  %v13285_v10 = vld [vmem:[#allocation10 + $0x504] ss:$16 sps:$4 sm:$0xff]  }
 0x574   :  { %10693 = vmatprep.subr.bf16.mxu1 %v13306_v51  ;;  %v13382_v51 = vld [vmem:[#allocation10 + $0x720] ss:$16 sps:$4 sm:$0xff]  }
 0x575   :  { %10651 = vmatpush1.bf16.msra.mxu0 %v13241_v44  ;;  %v13390_v44 = vld [vmem:[#allocation10 + $0x704] ss:$16 sps:$4 sm:$0xff]  }
 0x576   :  { %10652 = vmatprep.subr.bf16.mxu0 %v13246_v54  ;;  %v13283_v54 = vld [vmem:[#allocation10 + $0x500] ss:$16 sps:$4 sm:$0xff]  }
 0x577   :  { %10694 = vmatpush1.bf16.msra.mxu1 %v13304_v1  ;;  %v13288_v1 = vld [vmem:[#allocation10 + $0xec] ss:$16 sps:$4 sm:$0xff]  }
 0x578   :  { %10695 = vmatprep.subr.bf16.mxu1 %v13312_v22  ;;  %v13388_v22 = vld [vmem:[#allocation10 + $0x700] ss:$16 sps:$4 sm:$0xff]  }
 0x579   :  { %10653 = vmatpush1.bf16.msra.mxu0 %v13244_v35  ;;  %v13396_v35 = vld [vmem:[#allocation10 + $0x2ec] ss:$16 sps:$4 sm:$0xff]  }
 0x57a   :  { %10654 = vmatprep.subr.bf16.mxu0 %v13249_v4  ;;  %v13286_v4 = vld [vmem:[#allocation10 + $0xe8] ss:$16 sps:$4 sm:$0xff]  }
 0x57b   :  { %10696 = vmatpush1.bf16.msra.mxu1 %v13310_v8  ;;  %v13291_v8 = vld [vmem:[#allocation10 + $0xcc] ss:$16 sps:$4 sm:$0xff]  }
 0x57c   :  { %10697 = vmatprep.subr.bf16.mxu1 %v13318_v13  ;;  %v13289_v13 = vld [vmem:[#allocation10 + $0xc8] ss:$16 sps:$4 sm:$0xff]  }
 0x57d   :  { %10655 = vmatpush1.bf16.msra.mxu0 %v13247_v20  ;;  %v13294_v20 = vld [vmem:[#allocation10 + $0xac] ss:$16 sps:$4 sm:$0xff]  }
 0x57e   :  { %10656 = vmatprep.subr.bf16.mxu0 %v13252_v38  ;;  %v13292_v38 = vld [vmem:[#allocation10 + $0xa8] ss:$16 sps:$4 sm:$0xff]  }
 0x57f   :  { %10698 = vmatpush1.bf16.msra.mxu1 %v13316_v56  ;;  %v13297_v56 = vld [vmem:[#allocation10 + $0x8c] ss:$16 sps:$4 sm:$0xff]  }
 0x580   :  { %10699 = vmatprep.subr.bf16.mxu1 %v13324_v43  ;;  %v13295_v43 = vld [vmem:[#allocation10 + $0x88] ss:$16 sps:$4 sm:$0xff]  }
 0x581   :  { %10657 = vmatpush1.bf16.msra.mxu0 %v13250_v30  ;;  %v13303_v30 = vld [vmem:[#allocation10 + $0x6c] ss:$16 sps:$4 sm:$0xff]  }
 0x582   :  { %10658 = vmatprep.subr.bf16.mxu0 %v13255_v48  ;;  %v13301_v48 = vld [vmem:[#allocation10 + $0x68] ss:$16 sps:$4 sm:$0xff]  }
 0x583   :  { %10700 = vmatpush1.bf16.msra.mxu1 %v13322_v12  ;;  %v13309_v12 = vld [vmem:[#allocation10 + $0x4c] ss:$16 sps:$4 sm:$0xff]  }
 0x584   :  { %10701 = vmatprep.subr.bf16.mxu1 %v13330_v7  ;;  %v13307_v7 = vld [vmem:[#allocation10 + $0x48] ss:$16 sps:$4 sm:$0xff]  }
 0x585   :  { %10659 = vmatpush1.bf16.msra.mxu0 %v13253_v6  ;;  %v13315_v6 = vld [vmem:[#allocation10 + $0x2c] ss:$16 sps:$4 sm:$0xff]  }
 0x586   :  { %10660 = vmatprep.subr.bf16.mxu0 %v13258_v61  ;;  %v8670_v61 = vpop.f32.mrf.mxu0 }
 0x587   :  { %10702 = vmatpush1.bf16.msra.mxu1 %v13328_v17  ;;  %v13321_v17 = vld [vmem:[#allocation10 + $0xc] ss:$16 sps:$4 sm:$0xff]  }
 0x588   :  { %10703 = vmatprep.subr.bf16.mxu1 %v13336_v33  ;;  %v8713_v33 = vpop.f32.mrf.mxu1 }
 0x589   :  { %10661 = vmatpush1.bf16.msra.mxu0 %v13256_v3  ;;  %v13319_v3 = vld [vmem:[#allocation10 + $0x8] ss:$16 sps:$4 sm:$0xff]  }
 0x58a   :  { %10662 = vmatprep.subr.bf16.mxu0 %v13261_v24  ;;  %v8672_v24 = vpop.f32.mrf.mxu0 }
 0x58b   :  { %10704 = vmatpush1.bf16.msra.mxu1 %v13334_v46  ;;  %v13327_v46 = vld [vmem:[#allocation10 + $0x1ec] ss:$16 sps:$4 sm:$0xff]  }
 0x58c   :  { %10705 = vmatprep.subr.bf16.mxu1 %v13342_v14  ;;  %v8715_v14 = vpop.f32.mrf.mxu1 }
 0x58d   :  { %10663 = vmatpush1.bf16.msra.mxu0 %v13259_v52  ;;  %v13325_v52 = vld [vmem:[#allocation10 + $0x1e8] ss:$16 sps:$4 sm:$0xff]  }
 0x58e   :  { %10664 = vmatprep.subr.bf16.mxu0 %v13264_v28  ;;  %v8674_v28 = vpop.f32.mrf.mxu0 }
 0x58f   :  { %10706 = vmatpush1.bf16.msra.mxu1 %v13340_v60  ;;  %v13333_v60 = vld [vmem:[#allocation10 + $0x1cc] ss:$16 sps:$4 sm:$0xff]  }
 0x590   :  { %10707 = vmatprep.subr.bf16.mxu1 %v13348_v19  ;;  %v8717_v19 = vpop.f32.mrf.mxu1 }
 0x591   :  { %10665 = vmatpush2.bf16.msra.mxu0 %v13262_v23  ;;  %v13331_v23 = vld [vmem:[#allocation10 + $0x1c8] ss:$16 sps:$4 sm:$0xff]  }
 0x592   :  { %10666 = vmatprep.subr.bf16.mxu0 %v13267_v31  ;;  %v8676_v31 = vpop.f32.mrf.mxu0 }
 0x593   :  { %10708 = vmatpush2.bf16.msra.mxu1 %v13346_v47  ;;  %v13339_v47 = vld [vmem:[#allocation10 + $0x1ac] ss:$16 sps:$4 sm:$0xff]  }
 0x594   :  { %10709 = vmatprep.subr.bf16.mxu1 %v13354_v36  ;;  %v8719_v36 = vpop.f32.mrf.mxu1 }
 0x595   :  { %10667 = vmatpush2.bf16.msra.mxu0 %v13265_v34  ;;  %v8756_v34 = vpop.f32.mrf.mxu0 }
 0x596   :  { %10668 = vmatprep.subr.bf16.mxu0 %v13270_v53  ;;  %v8799_v53 = vpop.f32.mrf.mxu1 }
 0x597   :  { %10710 = vmatpush2.bf16.msra.mxu1 %v13352_v57  ;;  %v13337_v57 = vld [vmem:[#allocation10 + $0x1a8] ss:$16 sps:$4 sm:$0xff]  }
 0x598   :  { %10711 = vmatprep.subr.bf16.mxu1 %v13360_v11  ;;  %v13345_v11 = vld [vmem:[#allocation10 + $0x18c] ss:$16 sps:$4 sm:$0xff]  }
 0x599   :  { %10669 = vmatpush2.bf16.msra.mxu0 %v13268_v21  ;;  %v8758_v21 = vpop.f32.mrf.mxu0 }
 0x59a   :  { %10670 = vmatprep.subr.bf16.mxu0 %v13273_v27  ;;  %v8801_v27 = vpop.f32.mrf.mxu1 }
 0x59b   :  { %10712 = vmatpush2.bf16.msra.mxu1 %v13358_v62  ;;  %v13343_v62 = vld [vmem:[#allocation10 + $0x188] ss:$16 sps:$4 sm:$0xff]  }
 0x59c   :  { %10713 = vmatprep.subr.bf16.mxu1 %v13366_v59  ;;  %v13351_v59 = vld [vmem:[#allocation10 + $0x16c] ss:$16 sps:$4 sm:$0xff]  }
 0x59d   :  { %10671 = vmatpush2.bf16.msra.mxu0 %v13271_v42  ;;  %v8760_v42 = vpop.f32.mrf.mxu0 }
 0x59e   :  { %10672 = vmatprep.subr.bf16.mxu0 %v13276_v9  ;;  %v14534_v9 = vld [vmem:[#allocation30_spill] sm:$0xff] }
 0x59f   :  { %10714 = vmatpush2.bf16.msra.mxu1 %v13364_v26  ;;  %v2475_v26 = vrot.slane %v14370_v50, %v14534_v9 }
 0x5a0   :  { %10715 = vmatprep.subr.bf16.mxu1 %v13372_v0  ;;  %v8803_v0 = vpop.f32.mrf.mxu1 }
 0x5a1   :  { %10673 = vmatpush2.bf16.msra.mxu0 %v13274_v58  ;;  %v13349_v58 = vld [vmem:[#allocation10 + $0x168] ss:$16 sps:$4 sm:$0xff]  }
 0x5a2   :  { %10674 = vmatprep.subr.bf16.mxu0 %v13279_v63  ;;  %v14535_v63 = vld [vmem:[#allocation31_spill] sm:$0xff] }
 0x5a3   :  { %10716 = vmatpush2.bf16.msra.mxu1 %v13370_v15  ;;  %v2471_v15 = vrot.slane %v14370_v50, %v14535_v63  ;;  %v13369_v50 = vld [vmem:[#allocation10 + $0x10c] ss:$16 sps:$4 sm:$0xff]  }
 0x5a4   :  { %10717 = vmatprep.subr.bf16.mxu1 %v13378_v5  ;;  %v13357_v5 = vld [vmem:[#allocation10 + $0x14c] ss:$16 sps:$4 sm:$0xff]  }
 0x5a5   :  { %10675 = vmatpush2.bf16.msra.mxu0 %v13277_v25  ;;  %v8762_v25 = vpop.f32.mrf.mxu0  ;;  %v13393_v63 = vld [vmem:[#allocation10 + $0x48c] ss:$16 sps:$4 sm:$0xff]  }
 0x5a6   :  { %10676 = vmatprep.subr.bf16.mxu0 %v13282_v39  ;;  %v8673_v39 = vadd.f32 %v8672_v24, %v2475_v26  ;;  %v13373_v24 = vld [vmem:[#allocation10 + $0x4e8] ss:$16 sps:$4 sm:$0xff]  }
 0x5a7   :  { %10718 = vmatpush2.bf16.msra.mxu1 %v13376_v32  ;;  %v8805_v32 = vpop.f32.mrf.mxu1 }
 0x5a8   :  { %10719 = vmatprep.subr.bf16.mxu1 %v13384_v29  ;;  %v13355_v29 = vld [vmem:[#allocation10 + $0x148] ss:$16 sps:$4 sm:$0xff]  }
 0x5a9   :  { %10677 = vmatpush2.bf16.msra.mxu0 %v13280_v41  ;;  %v8671_v41 = vadd.f32 %v8670_v61, %v2471_v15 }
 0x5aa   :  { %10678 = vmatprep.subr.bf16.mxu0 %v13285_v10 }
 0x5ab   :  { %10720 = vmatpush2.bf16.msra.mxu1 %v13382_v51  ;;  %v13363_v51 = vld [vmem:[#allocation10 + $0x12c] ss:$16 sps:$4 sm:$0xff]  }
 0x5ac   :  { %10721 = vmatprep.subr.bf16.mxu1 %v13390_v44  ;;  %v8675_v44 = vadd.f32 %v8674_v28, %v2471_v15 }
 0x5ad   :  { %10679 = vmatpush2.bf16.msra.mxu0 %v13283_v54 }
 0x5ae   :  { %10734 = vmatprep.subr.bf16.mxu0 %v13288_v1  ;;  %v8716_v1 = vadd.f32 %v8715_v14, %v8673_v39 }
 0x5af   :  { %10722 = vmatpush2.bf16.msra.mxu1 %v13388_v22  ;;  %v8677_v22 = vadd.f32 %v8676_v31, %v2475_v26 }
 0x5b0   :  { %10681 = vmatmul.mubr.bf16.vlgmr.msra.gmra.mxu0 %v14368_v37  ;;  %10777 = vmatprep.subr.bf16.mxu1 %v13396_v35  ;;  %v8842_v10 = vpop.f32.mrf.mxu0  ;;  %v13361_v35 = vld [vmem:[#allocation10 + $0x128] ss:$16 sps:$4 sm:$0xff]  }
 0x5b1   :  { %10735 = vmatpush1.bf16.msra.mxu0 %v13286_v4  ;;  %10766 = vmatprep.mubr.bf16.mxu0 %v14408_v45  ;;  %v13313_v45 = vld [vmem:[#allocation10 + $0x28] ss:$16 sps:$4 sm:$0xff]   ;;  %v8885_v54 = vpop.f32.mrf.mxu1  ;;  %v8714_v4 = vadd.f32 %v8713_v33, %v8671_v41 }
 0x5b2   :  { %10736 = vmatprep.subr.bf16.mxu0 %v13291_v8  ;;  %v8844_v8 = vpop.f32.mrf.mxu0 }
 0x5b5   :  { %10737 = vmatpush1.bf16.msra.mxu0 %v13289_v13  ;;  %v8718_v13 = vadd.f32 %v8717_v19, %v8675_v44 }
 0x5b6   :  { %10738 = vmatprep.subr.bf16.mxu0 %v13294_v20  ;;  %v8759_v20 = vadd.f32 %v8758_v21, %v8716_v1 }
 0x5b9   :  { %10739 = vmatpush1.bf16.msra.mxu0 %v13292_v38  ;;  %v8887_v38 = vpop.f32.mrf.mxu1 }
 0x5ba   :  { %10740 = vmatprep.subr.bf16.mxu0 %v13297_v56  ;;  %v8757_v56 = vadd.f32 %v8756_v34, %v8714_v4  ;;  %v13379_v34 = vld [vmem:[#allocation10 + $0x4c8] ss:$16 sps:$4 sm:$0xff]  }
 0x5bb   :  { %v8889_v61 = vpop.f32.mrf.mxu1  ;;  %v13397_v4 = vld [vmem:[#allocation10 + $0x468] ss:$16 sps:$4 sm:$0xff]  }
 0x5bd   :  { %10741 = vmatpush1.bf16.msra.mxu0 %v13295_v43  ;;  %v8720_v43 = vadd.f32 %v8719_v36, %v8677_v22  ;;  %v8891_v19 = vpop.f32.mrf.mxu1  ;;  %v13394_v22 = vld [vmem:[#allocation10 + $0x2e8] ss:$16 sps:$4 sm:$0xff]  }
 0x5be   :  { %10742 = vmatprep.subr.bf16.mxu0 %v13303_v30  ;;  %v8761_v30 = vadd.f32 %v8760_v42, %v8718_v13  ;;  %v13400_v13 = vld [vmem:[#allocation10 + $0x2c8] ss:$16 sps:$4 sm:$0xff]  }
 0x5c1   :  { %10743 = vmatpush1.bf16.msra.mxu0 %v13301_v48  ;;  %v13367_v48 = vld [vmem:[#allocation10 + $0x108] ss:$16 sps:$4 sm:$0xff]  }
 0x5c2   :  { %10744 = vmatprep.subr.bf16.mxu0 %v13309_v12  ;;  %v8846_v12 = vpop.f32.mrf.mxu0 }
 0x5c4   :  { %v8848_v14 = vpop.f32.mrf.mxu0 }
 0x5c5   :  { %10745 = vmatpush1.bf16.msra.mxu0 %v13307_v7  ;;  %v13375_v7 = vld [vmem:[#allocation10 + $0x4ec] ss:$16 sps:$4 sm:$0xff]  }
 0x5c6   :  { %10746 = vmatprep.subr.bf16.mxu0 %v13315_v6  ;;  %v8802_v6 = vadd.f32 %v8801_v27, %v8759_v20  ;;  %v13403_v20 = vld [vmem:[#allocation10 + $0x448] ss:$16 sps:$4 sm:$0xff]  }
 0x5c8   :  { %v8845_v33 = vadd.f32 %v8844_v8, %v8802_v6  ;;  %v13402_v8 = vld [vmem:[#allocation10 + $0x2cc] ss:$16 sps:$4 sm:$0xff]  }
 0x5c9   :  { %10747 = vmatpush1.bf16.msra.mxu0 %v13313_v45  ;;  %v8763_v45 = vadd.f32 %v8762_v25, %v8720_v43  ;;  %v13406_v43 = vld [vmem:[#allocation10 + $0x2a8] ss:$16 sps:$4 sm:$0xff]   ;;  %v13420_v6 = vld [vmem:[#allocation10 + $0x26c] ss:$16 sps:$4 sm:$0xff]  }
 0x5ca   :  { %10748 = vmatprep.subr.bf16.mxu0 %v13321_v17  ;;  %v8800_v17 = vadd.f32 %v8799_v53, %v8757_v56  ;;  %v8888_v31 = vadd.f32 %v8887_v38, %v8845_v33  ;;  %v13408_v38 = vld [vmem:[#allocation10 + $0x2ac] ss:$16 sps:$4 sm:$0xff]  }
 0x5cb   :  { %v8806_v28 = vadd.f32 %v8805_v32, %v8763_v45  ;;  %v13411_v56 = vld [vmem:[#allocation10 + $0x42c] ss:$16 sps:$4 sm:$0xff]  }
 0x5cc   :  { %v13423_v45 = vld [vmem:[#allocation10 + $0x5ec] ss:$16 sps:$4 sm:$0xff]  }
 0x5cd   :  { %10749 = vmatpush1.bf16.msra.mxu0 %v13319_v3  ;;  %v8804_v3 = vadd.f32 %v8803_v0, %v8761_v30  ;;  %v13409_v30 = vld [vmem:[#allocation10 + $0x428] ss:$16 sps:$4 sm:$0xff]   ;;  %v13429_v33 = vld [vmem:[#allocation10 + $0x5cc] ss:$16 sps:$4 sm:$0xff]  }
 0x5ce   :  { %10750 = vmatprep.subr.bf16.mxu0 %v13327_v46  ;;  %v8843_v46 = vadd.f32 %v8842_v10, %v8800_v17  ;;  %v13399_v10 = vld [vmem:[#allocation10 + $0x46c] ss:$16 sps:$4 sm:$0xff]   ;;  %v13421_v17 = vld [vmem:[#allocation10 + $0x5e8] ss:$16 sps:$4 sm:$0xff]  }
 0x5d0   :  { %v8886_v53 = vadd.f32 %v8885_v54, %v8843_v46  ;;  %v13427_v46 = vld [vmem:[#allocation10 + $0x5c8] ss:$16 sps:$4 sm:$0xff]  }
 0x5d1   :  { %10751 = vmatpush2.bf16.msra.mxu0 %v13325_v52  ;;  %v13381_v52 = vld [vmem:[#allocation10 + $0x4cc] ss:$16 sps:$4 sm:$0xff]  }
 0x5d2   :  { %10752 = vmatprep.subr.bf16.mxu0 %v13333_v60  ;;  %v8847_v60 = vadd.f32 %v8846_v12, %v8804_v3  ;;  %v13417_v12 = vld [vmem:[#allocation10 + $0x40c] ss:$16 sps:$4 sm:$0xff]  }
 0x5d3   :  { %v13426_v3 = vld [vmem:[#allocation10 + $0x24c] ss:$16 sps:$4 sm:$0xff]  }
 0x5d4   :  { %v8890_v21 = vadd.f32 %v8889_v61, %v8847_v60  ;;  %v13418_v61 = vld [vmem:[#allocation10 + $0x268] ss:$16 sps:$4 sm:$0xff]  }
 0x5d5   :  { %10753 = vmatpush2.bf16.msra.mxu0 %v13331_v23  ;;  %v13433_v60 = vld [vmem:[#allocation10 + $0x5a8] ss:$16 sps:$4 sm:$0xff]  }
 0x5d6   :  { %10754 = vmatprep.subr.bf16.mxu0 %v13339_v47  ;;  %v8849_v47 = vadd.f32 %v8848_v14, %v8806_v28  ;;  %v13432_v14 = vld [vmem:[#allocation10 + $0x22c] ss:$16 sps:$4 sm:$0xff]   ;;  %v13430_v28 = vld [vmem:[#allocation10 + $0x228] ss:$16 sps:$4 sm:$0xff]  }
 0x5d8   :  { %v8892_v9 = vadd.f32 %v8891_v19, %v8849_v47  ;;  %v13438_v19 = vld [vmem:[#allocation10 + $0x20c] ss:$16 sps:$4 sm:$0xff]   ;;  %v13439_v47 = vld [vmem:[#allocation10 + $0x588] ss:$16 sps:$4 sm:$0xff]  }
 0x5d9   :  { %10755 = vmatpush2.bf16.msra.mxu0 %v13337_v57 }
 0x5da   :  { %10756 = vmatprep.subr.bf16.mxu0 %v13345_v11  ;;  %v13387_v11 = vld [vmem:[#allocation10 + $0x4ac] ss:$16 sps:$4 sm:$0xff]  }
 0x5dd   :  { %10757 = vmatpush2.bf16.msra.mxu0 %v13343_v62 }
 0x5de   :  { %10758 = vmatprep.subr.bf16.mxu0 %v13351_v59 }
 0x5e1   :  { %10759 = vmatpush2.bf16.msra.mxu0 %v13349_v58 }
 0x5e2   :  { %10760 = vmatprep.subr.bf16.mxu0 %v13357_v5 }
 0x5e5   :  { %10761 = vmatpush2.bf16.msra.mxu0 %v13355_v29  ;;  %v13391_v29 = vld [vmem:[#allocation10 + $0x488] ss:$16 sps:$4 sm:$0xff]  }
 0x5e6   :  { %10762 = vmatprep.subr.bf16.mxu0 %v13363_v51 }
 0x5e9   :  { %10763 = vmatpush2.bf16.msra.mxu0 %v13361_v35 }
 0x5ea   :  { %10764 = vmatprep.subr.bf16.mxu0 %v13369_v50  ;;  %v13405_v50 = vld [vmem:[#allocation10 + $0x44c] ss:$16 sps:$4 sm:$0xff]  }
 0x5ed   :  { %10765 = vmatpush2.bf16.msra.mxu0 %v13367_v48  ;;  %v13414_v48 = vld [vmem:[#allocation10 + $0x28c] ss:$16 sps:$4 sm:$0xff]  }
 0x5ee   :  { %10820 = vmatprep.subr.bf16.mxu0 %v13375_v7  ;;  %v13412_v7 = vld [vmem:[#allocation10 + $0x288] ss:$16 sps:$4 sm:$0xff]  }
 0x5f0   :  { %v8928_v23 = vpop.f32.mrf.mxu0  ;;  %10767 = vmatmul.mubr.bf16.vlgmr.msra.gmra.mxu0 %v14532_v55  ;;  %v13385_v55 = vld [vmem:[#allocation10 + $0x4a8] ss:$16 sps:$4 sm:$0xff]  }
 0x5f1   :  { %v8971_v36 = vpop.f32.mrf.mxu1  ;;  %10821 = vmatpush1.bf16.msra.mxu0 %v13373_v24  ;;  %10852 = vmatprep.mubr.bf16.mxu0 %v14432_v40  ;;  %v8929_v59 = vadd.f32 %v8928_v23, %v8886_v53  ;;  %v13424_v24 = vld [vmem:[#allocation10 + $0x248] ss:$16 sps:$4 sm:$0xff]   ;;  %v13441_v23 = vld [vmem:[#allocation10 + $0x58c] ss:$16 sps:$4 sm:$0xff]  }
 0x5f2   :  { %v8930_v57 = vpop.f32.mrf.mxu0  ;;  %10822 = vmatprep.subr.bf16.mxu0 %v13381_v52  ;;  %v13435_v52 = vld [vmem:[#allocation10 + $0x5ac] ss:$16 sps:$4 sm:$0xff]   ;;  %v13442_v53 = vld [vmem:[#allocation10 + $0x3e8] ss:$16 sps:$4 sm:$0xff]  }
 0x5f3   :  { %v8931_v27 = vadd.f32 %v8930_v57, %v8888_v31  ;;  %v8973_v62 = vpop.f32.mrf.mxu1  ;;  %v8972_v25 = vadd.f32 %v8971_v36, %v8929_v59  ;;  %v13436_v31 = vld [vmem:[#allocation10 + $0x208] ss:$16 sps:$4 sm:$0xff]   ;;  %v13444_v36 = vld [vmem:[#allocation10 + $0x3ec] ss:$16 sps:$4 sm:$0xff]  }
 0x5f4   :  { %v8932_v42 = vpop.f32.mrf.mxu0  ;;  %v13445_v57 = vld [vmem:[#allocation10 + $0x568] ss:$16 sps:$4 sm:$0xff]   ;;  %v13456_v59 = vld [vmem:[#allocation10 + $0x3ac] ss:$16 sps:$4 sm:$0xff]  }
 0x5f5   :  { %v8933_v26 = vadd.f32 %v8932_v42, %v8890_v21  ;;  %v8975_v0 = vpop.f32.mrf.mxu1  ;;  %10823 = vmatpush1.bf16.msra.mxu0 %v13379_v34  ;;  %v8974_v15 = vadd.f32 %v8973_v62, %v8931_v27  ;;  %v8986_v54 = vmax.f32 %v8972_v25, 0.0  ;;  %v13447_v34 = vld [vmem:[#allocation10 + $0x56c] ss:$16 sps:$4 sm:$0xff]   ;;  %v13448_v27 = vld [vmem:[#allocation10 + $0x3c8] ss:$16 sps:$4 sm:$0xff]  }
 0x5f6   :  { %v8934_v58 = vpop.f32.mrf.mxu0  ;;  %10824 = vmatprep.subr.bf16.mxu0 %v13387_v11  ;;  %v13450_v11 = vld [vmem:[#allocation10 + $0x3cc] ss:$16 sps:$4 sm:$0xff]   ;;  %v13451_v62 = vld [vmem:[#allocation10 + $0x548] ss:$16 sps:$4 sm:$0xff]  }
 0x5f7   :  { %v8976_v40 = vadd.f32 %v8975_v0, %v8933_v26  ;;  %v8935_v5 = vadd.f32 %v8934_v58, %v8892_v9  ;;  %v8977_v39 = vpop.f32.mrf.mxu1  ;;  %v8987_v51 = vmax.f32 %v8974_v15, 0.0  ;;  %v13453_v21 = vld [vmem:[#allocation10 + $0x54c] ss:$16 sps:$4 sm:$0xff]   ;;  %v13454_v9 = vld [vmem:[#allocation10 + $0x3a8] ss:$16 sps:$4 sm:$0xff]  }
 0x5f8   :  { %v13459_v42 = vld [vmem:[#allocation10 + $0x52c] ss:$16 sps:$4 sm:$0xff]   ;;  %v13457_v26 = vld [vmem:[#allocation10 + $0x528] ss:$16 sps:$4 sm:$0xff]  }
 0x5f9   :  { %v8978_v32 = vadd.f32 %v8977_v39, %v8935_v5  ;;  %10825 = vmatpush1.bf16.msra.mxu0 %v13385_v55  ;;  %v8994_v41 = vmax.f32 %v8976_v40, 0.0  ;;  %v13462_v0 = vld [vmem:[#allocation10 + $0x38c] ss:$16 sps:$4 sm:$0xff]   ;;  %v13460_v58 = vld [vmem:[#allocation10 + $0x388] ss:$16 sps:$4 sm:$0xff]  }
 0x5fa   :  { %10826 = vmatprep.subr.bf16.mxu0 %v13393_v63  ;;  %v13465_v55 = vld [vmem:[#allocation10 + $0x50c] ss:$16 sps:$4 sm:$0xff]   ;;  %v13463_v63 = vld [vmem:[#allocation10 + $0x508] ss:$16 sps:$4 sm:$0xff]  }
 0x5fb   :  { %v8995_v44 = vmax.f32 %v8978_v32, 0.0  ;;  %v14447_v35 = vpack.c.bf16 %v8994_v41, %v8986_v54  ;;  %v13468_v15 = vld [vmem:[#allocation10 + $0x36c] ss:$16 sps:$4 sm:$0xff]   ;;  %v13528_v40 = vld [vmem:[#allocation13 + $0x74] ss:$8 sps:$4 sm:$0xff]  }
 0x5fc   :  { %v13466_v5 = vld [vmem:[#allocation10 + $0x368] ss:$16 sps:$4 sm:$0xff]   ;;  %v13471_v25 = vld [vmem:[#allocation10 + $0x34c] ss:$16 sps:$4 sm:$0xff]  }
 0x5fd   :  { %v14445_v1 = vpack.c.bf16 %v8995_v44, %v8987_v51  ;;  %10827 = vmatpush1.bf16.msra.mxu0 %v13391_v29  ;;  %v13526_v39 = vld [vmem:[#allocation13 + $0x70] ss:$8 sps:$4 sm:$0xff]   ;;  %v13531_v32 = vld [vmem:[#allocation13 + $0x64] ss:$8 sps:$4 sm:$0xff]   ;;  %v13534_v51 = vld [vmem:[#allocation13 + $0x54] ss:$8 sps:$4 sm:$0xff]  }
 0x5fe   :  { %10828 = vmatprep.subr.bf16.mxu0 %v13399_v10  ;;  %v13469_v29 = vld [vmem:[#allocation10 + $0x348] ss:$16 sps:$4 sm:$0xff]   ;;  %v13474_v41 = vld [vmem:[#allocation10 + $0x32c] ss:$16 sps:$4 sm:$0xff]  }
 0x5ff   :  { %10723 = vmatprep.mubr.bf16.mxu1 %v14445_v1  ;;  %v13529_v10 = vld [vmem:[#allocation13 + $0x60] ss:$8 sps:$4 sm:$0xff]   ;;  %v13472_v44 = vld [vmem:[#allocation10 + $0x328] ss:$16 sps:$4 sm:$0xff]  }
 0x600   :  { %10724 = vmatmul.mubr.bf16.vlgmr.msra.gmra.mxu1 %v14447_v35  ;;  %v13477_v54 = vld [vmem:[#allocation10 + $0x30c] ss:$16 sps:$4 sm:$0xff]  }
 0x601   :  { %10778 = vmatpush1.bf16.msra.mxu1 %v13394_v22  ;;  %10809 = vmatprep.mubr.bf16.mxu1 %v14411_v49  ;;  %v13415_v49 = vld [vmem:[#allocation10 + $0x408] ss:$16 sps:$4 sm:$0xff]   ;;  %v13532_v22 = vld [vmem:[#allocation13 + $0x50] ss:$8 sps:$4 sm:$0xff]  }
 0x602   :  { %10829 = vmatpush1.bf16.msra.mxu0 %v13397_v4  ;;  %10779 = vmatprep.subr.bf16.mxu1 %v13402_v8  ;;  %v13537_v4 = vld [vmem:[#allocation13 + $0x44] ss:$8 sps:$4 sm:$0xff]  }
 0x603   :  { %10830 = vmatprep.subr.bf16.mxu0 %v13405_v50  ;;  %v13475_v8 = vld [vmem:[#allocation10 + $0x308] ss:$16 sps:$4 sm:$0xff]   ;;  %v13480_v50 = vld [vmem:[#allocation10 + $0x6ec] ss:$16 sps:$4 sm:$0xff]  }
 0x605   :  { %10780 = vmatpush1.bf16.msra.mxu1 %v13400_v13  ;;  %v13540_v13 = vld [vmem:[#allocation13 + $0x34] ss:$8 sps:$4 sm:$0xff]  }
 0x606   :  { %10831 = vmatpush1.bf16.msra.mxu0 %v13403_v20  ;;  %10781 = vmatprep.subr.bf16.mxu1 %v13408_v38  ;;  %v13478_v20 = vld [vmem:[#allocation10 + $0x6e8] ss:$16 sps:$4 sm:$0xff]   ;;  %v13483_v38 = vld [vmem:[#allocation10 + $0x6cc] ss:$16 sps:$4 sm:$0xff]  }
 0x607   :  { %10832 = vmatprep.subr.bf16.mxu0 %v13411_v56  ;;  %v13538_v56 = vld [vmem:[#allocation13 + $0x30] ss:$8 sps:$4 sm:$0xff]  }
 0x609   :  { %10782 = vmatpush1.bf16.msra.mxu1 %v13406_v43  ;;  %v13543_v43 = vld [vmem:[#allocation13 + $0x24] ss:$8 sps:$4 sm:$0xff]  }
 0x60a   :  { %10833 = vmatpush1.bf16.msra.mxu0 %v13409_v30  ;;  %10783 = vmatprep.subr.bf16.mxu1 %v13414_v48  ;;  %v13481_v30 = vld [vmem:[#allocation10 + $0x6c8] ss:$16 sps:$4 sm:$0xff]   ;;  %v13486_v48 = vld [vmem:[#allocation10 + $0x6ac] ss:$16 sps:$4 sm:$0xff]  }
 0x60b   :  { %10834 = vmatprep.subr.bf16.mxu0 %v13417_v12  ;;  %v13541_v12 = vld [vmem:[#allocation13 + $0x20] ss:$8 sps:$4 sm:$0xff]  }
 0x60d   :  { %10784 = vmatpush1.bf16.msra.mxu1 %v13412_v7  ;;  %v13546_v7 = vld [vmem:[#allocation13 + $0x14] ss:$8 sps:$4 sm:$0xff]  }
 0x60e   :  { %10835 = vmatpush1.bf16.msra.mxu0 %v13415_v49  ;;  %10785 = vmatprep.subr.bf16.mxu1 %v13420_v6  ;;  %v13484_v49 = vld [vmem:[#allocation10 + $0x6a8] ss:$16 sps:$4 sm:$0xff]   ;;  %v13489_v6 = vld [vmem:[#allocation10 + $0x68c] ss:$16 sps:$4 sm:$0xff]  }
 0x60f   :  { %10836 = vmatprep.subr.bf16.mxu0 %v13423_v45  ;;  %v13544_v45 = vld [vmem:[#allocation13 + $0x10] ss:$8 sps:$4 sm:$0xff]  }
 0x611   :  { %10786 = vmatpush1.bf16.msra.mxu1 %v13418_v61  ;;  %v13549_v61 = vld [vmem:[#allocation13 + $0x4] ss:$8 sps:$4 sm:$0xff]  }
 0x612   :  { %10837 = vmatpush2.bf16.msra.mxu0 %v13421_v17  ;;  %10787 = vmatprep.subr.bf16.mxu1 %v13426_v3  ;;  %v13492_v17 = vld [vmem:[#allocation10 + $0x66c] ss:$16 sps:$4 sm:$0xff]   ;;  %v13552_v3 = vld [vmem:[#allocation13 + $0xf4] ss:$8 sps:$4 sm:$0xff]  }
 0x613   :  { %10838 = vmatprep.subr.bf16.mxu0 %v13429_v33  ;;  %v13490_v33 = vld [vmem:[#allocation10 + $0x668] ss:$16 sps:$4 sm:$0xff]  }
 0x615   :  { %10788 = vmatpush1.bf16.msra.mxu1 %v13424_v24  ;;  %v13495_v24 = vld [vmem:[#allocation10 + $0x64c] ss:$16 sps:$4 sm:$0xff]  }
 0x616   :  { %10839 = vmatpush2.bf16.msra.mxu0 %v13427_v46  ;;  %10789 = vmatprep.subr.bf16.mxu1 %v13432_v14  ;;  %v13550_v46 = vld [vmem:[#allocation13 + $0xf0] ss:$8 sps:$4 sm:$0xff]   ;;  %v13555_v14 = vld [vmem:[#allocation13 + $0xe4] ss:$8 sps:$4 sm:$0xff]  }
 0x617   :  { %10840 = vmatprep.subr.bf16.mxu0 %v13435_v52  ;;  %v13493_v52 = vld [vmem:[#allocation10 + $0x648] ss:$16 sps:$4 sm:$0xff]  }
 0x619   :  { %10790 = vmatpush1.bf16.msra.mxu1 %v13430_v28  ;;  %v13498_v28 = vld [vmem:[#allocation10 + $0x62c] ss:$16 sps:$4 sm:$0xff]  }
 0x61a   :  { %10841 = vmatpush2.bf16.msra.mxu0 %v13433_v60  ;;  %10791 = vmatprep.subr.bf16.mxu1 %v13438_v19  ;;  %v13553_v60 = vld [vmem:[#allocation13 + $0xe0] ss:$8 sps:$4 sm:$0xff]   ;;  %v13558_v19 = vld [vmem:[#allocation13 + $0xd4] ss:$8 sps:$4 sm:$0xff]  }
 0x61b   :  { %10842 = vmatprep.subr.bf16.mxu0 %v13441_v23  ;;  %v13496_v23 = vld [vmem:[#allocation10 + $0x628] ss:$16 sps:$4 sm:$0xff]  }
 0x61d   :  { %10792 = vmatpush1.bf16.msra.mxu1 %v13436_v31  ;;  %v13501_v31 = vld [vmem:[#allocation10 + $0x60c] ss:$16 sps:$4 sm:$0xff]  }
 0x61e   :  { %10843 = vmatpush2.bf16.msra.mxu0 %v13439_v47  ;;  %10793 = vmatprep.subr.bf16.mxu1 %v13444_v36  ;;  %v13556_v47 = vld [vmem:[#allocation13 + $0xd0] ss:$8 sps:$4 sm:$0xff]   ;;  %v13561_v36 = vld [vmem:[#allocation13 + $0xc4] ss:$8 sps:$4 sm:$0xff]  }
 0x61f   :  { %10844 = vmatprep.subr.bf16.mxu0 %v13447_v34  ;;  %v13499_v34 = vld [vmem:[#allocation10 + $0x608] ss:$16 sps:$4 sm:$0xff]  }
 0x621   :  { %10794 = vmatpush2.bf16.msra.mxu1 %v13442_v53  ;;  %v13504_v53 = vld [vmem:[#allocation10 + $0x7ec] ss:$16 sps:$4 sm:$0xff]  }
 0x622   :  { %10845 = vmatpush2.bf16.msra.mxu0 %v13445_v57  ;;  %10795 = vmatprep.subr.bf16.mxu1 %v13450_v11  ;;  %v13559_v57 = vld [vmem:[#allocation13 + $0xc0] ss:$8 sps:$4 sm:$0xff]   ;;  %v13564_v11 = vld [vmem:[#allocation13 + $0xb4] ss:$8 sps:$4 sm:$0xff]  }
 0x623   :  { %10846 = vmatprep.subr.bf16.mxu0 %v13453_v21  ;;  %v13502_v21 = vld [vmem:[#allocation10 + $0x7e8] ss:$16 sps:$4 sm:$0xff]  }
 0x625   :  { %10796 = vmatpush2.bf16.msra.mxu1 %v13448_v27  ;;  %v13507_v27 = vld [vmem:[#allocation10 + $0x7cc] ss:$16 sps:$4 sm:$0xff]  }
 0x626   :  { %10847 = vmatpush2.bf16.msra.mxu0 %v13451_v62  ;;  %10797 = vmatprep.subr.bf16.mxu1 %v13456_v59  ;;  %v13562_v62 = vld [vmem:[#allocation13 + $0xb0] ss:$8 sps:$4 sm:$0xff]   ;;  %v13567_v59 = vld [vmem:[#allocation13 + $0xa4] ss:$8 sps:$4 sm:$0xff]  }
 0x627   :  { %10848 = vmatprep.subr.bf16.mxu0 %v13459_v42  ;;  %v13505_v42 = vld [vmem:[#allocation10 + $0x7c8] ss:$16 sps:$4 sm:$0xff]  }
 0x629   :  { %10798 = vmatpush2.bf16.msra.mxu1 %v13454_v9  ;;  %v13510_v9 = vld [vmem:[#allocation10 + $0x7ac] ss:$16 sps:$4 sm:$0xff]  }
 0x62a   :  { %10849 = vmatpush2.bf16.msra.mxu0 %v13457_v26  ;;  %10799 = vmatprep.subr.bf16.mxu1 %v13462_v0  ;;  %v13565_v26 = vld [vmem:[#allocation13 + $0xa0] ss:$8 sps:$4 sm:$0xff]   ;;  %v13570_v0 = vld [vmem:[#allocation13 + $0x94] ss:$8 sps:$4 sm:$0xff]  }
 0x62b   :  { %10850 = vmatprep.subr.bf16.mxu0 %v13465_v55  ;;  %v13508_v55 = vld [vmem:[#allocation10 + $0x7a8] ss:$16 sps:$4 sm:$0xff]  }
 0x62d   :  { %10800 = vmatpush2.bf16.msra.mxu1 %v13460_v58  ;;  %v13513_v58 = vld [vmem:[#allocation10 + $0x78c] ss:$16 sps:$4 sm:$0xff]  }
 0x62e   :  { %10851 = vmatpush2.bf16.msra.mxu0 %v13463_v63  ;;  %10801 = vmatprep.subr.bf16.mxu1 %v13468_v15  ;;  %v13568_v63 = vld [vmem:[#allocation13 + $0x90] ss:$8 sps:$4 sm:$0xff]   ;;  %v13573_v15 = vld [vmem:[#allocation13 + $0x84] ss:$8 sps:$4 sm:$0xff]  }
 0x62f   :  { %11314 = vmatprep.subr.bf16.mxu0 %v13528_v40  ;;  %v13511_v40 = vld [vmem:[#allocation10 + $0x788] ss:$16 sps:$4 sm:$0xff]  }
 0x631   :  { %10802 = vmatpush2.bf16.msra.mxu1 %v13466_v5  ;;  %10853 = vmatmul.mubr.bf16.vlgmr.msra.gmra.mxu0 %v14368_v37  ;;  %v13535_v37 = vld [vmem:[#allocation13 + $0x40] ss:$8 sps:$4 sm:$0xff]  }
 0x632   :  { %10803 = vmatprep.subr.bf16.mxu1 %v13471_v25  ;;  %11315 = vmatpush1.bf16.msra.mxu0 %v13526_v39  ;;  %v13516_v5 = vld [vmem:[#allocation10 + $0x76c] ss:$16 sps:$4 sm:$0xff]   ;;  %v13514_v39 = vld [vmem:[#allocation10 + $0x768] ss:$16 sps:$4 sm:$0xff]  }
 0x633   :  { %11316 = vmatprep.subr.bf16.mxu0 %v13531_v32  ;;  %v13571_v25 = vld [vmem:[#allocation13 + $0x80] ss:$8 sps:$4 sm:$0xff]  }
 0x634   :  { %v13519_v32 = vld [vmem:[#allocation10 + $0x74c] ss:$16 sps:$4 sm:$0xff]  }
 0x635   :  { %10804 = vmatpush2.bf16.msra.mxu1 %v13469_v29  ;;  %v13517_v29 = vld [vmem:[#allocation10 + $0x748] ss:$16 sps:$4 sm:$0xff]  }
 0x636   :  { %10805 = vmatprep.subr.bf16.mxu1 %v13474_v41  ;;  %11317 = vmatpush1.bf16.msra.mxu0 %v13529_v10  ;;  %v13522_v41 = vld [vmem:[#allocation10 + $0x72c] ss:$16 sps:$4 sm:$0xff]   ;;  %v13520_v10 = vld [vmem:[#allocation10 + $0x728] ss:$16 sps:$4 sm:$0xff]  }
 0x637   :  { %11318 = vmatprep.subr.bf16.mxu0 %v13534_v51  ;;  %v13525_v51 = vld [vmem:[#allocation10 + $0x70c] ss:$16 sps:$4 sm:$0xff]  }
 0x639   :  { %10806 = vmatpush2.bf16.msra.mxu1 %v13472_v44  ;;  %v13523_v44 = vld [vmem:[#allocation10 + $0x708] ss:$16 sps:$4 sm:$0xff]  }
 0x63a   :  { %10807 = vmatprep.subr.bf16.mxu1 %v13477_v54  ;;  %11319 = vmatpush1.bf16.msra.mxu0 %v13532_v22  ;;  %v13574_v54 = vld [vmem:[#allocation13 + $0x170] ss:$8 sps:$4 sm:$0xff]   ;;  %v13576_v22 = vld [vmem:[#allocation13 + $0x174] ss:$8 sps:$4 sm:$0xff]  }
 0x63b   :  { %11320 = vmatprep.subr.bf16.mxu0 %v13537_v4  ;;  %v13579_v4 = vld [vmem:[#allocation13 + $0x164] ss:$8 sps:$4 sm:$0xff]  }
 0x63d   :  { %10808 = vmatpush2.bf16.msra.mxu1 %v13475_v8  ;;  %v13577_v8 = vld [vmem:[#allocation13 + $0x160] ss:$8 sps:$4 sm:$0xff]  }
 0x63e   :  { %10863 = vmatprep.subr.bf16.mxu1 %v13480_v50  ;;  %11321 = vmatpush1.bf16.msra.mxu0 %v13535_v37  ;;  %v13582_v50 = vld [vmem:[#allocation13 + $0x154] ss:$8 sps:$4 sm:$0xff]   ;;  %v13580_v37 = vld [vmem:[#allocation13 + $0x150] ss:$8 sps:$4 sm:$0xff]  }
 0x63f   :  { %11322 = vmatprep.subr.bf16.mxu0 %v13540_v13  ;;  %v13585_v13 = vld [vmem:[#allocation13 + $0x144] ss:$8 sps:$4 sm:$0xff]  }
 0x640   :  { %10810 = vmatmul.mubr.bf16.vlgmr.msra.gmra.mxu1 %v14533_v2  ;;  %v13487_v2 = vld [vmem:[#allocation10 + $0x688] ss:$16 sps:$4 sm:$0xff]  }
 0x641   :  { %10864 = vmatpush1.bf16.msra.mxu1 %v13478_v20  ;;  %10895 = vmatprep.mubr.bf16.mxu1 %v14445_v1  ;;  %v13547_v1 = vld [vmem:[#allocation13] ss:$8 sps:$4 sm:$0xff]  }
 0x642   :  { %10865 = vmatprep.subr.bf16.mxu1 %v13483_v38  ;;  %11323 = vmatpush1.bf16.msra.mxu0 %v13538_v56  ;;  %v13583_v20 = vld [vmem:[#allocation13 + $0x140] ss:$8 sps:$4 sm:$0xff]   ;;  %v13588_v38 = vld [vmem:[#allocation13 + $0x134] ss:$8 sps:$4 sm:$0xff]   ;;  %v13586_v56 = vld [vmem:[#allocation13 + $0x130] ss:$8 sps:$4 sm:$0xff]  }
 0x643   :  { %11324 = vmatprep.subr.bf16.mxu0 %v13543_v43  ;;  %v13589_v43 = vld [vmem:[#allocation13 + $0x120] ss:$8 sps:$4 sm:$0xff]  }
 0x645   :  { %10866 = vmatpush1.bf16.msra.mxu1 %v13481_v30  ;;  %v13594_v30 = vld [vmem:[#allocation13 + $0x114] ss:$8 sps:$4 sm:$0xff]  }
 0x646   :  { %10867 = vmatprep.subr.bf16.mxu1 %v13486_v48  ;;  %11325 = vmatpush1.bf16.msra.mxu0 %v13541_v12  ;;  %v13592_v48 = vld [vmem:[#allocation13 + $0x110] ss:$8 sps:$4 sm:$0xff]   ;;  %v13597_v12 = vld [vmem:[#allocation13 + $0x104] ss:$8 sps:$4 sm:$0xff]  }
 0x647   :  { %11326 = vmatprep.subr.bf16.mxu0 %v13546_v7  ;;  %v13595_v7 = vld [vmem:[#allocation13 + $0x100] ss:$8 sps:$4 sm:$0xff]  }
 0x649   :  { %10868 = vmatpush1.bf16.msra.mxu1 %v13484_v49  ;;  %v13600_v49 = vld [vmem:[#allocation13 + $0x1f4] ss:$8 sps:$4 sm:$0xff]  }
 0x64a   :  { %10869 = vmatprep.subr.bf16.mxu1 %v13489_v6  ;;  %11327 = vmatpush1.bf16.msra.mxu0 %v13544_v45  ;;  %v13598_v6 = vld [vmem:[#allocation13 + $0x1f0] ss:$8 sps:$4 sm:$0xff]   ;;  %v13603_v45 = vld [vmem:[#allocation13 + $0x1e4] ss:$8 sps:$4 sm:$0xff]  }
 0x64b   :  { %11328 = vmatprep.subr.bf16.mxu0 %v13549_v61  ;;  %v10596_v61 = vpop.f32.mrf.mxu0 }
 0x64d   :  { %10870 = vmatpush1.bf16.msra.mxu1 %v13487_v2  ;;  %v13601_v2 = vld [vmem:[#allocation13 + $0x1e0] ss:$8 sps:$4 sm:$0xff]  }
 0x64e   :  { %10871 = vmatprep.subr.bf16.mxu1 %v13492_v17  ;;  %11329 = vmatpush1.bf16.msra.mxu0 %v13547_v1  ;;  %v13606_v17 = vld [vmem:[#allocation13 + $0x1d4] ss:$8 sps:$4 sm:$0xff]   ;;  %v10598_v1 = vpop.f32.mrf.mxu0 }
 0x64f   :  { %11330 = vmatprep.subr.bf16.mxu0 %v13552_v3  ;;  %v13604_v3 = vld [vmem:[#allocation13 + $0x1d0] ss:$8 sps:$4 sm:$0xff]  }
 0x651   :  { %10872 = vmatpush1.bf16.msra.mxu1 %v13490_v33  ;;  %v13609_v33 = vld [vmem:[#allocation13 + $0x1c4] ss:$8 sps:$4 sm:$0xff]  }
 0x652   :  { %10873 = vmatprep.subr.bf16.mxu1 %v13495_v24  ;;  %11331 = vmatpush2.bf16.msra.mxu0 %v13550_v46  ;;  %v10600_v24 = vpop.f32.mrf.mxu0  ;;  %v10639_v46 = vpop.f32.mrf.mxu1 }
 0x653   :  { %11332 = vmatprep.subr.bf16.mxu0 %v13555_v14  ;;  %v13607_v14 = vld [vmem:[#allocation13 + $0x1c0] ss:$8 sps:$4 sm:$0xff]  }
 0x655   :  { %10874 = vmatpush1.bf16.msra.mxu1 %v13493_v52  ;;  %v13612_v52 = vld [vmem:[#allocation13 + $0x1b4] ss:$8 sps:$4 sm:$0xff]  }
 0x656   :  { %10875 = vmatprep.subr.bf16.mxu1 %v13498_v28  ;;  %11333 = vmatpush2.bf16.msra.mxu0 %v13553_v60  ;;  %v10602_v28 = vpop.f32.mrf.mxu0  ;;  %v10641_v60 = vpop.f32.mrf.mxu1 }
 0x657   :  { %11334 = vmatprep.subr.bf16.mxu0 %v13558_v19 }
 0x659   :  { %10876 = vmatpush1.bf16.msra.mxu1 %v13496_v23  ;;  %v13610_v23 = vld [vmem:[#allocation13 + $0x1b0] ss:$8 sps:$4 sm:$0xff]  }
 0x65a   :  { %10877 = vmatprep.subr.bf16.mxu1 %v13501_v31  ;;  %11335 = vmatpush2.bf16.msra.mxu0 %v13556_v47  ;;  %v14456_v31 = vld [vmem:[#allocation11] sm:$0xf] }
 0x65b   :  { %11336 = vmatprep.subr.bf16.mxu0 %v13561_v36  ;;  %v9269_v47 = vrot.slane %v14456_v31, %v14028_v16  ;;  %v14536_v36 = vld [vmem:[#allocation27_spill] sm:$0xff] }
 0x65d   :  { %10878 = vmatpush1.bf16.msra.mxu1 %v13499_v34  ;;  %v9265_v34 = vrot.slane %v14456_v31, %v14536_v36 }
 0x65e   :  { %10879 = vmatprep.subr.bf16.mxu1 %v13504_v53  ;;  %11337 = vmatpush2.bf16.msra.mxu0 %v13559_v57  ;;  %v10643_v53 = vpop.f32.mrf.mxu1 }
 0x65f   :  { %11338 = vmatprep.subr.bf16.mxu0 %v13564_v11  ;;  %v10599_v11 = vadd.f32 %v10598_v1, %v9269_v47 }
 0x661   :  { %10880 = vmatpush2.bf16.msra.mxu1 %v13502_v21  ;;  %v10601_v21 = vadd.f32 %v10600_v24, %v9265_v34 }
 0x662   :  { %10881 = vmatprep.subr.bf16.mxu1 %v13507_v27  ;;  %11339 = vmatpush2.bf16.msra.mxu0 %v13562_v62  ;;  %v10597_v27 = vadd.f32 %v10596_v61, %v9265_v34  ;;  %v10645_v62 = vpop.f32.mrf.mxu1  ;;  %v13629_v61 = vld [vmem:[#allocation16 + $0x20] sm:$0xff]  }
 0x663   :  { %11340 = vmatprep.subr.bf16.mxu0 %v13567_v59 }
 0x665   :  { %10882 = vmatpush2.bf16.msra.mxu1 %v13505_v42  ;;  %v10603_v42 = vadd.f32 %v10602_v28, %v9269_v47  ;;  %v9277_v28 = vrot.slane %v14456_v31, %v14034_v18 }
 0x666   :  { %10883 = vmatprep.subr.bf16.mxu1 %v13510_v9  ;;  %11341 = vmatpush2.bf16.msra.mxu0 %v13565_v26  ;;  %v10642_v26 = vadd.f32 %v10641_v60, %v10599_v11  ;;  %v14537_v60 = vld [vmem:[#allocation28_spill] sm:$0xff] }
 0x667   :  { %11342 = vmatprep.subr.bf16.mxu0 %v13570_v0  ;;  %v10644_v0 = vadd.f32 %v10643_v53, %v10601_v21 }
 0x669   :  { %10884 = vmatpush2.bf16.msra.mxu1 %v13508_v55  ;;  %v13615_v55 = vld [vmem:[#allocation13 + $0x1a4] ss:$8 sps:$4 sm:$0xff]  }
 0x66a   :  { %10885 = vmatprep.subr.bf16.mxu1 %v13513_v58  ;;  %11343 = vmatpush2.bf16.msra.mxu0 %v13568_v63  ;;  %v10640_v58 = vadd.f32 %v10639_v46, %v10597_v27 }
 0x66b   :  { %11344 = vmatprep.subr.bf16.mxu0 %v13573_v15 }
 0x66d   :  { %10886 = vmatpush2.bf16.msra.mxu1 %v13511_v40  ;;  %v13613_v40 = vld [vmem:[#allocation13 + $0x1a0] ss:$8 sps:$4 sm:$0xff]  }
 0x66e   :  { %10887 = vmatprep.subr.bf16.mxu1 %v13516_v5  ;;  %11345 = vmatpush2.bf16.msra.mxu0 %v13571_v25  ;;  %v10646_v5 = vadd.f32 %v10645_v62, %v10603_v42 }
 0x670   :  { %v10682_v19 = vpop.f32.mrf.mxu0 }
 0x671   :  { %10888 = vmatpush2.bf16.msra.mxu1 %v13514_v39 }
 0x672   :  { %10889 = vmatprep.subr.bf16.mxu1 %v13519_v32  ;;  %v10684_v57 = vpop.f32.mrf.mxu0  ;;  %v10683_v32 = vadd.f32 %v10682_v19, %v10640_v58  ;;  %v9273_v19 = vrot.slane %v14456_v31, %v14537_v60 }
 0x673   :  { %v10685_v25 = vadd.f32 %v10684_v57, %v10642_v26 }
 0x674   :  { %v10686_v59 = vpop.f32.mrf.mxu0 }
 0x675   :  { %10890 = vmatpush2.bf16.msra.mxu1 %v13517_v29  ;;  %v10687_v39 = vadd.f32 %v10686_v59, %v10644_v0 }
 0x676   :  { %10891 = vmatprep.subr.bf16.mxu1 %v13522_v41  ;;  %v10688_v63 = vpop.f32.mrf.mxu0 }
 0x677   :  { %v10689_v41 = vadd.f32 %v10688_v63, %v10646_v5 }
 0x679   :  { %10892 = vmatpush2.bf16.msra.mxu1 %v13520_v10 }
 0x67a   :  { %10893 = vmatprep.subr.bf16.mxu1 %v13525_v51 }
 0x67d   :  { %10894 = vmatpush2.bf16.msra.mxu1 %v13523_v44  ;;  %v13618_v44 = vld [vmem:[#allocation13 + $0x194] ss:$8 sps:$4 sm:$0xff]  }
 0x67e   :  { %11357 = vmatprep.subr.bf16.mxu1 %v13576_v22 }
 0x680   :  { %10896 = vmatmul.mubr.bf16.vlgmr.msra.gmra.mxu1 %v14447_v35  ;;  %v13591_v35 = vld [vmem:[#allocation13 + $0x124] ss:$8 sps:$4 sm:$0xff]  }
 0x681   :  { %11358 = vmatpush1.bf16.msra.mxu1 %v13574_v54 }
 0x682   :  { %11359 = vmatprep.subr.bf16.mxu1 %v13579_v4  ;;  %v13616_v4 = vld [vmem:[#allocation13 + $0x190] ss:$8 sps:$4 sm:$0xff]  }
 0x685   :  { %11360 = vmatpush1.bf16.msra.mxu1 %v13577_v8 }
 0x686   :  { %11361 = vmatprep.subr.bf16.mxu1 %v13582_v50 }
 0x689   :  { %11362 = vmatpush1.bf16.msra.mxu1 %v13580_v37 }
 0x68a   :  { %11363 = vmatprep.subr.bf16.mxu1 %v13585_v13 }
 0x68d   :  { %11364 = vmatpush1.bf16.msra.mxu1 %v13583_v20  ;;  %v13621_v20 = vld [vmem:[#allocation13 + $0x184] ss:$8 sps:$4 sm:$0xff]  }
 0x68e   :  { %11365 = vmatprep.subr.bf16.mxu1 %v13588_v38 }
 0x691   :  { %11366 = vmatpush1.bf16.msra.mxu1 %v13586_v56  ;;  %v13619_v56 = vld [vmem:[#allocation13 + $0x180] ss:$8 sps:$4 sm:$0xff]  }
 0x692   :  { %11367 = vmatprep.subr.bf16.mxu1 %v13591_v35 }
 0x695   :  { %11368 = vmatpush1.bf16.msra.mxu1 %v13589_v43 }
 0x696   :  { %11369 = vmatprep.subr.bf16.mxu1 %v13594_v30  ;;  %v13622_v30 = vld [vmem:[#allocation16 + $0x78] sm:$0xff]  }
 0x697   :  { %13098 = vmatprep.subr.bf16.mxu0 %v13622_v30 }
 0x699   :  { %11370 = vmatpush1.bf16.msra.mxu1 %v13592_v48  ;;  %v13623_v48 = vld [vmem:[#allocation16 + $0x38] sm:$0xff]  }
 0x69a   :  { %11371 = vmatprep.subr.bf16.mxu1 %v13597_v12  ;;  %v13624_v12 = vld [vmem:[#allocation16 + $0x70] sm:$0xff]  }
 0x69d   :  { %11372 = vmatpush1.bf16.msra.mxu1 %v13595_v7  ;;  %v13625_v7 = vld [vmem:[#allocation16 + $0x30] sm:$0xff]  }
 0x69e   :  { %11373 = vmatprep.subr.bf16.mxu1 %v13600_v49  ;;  %v13626_v49 = vld [vmem:[#allocation16 + $0x68] sm:$0xff]  }
 0x6a1   :  { %11374 = vmatpush2.bf16.msra.mxu1 %v13598_v6  ;;  %v13627_v6 = vld [vmem:[#allocation16 + $0x28] sm:$0xff]  }
 0x6a2   :  { %11375 = vmatprep.subr.bf16.mxu1 %v13603_v45  ;;  %v13628_v45 = vld [vmem:[#allocation16 + $0x60] sm:$0xff]  }
 0x6a5   :  { %11376 = vmatpush2.bf16.msra.mxu1 %v13601_v2  ;;  %v13630_v2 = vld [vmem:[#allocation16 + $0x58] sm:$0xff]  }
 0x6a6   :  { %11377 = vmatprep.subr.bf16.mxu1 %v13606_v17  ;;  %v13631_v17 = vld [vmem:[#allocation16 + $0x18] sm:$0xff]  }
 0x6a9   :  { %11378 = vmatpush2.bf16.msra.mxu1 %v13604_v3 }
 0x6aa   :  { %11379 = vmatprep.subr.bf16.mxu1 %v13609_v33 }
 0x6ad   :  { %11380 = vmatpush2.bf16.msra.mxu1 %v13607_v14 }
 0x6ae   :  { %11381 = vmatprep.subr.bf16.mxu1 %v13612_v52 }
 0x6b0   :  { %v10768_v1 = vpop.f32.mrf.mxu0 }
 0x6b1   :  { %11382 = vmatpush2.bf16.msra.mxu1 %v13610_v23  ;;  %v10769_v57 = vadd.f32 %v10768_v1, %v9273_v19 }
 0x6b2   :  { %11383 = vmatprep.subr.bf16.mxu1 %v13615_v55  ;;  %v10770_v3 = vpop.f32.mrf.mxu0 }
 0x6b3   :  { %v10771_v34 = vadd.f32 %v10770_v3, %v9277_v28 }
 0x6b4   :  { %v10772_v33 = vpop.f32.mrf.mxu0 }
 0x6b5   :  { %11384 = vmatpush2.bf16.msra.mxu1 %v13613_v40  ;;  %v10773_v53 = vadd.f32 %v10772_v33, %v9273_v19  ;;  %v13081_v19 = vld [vmem:[#allocation17] ss:$0 sm:$0xff] }
 0x6b6   :  { %11385 = vmatprep.subr.bf16.mxu1 %v13618_v44  ;;  %v10774_v46 = vpop.f32.mrf.mxu0 }
 0x6b7   :  { %v10775_v21 = vadd.f32 %v10774_v46, %v9277_v28 }
 0x6b9   :  { %11386 = vmatpush2.bf16.msra.mxu1 %v13616_v4  ;;  %v13633_v4 = vld [vmem:[#allocation16 + $0x10] sm:$0xff]  }
 0x6ba   :  { %11387 = vmatprep.subr.bf16.mxu1 %v13621_v20 }
 0x6bd   :  { %11388 = vmatpush2.bf16.msra.mxu1 %v13619_v56  ;;  %v10982_v56 = vld [vmem:[#allocation14] sm:$0x3] }
 0x6be   :  { %v10987_v30 = vrot.slane %v10982_v56, %v14536_v36 }
 0x6c0   :  { %v10725_v9 = vpop.f32.mrf.mxu1 }
 0x6c1   :  { %v10726_v54 = vadd.f32 %v10725_v9, %v10683_v32 }
 0x6c2   :  { %v10727_v15 = vpop.f32.mrf.mxu1 }
 0x6c3   :  { %v10728_v10 = vadd.f32 %v10727_v15, %v10685_v25  ;;  %v10906_v38 = vmax.f32 %v10726_v54, 0.0 }
 0x6c4   :  { %v10729_v29 = vpop.f32.mrf.mxu1 }
 0x6c5   :  { %v10730_v51 = vadd.f32 %v10729_v29, %v10687_v39  ;;  %v10907_v37 = vmax.f32 %v10728_v10, 0.0 }
 0x6c6   :  { %v10731_v22 = vpop.f32.mrf.mxu1 }
 0x6c7   :  { %v10732_v8 = vadd.f32 %v10731_v22, %v10689_v41  ;;  %v10910_v50 = vmax.f32 %v10730_v51, 0.0  ;;  %v13632_v22 = vld [vmem:[#allocation16 + $0x50] sm:$0xff]  }
 0x6c9   :  { %v10911_v13 = vmax.f32 %v10732_v8, 0.0  ;;  %v10914_v43 = vpack.c.bf16 %v10910_v50, %v10906_v38  ;;  %v13634_v8 = vld [vmem:[#allocation16 + $0x48] sm:$0xff]  }
 0x6ca   :  { %v13635_v50 = vld [vmem:[#allocation16 + $0x8] sm:$0xff]  }
 0x6cb   :  { %v10915_v35 = vpack.c.bf16 %v10911_v13, %v10907_v37  ;;  %v13636_v37 = vld [vmem:[#allocation16 + $0x40] sm:$0xff]  }
 0x6cc   :  { %v13637_v13 = vld [vmem:[#allocation16] sm:$0xff]  }
 0x6cd   :  { %11346 = vmatprep.mubr.bf16.mxu0 %v10915_v35 }
 0x6ce   :  { %11347 = vmatmul.mubr.bf16.vlgmr.msra.gmra.mxu0 %v10914_v43  ;;  %v10991_v43 = vrot.slane %v10982_v56, %v14028_v16 }
 0x6cf   :  { %13099 = vmatpush3.bf16.msra.mxu0 %v13623_v48 }
 0x6d0   :  { %13100 = vmatprep.subr.bf16.mxu0 %v13624_v12 }
 0x6d3   :  { %13101 = vmatpush3.bf16.msra.mxu0 %v13625_v7 }
 0x6d4   :  { %13102 = vmatprep.subr.bf16.mxu0 %v13626_v49 }
 0x6d7   :  { %13103 = vmatpush3.bf16.msra.mxu0 %v13627_v6 }
 0x6d8   :  { %13104 = vmatprep.subr.bf16.mxu0 %v13628_v45 }
 0x6db   :  { %13105 = vmatpush3.bf16.msra.mxu0 %v13629_v61 }
 0x6dc   :  { %13106 = vmatprep.subr.bf16.mxu0 %v13630_v2 }
 0x6df   :  { %13107 = vmatpush3.bf16.msra.mxu0 %v13631_v17 }
 0x6e0   :  { %13108 = vmatprep.subr.bf16.mxu0 %v13632_v22 }
 0x6e3   :  { %13109 = vmatpush3.bf16.msra.mxu0 %v13633_v4 }
 0x6e4   :  { %13110 = vmatprep.subr.bf16.mxu0 %v13634_v8 }
 0x6e7   :  { %13111 = vmatpush3.bf16.msra.mxu0 %v13635_v50 }
 0x6e8   :  { %13112 = vmatprep.subr.bf16.mxu0 %v13636_v37 }
 0x6eb   :  { %13113 = vmatpush3.bf16.msra.mxu0 %v13637_v13 }
 0x6f1   :  { %v10854_v52 = vpop.f32.mrf.mxu0 }
 0x6f3   :  { %v10856_v47 = vpop.f32.mrf.mxu0 }
 0x6f5   :  { %v10858_v59 = vpop.f32.mrf.mxu0 }
 0x6f7   :  { %v10860_v18 = vpop.f32.mrf.mxu0 }
 0x700   :  { %v10811_v24 = vpop.f32.mrf.mxu1 }
 0x701   :  { %v10812_v42 = vadd.f32 %v10811_v24, %v10769_v57 }
 0x702   :  { %v10813_v14 = vpop.f32.mrf.mxu1 }
 0x703   :  { %v10814_v27 = vadd.f32 %v10813_v14, %v10771_v34  ;;  %v10855_v63 = vadd.f32 %v10854_v52, %v10812_v42 }
 0x704   :  { %v10815_v23 = vpop.f32.mrf.mxu1 }
 0x705   :  { %v10816_v62 = vadd.f32 %v10815_v23, %v10773_v53  ;;  %v10857_v55 = vadd.f32 %v10856_v47, %v10814_v27 }
 0x706   :  { %v10817_v11 = vpop.f32.mrf.mxu1 }
 0x707   :  { %v10818_v26 = vadd.f32 %v10817_v11, %v10775_v21  ;;  %v10859_v58 = vadd.f32 %v10858_v59, %v10816_v62 }
 0x709   :  { %v10861_v5 = vadd.f32 %v10860_v18, %v10818_v26 }
 0x740   :  { %v10897_v9 = vpop.f32.mrf.mxu1 }
 0x741   :  { %v10898_v25 = vadd.f32 %v10897_v9, %v10855_v63 }
 0x742   :  { %v10899_v0 = vpop.f32.mrf.mxu1 }
 0x743   :  { %v10900_v31 = vadd.f32 %v10899_v0, %v10857_v55  ;;  %v10908_v51 = vmax.f32 %v10898_v25, 0.0 }
 0x744   :  { %v10901_v15 = vpop.f32.mrf.mxu1 }
 0x745   :  { %v10902_v40 = vadd.f32 %v10901_v15, %v10859_v58  ;;  %v10909_v41 = vmax.f32 %v10900_v31, 0.0 }
 0x746   :  { %v10903_v39 = vpop.f32.mrf.mxu1 }
 0x747   :  { %v10904_v32 = vadd.f32 %v10903_v39, %v10861_v5  ;;  %v10912_v29 = vmax.f32 %v10902_v40, 0.0 }
 0x749   :  { %v10913_v10 = vmax.f32 %v10904_v32, 0.0  ;;  %v10916_v54 = vpack.c.bf16 %v10912_v29, %v10908_v51 }
 0x74b   :  { %v10917_v44 = vpack.c.bf16 %v10913_v10, %v10909_v41 }
 0x74d   :  { %11389 = vmatprep.mubr.bf16.mxu1 %v10917_v44 }
 0x74e   :  { %11390 = vmatmul.mubr.bf16.vlgmr.msra.gmra.mxu1 %v10916_v54 }
 0x78e   :  { %v11348_v20 = vpop.f32.mrf.mxu0 }
 0x78f   :  { %v11349_v45 = vadd.f32 %v11348_v20, %v10987_v30 }
 0x790   :  { %v11350_v38 = vpop.f32.mrf.mxu0 }
 0x791   :  { %v11351_v49 = vadd.f32 %v11350_v38, %v10991_v43 }
 0x792   :  { %v11352_v35 = vpop.f32.mrf.mxu0 }
 0x793   :  { %v11353_v6 = vadd.f32 %v11352_v35, %v10987_v30 }
 0x794   :  { %v11354_v12 = vpop.f32.mrf.mxu0 }
 0x795   :  { %v11355_v2 = vadd.f32 %v11354_v12, %v10991_v43 }
 0x80e   :  { %v11391_v48 = vpop.f32.mrf.mxu1 }
 0x80f   :  { %v11392_v3 = vadd.f32 %v11391_v48, %v11349_v45 }
 0x810   :  { %v11393_v7 = vpop.f32.mrf.mxu1 }
 0x811   :  { %v11394_v17 = vadd.f32 %v11393_v7, %v11351_v49  ;;  %v11400_v28 = vmax.f32 %v11392_v3, 0.0 }
 0x812   :  { %v11395_v61 = vpop.f32.mrf.mxu1 }
 0x813   :  { %v11396_v1 = vadd.f32 %v11395_v61, %v11353_v6  ;;  %v11401_v14 = vmax.f32 %v11394_v17, 0.0 }
 0x814   :  { %v11397_v33 = vpop.f32.mrf.mxu1 }
 0x815   :  { %v11398_v24 = vadd.f32 %v11397_v33, %v11355_v2  ;;  %v11402_v46 = vmax.f32 %v11396_v1, 0.0 }
 0x817   :  { %v11403_v52 = vmax.f32 %v11398_v24, 0.0  ;;  %v11404_v60 = vpack.c.bf16 %v11402_v46, %v11400_v28 }
 0x819   :  { %v11405_v16 = vpack.c.bf16 %v11403_v52, %v11401_v14 }
 0x81b   :  { %11573 = vmatprep.mubr.bf16.mxu0 %v11405_v16 }
 0x81c   :  { %11574 = vmatmul.mubr.bf16.vlgmr.msra.gmra.mxu0 %v11404_v60 }
 0x8dc   :  { %v13114_v36 = vpop.f32.mrf.mxu0 }
 0x8de   :  { %v13115_v23 = vpop.f32.mrf.mxu0 }
 0x8df   :  { %v13116_v47 = vadd.f32 %v13115_v23, %v13114_v36 }
 0x8e0   :  { %v13117_v34 = vpop.f32.mrf.mxu0 }
 0x8e1   :  { %v11576_v53 = vadd.f32 %v13116_v47, %v13081_v19 }
 0x8e2   :  { %v13118_v57 = vpop.f32.mrf.mxu0 }
 0x8e3   :  { %v11582_v11 = vmax.f32 %v11576_v53, 0.0  ;;  %v13119_v21 = vadd.f32 %v13118_v57, %v13117_v34 }
 0x8e5   :  { %11584 = vst [vmem:[#allocation19] sm:$0xff] %v11582_v11  ;;  %v11579_v27 = vadd.f32 %v13119_v21, %v13081_v19 }
 0x8e7   :  { %v11583_v62 = vmax.f32 %v11579_v27, 0.0 }
 0x8e9   :  { %11585 = vst [vmem:[#allocation19 + $0x8] sm:$0xff] %v11583_v62 }
 0x8ea   :  { %13852 = shalt.err (!%p13849_p12)
}
 0x8eb   :  { %11597 = dma.vmem_to_hbm [thread:$0]  %s11592_s19, 256, %s14485_s11, [#allocation4], %s13889_s15, %s13889_s15, %s13890_s16  }
 0x8ec   :  { %13873 = dma.done.wait [#allocation4], 256  }
 0x8ed   :  { %13874 = vsyncadd [#allocation4], 4294967040 }
 0x8ee   :  { %11601 = vsyncpa [#allocation3], 1 }
 0x8ef   :  { %11602 = vsyncpa [#allocation6], 1 }
 0x8f0   :  { %11603 = vsyncpa [#allocation9], 1 }
 0x8f1   :  { %11604 = vsyncpa [#allocation12], 1 }
 0x8f2   :  { %11605 = vsyncpa [#allocation15], 1 }
 0x8f3   :  { %11606 = vsyncpa [#allocation18], 1 }
 0x8f4   :  { %11607 = vsyncpa [#allocation4], 1 }

</bundles_post_ra>
